<compile_context>
chip_gen: v7x
topology: tpu7x:2x2x1
jax: 0.10.0
libtpu: 0.0.40
codegen_flags: <defaults>
</compile_context>

<pallas_src>
import functools

import jax
import jax.numpy as jnp
from jax.experimental import pallas as pl
from jax.experimental.pallas import tpu as pltpu


def _round_up(x, m):
    return ((x + m - 1) // m) * m


# ------------------------------ Pallas kernels -------------------------------
def _mm_bias_act_kernel(x_ref, w_ref, b_ref, o_ref, *, relu):
    # bf16 operands -> MXU, f32 accumulate, f32 bias + ReLU epilogue.
    acc = jnp.dot(x_ref[...], w_ref[...], preferred_element_type=jnp.float32)
    y = acc + b_ref[...]
    if relu:
        y = jnp.maximum(y, 0.0)
    o_ref[...] = y.astype(o_ref.dtype)


def _mm2_bias_act_kernel(x_ref, w1_ref, b1_ref, w2_ref, b2_ref, o_ref, *, relu2):
    # Two chained matmuls in one kernel: the intermediate never leaves VMEM.
    h = jnp.dot(x_ref[...], w1_ref[...], preferred_element_type=jnp.float32)
    h = jnp.maximum(h + b1_ref[...], 0.0)
    y = jnp.dot(h.astype(w2_ref.dtype), w2_ref[...],
                preferred_element_type=jnp.float32) + b2_ref[...]
    if relu2:
        y = jnp.maximum(y, 0.0)
    o_ref[...] = y.astype(o_ref.dtype)


def matmul_bias_act(x, w, b, *, relu, out_dtype=jnp.bfloat16, block_m=256):
    """y = act(x @ w + b).  x: (M, K); w: packed (K, N) bf16; b: (1, N) f32.
    K and N are single full-extent blocks; only M is tiled when it exceeds
    block_m (conv1 uses block_m=512 -> 2 parallel blocks for v7x megacore)."""
    M, K = x.shape
    Kw, N = w.shape
    assert K == Kw, (K, Kw)
    x = x.astype(jnp.bfloat16)
    bm = block_m if M > block_m else _round_up(M, 8)
    Mp = _round_up(M, bm)
    if Mp != M:
        x = jnp.pad(x, ((0, Mp - M), (0, 0)))
    out = pl.pallas_call(
        functools.partial(_mm_bias_act_kernel, relu=relu),
        out_shape=jax.ShapeDtypeStruct((Mp, N), out_dtype),
        grid=(Mp // bm,),
        in_specs=[
            pl.BlockSpec((bm, K), lambda i: (i, 0)),
            pl.BlockSpec((K, N), lambda i: (0, 0)),
            pl.BlockSpec((1, N), lambda i: (0, 0)),
        ],
        out_specs=pl.BlockSpec((bm, N), lambda i: (i, 0)),
        compiler_params=pltpu.CompilerParams(
            dimension_semantics=("parallel",),
            vmem_limit_bytes=32 * 1024 * 1024),
    )(x, w, b)
    return out[:M] if Mp != M else out


def fused_two_matmul(x, w1, b1, w2, b2, *, relu2, out_dtype=jnp.float32):
    """act2(relu(x @ w1 + b1) @ w2 + b2) as ONE pallas_call, single block.
    Used for the 1x1x1-spatial fires (squeeze+expand fused) and the FC head."""
    M, K1 = x.shape
    K1w, N1 = w1.shape
    K2, N2 = w2.shape
    assert K1 == K1w and K2 == N1, (x.shape, w1.shape, w2.shape)
    x = x.astype(jnp.bfloat16)
    Mp = _round_up(M, 8)
    if Mp != M:
        x = jnp.pad(x, ((0, Mp - M), (0, 0)))
    out = pl.pallas_call(
        functools.partial(_mm2_bias_act_kernel, relu2=relu2),
        out_shape=jax.ShapeDtypeStruct((Mp, N2), out_dtype),
        grid=(1,),
        in_specs=[
            pl.BlockSpec((Mp, K1), lambda i: (0, 0)),
            pl.BlockSpec((K1, N1), lambda i: (0, 0)),
            pl.BlockSpec((1, N1), lambda i: (0, 0)),
            pl.BlockSpec((K2, N2), lambda i: (0, 0)),
            pl.BlockSpec((1, N2), lambda i: (0, 0)),
        ],
        out_specs=pl.BlockSpec((Mp, N2), lambda i: (0, 0)),
        compiler_params=pltpu.CompilerParams(
            dimension_semantics=("arbitrary",),
            vmem_limit_bytes=32 * 1024 * 1024),
    )(x, w1, b1, w2, b2)
    return out[:M] if Mp != M else out


# ------------------------------ layer helpers --------------------------------
def conv3d(x, wp, bp, *, k, stride=1, padding=0, relu=True,
           out_dtype=jnp.bfloat16, block_m=256):
    """Conv3d via im2col + one Pallas matmul.  x: (B,D,H,W,C) channels-last
    bf16; wp: packed (Kp, Cout) bf16 with rows ordered (kd, kh, kw, Cin); any
    trailing rows beyond k^3*Cin are whole all-zero patches (K alignment), so
    the im2col stack is built directly at Kp -- no separate pad copy."""
    x = x.astype(jnp.bfloat16)
    B = x.shape[0]
    if padding:
        x = jnp.pad(x, ((0, 0), (padding, padding), (padding, padding),
                        (padding, padding), (0, 0)))
    _, Dp, Hp, Wq, C = x.shape
    Do = (Dp - k) // stride + 1
    Ho = (Hp - k) // stride + 1
    Wo = (Wq - k) // stride + 1
    patches = []
    for i in range(k):
        for j in range(k):
            for l in range(k):
                patches.append(x[:, i:i + stride * Do:stride,
                                 j:j + stride * Ho:stride,
                                 l:l + stride * Wo:stride, :])
    n_extra, rem = divmod(wp.shape[0] - k ** 3 * C, C)
    assert rem == 0 and n_extra >= 0, (wp.shape, k, C)
    if n_extra:  # K-pad built into the stack itself (fuses with the concat)
        patches.extend([jnp.zeros_like(patches[0])] * n_extra)
    xm = jnp.stack(patches, axis=-2).reshape(B * Do * Ho * Wo, wp.shape[0])
    y = matmul_bias_act(xm, wp, bp, relu=relu, out_dtype=out_dtype,
                        block_m=block_m)
    return y.reshape(B, Do, Ho, Wo, wp.shape[1])


def conv1x1(x, wp, bp, *, relu=True, out_dtype=jnp.bfloat16):
    """1x1x1 Conv3d: pure matmul over flattened spatial positions."""
    B, D, H, W, C = x.shape
    y = matmul_bias_act(x.reshape(B * D * H * W, C), wp, bp, relu=relu,
                        out_dtype=out_dtype)
    return y.reshape(B, D, H, W, wp.shape[1])


def maxpool3d(x, k=3, s=2):
    """MaxPool3d(kernel=3, stride=2, ceil_mode=True).  Right-padded with -inf
    so clipped windows match PyTorch; XLA-fused pairwise jnp.maximum tree."""
    B, D, H, W, C = x.shape

    def osz(n):
        return -((n - k) // -s) + 1  # ceil((n - k) / s) + 1

    Do, Ho, Wo = osz(D), osz(H), osz(W)
    Dn, Hn, Wn = (Do - 1) * s + k, (Ho - 1) * s + k, (Wo - 1) * s + k
    xp = jnp.pad(x, ((0, 0), (0, Dn - D), (0, Hn - H), (0, Wn - W), (0, 0)),
                 constant_values=-jnp.inf)
    out = None
    for i in range(k):
        for j in range(k):
            for l in range(k):
                v = xp[:, i:i + s * Do:s, j:j + s * Ho:s, l:l + s * Wo:s, :]
                out = v if out is None else jnp.maximum(out, v)
    return out


def fire(x, p):
    B, D, H, W, Cin = x.shape
    sq = p['sw'].shape[1]
    e = p['eb'].shape[1]
    if D == 1 and H == 1 and W == 1:
        # Degenerate spatial (1,1,1): the padded 3x3x3 expand only sees its
        # centre tap, so squeeze + [expand1x1 | expand3x3-centre] collapse to
        # two chained matmuls fused into ONE pallas_call.  The squeeze
        # activation never leaves VMEM and only (sq, e1+e3) of expand weight
        # is DMA'd instead of (27*sq, e1+e3).
        y = fused_two_matmul(x.reshape(B, Cin), p['sw'], p['sb'],
                             p['fw'], p['eb'], relu2=True,
                             out_dtype=jnp.bfloat16)
        return y.reshape(B, 1, 1, 1, e)
    # Spatial path: lane-dense squeeze (Cout zero-padded to 128), slice back
    # to sq channels, then the fused expand1x1+expand3x3 im2col matmul (the
    # 1x1 weights live in the centre-tap rows, so the channel concat is free).
    s = conv1x1(x, p['swp'], p['sbp'], relu=True)[..., :sq]
    return conv3d(s, p['ew'], p['eb'], k=3, padding=1, relu=True)


# ---------------------- deterministic init + weight packing ------------------
def _init_conv(key, cout, cin, k):
    k1, k2 = jax.random.split(key)
    bound = 1.0 / float(cin * k * k * k) ** 0.5
    w = jax.random.uniform(k1, (cout, cin, k, k, k), jnp.float32, -bound, bound)
    b = jax.random.uniform(k2, (cout,), jnp.float32, -bound, bound)
    return w, b


def _init_linear(key, nin, nout):
    k1, k2 = jax.random.split(key)
    bound = 1.0 / float(nin) ** 0.5
    w = jax.random.uniform(k1, (nin, nout), jnp.float32, -bound, bound)
    b = jax.random.uniform(k2, (nout,), jnp.float32, -bound, bound)
    return w, b


def _pack_conv(w, b, *, k_align=None):
    """(Cout, Cin, kd, kh, kw) -> (K[, padded], Cout) bf16 with K ordered
    (kd, kh, kw, Cin); optional zero-row padding by whole Cin-sized patches to
    a multiple of k_align.  Bias -> (1, Cout) f32."""
    cout, cin, kd, kh, kw = w.shape
    K = kd * kh * kw * cin
    wm = jnp.transpose(w, (2, 3, 4, 1, 0)).reshape(K, cout)
    if k_align:
        Kp = _round_up(K, k_align)
        if (Kp - K) % cin == 0:     # pad only by whole (zero) patches
            wm = jnp.pad(wm, ((0, Kp - K), (0, 0)))
    return wm.astype(jnp.bfloat16), b.astype(jnp.float32).reshape(1, cout)


def _pack_fire(key, inp, sq, e1, e3):
    ks = jax.random.split(key, 3)
    sq_w, sq_b = _init_conv(ks[0], sq, inp, 1)
    e1_w, e1_b = _init_conv(ks[1], e1, sq, 1)
    e3_w, e3_b = _init_conv(ks[2], e3, sq, 3)
    # squeeze: exact (fused 1x1x1 path) and Cout zero-padded to 128 (lane-dense
    # output stores on the spatial path; sliced back to sq before the expand).
    sw, sb = _pack_conv(sq_w, sq_b)                     # (inp, sq) / (1, sq)
    swp = jnp.pad(sw, ((0, 0), (0, 128 - sq)))
    sbp = jnp.pad(sb, ((0, 0), (0, 128 - sq)))
    # Combined expand weight for the spatial path: (27*sq -> Kp, e1+e3).
    # Columns [:e1] hold the 1x1 weights placed only in the centre-tap rows
    # (patch offset (1,1,1) -> 13), so the output is already
    # concat([expand1x1, expand3x3], channel).
    K = 27 * sq
    w3 = jnp.transpose(e3_w, (2, 3, 4, 1, 0)).reshape(K, e3)
    w1 = jnp.zeros((K, e1), jnp.float32).at[13 * sq:14 * sq, :].set(
        e1_w.reshape(e1, sq).T)
    ew = jnp.concatenate([w1, w3], axis=1)
    Kp = _round_up(K, 128)
    if (Kp - K) % sq == 0:          # whole zero patches (always true here)
        ew = jnp.pad(ew, ((0, Kp - K), (0, 0)))
    ew = ew.astype(jnp.bfloat16)
    eb = jnp.concatenate([e1_b, e3_b]).astype(jnp.float32).reshape(1, e1 + e3)
    # Centre-tap-only expand weight for the 1x1x1 fast path: (sq, e1+e3).
    fw = jnp.concatenate([e1_w.reshape(e1, sq).T, e3_w[:, :, 1, 1, 1].T],
                         axis=1).astype(jnp.bfloat16)
    return dict(sw=sw, sb=sb, swp=swp, sbp=sbp, ew=ew, eb=eb, fw=fw)


def init_params(key, input_nc):
    keys = jax.random.split(key, 11)
    fire_cfg = [(64, 16, 64, 64), (128, 16, 64, 64),
                (128, 32, 128, 128), (256, 32, 128, 128),
                (256, 48, 192, 192), (384, 48, 192, 192),
                (384, 64, 256, 256), (512, 64, 256, 256)]
    params = {}
    c1w, c1b = _init_conv(keys[0], 64, input_nc, 7)
    params['conv1_w'], params['conv1_b'] = _pack_conv(c1w, c1b, k_align=128)
    params['fires'] = [_pack_fire(keys[1 + i], *cfg)
                       for i, cfg in enumerate(fire_cfg)]
    # head: Linear(512,128) -> ReLU -> BatchNorm1d(128, eval) -> Linear(128,1)
    w1, b1 = _init_linear(keys[9], 512, 128)
    w2, b2 = _init_linear(keys[10], 128, 1)
    gamma = jnp.ones((128,), jnp.float32)
    beta = jnp.zeros((128,), jnp.float32)
    mean = jnp.zeros((128,), jnp.float32)
    var = jnp.ones((128,), jnp.float32)
    scale = gamma / jnp.sqrt(var + 1e-5)
    shift = beta - mean * scale
    # BN(relu(z)) @ w2 + b2 == relu(z) @ (scale[:,None]*w2) + (shift@w2 + b2):
    # fold the eval-mode BatchNorm into fc2 once at init (no runtime BN op).
    w2f = w2 * scale[:, None]
    b2f = b2 + shift @ w2
    params['fc1_w'] = w1.astype(jnp.bfloat16)                 # (512, 128)
    params['fc1_b'] = b1.astype(jnp.float32).reshape(1, 128)
    # fc2: pad N (=1) to 128 once at init so the Pallas output block is
    # lane-dense; the real output lives in column 0.
    params['fc2_w'] = jnp.pad(w2f, ((0, 0), (0, 127))).astype(jnp.bfloat16)
    params['fc2_b'] = jnp.pad(b2f, (0, 127)).astype(jnp.float32).reshape(1, 128)
    return params


# ---------------------------------- forward ----------------------------------
def squeezenet_forward(params, x_ncdhw):
    # NCDHW -> NDHWC, cast to bf16 once up front (all im2col glue stays bf16).
    x = jnp.transpose(x_ncdhw.astype(jnp.bfloat16), (0, 2, 3, 4, 1))
    # features
    x = conv3d(x, params['conv1_w'], params['conv1_b'], k=7, stride=2,
               relu=True, block_m=512)      # grid=(2,) parallel M-blocks
    x = maxpool3d(x)
    x = fire(x, params['fires'][0])
    x = fire(x, params['fires'][1])
    x = maxpool3d(x)
    x = fire(x, params['fires'][2])
    x = fire(x, params['fires'][3])
    x = maxpool3d(x)
    x = fire(x, params['fires'][4])         # spatial 1x1x1 -> fused fast path
    x = fire(x, params['fires'][5])
    x = fire(x, params['fires'][6])
    x = fire(x, params['fires'][7])
    # head: Flatten -> Dropout -> Linear(512,128) -> ReLU -> BatchNorm1d(128)
    #       -> Dropout -> Linear(128,1), all in ONE pallas_call (BN folded
    #       into fc2 at init).
    # TODO(synk): Dropout(p=0.5) is stochastic in train mode; eval-mode
    # (identity) semantics used.  BatchNorm1d uses eval-mode running stats at
    # their PyTorch init values (mean=0, var=1, gamma=1, beta=0).
    B = x.shape[0]
    h = x.reshape(B, -1)   # spatial is (1,1,1): matches PyTorch's view(B, -1)
    out = fused_two_matmul(h, params['fc1_w'], params['fc1_b'],
                           params['fc2_w'], params['fc2_b'],
                           relu2=False, out_dtype=jnp.float32)
    return out[:, :1]       # drop the fc2 lane padding -> (B, 1)


if __name__ == "__main__":
    key = jax.random.PRNGKey(0)
    pkey, xkey = jax.random.split(key)
    input_nc = 3
    params = init_params(pkey, input_nc)
    # 21^3 is the smallest spatial size that reduces to 1x1x1 before the
    # 512 -> 128 Linear (conv7/s2 -> 8, pool -> 4, pool -> 2, pool -> 1).
    x = jax.random.normal(xkey, (2, input_nc, 21, 21, 21), jnp.float32)
    fwd = jax.jit(squeezenet_forward)
    out = fwd(params, x)
    jax.block_until_ready(out)
    assert out.shape == (2, 1) and out.dtype == jnp.float32
    print("KERNEL_OK")
</pallas_src>

<mosaic_0001>
module attributes {stable_mosaic.version = 11 : i64} {
  func.func @_mm_bias_act_kernel(%arg0: i32, %arg1: memref<512x1152xbf16, #tpu.memory_space<vmem>>, %arg2: memref<1152x64xbf16, #tpu.memory_space<vmem>>, %arg3: memref<1x64xf32, #tpu.memory_space<vmem>>, %arg4: memref<512x64xbf16, #tpu.memory_space<vmem>>) attributes {dimension_semantics = [#tpu.dimension_semantics<parallel>], iteration_bounds = array<i64: 2>, scalar_prefetch = 0 : i64, scratch_operands = 0 : i64, tpu.core_type = #tpu.core_type<tc>, window_params = [{transform_indices = @transform_0, window_bounds = array<i64: 512, 1152>}, {pipeline_mode = #tpu.pipeline_mode<synchronous>, transform_indices = @transform_1, window_bounds = array<i64: 1152, 64>}, {pipeline_mode = #tpu.pipeline_mode<synchronous>, transform_indices = @transform_2, window_bounds = array<i64: 1, 64>}, {transform_indices = @transform_3, window_bounds = array<i64: 512, 64>}]} {
    %c0 = arith.constant 0 : index
    %c0_0 = arith.constant 0 : index
    %0 = vector.load %arg1[%c0, %c0_0] : memref<512x1152xbf16, #tpu.memory_space<vmem>>, vector<512x1152xbf16>
    %c0_1 = arith.constant 0 : index
    %c0_2 = arith.constant 0 : index
    %1 = vector.load %arg2[%c0_1, %c0_2] : memref<1152x64xbf16, #tpu.memory_space<vmem>>, vector<1152x64xbf16>
    %cst = arith.constant dense<0.000000e+00> : vector<512x64xf32>
    %2 = tpu.matmul %0, %1, %cst {dimension_numbers = #tpu.dot_dimension_numbers<[1], [0], [0], [1], [0, 0, 1, 1], [], []>} : vector<512x1152xbf16>, vector<1152x64xbf16>, vector<512x64xf32> -> vector<512x64xf32>
    %c0_3 = arith.constant 0 : index
    %c0_4 = arith.constant 0 : index
    %3 = vector.load %arg3[%c0_3, %c0_4] : memref<1x64xf32, #tpu.memory_space<vmem>>, vector<1x64xf32>
    %4 = vector.broadcast %3 : vector<1x64xf32> to vector<512x64xf32>
    %5 = arith.addf %2, %4 : vector<512x64xf32>
    %cst_5 = arith.constant 0.000000e+00 : f32
    %6 = vector.broadcast %cst_5 : f32 to vector<512x64xf32>
    %7 = arith.maximumf %5, %6 : vector<512x64xf32>
    %8 = arith.truncf %7 : vector<512x64xf32> to vector<512x64xbf16>
    %c0_6 = arith.constant 0 : index
    %c0_7 = arith.constant 0 : index
    %9 = vector.load %arg4[%c0_6, %c0_7] : memref<512x64xbf16, #tpu.memory_space<vmem>>, vector<512x64xbf16>
    tpu.vector_store %arg4[%c0_6, %c0_7], %8 {strides = array<i32>} : memref<512x64xbf16, #tpu.memory_space<vmem>>, vector<512x64xbf16>,
    return
  }
  func.func @transform_0(%arg0: i32) -> (i32, i32) {
    %c0_i32 = arith.constant 0 : i32
    %c0_i32_0 = arith.constant 0 : i32
    return %arg0, %c0_i32 : i32, i32
  }
  func.func @transform_1(%arg0: i32) -> (i32, i32) {
    %c0_i32 = arith.constant 0 : i32
    %c0_i32_0 = arith.constant 0 : i32
    %c0_i32_1 = arith.constant 0 : i32
    return %c0_i32, %c0_i32_0 : i32, i32
  }
  func.func @transform_2(%arg0: i32) -> (i32, i32) {
    %c0_i32 = arith.constant 0 : i32
    %c0_i32_0 = arith.constant 0 : i32
    %c0_i32_1 = arith.constant 0 : i32
    return %c0_i32, %c0_i32_0 : i32, i32
  }
  func.func @transform_3(%arg0: i32) -> (i32, i32) {
    %c0_i32 = arith.constant 0 : i32
    %c0_i32_0 = arith.constant 0 : i32
    return %arg0, %c0_i32 : i32, i32
  }
}

module attributes {stable_mosaic.version = 11 : i64} {
  func.func @_mm_bias_act_kernel(%arg0: i32, %arg1: memref<128x64xbf16, #tpu.memory_space<vmem>>, %arg2: memref<64x128xbf16, #tpu.memory_space<vmem>>, %arg3: memref<1x128xf32, #tpu.memory_space<vmem>>, %arg4: memref<128x128xbf16, #tpu.memory_space<vmem>>) attributes {dimension_semantics = [#tpu.dimension_semantics<parallel>], iteration_bounds = array<i64: 1>, scalar_prefetch = 0 : i64, scratch_operands = 0 : i64, tpu.core_type = #tpu.core_type<tc>, window_params = [{transform_indices = @transform_0, window_bounds = array<i64: 128, 64>}, {pipeline_mode = #tpu.pipeline_mode<synchronous>, transform_indices = @transform_1, window_bounds = array<i64: 64, 128>}, {pipeline_mode = #tpu.pipeline_mode<synchronous>, transform_indices = @transform_2, window_bounds = array<i64: 1, 128>}, {transform_indices = @transform_3, window_bounds = array<i64: 128, 128>}]} {
    %c0 = arith.constant 0 : index
    %c0_0 = arith.constant 0 : index
    %0 = vector.load %arg1[%c0, %c0_0] : memref<128x64xbf16, #tpu.memory_space<vmem>>, vector<128x64xbf16>
    %c0_1 = arith.constant 0 : index
    %c0_2 = arith.constant 0 : index
    %1 = vector.load %arg2[%c0_1, %c0_2] : memref<64x128xbf16, #tpu.memory_space<vmem>>, vector<64x128xbf16>
    %cst = arith.constant dense<0.000000e+00> : vector<128x128xf32>
    %2 = tpu.matmul %0, %1, %cst {dimension_numbers = #tpu.dot_dimension_numbers<[1], [0], [0], [1], [0, 0, 1, 1], [], []>} : vector<128x64xbf16>, vector<64x128xbf16>, vector<128x128xf32> -> vector<128x128xf32>
    %c0_3 = arith.constant 0 : index
    %c0_4 = arith.constant 0 : index
    %3 = vector.load %arg3[%c0_3, %c0_4] : memref<1x128xf32, #tpu.memory_space<vmem>>, vector<1x128xf32>
    %4 = vector.broadcast %3 : vector<1x128xf32> to vector<128x128xf32>
    %5 = arith.addf %2, %4 : vector<128x128xf32>
    %cst_5 = arith.constant 0.000000e+00 : f32
    %6 = vector.broadcast %cst_5 : f32 to vector<128x128xf32>
    %7 = arith.maximumf %5, %6 : vector<128x128xf32>
    %8 = arith.truncf %7 : vector<128x128xf32> to vector<128x128xbf16>
    %c0_6 = arith.constant 0 : index
    %c0_7 = arith.constant 0 : index
    %9 = vector.load %arg4[%c0_6, %c0_7] : memref<128x128xbf16, #tpu.memory_space<vmem>>, vector<128x128xbf16>
    tpu.vector_store %arg4[%c0_6, %c0_7], %8 {strides = array<i32>} : memref<128x128xbf16, #tpu.memory_space<vmem>>, vector<128x128xbf16>,
    return
  }
  func.func @transform_0(%arg0: i32) -> (i32, i32) {
    %c0_i32 = arith.constant 0 : i32
    %c0_i32_0 = arith.constant 0 : i32
    return %arg0, %c0_i32 : i32, i32
  }
  func.func @transform_1(%arg0: i32) -> (i32, i32) {
    %c0_i32 = arith.constant 0 : i32
    %c0_i32_0 = arith.constant 0 : i32
    %c0_i32_1 = arith.constant 0 : i32
    return %c0_i32, %c0_i32_0 : i32, i32
  }
  func.func @transform_2(%arg0: i32) -> (i32, i32) {
    %c0_i32 = arith.constant 0 : i32
    %c0_i32_0 = arith.constant 0 : i32
    %c0_i32_1 = arith.constant 0 : i32
    return %c0_i32, %c0_i32_0 : i32, i32
  }
  func.func @transform_3(%arg0: i32) -> (i32, i32) {
    %c0_i32 = arith.constant 0 : i32
    %c0_i32_0 = arith.constant 0 : i32
    return %arg0, %c0_i32 : i32, i32
  }
}

module attributes {stable_mosaic.version = 11 : i64} {
  func.func @_mm_bias_act_kernel(%arg0: i32, %arg1: memref<128x512xbf16, #tpu.memory_space<vmem>>, %arg2: memref<512x128xbf16, #tpu.memory_space<vmem>>, %arg3: memref<1x128xf32, #tpu.memory_space<vmem>>, %arg4: memref<128x128xbf16, #tpu.memory_space<vmem>>) attributes {dimension_semantics = [#tpu.dimension_semantics<parallel>], iteration_bounds = array<i64: 1>, scalar_prefetch = 0 : i64, scratch_operands = 0 : i64, tpu.core_type = #tpu.core_type<tc>, window_params = [{transform_indices = @transform_0, window_bounds = array<i64: 128, 512>}, {pipeline_mode = #tpu.pipeline_mode<synchronous>, transform_indices = @transform_1, window_bounds = array<i64: 512, 128>}, {pipeline_mode = #tpu.pipeline_mode<synchronous>, transform_indices = @transform_2, window_bounds = array<i64: 1, 128>}, {transform_indices = @transform_3, window_bounds = array<i64: 128, 128>}]} {
    %c0 = arith.constant 0 : index
    %c0_0 = arith.constant 0 : index
    %0 = vector.load %arg1[%c0, %c0_0] : memref<128x512xbf16, #tpu.memory_space<vmem>>, vector<128x512xbf16>
    %c0_1 = arith.constant 0 : index
    %c0_2 = arith.constant 0 : index
    %1 = vector.load %arg2[%c0_1, %c0_2] : memref<512x128xbf16, #tpu.memory_space<vmem>>, vector<512x128xbf16>
    %cst = arith.constant dense<0.000000e+00> : vector<128x128xf32>
    %2 = tpu.matmul %0, %1, %cst {dimension_numbers = #tpu.dot_dimension_numbers<[1], [0], [0], [1], [0, 0, 1, 1], [], []>} : vector<128x512xbf16>, vector<512x128xbf16>, vector<128x128xf32> -> vector<128x128xf32>
    %c0_3 = arith.constant 0 : index
    %c0_4 = arith.constant 0 : index
    %3 = vector.load %arg3[%c0_3, %c0_4] : memref<1x128xf32, #tpu.memory_space<vmem>>, vector<1x128xf32>
    %4 = vector.broadcast %3 : vector<1x128xf32> to vector<128x128xf32>
    %5 = arith.addf %2, %4 : vector<128x128xf32>
    %cst_5 = arith.constant 0.000000e+00 : f32
    %6 = vector.broadcast %cst_5 : f32 to vector<128x128xf32>
    %7 = arith.maximumf %5, %6 : vector<128x128xf32>
    %8 = arith.truncf %7 : vector<128x128xf32> to vector<128x128xbf16>
    %c0_6 = arith.constant 0 : index
    %c0_7 = arith.constant 0 : index
    %9 = vector.load %arg4[%c0_6, %c0_7] : memref<128x128xbf16, #tpu.memory_space<vmem>>, vector<128x128xbf16>
    tpu.vector_store %arg4[%c0_6, %c0_7], %8 {strides = array<i32>} : memref<128x128xbf16, #tpu.memory_space<vmem>>, vector<128x128xbf16>,
    return
  }
  func.func @transform_0(%arg0: i32) -> (i32, i32) {
    %c0_i32 = arith.constant 0 : i32
    %c0_i32_0 = arith.constant 0 : i32
    return %arg0, %c0_i32 : i32, i32
  }
  func.func @transform_1(%arg0: i32) -> (i32, i32) {
    %c0_i32 = arith.constant 0 : i32
    %c0_i32_0 = arith.constant 0 : i32
    %c0_i32_1 = arith.constant 0 : i32
    return %c0_i32, %c0_i32_0 : i32, i32
  }
  func.func @transform_2(%arg0: i32) -> (i32, i32) {
    %c0_i32 = arith.constant 0 : i32
    %c0_i32_0 = arith.constant 0 : i32
    %c0_i32_1 = arith.constant 0 : i32
    return %c0_i32, %c0_i32_0 : i32, i32
  }
  func.func @transform_3(%arg0: i32) -> (i32, i32) {
    %c0_i32 = arith.constant 0 : i32
    %c0_i32_0 = arith.constant 0 : i32
    return %arg0, %c0_i32 : i32, i32
  }
}

module attributes {stable_mosaic.version = 11 : i64} {
  func.func @_mm_bias_act_kernel(%arg0: i32, %arg1: memref<128x128xbf16, #tpu.memory_space<vmem>>, %arg2: memref<128x128xbf16, #tpu.memory_space<vmem>>, %arg3: memref<1x128xf32, #tpu.memory_space<vmem>>, %arg4: memref<128x128xbf16, #tpu.memory_space<vmem>>) attributes {dimension_semantics = [#tpu.dimension_semantics<parallel>], iteration_bounds = array<i64: 1>, scalar_prefetch = 0 : i64, scratch_operands = 0 : i64, tpu.core_type = #tpu.core_type<tc>, window_params = [{transform_indices = @transform_0, window_bounds = array<i64: 128, 128>}, {pipeline_mode = #tpu.pipeline_mode<synchronous>, transform_indices = @transform_1, window_bounds = array<i64: 128, 128>}, {pipeline_mode = #tpu.pipeline_mode<synchronous>, transform_indices = @transform_2, window_bounds = array<i64: 1, 128>}, {transform_indices = @transform_3, window_bounds = array<i64: 128, 128>}]} {
    %c0 = arith.constant 0 : index
    %c0_0 = arith.constant 0 : index
    %0 = vector.load %arg1[%c0, %c0_0] : memref<128x128xbf16, #tpu.memory_space<vmem>>, vector<128x128xbf16>
    %c0_1 = arith.constant 0 : index
    %c0_2 = arith.constant 0 : index
    %1 = vector.load %arg2[%c0_1, %c0_2] : memref<128x128xbf16, #tpu.memory_space<vmem>>, vector<128x128xbf16>
    %cst = arith.constant dense<0.000000e+00> : vector<128x128xf32>
    %2 = tpu.matmul %0, %1, %cst {dimension_numbers = #tpu.dot_dimension_numbers<[1], [0], [0], [1], [0, 0, 1, 1], [], []>} : vector<128x128xbf16>, vector<128x128xbf16>, vector<128x128xf32> -> vector<128x128xf32>
    %c0_3 = arith.constant 0 : index
    %c0_4 = arith.constant 0 : index
    %3 = vector.load %arg3[%c0_3, %c0_4] : memref<1x128xf32, #tpu.memory_space<vmem>>, vector<1x128xf32>
    %4 = vector.broadcast %3 : vector<1x128xf32> to vector<128x128xf32>
    %5 = arith.addf %2, %4 : vector<128x128xf32>
    %cst_5 = arith.constant 0.000000e+00 : f32
    %6 = vector.broadcast %cst_5 : f32 to vector<128x128xf32>
    %7 = arith.maximumf %5, %6 : vector<128x128xf32>
    %8 = arith.truncf %7 : vector<128x128xf32> to vector<128x128xbf16>
    %c0_6 = arith.constant 0 : index
    %c0_7 = arith.constant 0 : index
    %9 = vector.load %arg4[%c0_6, %c0_7] : memref<128x128xbf16, #tpu.memory_space<vmem>>, vector<128x128xbf16>
    tpu.vector_store %arg4[%c0_6, %c0_7], %8 {strides = array<i32>} : memref<128x128xbf16, #tpu.memory_space<vmem>>, vector<128x128xbf16>,
    return
  }
  func.func @transform_0(%arg0: i32) -> (i32, i32) {
    %c0_i32 = arith.constant 0 : i32
    %c0_i32_0 = arith.constant 0 : i32
    return %arg0, %c0_i32 : i32, i32
  }
  func.func @transform_1(%arg0: i32) -> (i32, i32) {
    %c0_i32 = arith.constant 0 : i32
    %c0_i32_0 = arith.constant 0 : i32
    %c0_i32_1 = arith.constant 0 : i32
    return %c0_i32, %c0_i32_0 : i32, i32
  }
  func.func @transform_2(%arg0: i32) -> (i32, i32) {
    %c0_i32 = arith.constant 0 : i32
    %c0_i32_0 = arith.constant 0 : i32
    %c0_i32_1 = arith.constant 0 : i32
    return %c0_i32, %c0_i32_0 : i32, i32
  }
  func.func @transform_3(%arg0: i32) -> (i32, i32) {
    %c0_i32 = arith.constant 0 : i32
    %c0_i32_0 = arith.constant 0 : i32
    return %arg0, %c0_i32 : i32, i32
  }
}

module attributes {stable_mosaic.version = 11 : i64} {
  func.func @_mm_bias_act_kernel(%arg0: i32, %arg1: memref<16x128xbf16, #tpu.memory_space<vmem>>, %arg2: memref<128x128xbf16, #tpu.memory_space<vmem>>, %arg3: memref<1x128xf32, #tpu.memory_space<vmem>>, %arg4: memref<16x128xbf16, #tpu.memory_space<vmem>>) attributes {dimension_semantics = [#tpu.dimension_semantics<parallel>], iteration_bounds = array<i64: 1>, scalar_prefetch = 0 : i64, scratch_operands = 0 : i64, tpu.core_type = #tpu.core_type<tc>, window_params = [{transform_indices = @transform_0, window_bounds = array<i64: 16, 128>}, {pipeline_mode = #tpu.pipeline_mode<synchronous>, transform_indices = @transform_1, window_bounds = array<i64: 128, 128>}, {pipeline_mode = #tpu.pipeline_mode<synchronous>, transform_indices = @transform_2, window_bounds = array<i64: 1, 128>}, {transform_indices = @transform_3, window_bounds = array<i64: 16, 128>}]} {
    %c0 = arith.constant 0 : index
    %c0_0 = arith.constant 0 : index
    %0 = vector.load %arg1[%c0, %c0_0] : memref<16x128xbf16, #tpu.memory_space<vmem>>, vector<16x128xbf16>
    %c0_1 = arith.constant 0 : index
    %c0_2 = arith.constant 0 : index
    %1 = vector.load %arg2[%c0_1, %c0_2] : memref<128x128xbf16, #tpu.memory_space<vmem>>, vector<128x128xbf16>
    %cst = arith.constant dense<0.000000e+00> : vector<16x128xf32>
    %2 = tpu.matmul %0, %1, %cst {dimension_numbers = #tpu.dot_dimension_numbers<[1], [0], [0], [1], [0, 0, 1, 1], [], []>} : vector<16x128xbf16>, vector<128x128xbf16>, vector<16x128xf32> -> vector<16x128xf32>
    %c0_3 = arith.constant 0 : index
    %c0_4 = arith.constant 0 : index
    %3 = vector.load %arg3[%c0_3, %c0_4] : memref<1x128xf32, #tpu.memory_space<vmem>>, vector<1x128xf32>
    %4 = vector.broadcast %3 : vector<1x128xf32> to vector<16x128xf32>
    %5 = arith.addf %2, %4 : vector<16x128xf32>
    %cst_5 = arith.constant 0.000000e+00 : f32
    %6 = vector.broadcast %cst_5 : f32 to vector<16x128xf32>
    %7 = arith.maximumf %5, %6 : vector<16x128xf32>
    %8 = arith.truncf %7 : vector<16x128xf32> to vector<16x128xbf16>
    %c0_6 = arith.constant 0 : index
    %c0_7 = arith.constant 0 : index
    %9 = vector.load %arg4[%c0_6, %c0_7] : memref<16x128xbf16, #tpu.memory_space<vmem>>, vector<16x128xbf16>
    tpu.vector_store %arg4[%c0_6, %c0_7], %8 {strides = array<i32>} : memref<16x128xbf16, #tpu.memory_space<vmem>>, vector<16x128xbf16>,
    return
  }
  func.func @transform_0(%arg0: i32) -> (i32, i32) {
    %c0_i32 = arith.constant 0 : i32
    %c0_i32_0 = arith.constant 0 : i32
    return %arg0, %c0_i32 : i32, i32
  }
  func.func @transform_1(%arg0: i32) -> (i32, i32) {
    %c0_i32 = arith.constant 0 : i32
    %c0_i32_0 = arith.constant 0 : i32
    %c0_i32_1 = arith.constant 0 : i32
    return %c0_i32, %c0_i32_0 : i32, i32
  }
  func.func @transform_2(%arg0: i32) -> (i32, i32) {
    %c0_i32 = arith.constant 0 : i32
    %c0_i32_0 = arith.constant 0 : i32
    %c0_i32_1 = arith.constant 0 : i32
    return %c0_i32, %c0_i32_0 : i32, i32
  }
  func.func @transform_3(%arg0: i32) -> (i32, i32) {
    %c0_i32 = arith.constant 0 : i32
    %c0_i32_0 = arith.constant 0 : i32
    return %arg0, %c0_i32 : i32, i32
  }
}

module attributes {stable_mosaic.version = 11 : i64} {
  func.func @_mm_bias_act_kernel(%arg0: i32, %arg1: memref<16x896xbf16, #tpu.memory_space<vmem>>, %arg2: memref<896x256xbf16, #tpu.memory_space<vmem>>, %arg3: memref<1x256xf32, #tpu.memory_space<vmem>>, %arg4: memref<16x256xbf16, #tpu.memory_space<vmem>>) attributes {dimension_semantics = [#tpu.dimension_semantics<parallel>], iteration_bounds = array<i64: 1>, scalar_prefetch = 0 : i64, scratch_operands = 0 : i64, tpu.core_type = #tpu.core_type<tc>, window_params = [{transform_indices = @transform_0, window_bounds = array<i64: 16, 896>}, {pipeline_mode = #tpu.pipeline_mode<synchronous>, transform_indices = @transform_1, window_bounds = array<i64: 896, 256>}, {pipeline_mode = #tpu.pipeline_mode<synchronous>, transform_indices = @transform_2, window_bounds = array<i64: 1, 256>}, {transform_indices = @transform_3, window_bounds = array<i64: 16, 256>}]} {
    %c0 = arith.constant 0 : index
    %c0_0 = arith.constant 0 : index
    %0 = vector.load %arg1[%c0, %c0_0] : memref<16x896xbf16, #tpu.memory_space<vmem>>, vector<16x896xbf16>
    %c0_1 = arith.constant 0 : index
    %c0_2 = arith.constant 0 : index
    %1 = vector.load %arg2[%c0_1, %c0_2] : memref<896x256xbf16, #tpu.memory_space<vmem>>, vector<896x256xbf16>
    %cst = arith.constant dense<0.000000e+00> : vector<16x256xf32>
    %2 = tpu.matmul %0, %1, %cst {dimension_numbers = #tpu.dot_dimension_numbers<[1], [0], [0], [1], [0, 0, 1, 1], [], []>} : vector<16x896xbf16>, vector<896x256xbf16>, vector<16x256xf32> -> vector<16x256xf32>
    %c0_3 = arith.constant 0 : index
    %c0_4 = arith.constant 0 : index
    %3 = vector.load %arg3[%c0_3, %c0_4] : memref<1x256xf32, #tpu.memory_space<vmem>>, vector<1x256xf32>
    %4 = vector.broadcast %3 : vector<1x256xf32> to vector<16x256xf32>
    %5 = arith.addf %2, %4 : vector<16x256xf32>
    %cst_5 = arith.constant 0.000000e+00 : f32
    %6 = vector.broadcast %cst_5 : f32 to vector<16x256xf32>
    %7 = arith.maximumf %5, %6 : vector<16x256xf32>
    %8 = arith.truncf %7 : vector<16x256xf32> to vector<16x256xbf16>
    %c0_6 = arith.constant 0 : index
    %c0_7 = arith.constant 0 : index
    %9 = vector.load %arg4[%c0_6, %c0_7] : memref<16x256xbf16, #tpu.memory_space<vmem>>, vector<16x256xbf16>
    tpu.vector_store %arg4[%c0_6, %c0_7], %8 {strides = array<i32>} : memref<16x256xbf16, #tpu.memory_space<vmem>>, vector<16x256xbf16>,
    return
  }
  func.func @transform_0(%arg0: i32) -> (i32, i32) {
    %c0_i32 = arith.constant 0 : i32
    %c0_i32_0 = arith.constant 0 : i32
    return %arg0, %c0_i32 : i32, i32
  }
  func.func @transform_1(%arg0: i32) -> (i32, i32) {
    %c0_i32 = arith.constant 0 : i32
    %c0_i32_0 = arith.constant 0 : i32
    %c0_i32_1 = arith.constant 0 : i32
    return %c0_i32, %c0_i32_0 : i32, i32
  }
  func.func @transform_2(%arg0: i32) -> (i32, i32) {
    %c0_i32 = arith.constant 0 : i32
    %c0_i32_0 = arith.constant 0 : i32
    %c0_i32_1 = arith.constant 0 : i32
    return %c0_i32, %c0_i32_0 : i32, i32
  }
  func.func @transform_3(%arg0: i32) -> (i32, i32) {
    %c0_i32 = arith.constant 0 : i32
    %c0_i32_0 = arith.constant 0 : i32
    return %arg0, %c0_i32 : i32, i32
  }
}

module attributes {stable_mosaic.version = 11 : i64} {
  func.func @_mm_bias_act_kernel(%arg0: i32, %arg1: memref<16x256xbf16, #tpu.memory_space<vmem>>, %arg2: memref<256x128xbf16, #tpu.memory_space<vmem>>, %arg3: memref<1x128xf32, #tpu.memory_space<vmem>>, %arg4: memref<16x128xbf16, #tpu.memory_space<vmem>>) attributes {dimension_semantics = [#tpu.dimension_semantics<parallel>], iteration_bounds = array<i64: 1>, scalar_prefetch = 0 : i64, scratch_operands = 0 : i64, tpu.core_type = #tpu.core_type<tc>, window_params = [{transform_indices = @transform_0, window_bounds = array<i64: 16, 256>}, {pipeline_mode = #tpu.pipeline_mode<synchronous>, transform_indices = @transform_1, window_bounds = array<i64: 256, 128>}, {pipeline_mode = #tpu.pipeline_mode<synchronous>, transform_indices = @transform_2, window_bounds = array<i64: 1, 128>}, {transform_indices = @transform_3, window_bounds = array<i64: 16, 128>}]} {
    %c0 = arith.constant 0 : index
    %c0_0 = arith.constant 0 : index
    %0 = vector.load %arg1[%c0, %c0_0] : memref<16x256xbf16, #tpu.memory_space<vmem>>, vector<16x256xbf16>
    %c0_1 = arith.constant 0 : index
    %c0_2 = arith.constant 0 : index
    %1 = vector.load %arg2[%c0_1, %c0_2] : memref<256x128xbf16, #tpu.memory_space<vmem>>, vector<256x128xbf16>
    %cst = arith.constant dense<0.000000e+00> : vector<16x128xf32>
    %2 = tpu.matmul %0, %1, %cst {dimension_numbers = #tpu.dot_dimension_numbers<[1], [0], [0], [1], [0, 0, 1, 1], [], []>} : vector<16x256xbf16>, vector<256x128xbf16>, vector<16x128xf32> -> vector<16x128xf32>
    %c0_3 = arith.constant 0 : index
    %c0_4 = arith.constant 0 : index
    %3 = vector.load %arg3[%c0_3, %c0_4] : memref<1x128xf32, #tpu.memory_space<vmem>>, vector<1x128xf32>
    %4 = vector.broadcast %3 : vector<1x128xf32> to vector<16x128xf32>
    %5 = arith.addf %2, %4 : vector<16x128xf32>
    %cst_5 = arith.constant 0.000000e+00 : f32
    %6 = vector.broadcast %cst_5 : f32 to vector<16x128xf32>
    %7 = arith.maximumf %5, %6 : vector<16x128xf32>
    %8 = arith.truncf %7 : vector<16x128xf32> to vector<16x128xbf16>
    %c0_6 = arith.constant 0 : index
    %c0_7 = arith.constant 0 : index
    %9 = vector.load %arg4[%c0_6, %c0_7] : memref<16x128xbf16, #tpu.memory_space<vmem>>, vector<16x128xbf16>
    tpu.vector_store %arg4[%c0_6, %c0_7], %8 {strides = array<i32>} : memref<16x128xbf16, #tpu.memory_space<vmem>>, vector<16x128xbf16>,
    return
  }
  func.func @transform_0(%arg0: i32) -> (i32, i32) {
    %c0_i32 = arith.constant 0 : i32
    %c0_i32_0 = arith.constant 0 : i32
    return %arg0, %c0_i32 : i32, i32
  }
  func.func @transform_1(%arg0: i32) -> (i32, i32) {
    %c0_i32 = arith.constant 0 : i32
    %c0_i32_0 = arith.constant 0 : i32
    %c0_i32_1 = arith.constant 0 : i32
    return %c0_i32, %c0_i32_0 : i32, i32
  }
  func.func @transform_2(%arg0: i32) -> (i32, i32) {
    %c0_i32 = arith.constant 0 : i32
    %c0_i32_0 = arith.constant 0 : i32
    %c0_i32_1 = arith.constant 0 : i32
    return %c0_i32, %c0_i32_0 : i32, i32
  }
  func.func @transform_3(%arg0: i32) -> (i32, i32) {
    %c0_i32 = arith.constant 0 : i32
    %c0_i32_0 = arith.constant 0 : i32
    return %arg0, %c0_i32 : i32, i32
  }
}

module attributes {stable_mosaic.version = 11 : i64} {
  func.func @_mm2_bias_act_kernel(%arg0: i32, %arg1: memref<8x256xbf16, #tpu.memory_space<vmem>>, %arg2: memref<256x48xbf16, #tpu.memory_space<vmem>>, %arg3: memref<1x48xf32, #tpu.memory_space<vmem>>, %arg4: memref<48x384xbf16, #tpu.memory_space<vmem>>, %arg5: memref<1x384xf32, #tpu.memory_space<vmem>>, %arg6: memref<8x384xbf16, #tpu.memory_space<vmem>>) attributes {dimension_semantics = [#tpu.dimension_semantics<arbitrary>], iteration_bounds = array<i64: 1>, scalar_prefetch = 0 : i64, scratch_operands = 0 : i64, tpu.core_type = #tpu.core_type<tc>, window_params = [{pipeline_mode = #tpu.pipeline_mode<synchronous>, transform_indices = @transform_0, window_bounds = array<i64: 8, 256>}, {pipeline_mode = #tpu.pipeline_mode<synchronous>, transform_indices = @transform_1, window_bounds = array<i64: 256, 48>}, {pipeline_mode = #tpu.pipeline_mode<synchronous>, transform_indices = @transform_2, window_bounds = array<i64: 1, 48>}, {pipeline_mode = #tpu.pipeline_mode<synchronous>, transform_indices = @transform_3, window_bounds = array<i64: 48, 384>}, {pipeline_mode = #tpu.pipeline_mode<synchronous>, transform_indices = @transform_4, window_bounds = array<i64: 1, 384>}, {pipeline_mode = #tpu.pipeline_mode<synchronous>, transform_indices = @transform_5, window_bounds = array<i64: 8, 384>}]} {
    %c0 = arith.constant 0 : index
    %c0_0 = arith.constant 0 : index
    %0 = vector.load %arg1[%c0, %c0_0] : memref<8x256xbf16, #tpu.memory_space<vmem>>, vector<8x256xbf16>
    %c0_1 = arith.constant 0 : index
    %c0_2 = arith.constant 0 : index
    %1 = vector.load %arg2[%c0_1, %c0_2] : memref<256x48xbf16, #tpu.memory_space<vmem>>, vector<256x48xbf16>
    %cst = arith.constant dense<0.000000e+00> : vector<8x48xf32>
    %2 = tpu.matmul %0, %1, %cst {dimension_numbers = #tpu.dot_dimension_numbers<[1], [0], [0], [1], [0, 0, 1, 1], [], []>} : vector<8x256xbf16>, vector<256x48xbf16>, vector<8x48xf32> -> vector<8x48xf32>
    %c0_3 = arith.constant 0 : index
    %c0_4 = arith.constant 0 : index
    %3 = vector.load %arg3[%c0_3, %c0_4] : memref<1x48xf32, #tpu.memory_space<vmem>>, vector<1x48xf32>
    %4 = vector.broadcast %3 : vector<1x48xf32> to vector<8x48xf32>
    %5 = arith.addf %2, %4 : vector<8x48xf32>
    %cst_5 = arith.constant 0.000000e+00 : f32
    %6 = vector.broadcast %cst_5 : f32 to vector<8x48xf32>
    %7 = arith.maximumf %5, %6 : vector<8x48xf32>
    %8 = arith.truncf %7 : vector<8x48xf32> to vector<8x48xbf16>
    %c0_6 = arith.constant 0 : index
    %c0_7 = arith.constant 0 : index
    %9 = vector.load %arg4[%c0_6, %c0_7] : memref<48x384xbf16, #tpu.memory_space<vmem>>, vector<48x384xbf16>
    %cst_8 = arith.constant dense<0.000000e+00> : vector<8x384xf32>
    %10 = tpu.matmul %8, %9, %cst_8 {dimension_numbers = #tpu.dot_dimension_numbers<[1], [0], [0], [1], [0, 0, 1, 1], [], []>} : vector<8x48xbf16>, vector<48x384xbf16>, vector<8x384xf32> -> vector<8x384xf32>
    %c0_9 = arith.constant 0 : index
    %c0_10 = arith.constant 0 : index
    %11 = vector.load %arg5[%c0_9, %c0_10] : memref<1x384xf32, #tpu.memory_space<vmem>>, vector<1x384xf32>
    %12 = vector.broadcast %11 : vector<1x384xf32> to vector<8x384xf32>
    %13 = arith.addf %10, %12 : vector<8x384xf32>
    %cst_11 = arith.constant 0.000000e+00 : f32
    %14 = vector.broadcast %cst_11 : f32 to vector<8x384xf32>
    %15 = arith.maximumf %13, %14 : vector<8x384xf32>
    %16 = arith.truncf %15 : vector<8x384xf32> to vector<8x384xbf16>
    %c0_12 = arith.constant 0 : index
    %c0_13 = arith.constant 0 : index
    %17 = vector.load %arg6[%c0_12, %c0_13] : memref<8x384xbf16, #tpu.memory_space<vmem>>, vector<8x384xbf16>
    tpu.vector_store %arg6[%c0_12, %c0_13], %16 {strides = array<i32>} : memref<8x384xbf16, #tpu.memory_space<vmem>>, vector<8x384xbf16>,
    return
  }
  func.func @transform_0(%arg0: i32) -> (i32, i32) {
    %c0_i32 = arith.constant 0 : i32
    %c0_i32_0 = arith.constant 0 : i32
    %c0_i32_1 = arith.constant 0 : i32
    return %c0_i32, %c0_i32_0 : i32, i32
  }
  func.func @transform_1(%arg0: i32) -> (i32, i32) {
    %c0_i32 = arith.constant 0 : i32
    %c0_i32_0 = arith.constant 0 : i32
    %c0_i32_1 = arith.constant 0 : i32
    return %c0_i32, %c0_i32_0 : i32, i32
  }
  func.func @transform_2(%arg0: i32) -> (i32, i32) {
    %c0_i32 = arith.constant 0 : i32
    %c0_i32_0 = arith.constant 0 : i32
    %c0_i32_1 = arith.constant 0 : i32
    return %c0_i32, %c0_i32_0 : i32, i32
  }
  func.func @transform_3(%arg0: i32) -> (i32, i32) {
    %c0_i32 = arith.constant 0 : i32
    %c0_i32_0 = arith.constant 0 : i32
    %c0_i32_1 = arith.constant 0 : i32
    return %c0_i32, %c0_i32_0 : i32, i32
  }
  func.func @transform_4(%arg0: i32) -> (i32, i32) {
    %c0_i32 = arith.constant 0 : i32
    %c0_i32_0 = arith.constant 0 : i32
    %c0_i32_1 = arith.constant 0 : i32
    return %c0_i32, %c0_i32_0 : i32, i32
  }
  func.func @transform_5(%arg0: i32) -> (i32, i32) {
    %c0_i32 = arith.constant 0 : i32
    %c0_i32_0 = arith.constant 0 : i32
    %c0_i32_1 = arith.constant 0 : i32
    return %c0_i32, %c0_i32_0 : i32, i32
  }
}

module attributes {stable_mosaic.version = 11 : i64} {
  func.func @_mm2_bias_act_kernel(%arg0: i32, %arg1: memref<8x384xbf16, #tpu.memory_space<vmem>>, %arg2: memref<384x48xbf16, #tpu.memory_space<vmem>>, %arg3: memref<1x48xf32, #tpu.memory_space<vmem>>, %arg4: memref<48x384xbf16, #tpu.memory_space<vmem>>, %arg5: memref<1x384xf32, #tpu.memory_space<vmem>>, %arg6: memref<8x384xbf16, #tpu.memory_space<vmem>>) attributes {dimension_semantics = [#tpu.dimension_semantics<arbitrary>], iteration_bounds = array<i64: 1>, scalar_prefetch = 0 : i64, scratch_operands = 0 : i64, tpu.core_type = #tpu.core_type<tc>, window_params = [{pipeline_mode = #tpu.pipeline_mode<synchronous>, transform_indices = @transform_0, window_bounds = array<i64: 8, 384>}, {pipeline_mode = #tpu.pipeline_mode<synchronous>, transform_indices = @transform_1, window_bounds = array<i64: 384, 48>}, {pipeline_mode = #tpu.pipeline_mode<synchronous>, transform_indices = @transform_2, window_bounds = array<i64: 1, 48>}, {pipeline_mode = #tpu.pipeline_mode<synchronous>, transform_indices = @transform_3, window_bounds = array<i64: 48, 384>}, {pipeline_mode = #tpu.pipeline_mode<synchronous>, transform_indices = @transform_4, window_bounds = array<i64: 1, 384>}, {pipeline_mode = #tpu.pipeline_mode<synchronous>, transform_indices = @transform_5, window_bounds = array<i64: 8, 384>}]} {
    %c0 = arith.constant 0 : index
    %c0_0 = arith.constant 0 : index
    %0 = vector.load %arg1[%c0, %c0_0] : memref<8x384xbf16, #tpu.memory_space<vmem>>, vector<8x384xbf16>
    %c0_1 = arith.constant 0 : index
    %c0_2 = arith.constant 0 : index
    %1 = vector.load %arg2[%c0_1, %c0_2] : memref<384x48xbf16, #tpu.memory_space<vmem>>, vector<384x48xbf16>
    %cst = arith.constant dense<0.000000e+00> : vector<8x48xf32>
    %2 = tpu.matmul %0, %1, %cst {dimension_numbers = #tpu.dot_dimension_numbers<[1], [0], [0], [1], [0, 0, 1, 1], [], []>} : vector<8x384xbf16>, vector<384x48xbf16>, vector<8x48xf32> -> vector<8x48xf32>
    %c0_3 = arith.constant 0 : index
    %c0_4 = arith.constant 0 : index
    %3 = vector.load %arg3[%c0_3, %c0_4] : memref<1x48xf32, #tpu.memory_space<vmem>>, vector<1x48xf32>
    %4 = vector.broadcast %3 : vector<1x48xf32> to vector<8x48xf32>
    %5 = arith.addf %2, %4 : vector<8x48xf32>
    %cst_5 = arith.constant 0.000000e+00 : f32
    %6 = vector.broadcast %cst_5 : f32 to vector<8x48xf32>
    %7 = arith.maximumf %5, %6 : vector<8x48xf32>
    %8 = arith.truncf %7 : vector<8x48xf32> to vector<8x48xbf16>
    %c0_6 = arith.constant 0 : index
    %c0_7 = arith.constant 0 : index
    %9 = vector.load %arg4[%c0_6, %c0_7] : memref<48x384xbf16, #tpu.memory_space<vmem>>, vector<48x384xbf16>
    %cst_8 = arith.constant dense<0.000000e+00> : vector<8x384xf32>
    %10 = tpu.matmul %8, %9, %cst_8 {dimension_numbers = #tpu.dot_dimension_numbers<[1], [0], [0], [1], [0, 0, 1, 1], [], []>} : vector<8x48xbf16>, vector<48x384xbf16>, vector<8x384xf32> -> vector<8x384xf32>
    %c0_9 = arith.constant 0 : index
    %c0_10 = arith.constant 0 : index
    %11 = vector.load %arg5[%c0_9, %c0_10] : memref<1x384xf32, #tpu.memory_space<vmem>>, vector<1x384xf32>
    %12 = vector.broadcast %11 : vector<1x384xf32> to vector<8x384xf32>
    %13 = arith.addf %10, %12 : vector<8x384xf32>
    %cst_11 = arith.constant 0.000000e+00 : f32
    %14 = vector.broadcast %cst_11 : f32 to vector<8x384xf32>
    %15 = arith.maximumf %13, %14 : vector<8x384xf32>
    %16 = arith.truncf %15 : vector<8x384xf32> to vector<8x384xbf16>
    %c0_12 = arith.constant 0 : index
    %c0_13 = arith.constant 0 : index
    %17 = vector.load %arg6[%c0_12, %c0_13] : memref<8x384xbf16, #tpu.memory_space<vmem>>, vector<8x384xbf16>
    tpu.vector_store %arg6[%c0_12, %c0_13], %16 {strides = array<i32>} : memref<8x384xbf16, #tpu.memory_space<vmem>>, vector<8x384xbf16>,
    return
  }
  func.func @transform_0(%arg0: i32) -> (i32, i32) {
    %c0_i32 = arith.constant 0 : i32
    %c0_i32_0 = arith.constant 0 : i32
    %c0_i32_1 = arith.constant 0 : i32
    return %c0_i32, %c0_i32_0 : i32, i32
  }
  func.func @transform_1(%arg0: i32) -> (i32, i32) {
    %c0_i32 = arith.constant 0 : i32
    %c0_i32_0 = arith.constant 0 : i32
    %c0_i32_1 = arith.constant 0 : i32
    return %c0_i32, %c0_i32_0 : i32, i32
  }
  func.func @transform_2(%arg0: i32) -> (i32, i32) {
    %c0_i32 = arith.constant 0 : i32
    %c0_i32_0 = arith.constant 0 : i32
    %c0_i32_1 = arith.constant 0 : i32
    return %c0_i32, %c0_i32_0 : i32, i32
  }
  func.func @transform_3(%arg0: i32) -> (i32, i32) {
    %c0_i32 = arith.constant 0 : i32
    %c0_i32_0 = arith.constant 0 : i32
    %c0_i32_1 = arith.constant 0 : i32
    return %c0_i32, %c0_i32_0 : i32, i32
  }
  func.func @transform_4(%arg0: i32) -> (i32, i32) {
    %c0_i32 = arith.constant 0 : i32
    %c0_i32_0 = arith.constant 0 : i32
    %c0_i32_1 = arith.constant 0 : i32
    return %c0_i32, %c0_i32_0 : i32, i32
  }
  func.func @transform_5(%arg0: i32) -> (i32, i32) {
    %c0_i32 = arith.constant 0 : i32
    %c0_i32_0 = arith.constant 0 : i32
    %c0_i32_1 = arith.constant 0 : i32
    return %c0_i32, %c0_i32_0 : i32, i32
  }
}

module attributes {stable_mosaic.version = 11 : i64} {
  func.func @_mm2_bias_act_kernel(%arg0: i32, %arg1: memref<8x384xbf16, #tpu.memory_space<vmem>>, %arg2: memref<384x64xbf16, #tpu.memory_space<vmem>>, %arg3: memref<1x64xf32, #tpu.memory_space<vmem>>, %arg4: memref<64x512xbf16, #tpu.memory_space<vmem>>, %arg5: memref<1x512xf32, #tpu.memory_space<vmem>>, %arg6: memref<8x512xbf16, #tpu.memory_space<vmem>>) attributes {dimension_semantics = [#tpu.dimension_semantics<arbitrary>], iteration_bounds = array<i64: 1>, scalar_prefetch = 0 : i64, scratch_operands = 0 : i64, tpu.core_type = #tpu.core_type<tc>, window_params = [{pipeline_mode = #tpu.pipeline_mode<synchronous>, transform_indices = @transform_0, window_bounds = array<i64: 8, 384>}, {pipeline_mode = #tpu.pipeline_mode<synchronous>, transform_indices = @transform_1, window_bounds = array<i64: 384, 64>}, {pipeline_mode = #tpu.pipeline_mode<synchronous>, transform_indices = @transform_2, window_bounds = array<i64: 1, 64>}, {pipeline_mode = #tpu.pipeline_mode<synchronous>, transform_indices = @transform_3, window_bounds = array<i64: 64, 512>}, {pipeline_mode = #tpu.pipeline_mode<synchronous>, transform_indices = @transform_4, window_bounds = array<i64: 1, 512>}, {pipeline_mode = #tpu.pipeline_mode<synchronous>, transform_indices = @transform_5, window_bounds = array<i64: 8, 512>}]} {
    %c0 = arith.constant 0 : index
    %c0_0 = arith.constant 0 : index
    %0 = vector.load %arg1[%c0, %c0_0] : memref<8x384xbf16, #tpu.memory_space<vmem>>, vector<8x384xbf16>
    %c0_1 = arith.constant 0 : index
    %c0_2 = arith.constant 0 : index
    %1 = vector.load %arg2[%c0_1, %c0_2] : memref<384x64xbf16, #tpu.memory_space<vmem>>, vector<384x64xbf16>
    %cst = arith.constant dense<0.000000e+00> : vector<8x64xf32>
    %2 = tpu.matmul %0, %1, %cst {dimension_numbers = #tpu.dot_dimension_numbers<[1], [0], [0], [1], [0, 0, 1, 1], [], []>} : vector<8x384xbf16>, vector<384x64xbf16>, vector<8x64xf32> -> vector<8x64xf32>
    %c0_3 = arith.constant 0 : index
    %c0_4 = arith.constant 0 : index
    %3 = vector.load %arg3[%c0_3, %c0_4] : memref<1x64xf32, #tpu.memory_space<vmem>>, vector<1x64xf32>
    %4 = vector.broadcast %3 : vector<1x64xf32> to vector<8x64xf32>
    %5 = arith.addf %2, %4 : vector<8x64xf32>
    %cst_5 = arith.constant 0.000000e+00 : f32
    %6 = vector.broadcast %cst_5 : f32 to vector<8x64xf32>
    %7 = arith.maximumf %5, %6 : vector<8x64xf32>
    %8 = arith.truncf %7 : vector<8x64xf32> to vector<8x64xbf16>
    %c0_6 = arith.constant 0 : index
    %c0_7 = arith.constant 0 : index
    %9 = vector.load %arg4[%c0_6, %c0_7] : memref<64x512xbf16, #tpu.memory_space<vmem>>, vector<64x512xbf16>
    %cst_8 = arith.constant dense<0.000000e+00> : vector<8x512xf32>
    %10 = tpu.matmul %8, %9, %cst_8 {dimension_numbers = #tpu.dot_dimension_numbers<[1], [0], [0], [1], [0, 0, 1, 1], [], []>} : vector<8x64xbf16>, vector<64x512xbf16>, vector<8x512xf32> -> vector<8x512xf32>
    %c0_9 = arith.constant 0 : index
    %c0_10 = arith.constant 0 : index
    %11 = vector.load %arg5[%c0_9, %c0_10] : memref<1x512xf32, #tpu.memory_space<vmem>>, vector<1x512xf32>
    %12 = vector.broadcast %11 : vector<1x512xf32> to vector<8x512xf32>
    %13 = arith.addf %10, %12 : vector<8x512xf32>
    %cst_11 = arith.constant 0.000000e+00 : f32
    %14 = vector.broadcast %cst_11 : f32 to vector<8x512xf32>
    %15 = arith.maximumf %13, %14 : vector<8x512xf32>
    %16 = arith.truncf %15 : vector<8x512xf32> to vector<8x512xbf16>
    %c0_12 = arith.constant 0 : index
    %c0_13 = arith.constant 0 : index
    %17 = vector.load %arg6[%c0_12, %c0_13] : memref<8x512xbf16, #tpu.memory_space<vmem>>, vector<8x512xbf16>
    tpu.vector_store %arg6[%c0_12, %c0_13], %16 {strides = array<i32>} : memref<8x512xbf16, #tpu.memory_space<vmem>>, vector<8x512xbf16>,
    return
  }
  func.func @transform_0(%arg0: i32) -> (i32, i32) {
    %c0_i32 = arith.constant 0 : i32
    %c0_i32_0 = arith.constant 0 : i32
    %c0_i32_1 = arith.constant 0 : i32
    return %c0_i32, %c0_i32_0 : i32, i32
  }
  func.func @transform_1(%arg0: i32) -> (i32, i32) {
    %c0_i32 = arith.constant 0 : i32
    %c0_i32_0 = arith.constant 0 : i32
    %c0_i32_1 = arith.constant 0 : i32
    return %c0_i32, %c0_i32_0 : i32, i32
  }
  func.func @transform_2(%arg0: i32) -> (i32, i32) {
    %c0_i32 = arith.constant 0 : i32
    %c0_i32_0 = arith.constant 0 : i32
    %c0_i32_1 = arith.constant 0 : i32
    return %c0_i32, %c0_i32_0 : i32, i32
  }
  func.func @transform_3(%arg0: i32) -> (i32, i32) {
    %c0_i32 = arith.constant 0 : i32
    %c0_i32_0 = arith.constant 0 : i32
    %c0_i32_1 = arith.constant 0 : i32
    return %c0_i32, %c0_i32_0 : i32, i32
  }
  func.func @transform_4(%arg0: i32) -> (i32, i32) {
    %c0_i32 = arith.constant 0 : i32
    %c0_i32_0 = arith.constant 0 : i32
    %c0_i32_1 = arith.constant 0 : i32
    return %c0_i32, %c0_i32_0 : i32, i32
  }
  func.func @transform_5(%arg0: i32) -> (i32, i32) {
    %c0_i32 = arith.constant 0 : i32
    %c0_i32_0 = arith.constant 0 : i32
    %c0_i32_1 = arith.constant 0 : i32
    return %c0_i32, %c0_i32_0 : i32, i32
  }
}

module attributes {stable_mosaic.version = 11 : i64} {
  func.func @_mm2_bias_act_kernel(%arg0: i32, %arg1: memref<8x512xbf16, #tpu.memory_space<vmem>>, %arg2: memref<512x64xbf16, #tpu.memory_space<vmem>>, %arg3: memref<1x64xf32, #tpu.memory_space<vmem>>, %arg4: memref<64x512xbf16, #tpu.memory_space<vmem>>, %arg5: memref<1x512xf32, #tpu.memory_space<vmem>>, %arg6: memref<8x512xbf16, #tpu.memory_space<vmem>>) attributes {dimension_semantics = [#tpu.dimension_semantics<arbitrary>], iteration_bounds = array<i64: 1>, scalar_prefetch = 0 : i64, scratch_operands = 0 : i64, tpu.core_type = #tpu.core_type<tc>, window_params = [{pipeline_mode = #tpu.pipeline_mode<synchronous>, transform_indices = @transform_0, window_bounds = array<i64: 8, 512>}, {pipeline_mode = #tpu.pipeline_mode<synchronous>, transform_indices = @transform_1, window_bounds = array<i64: 512, 64>}, {pipeline_mode = #tpu.pipeline_mode<synchronous>, transform_indices = @transform_2, window_bounds = array<i64: 1, 64>}, {pipeline_mode = #tpu.pipeline_mode<synchronous>, transform_indices = @transform_3, window_bounds = array<i64: 64, 512>}, {pipeline_mode = #tpu.pipeline_mode<synchronous>, transform_indices = @transform_4, window_bounds = array<i64: 1, 512>}, {pipeline_mode = #tpu.pipeline_mode<synchronous>, transform_indices = @transform_5, window_bounds = array<i64: 8, 512>}]} {
    %c0 = arith.constant 0 : index
    %c0_0 = arith.constant 0 : index
    %0 = vector.load %arg1[%c0, %c0_0] : memref<8x512xbf16, #tpu.memory_space<vmem>>, vector<8x512xbf16>
    %c0_1 = arith.constant 0 : index
    %c0_2 = arith.constant 0 : index
    %1 = vector.load %arg2[%c0_1, %c0_2] : memref<512x64xbf16, #tpu.memory_space<vmem>>, vector<512x64xbf16>
    %cst = arith.constant dense<0.000000e+00> : vector<8x64xf32>
    %2 = tpu.matmul %0, %1, %cst {dimension_numbers = #tpu.dot_dimension_numbers<[1], [0], [0], [1], [0, 0, 1, 1], [], []>} : vector<8x512xbf16>, vector<512x64xbf16>, vector<8x64xf32> -> vector<8x64xf32>
    %c0_3 = arith.constant 0 : index
    %c0_4 = arith.constant 0 : index
    %3 = vector.load %arg3[%c0_3, %c0_4] : memref<1x64xf32, #tpu.memory_space<vmem>>, vector<1x64xf32>
    %4 = vector.broadcast %3 : vector<1x64xf32> to vector<8x64xf32>
    %5 = arith.addf %2, %4 : vector<8x64xf32>
    %cst_5 = arith.constant 0.000000e+00 : f32
    %6 = vector.broadcast %cst_5 : f32 to vector<8x64xf32>
    %7 = arith.maximumf %5, %6 : vector<8x64xf32>
    %8 = arith.truncf %7 : vector<8x64xf32> to vector<8x64xbf16>
    %c0_6 = arith.constant 0 : index
    %c0_7 = arith.constant 0 : index
    %9 = vector.load %arg4[%c0_6, %c0_7] : memref<64x512xbf16, #tpu.memory_space<vmem>>, vector<64x512xbf16>
    %cst_8 = arith.constant dense<0.000000e+00> : vector<8x512xf32>
    %10 = tpu.matmul %8, %9, %cst_8 {dimension_numbers = #tpu.dot_dimension_numbers<[1], [0], [0], [1], [0, 0, 1, 1], [], []>} : vector<8x64xbf16>, vector<64x512xbf16>, vector<8x512xf32> -> vector<8x512xf32>
    %c0_9 = arith.constant 0 : index
    %c0_10 = arith.constant 0 : index
    %11 = vector.load %arg5[%c0_9, %c0_10] : memref<1x512xf32, #tpu.memory_space<vmem>>, vector<1x512xf32>
    %12 = vector.broadcast %11 : vector<1x512xf32> to vector<8x512xf32>
    %13 = arith.addf %10, %12 : vector<8x512xf32>
    %cst_11 = arith.constant 0.000000e+00 : f32
    %14 = vector.broadcast %cst_11 : f32 to vector<8x512xf32>
    %15 = arith.maximumf %13, %14 : vector<8x512xf32>
    %16 = arith.truncf %15 : vector<8x512xf32> to vector<8x512xbf16>
    %c0_12 = arith.constant 0 : index
    %c0_13 = arith.constant 0 : index
    %17 = vector.load %arg6[%c0_12, %c0_13] : memref<8x512xbf16, #tpu.memory_space<vmem>>, vector<8x512xbf16>
    tpu.vector_store %arg6[%c0_12, %c0_13], %16 {strides = array<i32>} : memref<8x512xbf16, #tpu.memory_space<vmem>>, vector<8x512xbf16>,
    return
  }
  func.func @transform_0(%arg0: i32) -> (i32, i32) {
    %c0_i32 = arith.constant 0 : i32
    %c0_i32_0 = arith.constant 0 : i32
    %c0_i32_1 = arith.constant 0 : i32
    return %c0_i32, %c0_i32_0 : i32, i32
  }
  func.func @transform_1(%arg0: i32) -> (i32, i32) {
    %c0_i32 = arith.constant 0 : i32
    %c0_i32_0 = arith.constant 0 : i32
    %c0_i32_1 = arith.constant 0 : i32
    return %c0_i32, %c0_i32_0 : i32, i32
  }
  func.func @transform_2(%arg0: i32) -> (i32, i32) {
    %c0_i32 = arith.constant 0 : i32
    %c0_i32_0 = arith.constant 0 : i32
    %c0_i32_1 = arith.constant 0 : i32
    return %c0_i32, %c0_i32_0 : i32, i32
  }
  func.func @transform_3(%arg0: i32) -> (i32, i32) {
    %c0_i32 = arith.constant 0 : i32
    %c0_i32_0 = arith.constant 0 : i32
    %c0_i32_1 = arith.constant 0 : i32
    return %c0_i32, %c0_i32_0 : i32, i32
  }
  func.func @transform_4(%arg0: i32) -> (i32, i32) {
    %c0_i32 = arith.constant 0 : i32
    %c0_i32_0 = arith.constant 0 : i32
    %c0_i32_1 = arith.constant 0 : i32
    return %c0_i32, %c0_i32_0 : i32, i32
  }
  func.func @transform_5(%arg0: i32) -> (i32, i32) {
    %c0_i32 = arith.constant 0 : i32
    %c0_i32_0 = arith.constant 0 : i32
    %c0_i32_1 = arith.constant 0 : i32
    return %c0_i32, %c0_i32_0 : i32, i32
  }
}

module attributes {stable_mosaic.version = 11 : i64} {
  func.func @_mm2_bias_act_kernel(%arg0: i32, %arg1: memref<8x512xbf16, #tpu.memory_space<vmem>>, %arg2: memref<512x128xbf16, #tpu.memory_space<vmem>>, %arg3: memref<1x128xf32, #tpu.memory_space<vmem>>, %arg4: memref<128x128xbf16, #tpu.memory_space<vmem>>, %arg5: memref<1x128xf32, #tpu.memory_space<vmem>>, %arg6: memref<8x128xf32, #tpu.memory_space<vmem>>) attributes {dimension_semantics = [#tpu.dimension_semantics<arbitrary>], iteration_bounds = array<i64: 1>, scalar_prefetch = 0 : i64, scratch_operands = 0 : i64, tpu.core_type = #tpu.core_type<tc>, window_params = [{pipeline_mode = #tpu.pipeline_mode<synchronous>, transform_indices = @transform_0, window_bounds = array<i64: 8, 512>}, {pipeline_mode = #tpu.pipeline_mode<synchronous>, transform_indices = @transform_1, window_bounds = array<i64: 512, 128>}, {pipeline_mode = #tpu.pipeline_mode<synchronous>, transform_indices = @transform_2, window_bounds = array<i64: 1, 128>}, {pipeline_mode = #tpu.pipeline_mode<synchronous>, transform_indices = @transform_3, window_bounds = array<i64: 128, 128>}, {pipeline_mode = #tpu.pipeline_mode<synchronous>, transform_indices = @transform_4, window_bounds = array<i64: 1, 128>}, {pipeline_mode = #tpu.pipeline_mode<synchronous>, transform_indices = @transform_5, window_bounds = array<i64: 8, 128>}]} {
    %c0 = arith.constant 0 : index
    %c0_0 = arith.constant 0 : index
    %0 = vector.load %arg1[%c0, %c0_0] : memref<8x512xbf16, #tpu.memory_space<vmem>>, vector<8x512xbf16>
    %c0_1 = arith.constant 0 : index
    %c0_2 = arith.constant 0 : index
    %1 = vector.load %arg2[%c0_1, %c0_2] : memref<512x128xbf16, #tpu.memory_space<vmem>>, vector<512x128xbf16>
    %cst = arith.constant dense<0.000000e+00> : vector<8x128xf32>
    %2 = tpu.matmul %0, %1, %cst {dimension_numbers = #tpu.dot_dimension_numbers<[1], [0], [0], [1], [0, 0, 1, 1], [], []>} : vector<8x512xbf16>, vector<512x128xbf16>, vector<8x128xf32> -> vector<8x128xf32>
    %c0_3 = arith.constant 0 : index
    %c0_4 = arith.constant 0 : index
    %3 = vector.load %arg3[%c0_3, %c0_4] : memref<1x128xf32, #tpu.memory_space<vmem>>, vector<1x128xf32>
    %4 = vector.broadcast %3 : vector<1x128xf32> to vector<8x128xf32>
    %5 = arith.addf %2, %4 : vector<8x128xf32>
    %cst_5 = arith.constant 0.000000e+00 : f32
    %6 = vector.broadcast %cst_5 : f32 to vector<8x128xf32>
    %7 = arith.maximumf %5, %6 : vector<8x128xf32>
    %8 = arith.truncf %7 : vector<8x128xf32> to vector<8x128xbf16>
    %c0_6 = arith.constant 0 : index
    %c0_7 = arith.constant 0 : index
    %9 = vector.load %arg4[%c0_6, %c0_7] : memref<128x128xbf16, #tpu.memory_space<vmem>>, vector<128x128xbf16>
    %cst_8 = arith.constant dense<0.000000e+00> : vector<8x128xf32>
    %10 = tpu.matmul %8, %9, %cst_8 {dimension_numbers = #tpu.dot_dimension_numbers<[1], [0], [0], [1], [0, 0, 1, 1], [], []>} : vector<8x128xbf16>, vector<128x128xbf16>, vector<8x128xf32> -> vector<8x128xf32>
    %c0_9 = arith.constant 0 : index
    %c0_10 = arith.constant 0 : index
    %11 = vector.load %arg5[%c0_9, %c0_10] : memref<1x128xf32, #tpu.memory_space<vmem>>, vector<1x128xf32>
    %12 = vector.broadcast %11 : vector<1x128xf32> to vector<8x128xf32>
    %13 = arith.addf %10, %12 : vector<8x128xf32>
    %c0_11 = arith.constant 0 : index
    %c0_12 = arith.constant 0 : index
    %14 = vector.load %arg6[%c0_11, %c0_12] : memref<8x128xf32, #tpu.memory_space<vmem>>, vector<8x128xf32>
    tpu.vector_store %arg6[%c0_11, %c0_12], %13 {strides = array<i32>} : memref<8x128xf32, #tpu.memory_space<vmem>>, vector<8x128xf32>,
    return
  }
  func.func @transform_0(%arg0: i32) -> (i32, i32) {
    %c0_i32 = arith.constant 0 : i32
    %c0_i32_0 = arith.constant 0 : i32
    %c0_i32_1 = arith.constant 0 : i32
    return %c0_i32, %c0_i32_0 : i32, i32
  }
  func.func @transform_1(%arg0: i32) -> (i32, i32) {
    %c0_i32 = arith.constant 0 : i32
    %c0_i32_0 = arith.constant 0 : i32
    %c0_i32_1 = arith.constant 0 : i32
    return %c0_i32, %c0_i32_0 : i32, i32
  }
  func.func @transform_2(%arg0: i32) -> (i32, i32) {
    %c0_i32 = arith.constant 0 : i32
    %c0_i32_0 = arith.constant 0 : i32
    %c0_i32_1 = arith.constant 0 : i32
    return %c0_i32, %c0_i32_0 : i32, i32
  }
  func.func @transform_3(%arg0: i32) -> (i32, i32) {
    %c0_i32 = arith.constant 0 : i32
    %c0_i32_0 = arith.constant 0 : i32
    %c0_i32_1 = arith.constant 0 : i32
    return %c0_i32, %c0_i32_0 : i32, i32
  }
  func.func @transform_4(%arg0: i32) -> (i32, i32) {
    %c0_i32 = arith.constant 0 : i32
    %c0_i32_0 = arith.constant 0 : i32
    %c0_i32_1 = arith.constant 0 : i32
    return %c0_i32, %c0_i32_0 : i32, i32
  }
  func.func @transform_5(%arg0: i32) -> (i32, i32) {
    %c0_i32 = arith.constant 0 : i32
    %c0_i32_0 = arith.constant 0 : i32
    %c0_i32_1 = arith.constant 0 : i32
    return %c0_i32, %c0_i32_0 : i32, i32
  }
}

</mosaic_0001>

<bundles_post_ra>
// kernel: squeezenet_forward.14
= control target key start
LH: loop header
LB: loop body
LE: loop exit
PB: predicated region body
PF: predicated region fallthrough
CT: control target
= control target key end

     0   :  { %s6003_s12 = smov 0   ;;  %s7238_s0 = inlined_call_operand.vmem [shape: bf16[1024,1152], index: 0, kind: input, shape index: {}]   ;;  %s7239_s1 = inlined_call_operand.vmem [shape: bf16[1152,64], index: 1, kind: input, shape index: {}]   ;;  %s7240_s2 = inlined_call_operand.vmem [shape: f32[1,64], index: 2, kind: input, shape index: {}]   ;;  %s7241_s3 = inlined_call_operand.vmem [shape: bf16[1024,64], index: 3, kind: output, shape index: {}]  }
   0x1 LB: > { %s4439_s13 = sadd.s32 4294967295, %s5980_s12   ;;  %p4443_p0 = scmp.ge.s32.totalorder %s5980_s12, 1  ;;  %s5980_s12 = sphi %s6003_s12, %s13_s12  }
   0x2   : > { %p139_p1 = scmp.lt.s32.totalorder %s5980_s12, 3 }
   0x4   : > { %p140_p2 = pnand %p4443_p0, %p139_p1 }
   0x6   : > { %143 = sbr.rel (%p140_p2) target bundleno = 870 (0x366), region = 32 }
   0xd   : > { %v5485_v0 = vld [vmem:[%s7239_s1] sm:$0xff]   ;;  %v5982_v1 = vmov 0   ;;  %v5487_v3 = vld [vmem:[%s7239_s1 + $0x8] sm:$0xff]   ;;  %v5489_v5 = vld [vmem:[%s7239_s1 + $0x10] sm:$0xff]   ;;  %s4444_s7 = sshll.u32 %s4439_s13, 6  ;;  %vm4318_vm0 = vcmask 519168  }
   0xe   : > { %2553 = vmatprep.subr.bf16.mxu1 %v5982_v1  ;;  %2842 = vmatprep.subr.bf16.mxu0 %v5982_v1  ;;  %v6019_v2 = vld [vmem:[%s7239_s1 + $0x80] sm:$0xff]   ;;  %v6029_v4 = vld [vmem:[%s7239_s1 + $0x88] sm:$0xff]   ;;  %v6040_v6 = vld [vmem:[%s7239_s1 + $0x90] sm:$0xff]   ;;  %p165_p3 = scmp.lt.s32.totalorder %s4444_s7, 127 }
   0xf   : > { %2554 = vmatpush1.bf16.msra.mxu1 %v5485_v0  ;;  %2843 = vmatpush1.bf16.msra.mxu0 %v6019_v2  ;;  %v5491_v7 = vld [vmem:[%s7239_s1 + $0x18] sm:$0xff]   ;;  %v5493_v9 = vld [vmem:[%s7239_s1 + $0x20] sm:$0xff]   ;;  %v5495_v11 = vld [vmem:[%s7239_s1 + $0x28] sm:$0xff]  }
  0x10   : > { %2555 = vmatprep.subr.bf16.mxu1 %v5982_v1  ;;  %2844 = vmatprep.subr.bf16.mxu0 %v5982_v1  ;;  %v6051_v8 = vld [vmem:[%s7239_s1 + $0x98] sm:$0xff]   ;;  %v6062_v10 = vld [vmem:[%s7239_s1 + $0xa0] sm:$0xff]   ;;  %v6075_v12 = vld [vmem:[%s7239_s1 + $0xa8] sm:$0xff]   ;;  %s7271_s7 = smov (!%p165_p3, %s4444_s7), 127 }
  0x11   : > { %v5497_v13 = vld [vmem:[%s7239_s1 + $0x30] sm:$0xff]   ;;  %v5499_v15 = vld [vmem:[%s7239_s1 + $0x38] sm:$0xff]   ;;  %s5475_s19 = smul.u32 36, %s7271_s7  ;;  %v5501_v17 = vld [vmem:[%s7239_s1 + $0x40] sm:$0xff]  }
  0x12   : > { %v6088_v14 = vld [vmem:[%s7239_s1 + $0xb0] sm:$0xff]   ;;  %v6100_v16 = vld [vmem:[%s7239_s1 + $0xb8] sm:$0xff]   ;;  %v6116_v18 = vld [vmem:[%s7239_s1 + $0xc0] sm:$0xff]  }
  0x13   : > { %2556 = vmatpush1.bf16.msra.mxu1 %v5487_v3  ;;  %2845 = vmatpush1.bf16.msra.mxu0 %v6029_v4  ;;  %s6109_s26 = scalar_lea.vmem %s7238_s0, %s5475_s19  ;;  %v5503_v20 = vld [vmem:[%s7239_s1 + $0x48] sm:$0xff]   ;;  %v5505_v23 = vld [vmem:[%s7239_s1 + $0x50] sm:$0xff]   ;;  %v5507_v25 = vld [vmem:[%s7239_s1 + $0x58] sm:$0xff]  }
  0x14   : > { %2557 = vmatprep.subr.bf16.mxu1 %v5982_v1  ;;  %2846 = vmatprep.subr.bf16.mxu0 %v5982_v1  ;;  %v5519_v19 = vld [vmem:[%s6109_s26 + $0x4] ss:$36 sps:$4 sm:$0xff]   ;;  %v5522_v21 = vld [vmem:[%s6109_s26 + $0xc] ss:$36 sps:$4 sm:$0xff]   ;;  %v6151_v26 = vld [vmem:[%s7239_s1 + $0xd8] sm:$0xff]  }
  0x15   : > { %v6129_v22 = vld [vmem:[%s7239_s1 + $0xc8] sm:$0xff]   ;;  %2585 = vmatprep.mubr.bf16.mxu1 %v5519_v19  ;;  %2874 = vmatprep.mubr.bf16.mxu0 %v5522_v21  ;;  %v6140_v24 = vld [vmem:[%s7239_s1 + $0xd0] sm:$0xff]   ;;  %v5509_v27 = vld [vmem:[%s7239_s1 + $0x60] sm:$0xff]  }
  0x16   : > { %v6162_v28 = vld [vmem:[%s7239_s1 + $0xe0] sm:$0xff]   ;;  %v5511_v29 = vld [vmem:[%s7239_s1 + $0x68] sm:$0xff]   ;;  %v5513_v31 = vld [vmem:[%s7239_s1 + $0x70] sm:$0xff]  }
  0x17   : > { %2558 = vmatpush1.bf16.msra.mxu1 %v5489_v5  ;;  %2847 = vmatpush1.bf16.msra.mxu0 %v6040_v6  ;;  %v6173_v30 = vld [vmem:[%s7239_s1 + $0xe8] sm:$0xff]   ;;  %v6184_v32 = vld [vmem:[%s7239_s1 + $0xf0] sm:$0xff]   ;;  %v5515_v33 = vld [vmem:[%s7239_s1 + $0x78] sm:$0xff]  }
  0x18   : > { %2559 = vmatprep.subr.bf16.mxu1 %v5982_v1  ;;  %2848 = vmatprep.subr.bf16.mxu0 %v5982_v1  ;;  %v6195_v34 = vld [vmem:[%s7239_s1 + $0xf8] sm:$0xff]   ;;  %v5517_v35 = vld [vmem:[%s6109_s26] ss:$36 sps:$4 sm:$0xff]   ;;  %v5520_v36 = vld [vmem:[%s6109_s26 + $0x8] ss:$36 sps:$4 sm:$0xff]  }
  0x19   : > { %v5523_v37 = vld [vmem:[%s7239_s1 + $0x100] sm:$0xff]   ;;  %v5525_v38 = vld [vmem:[%s6109_s26 + $0x4c] ss:$36 sps:$4 sm:$0xff]   ;;  %v5527_v39 = vld [vmem:[%s6109_s26 + $0x54] ss:$36 sps:$4 sm:$0xff]  }
  0x1a   : > { %v5524_v40 = vld [vmem:[%s7239_s1 + $0x108] sm:$0xff]   ;;  %v5530_v42 = vld [vmem:[%s6109_s26 + $0x50] ss:$36 sps:$4 sm:$0xff]   ;;  %v5535_v45 = vld [vmem:[%s6109_s26 + $0x9c] ss:$36 sps:$4 sm:$0xff]  }
  0x1b   : > { %2560 = vmatpush1.bf16.msra.mxu1 %v5491_v7  ;;  %2849 = vmatpush1.bf16.msra.mxu0 %v6051_v8  ;;  %v5529_v41 = vld [vmem:[%s6109_s26 + $0x48] ss:$36 sps:$4 sm:$0xff]   ;;  %v5533_v43 = vld [vmem:[%s6109_s26 + $0x94] ss:$36 sps:$4 sm:$0xff]   ;;  %v5539_v49 = vld [vmem:[%s7239_s1 + $0x120] sm:$0xff]  }
  0x1c   : > { %2561 = vmatprep.subr.bf16.mxu1 %v5982_v1  ;;  %2850 = vmatprep.subr.bf16.mxu0 %v5982_v1  ;;  %v5531_v44 = vld [vmem:[%s7239_s1 + $0x110] sm:$0xff]   ;;  %v5532_v46 = vld [vmem:[%s7239_s1 + $0x118] sm:$0xff]   ;;  %v5543_v51 = vld [vmem:[%s6109_s26 + $0xe4] ss:$36 sps:$4 sm:$0xff]  }
  0x1d   : > { %v5537_v47 = vld [vmem:[%s6109_s26 + $0x90] ss:$36 sps:$4 sm:$0xff]   ;;  %v5538_v48 = vld [vmem:[%s6109_s26 + $0x98] ss:$36 sps:$4 sm:$0xff]   ;;  %v5540_v52 = vld [vmem:[%s7239_s1 + $0x128] sm:$0xff]  }
  0x1e   : > { %v5541_v50 = vld [vmem:[%s6109_s26 + $0xdc] ss:$36 sps:$4 sm:$0xff]   ;;  %v5549_v55 = vld [vmem:[%s6109_s26 + $0x124] ss:$36 sps:$4 sm:$0xff]   ;;  %v5547_v56 = vld [vmem:[%s7239_s1 + $0x130] sm:$0xff]  }
  0x1f   : > { %2562 = vmatpush1.bf16.msra.mxu1 %v5493_v9  ;;  %2851 = vmatpush1.bf16.msra.mxu0 %v6062_v10  ;;  %v5545_v53 = vld [vmem:[%s6109_s26 + $0xd8] ss:$36 sps:$4 sm:$0xff]   ;;  %v5546_v54 = vld [vmem:[%s6109_s26 + $0xe0] ss:$36 sps:$4 sm:$0xff]   ;;  %v5551_v57 = vld [vmem:[%s6109_s26 + $0x12c] ss:$36 sps:$4 sm:$0xff]  }
  0x20   : > { %2563 = vmatprep.subr.bf16.mxu1 %v5982_v1  ;;  %2852 = vmatprep.subr.bf16.mxu0 %v5982_v1  ;;  %v5548_v58 = vld [vmem:[%s7239_s1 + $0x138] sm:$0xff]   ;;  %v5553_v59 = vld [vmem:[%s6109_s26 + $0x120] ss:$36 sps:$4 sm:$0xff]   ;;  %v5554_v60 = vld [vmem:[%s6109_s26 + $0x128] ss:$36 sps:$4 sm:$0xff]  }
  0x21   : > { %v5555_v61 = vld [vmem:[%s7239_s1 + $0x140] sm:$0xff]   ;;  %v5557_v62 = vld [vmem:[%s6109_s26 + $0x16c] ss:$36 sps:$4 sm:$0xff]   ;;  %v5559_v63 = vld [vmem:[%s6109_s26 + $0x174] ss:$36 sps:$4 sm:$0xff]  }
  0x22   : > { %v5556_v0 = vld [vmem:[%s7239_s1 + $0x148] sm:$0xff]   ;;  %v5562_v3 = vld [vmem:[%s6109_s26 + $0x170] ss:$36 sps:$4 sm:$0xff]   ;;  %v5564_v7 = vld [vmem:[%s7239_s1 + $0x158] sm:$0xff]  }
  0x23   : > { %2564 = vmatpush1.bf16.msra.mxu1 %v5495_v11  ;;  %2853 = vmatpush1.bf16.msra.mxu0 %v6075_v12  ;;  %v5563_v5 = vld [vmem:[%s7239_s1 + $0x150] sm:$0xff]   ;;  %v5570_v9 = vld [vmem:[%s6109_s26 + $0x1b8] ss:$36 sps:$4 sm:$0xff]  }
  0x24   : > { %2565 = vmatprep.subr.bf16.mxu1 %v5982_v1  ;;  %2854 = vmatprep.subr.bf16.mxu0 %v5982_v1  ;;  %v5573_v11 = vld [vmem:[%s6109_s26 + $0x1fc] ss:$36 sps:$4 sm:$0xff]   ;;  %v5583_v21 = vld [vmem:[%s6109_s26 + $0x10] ss:$36 sps:$4 sm:$0xff]  }
  0x25   : > { %v5580_v19 = vld [vmem:[%s7239_s1 + $0x178] sm:$0xff]  }
  0x27   : > { %2566 = vmatpush1.bf16.msra.mxu1 %v5497_v13  ;;  %2855 = vmatpush1.bf16.msra.mxu0 %v6088_v14  ;;  %v5572_v13 = vld [vmem:[%s7239_s1 + $0x168] sm:$0xff]  }
  0x28   : > { %2567 = vmatprep.subr.bf16.mxu1 %v5982_v1  ;;  %2856 = vmatprep.subr.bf16.mxu0 %v5982_v1 }
  0x2b   : > { %2568 = vmatpush1.bf16.msra.mxu1 %v5499_v15  ;;  %2857 = vmatpush1.bf16.msra.mxu0 %v6100_v16  ;;  %v5578_v15 = vld [vmem:[%s6109_s26 + $0x200] ss:$36 sps:$4 sm:$0xff]  }
  0x2c   : > { %2569 = vmatprep.subr.bf16.mxu1 %v5982_v1  ;;  %2858 = vmatprep.subr.bf16.mxu0 %v5982_v1 }
  0x2f   : > { %2570 = vmatpush1.bf16.msra.mxu1 %v5501_v17  ;;  %2859 = vmatpush1.bf16.msra.mxu0 %v6116_v18  ;;  %v5579_v17 = vld [vmem:[%s7239_s1 + $0x170] sm:$0xff]  }
  0x30   : > { %2571 = vmatprep.subr.bf16.mxu1 %v5982_v1  ;;  %2860 = vmatprep.subr.bf16.mxu0 %v5982_v1 }
  0x33   : > { %2572 = vmatpush1.bf16.msra.mxu1 %v5503_v20  ;;  %2861 = vmatpush1.bf16.msra.mxu0 %v6129_v22  ;;  %v5586_v20 = vld [vmem:[%s6109_s26 + $0x240] ss:$36 sps:$4 sm:$0xff]  }
  0x34   : > { %2573 = vmatprep.subr.bf16.mxu1 %v5982_v1  ;;  %2862 = vmatprep.subr.bf16.mxu0 %v5982_v1 }
  0x37   : > { %2574 = vmatpush1.bf16.msra.mxu1 %v5505_v23  ;;  %2863 = vmatpush1.bf16.msra.mxu0 %v6140_v24  ;;  %v5587_v23 = vld [vmem:[%s7239_s1 + $0x180] sm:$0xff]  }
  0x38   : > { %2575 = vmatprep.subr.bf16.mxu1 %v5982_v1  ;;  %2864 = vmatprep.subr.bf16.mxu0 %v5982_v1 }
  0x3b   : > { %2576 = vmatpush1.bf16.msra.mxu1 %v5507_v25  ;;  %2865 = vmatpush1.bf16.msra.mxu0 %v6151_v26  ;;  %v5592_v25 = vld [vmem:[%s6109_s26 + $0x288] ss:$36 sps:$4 sm:$0xff]  }
  0x3c   : > { %2577 = vmatprep.subr.bf16.mxu1 %v5982_v1  ;;  %2866 = vmatprep.subr.bf16.mxu0 %v5982_v1 }
  0x3f   : > { %2578 = vmatpush1.bf16.msra.mxu1 %v5509_v27  ;;  %2867 = vmatpush1.bf16.msra.mxu0 %v6162_v28  ;;  %v5593_v27 = vld [vmem:[%s6109_s26 + $0x58] ss:$36 sps:$4 sm:$0xff]  }
  0x40   : > { %2579 = vmatprep.subr.bf16.mxu1 %v5982_v1  ;;  %2868 = vmatprep.subr.bf16.mxu0 %v5982_v1 }
  0x43   : > { %2580 = vmatpush1.bf16.msra.mxu1 %v5511_v29  ;;  %2869 = vmatpush1.bf16.msra.mxu0 %v6173_v30  ;;  %v5596_v29 = vld [vmem:[%s6109_s26 + $0xa4] ss:$36 sps:$4 sm:$0xff]  }
  0x44   : > { %2581 = vmatprep.subr.bf16.mxu1 %v5982_v1  ;;  %2870 = vmatprep.subr.bf16.mxu0 %v5982_v1 }
  0x47   : > { %2582 = vmatpush1.bf16.msra.mxu1 %v5513_v31  ;;  %2871 = vmatpush1.bf16.msra.mxu0 %v6184_v32  ;;  %v5598_v31 = vld [vmem:[%s6109_s26 + $0x2d0] ss:$36 sps:$4 sm:$0xff]  }
  0x48   : > { %2583 = vmatprep.subr.bf16.mxu1 %v5982_v1  ;;  %2872 = vmatprep.subr.bf16.mxu0 %v5982_v1 }
  0x4b   : > { %2584 = vmatpush1.bf16.msra.mxu1 %v5515_v33  ;;  %2873 = vmatpush1.bf16.msra.mxu0 %v6195_v34  ;;  %v5599_v33 = vld [vmem:[%s6109_s26 + $0xa0] ss:$36 sps:$4 sm:$0xff]  }
  0x4c   : > { %5059 = vmatprep.subr.bf16.mxu1 %v5982_v1  ;;  %3131 = vmatprep.subr.bf16.mxu0 %v5982_v1 }
  0x4e   : > { %2586 = vmatmul.mubr.bf16.vlgmr.msra.gmra.mrb[0].mxu1 %v5517_v35  ;;  %2875 = vmatmul.mubr.bf16.vlgmr.msra.gmra.mrb[0].mxu0 %v5520_v36  ;;  %v5603_v35 = vld [vmem:[%s6109_s26 + $0xec] ss:$36 sps:$4 sm:$0xff]   ;;  %v5639_v36 = vld [vmem:[%s7239_s1 + $0x1a0] sm:$0xff]  }
  0x4f   : > { %5075 = vmatpush1.bf16.msra.mxu1 %v6019_v2  ;;  %3132 = vmatpush1.bf16.msra.mxu0 %v5523_v37  ;;  %v5561_v2 = vld [vmem:[%s6109_s26 + $0x168] ss:$36 sps:$4 sm:$0xff]  }
  0x50   : > { %2593 = vmatprep.mubr.bf16.mxu1 %v5525_v38  ;;  %3133 = vmatprep.subr.bf16.mxu0 %v5982_v1  ;;  %v5652_v37 = vld [vmem:[%s7239_s1 + $0x1a8] sm:$0xff]   ;;  %v5605_v38 = vld [vmem:[%s6109_s26 + $0x318] ss:$36 sps:$4 sm:$0xff]  }
  0x51   : > { %2882 = vmatprep.mubr.bf16.mxu0 %v5527_v39  ;;  %5060 = vmatprep.subr.bf16.mxu1 %v5982_v1  ;;  %v5606_v39 = vld [vmem:[%s6109_s26 + $0xe8] ss:$36 sps:$4 sm:$0xff]  }
  0x53   : > { %5076 = vmatpush1.bf16.msra.mxu1 %v6029_v4  ;;  %3134 = vmatpush1.bf16.msra.mxu0 %v5524_v40  ;;  %v5565_v4 = vld [vmem:[%s6109_s26 + $0x1b4] ss:$36 sps:$4 sm:$0xff]   ;;  %v5607_v40 = vld [vmem:[%s6109_s26 + $0x364] ss:$36 sps:$4 sm:$0xff]  }
  0x54   : > { %5061 = vmatprep.subr.bf16.mxu1 %v5982_v1  ;;  %3135 = vmatprep.subr.bf16.mxu0 %v5982_v1 }
  0x56   : > { %2594 = vmatmul.mubr.bf16.gmra.mrb[4].mxu1 %v5529_v41  ;;  %2883 = vmatmul.mubr.bf16.gmra.mrb[4].mxu0 %v5530_v42  ;;  %v5609_v41 = vld [vmem:[%s6109_s26 + $0x134] ss:$36 sps:$4 sm:$0xff]  }
  0x57   : > { %2601 = vmatprep.mubr.bf16.mxu1 %v5533_v43  ;;  %3136 = vmatpush1.bf16.msra.mxu0 %v5531_v44  ;;  %v5665_v42 = vld [vmem:[%s7239_s1 + $0x1b0] sm:$0xff]   ;;  %v5678_v43 = vld [vmem:[%s7239_s1 + $0x1b8] sm:$0xff]   ;;  %v5611_v44 = vld [vmem:[%s6109_s26 + $0x360] ss:$36 sps:$4 sm:$0xff]  }
  0x58   : > { %2890 = vmatprep.mubr.bf16.mxu0 %v5535_v45  ;;  %3137 = vmatprep.subr.bf16.mxu0 %v5982_v1  ;;  %v5612_v45 = vld [vmem:[%s6109_s26 + $0x130] ss:$36 sps:$4 sm:$0xff]  }
  0x59   : > { %5077 = vmatpush1.bf16.msra.mxu1 %v6040_v6  ;;  %v5567_v6 = vld [vmem:[%s6109_s26 + $0x1bc] ss:$36 sps:$4 sm:$0xff]  }
  0x5a   : > { %5062 = vmatprep.subr.bf16.mxu1 %v5982_v1 }
  0x5b   : > { %3138 = vmatpush1.bf16.msra.mxu0 %v5532_v46  ;;  %v5614_v46 = vld [vmem:[%s6109_s26 + $0x3ac] ss:$36 sps:$4 sm:$0xff]  }
  0x5c   : > { %3139 = vmatprep.subr.bf16.mxu0 %v5982_v1 }
  0x5d   : > { %5078 = vmatpush1.bf16.msra.mxu1 %v6051_v8  ;;  %v5569_v8 = vld [vmem:[%s6109_s26 + $0x1b0] ss:$36 sps:$4 sm:$0xff]  }
  0x5e   : > { %2602 = vmatmul.mubr.bf16.gmra.mrb[8].mxu1 %v5537_v47  ;;  %5063 = vmatprep.subr.bf16.mxu1 %v5982_v1  ;;  %v5616_v47 = vld [vmem:[%s6109_s26 + $0x17c] ss:$36 sps:$4 sm:$0xff]  }
  0x5f   : > { %2891 = vmatmul.mubr.bf16.gmra.mrb[8].mxu0 %v5538_v48  ;;  %2609 = vmatprep.mubr.bf16.mxu1 %v5541_v50  ;;  %v5691_v48 = vld [vmem:[%s7239_s1 + $0x1c0] sm:$0xff]   ;;  %v5618_v50 = vld [vmem:[%s6109_s26 + $0x3a8] ss:$36 sps:$4 sm:$0xff]  }
  0x60   : > { %3140 = vmatpush1.bf16.msra.mxu0 %v5539_v49  ;;  %2898 = vmatprep.mubr.bf16.mxu0 %v5543_v51  ;;  %v5704_v49 = vld [vmem:[%s7239_s1 + $0x1c8] sm:$0xff]   ;;  %v5619_v51 = vld [vmem:[%s6109_s26 + $0x178] ss:$36 sps:$4 sm:$0xff]  }
  0x61   : > { %3141 = vmatprep.subr.bf16.mxu0 %v5982_v1  ;;  %5079 = vmatpush1.bf16.msra.mxu1 %v6062_v10  ;;  %v5571_v10 = vld [vmem:[%s7239_s1 + $0x160] sm:$0xff]  }
  0x62   : > { %5064 = vmatprep.subr.bf16.mxu1 %v5982_v1 }
  0x64   : > { %3142 = vmatpush1.bf16.msra.mxu0 %v5540_v52  ;;  %v5620_v52 = vld [vmem:[%s6109_s26 + $0x3f4] ss:$36 sps:$4 sm:$0xff]  }
  0x65   : > { %3143 = vmatprep.subr.bf16.mxu0 %v5982_v1  ;;  %5080 = vmatpush1.bf16.msra.mxu1 %v6075_v12  ;;  %v5575_v12 = vld [vmem:[%s6109_s26 + $0x204] ss:$36 sps:$4 sm:$0xff]  }
  0x66   : > { %2610 = vmatmul.mubr.bf16.gmra.mrb[12].mxu1 %v5545_v53  ;;  %5065 = vmatprep.subr.bf16.mxu1 %v5982_v1  ;;  %v5622_v53 = vld [vmem:[%s6109_s26 + $0x1c4] ss:$36 sps:$4 sm:$0xff]  }
  0x67   : > { %2899 = vmatmul.mubr.bf16.gmra.mrb[12].mxu0 %v5546_v54  ;;  %2617 = vmatprep.mubr.bf16.mxu1 %v5549_v55  ;;  %v5717_v54 = vld [vmem:[%s7239_s1 + $0x1d0] sm:$0xff]  }
  0x68   : > { %3144 = vmatpush1.bf16.msra.mxu0 %v5547_v56  ;;  %2906 = vmatprep.mubr.bf16.mxu0 %v5551_v57  ;;  %v5624_v55 = vld [vmem:[%s6109_s26 + $0x3f0] ss:$36 sps:$4 sm:$0xff]   ;;  %v5625_v56 = vld [vmem:[%s6109_s26 + $0x1c0] ss:$36 sps:$4 sm:$0xff]  }
  0x69   : > { %3145 = vmatprep.subr.bf16.mxu0 %v5982_v1  ;;  %5081 = vmatpush1.bf16.msra.mxu1 %v6088_v14  ;;  %v5577_v14 = vld [vmem:[%s6109_s26 + $0x1f8] ss:$36 sps:$4 sm:$0xff]  }
  0x6a   : > { %5066 = vmatprep.subr.bf16.mxu1 %v5982_v1  ;;  %v5627_v57 = vld [vmem:[%s6109_s26 + $0x43c] ss:$36 sps:$4 sm:$0xff]  }
  0x6c   : > { %3146 = vmatpush1.bf16.msra.mxu0 %v5548_v58  ;;  %v5629_v58 = vld [vmem:[%s6109_s26 + $0x20c] ss:$36 sps:$4 sm:$0xff]  }
  0x6d   : > { %3147 = vmatprep.subr.bf16.mxu0 %v5982_v1  ;;  %5082 = vmatpush1.bf16.msra.mxu1 %v6100_v16  ;;  %v5581_v16 = vld [vmem:[%s6109_s26 + $0x244] ss:$36 sps:$4 sm:$0xff]  }
  0x6e   : > { %2618 = vmatmul.mubr.bf16.gmra.mrb[16].mxu1 %v5553_v59  ;;  %5067 = vmatprep.subr.bf16.mxu1 %v5982_v1  ;;  %v5730_v59 = vld [vmem:[%s7239_s1 + $0x1d8] sm:$0xff]  }
  0x6f   : > { %2907 = vmatmul.mubr.bf16.gmra.mrb[16].mxu0 %v5554_v60  ;;  %2625 = vmatprep.mubr.bf16.mxu1 %v5557_v62  ;;  %v5631_v60 = vld [vmem:[%s6109_s26 + $0x438] ss:$36 sps:$4 sm:$0xff]   ;;  %v5633_v62 = vld [vmem:[%s6109_s26 + $0x484] ss:$36 sps:$4 sm:$0xff]  }
  0x70   : > { %3148 = vmatpush1.bf16.msra.mxu0 %v5555_v61  ;;  %2914 = vmatprep.mubr.bf16.mxu0 %v5559_v63  ;;  %v5632_v61 = vld [vmem:[%s6109_s26 + $0x208] ss:$36 sps:$4 sm:$0xff]   ;;  %v5635_v63 = vld [vmem:[%s6109_s26 + $0x254] ss:$36 sps:$4 sm:$0xff]  }
  0x71   : > { %3149 = vmatprep.subr.bf16.mxu0 %v5982_v1  ;;  %5083 = vmatpush1.bf16.msra.mxu1 %v6116_v18  ;;  %v5585_v18 = vld [vmem:[%s6109_s26 + $0x14] ss:$36 sps:$4 sm:$0xff]  }
  0x72   : > { %5068 = vmatprep.subr.bf16.mxu1 %v5982_v1 }
  0x74   : > { %3150 = vmatpush1.bf16.msra.mxu0 %v5556_v0  ;;  %v5637_v0 = vld [vmem:[%s6109_s26 + $0x480] ss:$36 sps:$4 sm:$0xff]  }
  0x75   : > { %3151 = vmatprep.subr.bf16.mxu0 %v5982_v1  ;;  %5084 = vmatpush1.bf16.msra.mxu1 %v6129_v22  ;;  %v5588_v22 = vld [vmem:[%s6109_s26 + $0x28c] ss:$36 sps:$4 sm:$0xff]  }
  0x76   : > { %2626 = vmatmul.mubr.bf16.gmra.mrb[20].mxu1 %v5561_v2  ;;  %5069 = vmatprep.subr.bf16.mxu1 %v5982_v1  ;;  %v5638_v2 = vld [vmem:[%s6109_s26 + $0x250] ss:$36 sps:$4 sm:$0xff]  }
  0x77   : > { %2915 = vmatmul.mubr.bf16.gmra.mrb[20].mxu0 %v5562_v3  ;;  %2633 = vmatprep.mubr.bf16.mxu1 %v5565_v4  ;;  %v5640_v3 = vld [vmem:[%s6109_s26 + $0x4cc] ss:$36 sps:$4 sm:$0xff]   ;;  %v5642_v4 = vld [vmem:[%s6109_s26 + $0x29c] ss:$36 sps:$4 sm:$0xff]  }
  0x78   : > { %3152 = vmatpush1.bf16.msra.mxu0 %v5563_v5  ;;  %2922 = vmatprep.mubr.bf16.mxu0 %v5567_v6  ;;  %v5743_v5 = vld [vmem:[%s7239_s1 + $0x1e0] sm:$0xff]  }
  0x79   : > { %3153 = vmatprep.subr.bf16.mxu0 %v5982_v1  ;;  %5085 = vmatpush1.bf16.msra.mxu1 %v6140_v24  ;;  %v5590_v24 = vld [vmem:[%s6109_s26 + $0x5c] ss:$36 sps:$4 sm:$0xff]  }
  0x7a   : > { %5070 = vmatprep.subr.bf16.mxu1 %v5982_v1  ;;  %v6418_v6 = vld [vmem:[%s7239_s1 + $0x200] sm:$0xff]  }
  0x7c   : > { %3154 = vmatpush1.bf16.msra.mxu0 %v5564_v7  ;;  %v5644_v7 = vld [vmem:[%s6109_s26 + $0x4c8] ss:$36 sps:$4 sm:$0xff]  }
  0x7d   : > { %3155 = vmatprep.subr.bf16.mxu0 %v5982_v1  ;;  %5086 = vmatpush1.bf16.msra.mxu1 %v6151_v26  ;;  %v5600_v26 = vld [vmem:[%s7239_s1 + $0x188] sm:$0xff]  }
  0x7e   : > { %2634 = vmatmul.mubr.bf16.gmra.mrb[24].mxu1 %v5569_v8  ;;  %5071 = vmatprep.subr.bf16.mxu1 %v5982_v1  ;;  %v5645_v8 = vld [vmem:[%s6109_s26 + $0x298] ss:$36 sps:$4 sm:$0xff]  }
  0x7f   : > { %2923 = vmatmul.mubr.bf16.gmra.mrb[24].mxu0 %v5570_v9  ;;  %2641 = vmatprep.mubr.bf16.mxu1 %v5573_v11  ;;  %v5646_v9 = vld [vmem:[%s6109_s26 + $0x514] ss:$36 sps:$4 sm:$0xff]  }
  0x80   : > { %3156 = vmatpush1.bf16.msra.mxu0 %v5571_v10  ;;  %2930 = vmatprep.mubr.bf16.mxu0 %v5575_v12  ;;  %v5648_v10 = vld [vmem:[%s6109_s26 + $0x2e4] ss:$36 sps:$4 sm:$0xff]   ;;  %v5650_v11 = vld [vmem:[%s6109_s26 + $0x510] ss:$36 sps:$4 sm:$0xff]  }
  0x81   : > { %3157 = vmatprep.subr.bf16.mxu0 %v5982_v1  ;;  %5087 = vmatpush1.bf16.msra.mxu1 %v6162_v28  ;;  %v5594_v28 = vld [vmem:[%s6109_s26 + $0x2d4] ss:$36 sps:$4 sm:$0xff]   ;;  %v5651_v12 = vld [vmem:[%s6109_s26 + $0x2e0] ss:$36 sps:$4 sm:$0xff]  }
  0x82   : > { %5072 = vmatprep.subr.bf16.mxu1 %v5982_v1 }
  0x84   : > { %3158 = vmatpush1.bf16.msra.mxu0 %v5572_v13  ;;  %v5653_v13 = vld [vmem:[%s6109_s26 + $0x55c] ss:$36 sps:$4 sm:$0xff]  }
  0x85   : > { %3159 = vmatprep.subr.bf16.mxu0 %v5982_v1  ;;  %5088 = vmatpush1.bf16.msra.mxu1 %v6173_v30  ;;  %v5613_v30 = vld [vmem:[%s7239_s1 + $0x190] sm:$0xff]  }
  0x86   : > { %2642 = vmatmul.mubr.bf16.gmra.mrb[28].mxu1 %v5577_v14  ;;  %5073 = vmatprep.subr.bf16.mxu1 %v5982_v1  ;;  %v5655_v14 = vld [vmem:[%s6109_s26 + $0x32c] ss:$36 sps:$4 sm:$0xff]  }
  0x87   : > { %2931 = vmatmul.mubr.bf16.gmra.mrb[28].mxu0 %v5578_v15  ;;  %2649 = vmatprep.mubr.bf16.mxu1 %v5581_v16  ;;  %v5757_v15 = vld [vmem:[%s7239_s1 + $0x1e8] sm:$0xff]   ;;  %v5657_v16 = vld [vmem:[%s6109_s26 + $0x558] ss:$36 sps:$4 sm:$0xff]  }
  0x88   : > { %3160 = vmatpush1.bf16.msra.mxu0 %v5579_v17  ;;  %3163 = vmatprep.mubr.bf16.mxu0 %v5585_v18  ;;  %v5658_v17 = vld [vmem:[%s6109_s26 + $0x328] ss:$36 sps:$4 sm:$0xff]  }
  0x89   : > { %3161 = vmatprep.subr.bf16.mxu0 %v5982_v1  ;;  %5089 = vmatpush1.bf16.msra.mxu1 %v6184_v32  ;;  %v5626_v32 = vld [vmem:[%s7239_s1 + $0x198] sm:$0xff]   ;;  %v5659_v18 = vld [vmem:[%s6109_s26 + $0x5a4] ss:$36 sps:$4 sm:$0xff]  }
  0x8a   : > { %5074 = vmatprep.subr.bf16.mxu1 %v5982_v1 }
  0x8c   : > { %3162 = vmatpush1.bf16.msra.mxu0 %v5580_v19  ;;  %v5661_v19 = vld [vmem:[%s6109_s26 + $0x374] ss:$36 sps:$4 sm:$0xff]  }
  0x8d   : > { %3420 = vmatprep.subr.bf16.mxu0 %v5982_v1  ;;  %5090 = vmatpush1.bf16.msra.mxu1 %v6195_v34  ;;  %v5601_v34 = vld [vmem:[%s6109_s26 + $0x31c] ss:$36 sps:$4 sm:$0xff]  }
  0x8e   : > { %2650 = vmatmul.mubr.bf16.gmra.mrb[32].mxu1 %v5586_v20  ;;  %4979 = vmatprep.subr.bf16.mxu1 %v6418_v6  ;;  %v5663_v20 = vld [vmem:[%s6109_s26 + $0x5a0] ss:$36 sps:$4 sm:$0xff]  }
  0x8f   : > { %3164 = vmatmul.mubr.bf16.vlgmr.msra.gmra.mrb[0].mxu0 %v5583_v21  ;;  %2657 = vmatprep.mubr.bf16.mxu1 %v5588_v22  ;;  %v5664_v21 = vld [vmem:[%s6109_s26 + $0x370] ss:$36 sps:$4 sm:$0xff]  }
  0x90   : > { %3421 = vmatpush1.bf16.msra.mxu0 %v5587_v23  ;;  %3171 = vmatprep.mubr.bf16.mxu0 %v5590_v24  ;;  %v5666_v22 = vld [vmem:[%s6109_s26 + $0x5ec] ss:$36 sps:$4 sm:$0xff]   ;;  %v5668_v23 = vld [vmem:[%s6109_s26 + $0x3bc] ss:$36 sps:$4 sm:$0xff]  }
  0x91   : > { %3422 = vmatprep.subr.bf16.mxu0 %v5982_v1  ;;  %v5771_v24 = vld [vmem:[%s7239_s1 + $0x1f0] sm:$0xff]  }
  0x94   : > { %3423 = vmatpush1.bf16.msra.mxu0 %v5600_v26  ;;  %v5671_v26 = vld [vmem:[%s6109_s26 + $0x3b8] ss:$36 sps:$4 sm:$0xff]  }
  0x95   : > { %3424 = vmatprep.subr.bf16.mxu0 %v5982_v1 }
  0x96   : > { %2658 = vmatmul.mubr.bf16.gmra.mrb[36].mxu1 %v5592_v25  ;;  %v5670_v25 = vld [vmem:[%s6109_s26 + $0x5e8] ss:$36 sps:$4 sm:$0xff]  }
  0x97   : > { %3172 = vmatmul.mubr.bf16.gmra.mrb[4].mxu0 %v5593_v27  ;;  %2665 = vmatprep.mubr.bf16.mxu1 %v5594_v28  ;;  %v5672_v27 = vld [vmem:[%s6109_s26 + $0x634] ss:$36 sps:$4 sm:$0xff]   ;;  %v5674_v28 = vld [vmem:[%s6109_s26 + $0x404] ss:$36 sps:$4 sm:$0xff]  }
  0x98   : > { %3179 = vmatprep.mubr.bf16.mxu0 %v5596_v29  ;;  %3425 = vmatpush1.bf16.msra.mxu0 %v5613_v30  ;;  %v5676_v29 = vld [vmem:[%s6109_s26 + $0x630] ss:$36 sps:$4 sm:$0xff]   ;;  %v5677_v30 = vld [vmem:[%s6109_s26 + $0x400] ss:$36 sps:$4 sm:$0xff]  }
  0x99   : > { %3426 = vmatprep.subr.bf16.mxu0 %v5982_v1 }
  0x9c   : > { %3427 = vmatpush1.bf16.msra.mxu0 %v5626_v32  ;;  %v5681_v32 = vld [vmem:[%s6109_s26 + $0x44c] ss:$36 sps:$4 sm:$0xff]  }
  0x9d   : > { %3428 = vmatprep.subr.bf16.mxu0 %v5982_v1 }
  0x9e   : > { %2666 = vmatmul.mubr.bf16.gmra.mrb[40].mxu1 %v5598_v31  ;;  %v5679_v31 = vld [vmem:[%s6109_s26 + $0x67c] ss:$36 sps:$4 sm:$0xff]  }
  0x9f   : > { %3180 = vmatmul.mubr.bf16.gmra.mrb[8].mxu0 %v5599_v33  ;;  %2673 = vmatprep.mubr.bf16.mxu1 %v5601_v34  ;;  %v5683_v33 = vld [vmem:[%s6109_s26 + $0x678] ss:$36 sps:$4 sm:$0xff]   ;;  %v5684_v34 = vld [vmem:[%s6109_s26 + $0x448] ss:$36 sps:$4 sm:$0xff]  }
  0xa0   : > { %3187 = vmatprep.mubr.bf16.mxu0 %v5603_v35  ;;  %3429 = vmatpush1.bf16.msra.mxu0 %v5639_v36  ;;  %v5685_v35 = vld [vmem:[%s6109_s26 + $0x6c4] ss:$36 sps:$4 sm:$0xff]   ;;  %v5687_v36 = vld [vmem:[%s6109_s26 + $0x494] ss:$36 sps:$4 sm:$0xff]  }
  0xa1   : > { %3430 = vmatprep.subr.bf16.mxu0 %v5982_v1 }
  0xa4   : > { %3431 = vmatpush1.bf16.msra.mxu0 %v5652_v37  ;;  %v5689_v37 = vld [vmem:[%s6109_s26 + $0x6c0] ss:$36 sps:$4 sm:$0xff]  }
  0xa5   : > { %3432 = vmatprep.subr.bf16.mxu0 %v5982_v1 }
  0xa6   : > { %2674 = vmatmul.mubr.bf16.gmra.mrb[44].mxu1 %v5605_v38  ;;  %v5690_v38 = vld [vmem:[%s6109_s26 + $0x490] ss:$36 sps:$4 sm:$0xff]  }
  0xa7   : > { %3188 = vmatmul.mubr.bf16.gmra.mrb[12].mxu0 %v5606_v39  ;;  %2681 = vmatprep.mubr.bf16.mxu1 %v5607_v40  ;;  %v5692_v39 = vld [vmem:[%s6109_s26 + $0x70c] ss:$36 sps:$4 sm:$0xff]   ;;  %v5694_v40 = vld [vmem:[%s6109_s26 + $0x4dc] ss:$36 sps:$4 sm:$0xff]  }
  0xa8   : > { %3195 = vmatprep.mubr.bf16.mxu0 %v5609_v41  ;;  %3433 = vmatpush1.bf16.msra.mxu0 %v5665_v42  ;;  %v5696_v41 = vld [vmem:[%s6109_s26 + $0x708] ss:$36 sps:$4 sm:$0xff]   ;;  %v5697_v42 = vld [vmem:[%s6109_s26 + $0x4d8] ss:$36 sps:$4 sm:$0xff]  }
  0xa9   : > { %3434 = vmatprep.subr.bf16.mxu0 %v5982_v1 }
  0xac   : > { %3435 = vmatpush1.bf16.msra.mxu0 %v5678_v43  ;;  %v5698_v43 = vld [vmem:[%s6109_s26 + $0x754] ss:$36 sps:$4 sm:$0xff]  }
  0xad   : > { %3436 = vmatprep.subr.bf16.mxu0 %v5982_v1 }
  0xae   : > { %2682 = vmatmul.mubr.bf16.gmra.mrb[48].mxu1 %v5611_v44  ;;  %v5700_v44 = vld [vmem:[%s6109_s26 + $0x524] ss:$36 sps:$4 sm:$0xff]  }
  0xaf   : > { %3196 = vmatmul.mubr.bf16.gmra.mrb[16].mxu0 %v5612_v45  ;;  %2689 = vmatprep.mubr.bf16.mxu1 %v5614_v46  ;;  %v5702_v45 = vld [vmem:[%s6109_s26 + $0x750] ss:$36 sps:$4 sm:$0xff]   ;;  %v5703_v46 = vld [vmem:[%s6109_s26 + $0x520] ss:$36 sps:$4 sm:$0xff]  }
  0xb0   : > { %3203 = vmatprep.mubr.bf16.mxu0 %v5616_v47  ;;  %3437 = vmatpush1.bf16.msra.mxu0 %v5691_v48  ;;  %v5705_v47 = vld [vmem:[%s6109_s26 + $0x79c] ss:$36 sps:$4 sm:$0xff]   ;;  %v5707_v48 = vld [vmem:[%s6109_s26 + $0x56c] ss:$36 sps:$4 sm:$0xff]  }
  0xb1   : > { %3438 = vmatprep.subr.bf16.mxu0 %v5982_v1 }
  0xb4   : > { %3439 = vmatpush1.bf16.msra.mxu0 %v5704_v49 }
  0xb5   : > { %3440 = vmatprep.subr.bf16.mxu0 %v5982_v1 }
  0xb6   : > { %2690 = vmatmul.mubr.bf16.gmra.mrb[52].mxu1 %v5618_v50 }
  0xb7   : > { %3204 = vmatmul.mubr.bf16.gmra.mrb[20].mxu0 %v5619_v51  ;;  %2697 = vmatprep.mubr.bf16.mxu1 %v5620_v52  ;;  %v5709_v51 = vld [vmem:[%s6109_s26 + $0x798] ss:$36 sps:$4 sm:$0xff]  }
  0xb8   : > { %3211 = vmatprep.mubr.bf16.mxu0 %v5622_v53  ;;  %3441 = vmatpush1.bf16.msra.mxu0 %v5717_v54  ;;  %v5710_v53 = vld [vmem:[%s6109_s26 + $0x568] ss:$36 sps:$4 sm:$0xff]  }
  0xb9   : > { %3442 = vmatprep.subr.bf16.mxu0 %v5982_v1  ;;  %v5711_v54 = vld [vmem:[%s6109_s26 + $0x7e4] ss:$36 sps:$4 sm:$0xff]  }
  0xbc   : > { %3443 = vmatpush1.bf16.msra.mxu0 %v5730_v59  ;;  %v5715_v59 = vld [vmem:[%s6109_s26 + $0x7e0] ss:$36 sps:$4 sm:$0xff]  }
  0xbd   : > { %3444 = vmatprep.subr.bf16.mxu0 %v5982_v1 }
  0xbe   : > { %2698 = vmatmul.mubr.bf16.gmra.mrb[56].mxu1 %v5624_v55 }
  0xbf   : > { %3212 = vmatmul.mubr.bf16.gmra.mrb[24].mxu0 %v5625_v56  ;;  %2705 = vmatprep.mubr.bf16.mxu1 %v5627_v57  ;;  %v5713_v56 = vld [vmem:[%s6109_s26 + $0x5b4] ss:$36 sps:$4 sm:$0xff]  }
  0xc0   : > { %3219 = vmatprep.mubr.bf16.mxu0 %v5629_v58  ;;  %3445 = vmatpush1.bf16.msra.mxu0 %v5743_v5 }
  0xc1   : > { %3446 = vmatprep.subr.bf16.mxu0 %v5982_v1 }
  0xc4   : > { %3447 = vmatpush1.bf16.msra.mxu0 %v5757_v15  ;;  %v5729_v15 = vld [vmem:[%s6109_s26 + $0x640] ss:$36 sps:$4 sm:$0xff]  }
  0xc5   : > { %3448 = vmatprep.subr.bf16.mxu0 %v5982_v1 }
  0xc6   : > { %2706 = vmatmul.mubr.bf16.gmra.mrb[60].mxu1 %v5631_v60 }
  0xc7   : > { %3220 = vmatmul.mubr.bf16.gmra.mrb[28].mxu0 %v5632_v61  ;;  %2713 = vmatprep.mubr.bf16.mxu1 %v5633_v62  ;;  %v5716_v61 = vld [vmem:[%s6109_s26 + $0x5b0] ss:$36 sps:$4 sm:$0xff]  }
  0xc8   : > { %3227 = vmatprep.mubr.bf16.mxu0 %v5635_v63  ;;  %3449 = vmatpush1.bf16.msra.mxu0 %v5771_v24  ;;  %v5718_v62 = vld [vmem:[%s6109_s26 + $0x82c] ss:$36 sps:$4 sm:$0xff]  }
  0xc9   : > { %3450 = vmatprep.subr.bf16.mxu0 %v5982_v1  ;;  %v5784_v1 = vld [vmem:[%s7239_s1 + $0x1f8] sm:$0xff]   ;;  %v5739_v24 = vld [vmem:[%s6109_s26 + $0x24c] ss:$36 sps:$4 sm:$0xff]  }
  0xcc   : > { %3451 = vmatpush1.bf16.msra.mxu0 %v5784_v1  ;;  %v5745_v1 = vld [vmem:[%s6109_s26 + $0x294] ss:$36 sps:$4 sm:$0xff]  }
  0xce   : > { %2714 = vmatmul.mubr.bf16.gmra.mrb[64].mxu1 %v5637_v0  ;;  %v5720_v0 = vld [vmem:[%s6109_s26 + $0x5fc] ss:$36 sps:$4 sm:$0xff]  }
  0xcf   : > { %3228 = vmatmul.mubr.bf16.gmra.mrb[32].mxu0 %v5638_v2  ;;  %2721 = vmatprep.mubr.bf16.mxu1 %v5640_v3 }
  0xd0   : > { %3235 = vmatprep.mubr.bf16.mxu0 %v5642_v4  ;;  %v5722_v4 = vld [vmem:[%s6109_s26 + $0x828] ss:$36 sps:$4 sm:$0xff]  }
  0xd6   : > { %2722 = vmatmul.mubr.bf16.gmra.mrb[68].mxu1 %v5644_v7  ;;  %v5723_v7 = vld [vmem:[%s6109_s26 + $0x5f8] ss:$36 sps:$4 sm:$0xff]  }
  0xd7   : > { %3236 = vmatmul.mubr.bf16.gmra.mrb[36].mxu0 %v5645_v8  ;;  %2729 = vmatprep.mubr.bf16.mxu1 %v5646_v9  ;;  %v5724_v8 = vld [vmem:[%s6109_s26 + $0x874] ss:$36 sps:$4 sm:$0xff]  }
  0xd8   : > { %3243 = vmatprep.mubr.bf16.mxu0 %v5648_v10  ;;  %v5726_v10 = vld [vmem:[%s6109_s26 + $0x644] ss:$36 sps:$4 sm:$0xff]  }
  0xde   : > { %2730 = vmatmul.mubr.bf16.gmra.mrb[72].mxu1 %v5650_v11 }
  0xdf   : > { %3244 = vmatmul.mubr.bf16.gmra.mrb[40].mxu0 %v5651_v12  ;;  %2737 = vmatprep.mubr.bf16.mxu1 %v5653_v13  ;;  %v5728_v13 = vld [vmem:[%s6109_s26 + $0x870] ss:$36 sps:$4 sm:$0xff]  }
  0xe0   : > { %3251 = vmatprep.mubr.bf16.mxu0 %v5655_v14 }
  0xe6   : > { %2738 = vmatmul.mubr.bf16.gmra.mrb[76].mxu1 %v5657_v16  ;;  %v5731_v16 = vld [vmem:[%s6109_s26 + $0x8bc] ss:$36 sps:$4 sm:$0xff]  }
  0xe7   : > { %3252 = vmatmul.mubr.bf16.gmra.mrb[44].mxu0 %v5658_v17  ;;  %2745 = vmatprep.mubr.bf16.mxu1 %v5659_v18  ;;  %v5733_v18 = vld [vmem:[%s6109_s26 + $0x68c] ss:$36 sps:$4 sm:$0xff]  }
  0xe8   : > { %3259 = vmatprep.mubr.bf16.mxu0 %v5661_v19 }
  0xee   : > { %2746 = vmatmul.mubr.bf16.gmra.mrb[80].mxu1 %v5663_v20 }
  0xef   : > { %3260 = vmatmul.mubr.bf16.gmra.mrb[48].mxu0 %v5664_v21  ;;  %2753 = vmatprep.mubr.bf16.mxu1 %v5666_v22  ;;  %v5735_v21 = vld [vmem:[%s6109_s26 + $0x8b8] ss:$36 sps:$4 sm:$0xff]  }
  0xf0   : > { %3267 = vmatprep.mubr.bf16.mxu0 %v5668_v23  ;;  %v5736_v23 = vld [vmem:[%s6109_s26 + $0x688] ss:$36 sps:$4 sm:$0xff]  }
  0xf6   : > { %2754 = vmatmul.mubr.bf16.gmra.mrb[84].mxu1 %v5670_v25 }
  0xf7   : > { %3268 = vmatmul.mubr.bf16.gmra.mrb[52].mxu0 %v5671_v26  ;;  %2761 = vmatprep.mubr.bf16.mxu1 %v5672_v27  ;;  %v5740_v26 = vld [vmem:[%s6109_s26 + $0x6d4] ss:$36 sps:$4 sm:$0xff]  }
  0xf8   : > { %3275 = vmatprep.mubr.bf16.mxu0 %v5674_v28 }
  0xfe   : > { %2762 = vmatmul.mubr.bf16.gmra.mrb[88].mxu1 %v5676_v29  ;;  %v5737_v29 = vld [vmem:[%s6109_s26 + $0x248] ss:$36 sps:$4 sm:$0xff]  }
  0xff   : > { %3276 = vmatmul.mubr.bf16.gmra.mrb[56].mxu0 %v5677_v30  ;;  %2769 = vmatprep.mubr.bf16.mxu1 %v5679_v31  ;;  %v5742_v31 = vld [vmem:[%s6109_s26 + $0x6d0] ss:$36 sps:$4 sm:$0xff]  }
 0x100   : > { %3283 = vmatprep.mubr.bf16.mxu0 %v5681_v32 }
 0x106   : > { %2770 = vmatmul.mubr.bf16.gmra.mrb[92].mxu1 %v5683_v33  ;;  %v5747_v33 = vld [vmem:[%s6109_s26 + $0x71c] ss:$36 sps:$4 sm:$0xff]  }
 0x107   : > { %3284 = vmatmul.mubr.bf16.gmra.mrb[60].mxu0 %v5684_v34  ;;  %2777 = vmatprep.mubr.bf16.mxu1 %v5685_v35  ;;  %v5764_v34 = vld [vmem:[%s7239_s1 + $0x208] sm:$0xff]   ;;  %v5785_v35 = vld [vmem:[%s7239_s1 + $0x210] sm:$0xff]  }
 0x108   : > { %3291 = vmatprep.mubr.bf16.mxu0 %v5687_v36 }
 0x10e   : > { %2778 = vmatmul.mubr.bf16.gmra.mrb[96].mxu1 %v5689_v37 }
 0x10f   : > { %3292 = vmatmul.mubr.bf16.gmra.mrb[64].mxu0 %v5690_v38  ;;  %2785 = vmatprep.mubr.bf16.mxu1 %v5692_v39  ;;  %v5749_v38 = vld [vmem:[%s6109_s26 + $0x290] ss:$36 sps:$4 sm:$0xff]  }
 0x110   : > { %3299 = vmatprep.mubr.bf16.mxu0 %v5694_v40  ;;  %v5750_v40 = vld [vmem:[%s6109_s26 + $0x718] ss:$36 sps:$4 sm:$0xff]  }
 0x116   : > { %2786 = vmatmul.mubr.bf16.gmra.mrb[100].mxu1 %v5696_v41  ;;  %v5751_v41 = vld [vmem:[%s6109_s26 + $0x2dc] ss:$36 sps:$4 sm:$0xff]  }
 0x117   : > { %3300 = vmatmul.mubr.bf16.gmra.mrb[68].mxu0 %v5697_v42  ;;  %2793 = vmatprep.mubr.bf16.mxu1 %v5698_v43  ;;  %v5804_v43 = vld [vmem:[%s7239_s1 + $0x218] sm:$0xff]  }
 0x118   : > { %3307 = vmatprep.mubr.bf16.mxu0 %v5700_v44 }
 0x11e   : > { %2794 = vmatmul.mubr.bf16.gmra.mrb[104].mxu1 %v5702_v45  ;;  %v5823_v45 = vld [vmem:[%s7239_s1 + $0x220] sm:$0xff]  }
 0x11f   : > { %3308 = vmatmul.mubr.bf16.gmra.mrb[72].mxu0 %v5703_v46  ;;  %2801 = vmatprep.mubr.bf16.mxu1 %v5705_v47  ;;  %v5755_v47 = vld [vmem:[%s6109_s26 + $0x2d8] ss:$36 sps:$4 sm:$0xff]  }
 0x120   : > { %3315 = vmatprep.mubr.bf16.mxu0 %v5707_v48 }
 0x121   : > { %v6473_v49 = vpop.f32.mrb[0].mxu1 }
 0x122   : > { %v2589_v50 = vpop.f32.mrb[1].mxu1 }
 0x123   : > { %v6476_v52 = vpop.f32.mrb[2].mxu1  ;;  %v5756_v50 = vld [vmem:[%s6109_s26 + $0x760] ss:$36 sps:$4 sm:$0xff]  }
 0x124   : > { %v2592_v55 = vpop.f32.mrb[3].mxu1 }
 0x125   : > { %v5842_v55 = vld [vmem:[%s7239_s1 + $0x228] sm:$0xff]  }
 0x126   : > { %2802 = vmatmul.mubr.bf16.gmra.mrb[108].mxu1 %v5709_v51  ;;  %v5758_v51 = vld [vmem:[%s6109_s26 + $0x324] ss:$36 sps:$4 sm:$0xff]  }
 0x127   : > { %3316 = vmatmul.mubr.bf16.gmra.mrb[76].mxu0 %v5710_v53  ;;  %2809 = vmatprep.mubr.bf16.mxu1 %v5711_v54  ;;  %v5760_v54 = vld [vmem:[%s6109_s26 + $0x7ac] ss:$36 sps:$4 sm:$0xff]  }
 0x128   : > { %3323 = vmatprep.mubr.bf16.mxu0 %v5713_v56  ;;  %v5861_v56 = vld [vmem:[%s7239_s1 + $0x230] sm:$0xff]  }
 0x129   : > { %v6481_v57 = vpop.f32.mrb[4].mxu1 }
 0x12a   : > { %v2597_v58 = vpop.f32.mrb[5].mxu1 }
 0x12b   : > { %v6484_v60 = vpop.f32.mrb[6].mxu1  ;;  %v5762_v58 = vld [vmem:[%s6109_s26 + $0x320] ss:$36 sps:$4 sm:$0xff]  }
 0x12c   : > { %v2600_v63 = vpop.f32.mrb[7].mxu1 }
 0x12d   : > { %v5769_v63 = vld [vmem:[%s6109_s26 + $0x368] ss:$36 sps:$4 sm:$0xff]  }
 0x12e   : > { %2810 = vmatmul.mubr.bf16.gmra.mrb[112].mxu1 %v5715_v59  ;;  %v5763_v59 = vld [vmem:[%s6109_s26 + $0x7a8] ss:$36 sps:$4 sm:$0xff]  }
 0x12f   : > { %3324 = vmatmul.mubr.bf16.gmra.mrb[80].mxu0 %v5716_v61  ;;  %2817 = vmatprep.mubr.bf16.mxu1 %v5718_v62  ;;  %v5765_v61 = vld [vmem:[%s6109_s26 + $0x36c] ss:$36 sps:$4 sm:$0xff]   ;;  %v5767_v62 = vld [vmem:[%s6109_s26 + $0x7f4] ss:$36 sps:$4 sm:$0xff]  }
 0x130   : > { %3331 = vmatprep.mubr.bf16.mxu0 %v5720_v0  ;;  %v5770_v0 = vld [vmem:[%s6109_s26 + $0x7f0] ss:$36 sps:$4 sm:$0xff]  }
 0x131   : > { %v6489_v2 = vpop.f32.mrb[8].mxu1 }
 0x132   : > { %v2605_v3 = vpop.f32.mrb[9].mxu1 }
 0x133   : > { %v6492_v5 = vpop.f32.mrb[10].mxu1  ;;  %v5772_v3 = vld [vmem:[%s6109_s26 + $0x3b4] ss:$36 sps:$4 sm:$0xff]  }
 0x134   : > { %v2608_v9 = vpop.f32.mrb[11].mxu1 }
 0x135   : > { %v5778_v9 = vld [vmem:[%s6109_s26 + $0x3fc] ss:$36 sps:$4 sm:$0xff]  }
 0x136   : > { %2818 = vmatmul.mubr.bf16.gmra.mrb[116].mxu1 %v5722_v4  ;;  %v5774_v4 = vld [vmem:[%s6109_s26 + $0x83c] ss:$36 sps:$4 sm:$0xff]  }
 0x137   : > { %3332 = vmatmul.mubr.bf16.gmra.mrb[84].mxu0 %v5723_v7  ;;  %2825 = vmatprep.mubr.bf16.mxu1 %v5724_v8  ;;  %v5776_v7 = vld [vmem:[%s6109_s26 + $0x3b0] ss:$36 sps:$4 sm:$0xff]   ;;  %v5777_v8 = vld [vmem:[%s6109_s26 + $0x838] ss:$36 sps:$4 sm:$0xff]  }
 0x138   : > { %3339 = vmatprep.mubr.bf16.mxu0 %v5726_v10  ;;  %v5780_v10 = vld [vmem:[%s6109_s26 + $0x884] ss:$36 sps:$4 sm:$0xff]  }
 0x139   : > { %v6497_v11 = vpop.f32.mrb[12].mxu1 }
 0x13a   : > { %v2613_v12 = vpop.f32.mrb[13].mxu1 }
 0x13b   : > { %v6500_v14 = vpop.f32.mrb[14].mxu1  ;;  %v5880_v12 = vld [vmem:[%s7239_s1 + $0x238] sm:$0xff]  }
 0x13c   : > { %v2616_v17 = vpop.f32.mrb[15].mxu1 }
 0x13d   : > { %v5788_v17 = vld [vmem:[%s6109_s26 + $0x8cc] ss:$36 sps:$4 sm:$0xff]  }
 0x13e   : > { %2826 = vmatmul.mubr.bf16.gmra.mrb[120].mxu1 %v5728_v13  ;;  %v5782_v13 = vld [vmem:[%s6109_s26 + $0x3f8] ss:$36 sps:$4 sm:$0xff]  }
 0x13f   : > { %3340 = vmatmul.mubr.bf16.gmra.mrb[88].mxu0 %v5729_v15  ;;  %2833 = vmatprep.mubr.bf16.mxu1 %v5731_v16  ;;  %v5783_v15 = vld [vmem:[%s6109_s26 + $0x880] ss:$36 sps:$4 sm:$0xff]  }
 0x140   : > { %3347 = vmatprep.mubr.bf16.mxu0 %v5733_v18  ;;  %v5786_v16 = vld [vmem:[%s6109_s26 + $0x444] ss:$36 sps:$4 sm:$0xff]  }
 0x141   : > { %v6505_v19 = vpop.f32.mrb[16].mxu1  ;;  %v5790_v18 = vld [vmem:[%s6109_s26 + $0x440] ss:$36 sps:$4 sm:$0xff]  }
 0x142   : > { %v2621_v20 = vpop.f32.mrb[17].mxu1 }
 0x143   : > { %v6508_v22 = vpop.f32.mrb[18].mxu1  ;;  %v5791_v20 = vld [vmem:[%s6109_s26 + $0x8c8] ss:$36 sps:$4 sm:$0xff]  }
 0x144   : > { %v2624_v25 = vpop.f32.mrb[19].mxu1 }
 0x145   : > { %v5794_v25 = vld [vmem:[%s6109_s26 + $0x18] ss:$36 sps:$4 sm:$0xff]  }
 0x146   : > { %2834 = vmatmul.mubr.bf16.gmra.mrb[124].mxu1 %v5735_v21  ;;  %v5792_v21 = vld [vmem:[%s6109_s26 + $0x48c] ss:$36 sps:$4 sm:$0xff]  }
 0x147   : > { %3348 = vmatmul.mubr.bf16.gmra.mrb[92].mxu0 %v5736_v23  ;;  %2938 = vmatprep.mubr.bf16.mxu1 %v5739_v24  ;;  %v5796_v23 = vld [vmem:[%s6109_s26 + $0x1c] ss:$36 sps:$4 sm:$0xff]   ;;  %v5797_v24 = vld [vmem:[%s6109_s26 + $0x488] ss:$36 sps:$4 sm:$0xff]  }
 0x148   : > { %3355 = vmatprep.mubr.bf16.mxu0 %v5740_v26  ;;  %v5798_v26 = vld [vmem:[%s6109_s26 + $0x4d4] ss:$36 sps:$4 sm:$0xff]  }
 0x149   : > { %v6513_v27 = vpop.f32.mrb[20].mxu1 }
 0x14a   : > { %v2629_v28 = vpop.f32.mrb[21].mxu1 }
 0x14b   : > { %v6516_v30 = vpop.f32.mrb[22].mxu1  ;;  %v5800_v28 = vld [vmem:[%s6109_s26 + $0x64] ss:$36 sps:$4 sm:$0xff]  }
 0x14c   : > { %v2632_v32 = vpop.f32.mrb[23].mxu1 }
 0x14d   : > { %v5805_v32 = vld [vmem:[%s6109_s26 + $0x51c] ss:$36 sps:$4 sm:$0xff]  }
 0x14e   : > { %2939 = vmatmul.mubr.bf16.vlgmr.msra.gmra.mrb[32].mxu1 %v5737_v29  ;;  %v5802_v29 = vld [vmem:[%s6109_s26 + $0x4d0] ss:$36 sps:$4 sm:$0xff]  }
 0x14f   : > { %3356 = vmatmul.mubr.bf16.gmra.mrb[96].mxu0 %v5742_v31  ;;  %4980 = vmatpush3.bf16.msra.mxu1 %v6418_v6  ;;  %v5753_v6 = vld [vmem:[%s6109_s26 + $0x764] ss:$36 sps:$4 sm:$0xff]  }
 0x150   : > { %2946 = vmatprep.mubr.bf16.mxu1 %v5745_v1  ;;  %3363 = vmatprep.mubr.bf16.mxu0 %v5747_v33  ;;  %v5803_v31 = vld [vmem:[%s6109_s26 + $0x60] ss:$36 sps:$4 sm:$0xff]   ;;  %v5807_v1 = vld [vmem:[%s6109_s26 + $0xac] ss:$36 sps:$4 sm:$0xff]   ;;  %v5809_v33 = vld [vmem:[%s6109_s26 + $0x518] ss:$36 sps:$4 sm:$0xff]  }
 0x151   : > { %v6528_v36 = vpop.f32.mrb[24].mxu1  ;;  %4981 = vmatprep.subr.bf16.mxu1 %v5764_v34 }
 0x152   : > { %v2637_v37 = vpop.f32.mrb[25].mxu1 }
 0x153   : > { %v6531_v39 = vpop.f32.mrb[26].mxu1  ;;  %4982 = vmatpush3.bf16.msra.mxu1 %v5764_v34  ;;  %v5810_v34 = vld [vmem:[%s6109_s26 + $0xa8] ss:$36 sps:$4 sm:$0xff]   ;;  %v5813_v37 = vld [vmem:[%s6109_s26 + $0xf4] ss:$36 sps:$4 sm:$0xff]  }
 0x154   : > { %v2640_v42 = vpop.f32.mrb[27].mxu1  ;;  %4983 = vmatprep.subr.bf16.mxu1 %v5785_v35 }
 0x155   : > { %v5819_v42 = vld [vmem:[%s6109_s26 + $0x13c] ss:$36 sps:$4 sm:$0xff]  }
 0x156   : > { %2947 = vmatmul.mubr.bf16.gmra.mrb[36].mxu1 %v5749_v38  ;;  %v5815_v38 = vld [vmem:[%s6109_s26 + $0x560] ss:$36 sps:$4 sm:$0xff]  }
 0x157   : > { %3364 = vmatmul.mubr.bf16.gmra.mrb[100].mxu0 %v5750_v40  ;;  %2954 = vmatprep.mubr.bf16.mxu1 %v5751_v41  ;;  %v5816_v40 = vld [vmem:[%s6109_s26 + $0xf0] ss:$36 sps:$4 sm:$0xff]  }
 0x158   : > { %3371 = vmatprep.mubr.bf16.mxu0 %v5753_v6  ;;  %4984 = vmatpush3.bf16.msra.mxu1 %v5785_v35  ;;  %v5811_v35 = vld [vmem:[%s6109_s26 + $0x564] ss:$36 sps:$4 sm:$0xff]   ;;  %v5817_v41 = vld [vmem:[%s6109_s26 + $0x5ac] ss:$36 sps:$4 sm:$0xff]  }
 0x159   : > { %v6539_v44 = vpop.f32.mrb[28].mxu1  ;;  %4985 = vmatprep.subr.bf16.mxu1 %v5804_v43  ;;  %v5821_v6 = vld [vmem:[%s6109_s26 + $0x5a8] ss:$36 sps:$4 sm:$0xff]  }
 0x15a   : > { %v2645_v46 = vpop.f32.mrb[29].mxu1 }
 0x15b   : > { %v6545_v48 = vpop.f32.mrb[30].mxu1  ;;  %v5826_v46 = vld [vmem:[%s6109_s26 + $0x184] ss:$36 sps:$4 sm:$0xff]  }
 0x15c   : > { %v2648_v53 = vpop.f32.mrb[31].mxu1  ;;  %4986 = vmatpush3.bf16.msra.mxu1 %v5804_v43  ;;  %v5822_v43 = vld [vmem:[%s6109_s26 + $0x138] ss:$36 sps:$4 sm:$0xff]  }
 0x15d   : > { %4987 = vmatprep.subr.bf16.mxu1 %v5823_v45  ;;  %v5832_v53 = vld [vmem:[%s6109_s26 + $0x1cc] ss:$36 sps:$4 sm:$0xff]  }
 0x15e   : > { %2955 = vmatmul.mubr.bf16.gmra.mrb[40].mxu1 %v5755_v47  ;;  %v5828_v47 = vld [vmem:[%s6109_s26 + $0x5f0] ss:$36 sps:$4 sm:$0xff]  }
 0x15f   : > { %3372 = vmatmul.mubr.bf16.gmra.mrb[104].mxu0 %v5756_v50  ;;  %2962 = vmatprep.mubr.bf16.mxu1 %v5758_v51  ;;  %v5829_v50 = vld [vmem:[%s6109_s26 + $0x180] ss:$36 sps:$4 sm:$0xff]  }
 0x160   : > { %3379 = vmatprep.mubr.bf16.mxu0 %v5760_v54  ;;  %4988 = vmatpush3.bf16.msra.mxu1 %v5823_v45  ;;  %v5824_v45 = vld [vmem:[%s6109_s26 + $0x5f4] ss:$36 sps:$4 sm:$0xff]   ;;  %v5830_v51 = vld [vmem:[%s6109_s26 + $0x63c] ss:$36 sps:$4 sm:$0xff]  }
 0x161   : > { %4989 = vmatprep.subr.bf16.mxu1 %v5842_v55  ;;  %v5834_v54 = vld [vmem:[%s6109_s26 + $0x638] ss:$36 sps:$4 sm:$0xff]  }
 0x164   : > { %4990 = vmatpush3.bf16.msra.mxu1 %v5842_v55  ;;  %v5835_v55 = vld [vmem:[%s6109_s26 + $0x1c8] ss:$36 sps:$4 sm:$0xff]  }
 0x165   : > { %4991 = vmatprep.subr.bf16.mxu1 %v5861_v56 }
 0x166   : > { %2963 = vmatmul.mubr.bf16.gmra.mrb[44].mxu1 %v5762_v58  ;;  %v5838_v58 = vld [vmem:[%s6109_s26 + $0x214] ss:$36 sps:$4 sm:$0xff]  }
 0x167   : > { %3380 = vmatmul.mubr.bf16.gmra.mrb[108].mxu0 %v5763_v59  ;;  %2970 = vmatprep.mubr.bf16.mxu1 %v5765_v61  ;;  %v5840_v59 = vld [vmem:[%s6109_s26 + $0x680] ss:$36 sps:$4 sm:$0xff]   ;;  %v5841_v61 = vld [vmem:[%s6109_s26 + $0x210] ss:$36 sps:$4 sm:$0xff]  }
 0x168   : > { %3387 = vmatprep.mubr.bf16.mxu0 %v5767_v62  ;;  %4992 = vmatpush3.bf16.msra.mxu1 %v5861_v56  ;;  %v5836_v56 = vld [vmem:[%s6109_s26 + $0x684] ss:$36 sps:$4 sm:$0xff]   ;;  %v5843_v62 = vld [vmem:[%s6109_s26 + $0x6cc] ss:$36 sps:$4 sm:$0xff]  }
 0x169   : > { %4993 = vmatprep.subr.bf16.mxu1 %v5880_v12 }
 0x16c   : > { %4994 = vmatpush3.bf16.msra.mxu1 %v5880_v12  ;;  %v5857_v12 = vld [vmem:[%s6109_s26 + $0x2ec] ss:$36 sps:$4 sm:$0xff]  }
 0x16e   : > { %2971 = vmatmul.mubr.bf16.gmra.mrb[48].mxu1 %v5769_v63  ;;  %v5845_v63 = vld [vmem:[%s6109_s26 + $0x25c] ss:$36 sps:$4 sm:$0xff]  }
 0x16f   : > { %3388 = vmatmul.mubr.bf16.gmra.mrb[112].mxu0 %v5770_v0  ;;  %2978 = vmatprep.mubr.bf16.mxu1 %v5772_v3  ;;  %v5847_v0 = vld [vmem:[%s6109_s26 + $0x6c8] ss:$36 sps:$4 sm:$0xff]   ;;  %v5848_v3 = vld [vmem:[%s6109_s26 + $0x258] ss:$36 sps:$4 sm:$0xff]  }
 0x170   : > { %3395 = vmatprep.mubr.bf16.mxu0 %v5774_v4  ;;  %v5849_v4 = vld [vmem:[%s6109_s26 + $0x714] ss:$36 sps:$4 sm:$0xff]  }
 0x176   : > { %2979 = vmatmul.mubr.bf16.gmra.mrb[52].mxu1 %v5776_v7  ;;  %v5851_v7 = vld [vmem:[%s6109_s26 + $0x2a4] ss:$36 sps:$4 sm:$0xff]  }
 0x177   : > { %3396 = vmatmul.mubr.bf16.gmra.mrb[116].mxu0 %v5777_v8  ;;  %2986 = vmatprep.mubr.bf16.mxu1 %v5778_v9  ;;  %v5853_v8 = vld [vmem:[%s6109_s26 + $0x710] ss:$36 sps:$4 sm:$0xff]   ;;  %v5854_v9 = vld [vmem:[%s6109_s26 + $0x2a0] ss:$36 sps:$4 sm:$0xff]  }
 0x178   : > { %3403 = vmatprep.mubr.bf16.mxu0 %v5780_v10  ;;  %v5855_v10 = vld [vmem:[%s6109_s26 + $0x75c] ss:$36 sps:$4 sm:$0xff]  }
 0x17e   : > { %2987 = vmatmul.mubr.bf16.gmra.mrb[56].mxu1 %v5782_v13  ;;  %v5859_v13 = vld [vmem:[%s6109_s26 + $0x758] ss:$36 sps:$4 sm:$0xff]  }
 0x17f   : > { %3404 = vmatmul.mubr.bf16.gmra.mrb[120].mxu0 %v5783_v15  ;;  %2994 = vmatprep.mubr.bf16.mxu1 %v5786_v16  ;;  %v5860_v15 = vld [vmem:[%s6109_s26 + $0x2e8] ss:$36 sps:$4 sm:$0xff]  }
 0x180   : > { %3411 = vmatprep.mubr.bf16.mxu0 %v5788_v17  ;;  %v5862_v16 = vld [vmem:[%s6109_s26 + $0x7a4] ss:$36 sps:$4 sm:$0xff]   ;;  %v5864_v17 = vld [vmem:[%s6109_s26 + $0x334] ss:$36 sps:$4 sm:$0xff]  }
 0x186   : > { %2995 = vmatmul.mubr.bf16.gmra.mrb[60].mxu1 %v5790_v18  ;;  %v5866_v18 = vld [vmem:[%s6109_s26 + $0x7a0] ss:$36 sps:$4 sm:$0xff]  }
 0x187   : > { %3412 = vmatmul.mubr.bf16.gmra.mrb[124].mxu0 %v5791_v20  ;;  %3002 = vmatprep.mubr.bf16.mxu1 %v5792_v21  ;;  %v5867_v20 = vld [vmem:[%s6109_s26 + $0x330] ss:$36 sps:$4 sm:$0xff]  }
 0x188   : > { %3452 = vmatprep.mubr.bf16.mxu0 %v5796_v23  ;;  %v5868_v21 = vld [vmem:[%s6109_s26 + $0x7ec] ss:$36 sps:$4 sm:$0xff]   ;;  %v5870_v23 = vld [vmem:[%s6109_s26 + $0x37c] ss:$36 sps:$4 sm:$0xff]  }
 0x18e   : > { %3003 = vmatmul.mubr.bf16.gmra.mrb[64].mxu1 %v5797_v24  ;;  %v5872_v24 = vld [vmem:[%s6109_s26 + $0x7e8] ss:$36 sps:$4 sm:$0xff]  }
 0x18f   : > { %3453 = vmatmul.mubr.bf16.vlgmr.msra.gmra.mrb[0].mxu0 %v5794_v25  ;;  %3010 = vmatprep.mubr.bf16.mxu1 %v5798_v26  ;;  %v5873_v25 = vld [vmem:[%s6109_s26 + $0x378] ss:$36 sps:$4 sm:$0xff]  }
 0x190   : > { %3460 = vmatprep.mubr.bf16.mxu0 %v5800_v28  ;;  %v5874_v26 = vld [vmem:[%s6109_s26 + $0x834] ss:$36 sps:$4 sm:$0xff]   ;;  %v5876_v28 = vld [vmem:[%s6109_s26 + $0x3c4] ss:$36 sps:$4 sm:$0xff]  }
 0x196   : > { %3011 = vmatmul.mubr.bf16.gmra.mrb[68].mxu1 %v5802_v29  ;;  %v5878_v29 = vld [vmem:[%s6109_s26 + $0x830] ss:$36 sps:$4 sm:$0xff]  }
 0x197   : > { %3461 = vmatmul.mubr.bf16.gmra.mrb[4].mxu0 %v5803_v31  ;;  %3018 = vmatprep.mubr.bf16.mxu1 %v5805_v32  ;;  %v5879_v31 = vld [vmem:[%s6109_s26 + $0x3c0] ss:$36 sps:$4 sm:$0xff]  }
 0x198   : > { %3468 = vmatprep.mubr.bf16.mxu0 %v5807_v1  ;;  %v5881_v32 = vld [vmem:[%s6109_s26 + $0x87c] ss:$36 sps:$4 sm:$0xff]   ;;  %v5883_v1 = vld [vmem:[%s6109_s26 + $0x40c] ss:$36 sps:$4 sm:$0xff]  }
 0x19e   : > { %3019 = vmatmul.mubr.bf16.gmra.mrb[72].mxu1 %v5809_v33  ;;  %v5885_v33 = vld [vmem:[%s6109_s26 + $0x878] ss:$36 sps:$4 sm:$0xff]  }
 0x19f   : > { %3469 = vmatmul.mubr.bf16.gmra.mrb[8].mxu0 %v5810_v34  ;;  %3026 = vmatprep.mubr.bf16.mxu1 %v5811_v35  ;;  %v5886_v34 = vld [vmem:[%s6109_s26 + $0x408] ss:$36 sps:$4 sm:$0xff]  }
 0x1a0   : > { %3476 = vmatprep.mubr.bf16.mxu0 %v5813_v37  ;;  %v5887_v35 = vld [vmem:[%s6109_s26 + $0x8c4] ss:$36 sps:$4 sm:$0xff]   ;;  %v5889_v37 = vld [vmem:[%s6109_s26 + $0x454] ss:$36 sps:$4 sm:$0xff]  }
 0x1a6   : > { %3027 = vmatmul.mubr.bf16.gmra.mrb[76].mxu1 %v5815_v38  ;;  %v5891_v38 = vld [vmem:[%s6109_s26 + $0x8c0] ss:$36 sps:$4 sm:$0xff]  }
 0x1a7   : > { %3477 = vmatmul.mubr.bf16.gmra.mrb[12].mxu0 %v5816_v40  ;;  %3034 = vmatprep.mubr.bf16.mxu1 %v5817_v41  ;;  %v5892_v40 = vld [vmem:[%s6109_s26 + $0x450] ss:$36 sps:$4 sm:$0xff]   ;;  %v5895_v41 = vld [vmem:[%s6109_s26 + $0x20] ss:$36 sps:$4 sm:$0xff]  }
 0x1a8   : > { %3484 = vmatprep.mubr.bf16.mxu0 %v5819_v42  ;;  %v5893_v42 = vld [vmem:[%s6109_s26 + $0x49c] ss:$36 sps:$4 sm:$0xff]  }
 0x1ae   : > { %3035 = vmatmul.mubr.bf16.gmra.mrb[80].mxu1 %v5821_v6  ;;  %v5897_v6 = vld [vmem:[%s6109_s26 + $0x68] ss:$36 sps:$4 sm:$0xff]  }
 0x1af   : > { %3485 = vmatmul.mubr.bf16.gmra.mrb[16].mxu0 %v5822_v43  ;;  %3042 = vmatprep.mubr.bf16.mxu1 %v5824_v45  ;;  %v5896_v43 = vld [vmem:[%s6109_s26 + $0x498] ss:$36 sps:$4 sm:$0xff]   ;;  %v5900_v45 = vld [vmem:[%s6109_s26 + $0xb0] ss:$36 sps:$4 sm:$0xff]  }
 0x1b0   : > { %3492 = vmatprep.mubr.bf16.mxu0 %v5826_v46  ;;  %v5898_v46 = vld [vmem:[%s6109_s26 + $0x4e4] ss:$36 sps:$4 sm:$0xff]  }
 0x1b6   : > { %3043 = vmatmul.mubr.bf16.gmra.mrb[84].mxu1 %v5828_v47  ;;  %v5902_v47 = vld [vmem:[%s6109_s26 + $0xf8] ss:$36 sps:$4 sm:$0xff]  }
 0x1b7   : > { %3493 = vmatmul.mubr.bf16.gmra.mrb[20].mxu0 %v5829_v50  ;;  %3050 = vmatprep.mubr.bf16.mxu1 %v5830_v51  ;;  %v5901_v50 = vld [vmem:[%s6109_s26 + $0x4e0] ss:$36 sps:$4 sm:$0xff]  }
 0x1b8   : > { %3500 = vmatprep.mubr.bf16.mxu0 %v5832_v53  ;;  %v5905_v51 = vld [vmem:[%s6109_s26 + $0x140] ss:$36 sps:$4 sm:$0xff]   ;;  %v5903_v53 = vld [vmem:[%s6109_s26 + $0x52c] ss:$36 sps:$4 sm:$0xff]  }
 0x1be   : > { %3051 = vmatmul.mubr.bf16.gmra.mrb[88].mxu1 %v5834_v54  ;;  %v5907_v54 = vld [vmem:[%s6109_s26 + $0x188] ss:$36 sps:$4 sm:$0xff]  }
 0x1bf   : > { %3501 = vmatmul.mubr.bf16.gmra.mrb[24].mxu0 %v5835_v55  ;;  %3058 = vmatprep.mubr.bf16.mxu1 %v5836_v56  ;;  %v5906_v55 = vld [vmem:[%s6109_s26 + $0x528] ss:$36 sps:$4 sm:$0xff]   ;;  %v5910_v56 = vld [vmem:[%s6109_s26 + $0x1d0] ss:$36 sps:$4 sm:$0xff]  }
 0x1c0   : > { %3508 = vmatprep.mubr.bf16.mxu0 %v5838_v58  ;;  %v5908_v58 = vld [vmem:[%s6109_s26 + $0x574] ss:$36 sps:$4 sm:$0xff]  }
 0x1c6   : > { %3059 = vmatmul.mubr.bf16.gmra.mrb[92].mxu1 %v5840_v59 }
 0x1c7   : > { %3509 = vmatmul.mubr.bf16.gmra.mrb[28].mxu0 %v5841_v61  ;;  %3066 = vmatprep.mubr.bf16.mxu1 %v5843_v62  ;;  %v5912_v62 = vld [vmem:[%s6109_s26 + $0x218] ss:$36 sps:$4 sm:$0xff]  }
 0x1c8   : > { %3516 = vmatprep.mubr.bf16.mxu0 %v5845_v63 }
 0x1ce   : > { %3067 = vmatmul.mubr.bf16.gmra.mrb[96].mxu1 %v5847_v0  ;;  %v5911_v0 = vld [vmem:[%s6109_s26 + $0x570] ss:$36 sps:$4 sm:$0xff]  }
 0x1cf   : > { %3517 = vmatmul.mubr.bf16.gmra.mrb[32].mxu0 %v5848_v3  ;;  %3074 = vmatprep.mubr.bf16.mxu1 %v5849_v4  ;;  %v5915_v3 = vld [vmem:[%s6109_s26 + $0x260] ss:$36 sps:$4 sm:$0xff]  }
 0x1d0   : > { %3524 = vmatprep.mubr.bf16.mxu0 %v5851_v7  ;;  %v5913_v7 = vld [vmem:[%s6109_s26 + $0x5bc] ss:$36 sps:$4 sm:$0xff]  }
 0x1d6   : > { %3075 = vmatmul.mubr.bf16.gmra.mrb[100].mxu1 %v5853_v8 }
 0x1d7   : > { %3525 = vmatmul.mubr.bf16.gmra.mrb[36].mxu0 %v5854_v9  ;;  %3082 = vmatprep.mubr.bf16.mxu1 %v5855_v10  ;;  %v5917_v10 = vld [vmem:[%s6109_s26 + $0x2a8] ss:$36 sps:$4 sm:$0xff]  }
 0x1d8   : > { %3532 = vmatprep.mubr.bf16.mxu0 %v5857_v12 }
 0x1de   : > { %3083 = vmatmul.mubr.bf16.gmra.mrb[104].mxu1 %v5859_v13  ;;  %v5916_v13 = vld [vmem:[%s6109_s26 + $0x5b8] ss:$36 sps:$4 sm:$0xff]  }
 0x1df   : > { %3533 = vmatmul.mubr.bf16.gmra.mrb[40].mxu0 %v5860_v15  ;;  %3090 = vmatprep.mubr.bf16.mxu1 %v5862_v16  ;;  %v5920_v15 = vld [vmem:[%s6109_s26 + $0x2f0] ss:$36 sps:$4 sm:$0xff]  }
 0x1e0   : > { %3540 = vmatprep.mubr.bf16.mxu0 %v5864_v17  ;;  %v5918_v17 = vld [vmem:[%s6109_s26 + $0x604] ss:$36 sps:$4 sm:$0xff]  }
 0x1e6   : > { %3091 = vmatmul.mubr.bf16.gmra.mrb[108].mxu1 %v5866_v18 }
 0x1e7   : > { %3541 = vmatmul.mubr.bf16.gmra.mrb[44].mxu0 %v5867_v20  ;;  %3098 = vmatprep.mubr.bf16.mxu1 %v5868_v21  ;;  %v5922_v21 = vld [vmem:[%s6109_s26 + $0x338] ss:$36 sps:$4 sm:$0xff]  }
 0x1e8   : > { %3548 = vmatprep.mubr.bf16.mxu0 %v5870_v23 }
 0x1ee   : > { %3099 = vmatmul.mubr.bf16.gmra.mrb[112].mxu1 %v5872_v24  ;;  %v5921_v24 = vld [vmem:[%s6109_s26 + $0x600] ss:$36 sps:$4 sm:$0xff]  }
 0x1ef   : > { %3549 = vmatmul.mubr.bf16.gmra.mrb[48].mxu0 %v5873_v25  ;;  %3106 = vmatprep.mubr.bf16.mxu1 %v5874_v26  ;;  %v5925_v25 = vld [vmem:[%s6109_s26 + $0x380] ss:$36 sps:$4 sm:$0xff]  }
 0x1f0   : > { %3556 = vmatprep.mubr.bf16.mxu0 %v5876_v28  ;;  %v5923_v28 = vld [vmem:[%s6109_s26 + $0x64c] ss:$36 sps:$4 sm:$0xff]  }
 0x1f6   : > { %3107 = vmatmul.mubr.bf16.gmra.mrb[116].mxu1 %v5878_v29 }
 0x1f7   : > { %3557 = vmatmul.mubr.bf16.gmra.mrb[52].mxu0 %v5879_v31  ;;  %3114 = vmatprep.mubr.bf16.mxu1 %v5881_v32  ;;  %v5927_v32 = vld [vmem:[%s6109_s26 + $0x3c8] ss:$36 sps:$4 sm:$0xff]  }
 0x1f8   : > { %3564 = vmatprep.mubr.bf16.mxu0 %v5883_v1 }
 0x1fe   : > { %3115 = vmatmul.mubr.bf16.gmra.mrb[120].mxu1 %v5885_v33  ;;  %v5926_v33 = vld [vmem:[%s6109_s26 + $0x648] ss:$36 sps:$4 sm:$0xff]  }
 0x1ff   : > { %3565 = vmatmul.mubr.bf16.gmra.mrb[56].mxu0 %v5886_v34  ;;  %3122 = vmatprep.mubr.bf16.mxu1 %v5887_v35  ;;  %v5930_v34 = vld [vmem:[%s6109_s26 + $0x410] ss:$36 sps:$4 sm:$0xff]  }
 0x200   : > { %3572 = vmatprep.mubr.bf16.mxu0 %v5889_v37  ;;  %v5928_v37 = vld [vmem:[%s6109_s26 + $0x694] ss:$36 sps:$4 sm:$0xff]  }
 0x206   : > { %3123 = vmatmul.mubr.bf16.gmra.mrb[124].mxu1 %v5891_v38 }
 0x207   : > { %3573 = vmatmul.mubr.bf16.gmra.mrb[60].mxu0 %v5892_v40  ;;  %4995 = vmatprep.mubr.bf16.mxu1 %v5895_v41  ;;  %v5932_v41 = vld [vmem:[%s6109_s26 + $0x458] ss:$36 sps:$4 sm:$0xff]  }
 0x208   : > { %3580 = vmatprep.mubr.bf16.mxu0 %v5893_v42 }
 0x20e   : > { %4996 = vmatmul.mubr.bf16.vlgmr.msra.gmra.mrb[128].mxu1 %v5897_v6  ;;  %v5931_v6 = vld [vmem:[%s6109_s26 + $0x690] ss:$36 sps:$4 sm:$0xff]  }
 0x20f   : > { %3581 = vmatmul.mubr.bf16.gmra.mrb[64].mxu0 %v5896_v43  ;;  %4999 = vmatprep.mubr.bf16.mxu1 %v5900_v45  ;;  %v5935_v43 = vld [vmem:[%s6109_s26 + $0x4a0] ss:$36 sps:$4 sm:$0xff]  }
 0x210   : > { %3588 = vmatprep.mubr.bf16.mxu0 %v5898_v46  ;;  %v5933_v46 = vld [vmem:[%s6109_s26 + $0x6dc] ss:$36 sps:$4 sm:$0xff]  }
 0x216   : > { %5000 = vmatmul.mubr.bf16.gmra.mrb[132].mxu1 %v5902_v47 }
 0x217   : > { %3589 = vmatmul.mubr.bf16.gmra.mrb[68].mxu0 %v5901_v50  ;;  %5003 = vmatprep.mubr.bf16.mxu1 %v5905_v51  ;;  %v5937_v51 = vld [vmem:[%s6109_s26 + $0x4e8] ss:$36 sps:$4 sm:$0xff]  }
 0x218   : > { %3596 = vmatprep.mubr.bf16.mxu0 %v5903_v53 }
 0x21e   : > { %5004 = vmatmul.mubr.bf16.gmra.mrb[136].mxu1 %v5907_v54  ;;  %v5936_v54 = vld [vmem:[%s6109_s26 + $0x6d8] ss:$36 sps:$4 sm:$0xff]  }
 0x21f   : > { %3597 = vmatmul.mubr.bf16.gmra.mrb[72].mxu0 %v5906_v55  ;;  %5007 = vmatprep.mubr.bf16.mxu1 %v5910_v56  ;;  %v5940_v55 = vld [vmem:[%s6109_s26 + $0x530] ss:$36 sps:$4 sm:$0xff]  }
 0x220   : > { %3604 = vmatprep.mubr.bf16.mxu0 %v5908_v58  ;;  %v5938_v58 = vld [vmem:[%s6109_s26 + $0x724] ss:$36 sps:$4 sm:$0xff]  }
 0x221   : > { %v6655_v59 = vpop.f32.mrb[32].mxu1 }
 0x222   : > { %v2942_v61 = vpop.f32.mrb[33].mxu1 }
 0x223   : > { %v6658_v63 = vpop.f32.mrb[34].mxu1 }
 0x224   : > { %v2945_v4 = vpop.f32.mrb[35].mxu1 }
 0x225   : > { %v5941_v4 = vld [vmem:[%s6109_s26 + $0x720] ss:$36 sps:$4 sm:$0xff]  }
 0x226   : > { %5008 = vmatmul.mubr.bf16.gmra.mrb[140].mxu1 %v5912_v62 }
 0x227   : > { %3605 = vmatmul.mubr.bf16.gmra.mrb[76].mxu0 %v5911_v0  ;;  %5011 = vmatprep.mubr.bf16.mxu1 %v5915_v3  ;;  %v5942_v0 = vld [vmem:[%s6109_s26 + $0x578] ss:$36 sps:$4 sm:$0xff]  }
 0x228   : > { %3612 = vmatprep.mubr.bf16.mxu0 %v5913_v7  ;;  %v5945_v7 = vld [vmem:[%s6109_s26 + $0x5c0] ss:$36 sps:$4 sm:$0xff]  }
 0x229   : > { %v6663_v8 = vpop.f32.mrb[36].mxu1 }
 0x22a   : > { %v2950_v9 = vpop.f32.mrb[37].mxu1 }
 0x22b   : > { %v6666_v12 = vpop.f32.mrb[38].mxu1 }
 0x22c   : > { %v2953_v16 = vpop.f32.mrb[39].mxu1 }
 0x22d   : > { %v5947_v16 = vld [vmem:[%s6109_s26 + $0x608] ss:$36 sps:$4 sm:$0xff]  }
 0x22e   : > { %5012 = vmatmul.mubr.bf16.gmra.mrb[144].mxu1 %v5917_v10  ;;  %v5943_v10 = vld [vmem:[%s6109_s26 + $0x76c] ss:$36 sps:$4 sm:$0xff]  }
 0x22f   : > { %3613 = vmatmul.mubr.bf16.gmra.mrb[80].mxu0 %v5916_v13  ;;  %5015 = vmatprep.mubr.bf16.mxu1 %v5920_v15 }
 0x230   : > { %3620 = vmatprep.mubr.bf16.mxu0 %v5918_v17 }
 0x231   : > { %v6671_v18 = vpop.f32.mrb[40].mxu1 }
 0x232   : > { %v2958_v20 = vpop.f32.mrb[41].mxu1 }
 0x233   : > { %v6674_v23 = vpop.f32.mrb[42].mxu1  ;;  %v5946_v20 = vld [vmem:[%s6109_s26 + $0x768] ss:$36 sps:$4 sm:$0xff]  }
 0x234   : > { %v2961_v26 = vpop.f32.mrb[43].mxu1 }
 0x235   : > { %v6722_v26 = vld [vmem:[%s7240_s2] ss:$0 sm:$0xff] }
 0x236   : > { %5016 = vmatmul.mubr.bf16.gmra.mrb[148].mxu1 %v5922_v21  ;;  %v5950_v21 = vld [vmem:[%s6109_s26 + $0x650] ss:$36 sps:$4 sm:$0xff]  }
 0x237   : > { %3621 = vmatmul.mubr.bf16.gmra.mrb[84].mxu0 %v5921_v24  ;;  %5019 = vmatprep.mubr.bf16.mxu1 %v5925_v25  ;;  %v5948_v25 = vld [vmem:[%s6109_s26 + $0x7b4] ss:$36 sps:$4 sm:$0xff]  }
 0x238   : > { %3628 = vmatprep.mubr.bf16.mxu0 %v5923_v28  ;;  %v2588_v28 = vadd.f32 %v6722_v26, %v6473_v49 }
 0x239   : > { %v6679_v29 = vpop.f32.mrb[44].mxu1 }
 0x23a   : > { %v2966_v31 = vpop.f32.mrb[45].mxu1 }
 0x23b   : > { %v6682_v1 = vpop.f32.mrb[46].mxu1 }
 0x23c   : > { %v2969_v35 = vpop.f32.mrb[47].mxu1 }
 0x23d   : > { %v2591_v35 = vadd.f32 %v6722_v26, %v6476_v52  ;;  %v2596_v52 = vadd.f32 %v6722_v26, %v6481_v57 }
 0x23e   : > { %5020 = vmatmul.mubr.bf16.gmra.mrb[152].mxu1 %v5927_v32 }
 0x23f   : > { %3629 = vmatmul.mubr.bf16.gmra.mrb[88].mxu0 %v5926_v33  ;;  %5023 = vmatprep.mubr.bf16.mxu1 %v5930_v34  ;;  %v5952_v34 = vld [vmem:[%s6109_s26 + $0x698] ss:$36 sps:$4 sm:$0xff]  }
 0x240   : > { %3636 = vmatprep.mubr.bf16.mxu0 %v5928_v37 }
 0x241   : > { %v6687_v38 = vpop.f32.mrb[48].mxu1 }
 0x242   : > { %v2974_v40 = vpop.f32.mrb[49].mxu1 }
 0x243   : > { %v6690_v42 = vpop.f32.mrb[50].mxu1 }
 0x244   : > { %v2977_v45 = vpop.f32.mrb[51].mxu1 }
 0x246   : > { %5024 = vmatmul.mubr.bf16.gmra.mrb[156].mxu1 %v5932_v41 }
 0x247   : > { %3637 = vmatmul.mubr.bf16.gmra.mrb[92].mxu0 %v5931_v6  ;;  %5027 = vmatprep.mubr.bf16.mxu1 %v5935_v43  ;;  %v5951_v6 = vld [vmem:[%s6109_s26 + $0x7b0] ss:$36 sps:$4 sm:$0xff]   ;;  %v5955_v43 = vld [vmem:[%s6109_s26 + $0x6e0] ss:$36 sps:$4 sm:$0xff]  }
 0x248   : > { %3644 = vmatprep.mubr.bf16.mxu0 %v5933_v46 }
 0x249   : > { %v6695_v47 = vpop.f32.mrb[52].mxu1 }
 0x24a   : > { %v2982_v50 = vpop.f32.mrb[53].mxu1 }
 0x24b   : > { %v6698_v53 = vpop.f32.mrb[54].mxu1  ;;  %v5953_v50 = vld [vmem:[%s6109_s26 + $0x7fc] ss:$36 sps:$4 sm:$0xff]  }
 0x24c   : > { %v2985_v56 = vpop.f32.mrb[55].mxu1 }
 0x24e   : > { %5028 = vmatmul.mubr.bf16.gmra.mrb[160].mxu1 %v5937_v51 }
 0x24f   : > { %3645 = vmatmul.mubr.bf16.gmra.mrb[96].mxu0 %v5936_v54  ;;  %5031 = vmatprep.mubr.bf16.mxu1 %v5940_v55 }
 0x250   : > { %3652 = vmatprep.mubr.bf16.mxu0 %v5938_v58  ;;  %v5957_v58 = vld [vmem:[%s6109_s26 + $0x728] ss:$36 sps:$4 sm:$0xff]  }
 0x251   : > { %v6703_v61 = vpop.f32.mrb[56].mxu1 }
 0x252   : > { %v2990_v62 = vpop.f32.mrb[57].mxu1 }
 0x253   : > { %v6706_v3 = vpop.f32.mrb[58].mxu1  ;;  %v2599_v62 = vadd.f32 %v6722_v26, %v6484_v60  ;;  %v2604_v60 = vadd.f32 %v6722_v26, %v6489_v2 }
 0x254   : > { %v2993_v9 = vpop.f32.mrb[59].mxu1 }
 0x255   : > { %v5956_v9 = vld [vmem:[%s6109_s26 + $0x7f8] ss:$36 sps:$4 sm:$0xff]  }
 0x256   : > { %5032 = vmatmul.mubr.bf16.gmra.mrb[164].mxu1 %v5942_v0 }
 0x257   : > { %3653 = vmatmul.mubr.bf16.gmra.mrb[100].mxu0 %v5941_v4  ;;  %5035 = vmatprep.mubr.bf16.mxu1 %v5945_v7 }
 0x258   : > { %3660 = vmatprep.mubr.bf16.mxu0 %v5943_v10  ;;  %v5960_v10 = vld [vmem:[%s6109_s26 + $0x770] ss:$36 sps:$4 sm:$0xff]  }
 0x259   : > { %v6711_v13 = vpop.f32.mrb[60].mxu1 }
 0x25a   : > { %v2998_v15 = vpop.f32.mrb[61].mxu1 }
 0x25b   : > { %v6714_v17 = vpop.f32.mrb[62].mxu1 }
 0x25c   : > { %v3001_v24 = vpop.f32.mrb[63].mxu1 }
 0x25e   : > { %5036 = vmatmul.mubr.bf16.gmra.mrb[168].mxu1 %v5947_v16 }
 0x25f   : > { %3661 = vmatmul.mubr.bf16.gmra.mrb[104].mxu0 %v5946_v20  ;;  %5039 = vmatprep.mubr.bf16.mxu1 %v5950_v21  ;;  %v5958_v20 = vld [vmem:[%s6109_s26 + $0x844] ss:$36 sps:$4 sm:$0xff]  }
 0x260   : > { %3668 = vmatprep.mubr.bf16.mxu0 %v5948_v25 }
 0x261   : > { %v6726_v31 = vpop.f32.mrb[64].mxu1 }
 0x262   : > { %v3454_v32 = vpop.f32.mrb[0].mxu0  ;;  %v3006_v33 = vpop.f32.mrb[65].mxu1 }
 0x263   : > { %v6731_v37 = vadd.f32 %v3454_v32, %v2588_v28  ;;  %v3456_v40 = vpop.f32.mrb[1].mxu0  ;;  %v6733_v41 = vpop.f32.mrb[66].mxu1  ;;  %v5962_v32 = vld [vmem:[%s6109_s26 + $0x7b8] ss:$36 sps:$4 sm:$0xff]   ;;  %v2607_v33 = vadd.f32 %v6722_v26, %v6492_v5  ;;  %v2612_v5 = vadd.f32 %v6722_v26, %v6497_v11 }
 0x264   : > { %v3457_v45 = vpop.f32.mrb[2].mxu0  ;;  %v3009_v46 = vpop.f32.mrb[67].mxu1 }
 0x265   : > { %v6738_v49 = vadd.f32 %v3457_v45, %v2591_v35  ;;  %v3459_v51 = vpop.f32.mrb[3].mxu0 }
 0x266   : > { %5040 = vmatmul.mubr.bf16.gmra.mrb[172].mxu1 %v5952_v34 }
 0x267   : > { %3669 = vmatmul.mubr.bf16.gmra.mrb[108].mxu0 %v5951_v6  ;;  %5043 = vmatprep.mubr.bf16.mxu1 %v5955_v43  ;;  %v5961_v6 = vld [vmem:[%s6109_s26 + $0x840] ss:$36 sps:$4 sm:$0xff]  }
 0x268   : > { %3676 = vmatprep.mubr.bf16.mxu0 %v5953_v50  ;;  %v5965_v43 = vld [vmem:[%s6109_s26 + $0x800] ss:$36 sps:$4 sm:$0xff]   ;;  %v5963_v50 = vld [vmem:[%s6109_s26 + $0x88c] ss:$36 sps:$4 sm:$0xff]  }
 0x269   : > { %v6742_v54 = vpop.f32.mrb[68].mxu1 }
 0x26a   : > { %v3462_v55 = vpop.f32.mrb[4].mxu0  ;;  %v3014_v56 = vpop.f32.mrb[69].mxu1 }
 0x26b   : > { %v6747_v0 = vadd.f32 %v3462_v55, %v2596_v52  ;;  %v3464_v4 = vpop.f32.mrb[5].mxu0  ;;  %v6749_v7 = vpop.f32.mrb[70].mxu1 }
 0x26c   : > { %v3465_v15 = vpop.f32.mrb[6].mxu0  ;;  %v3017_v16 = vpop.f32.mrb[71].mxu1 }
 0x26d   : > { %v6754_v57 = vadd.f32 %v3465_v15, %v2599_v62  ;;  %v3467_v21 = vpop.f32.mrb[7].mxu0  ;;  %v2615_v62 = vadd.f32 %v6722_v26, %v6500_v14  ;;  %v5966_v15 = vld [vmem:[%s6109_s26 + $0x888] ss:$36 sps:$4 sm:$0xff]   ;;  %v5970_v16 = vld [vmem:[%s6109_s26 + $0x890] ss:$36 sps:$4 sm:$0xff]   ;;  %v2620_v14 = vadd.f32 %v6722_v26, %v6505_v19  ;;  %v2628_v19 = vadd.f32 %v6722_v26, %v6513_v27 }
 0x26e   : > { %5044 = vmatmul.mubr.bf16.gmra.mrb[176].mxu1 %v5957_v58  ;;  %v5967_v58 = vld [vmem:[%s6109_s26 + $0x848] ss:$36 sps:$4 sm:$0xff]   ;;  %v2636_v27 = vadd.f32 %v6722_v26, %v6528_v36  ;;  %v2644_v36 = vadd.f32 %v6722_v26, %v6539_v44  ;;  %v5123_v44 = vadd.f32 %v6722_v26, %v6655_v59  ;;  %v5127_v59 = vadd.f32 %v6722_v26, %v6663_v8 }
 0x26f   : > { %3677 = vmatmul.mubr.bf16.gmra.mrb[112].mxu0 %v5956_v9  ;;  %5047 = vmatprep.mubr.bf16.mxu1 %v5960_v10  ;;  %v5131_v8 = vadd.f32 %v6722_v26, %v6671_v18  ;;  %v5135_v18 = vadd.f32 %v6722_v26, %v6679_v29  ;;  %v5139_v29 = vadd.f32 %v6722_v26, %v6687_v38 }
 0x270   : > { %3684 = vmatprep.mubr.bf16.mxu0 %v5958_v20  ;;  %v5143_v38 = vadd.f32 %v6722_v26, %v6695_v47  ;;  %v5147_v47 = vadd.f32 %v6722_v26, %v6703_v61  ;;  %v5151_v61 = vadd.f32 %v6722_v26, %v6711_v13  ;;  %v5155_v13 = vadd.f32 %v6722_v26, %v6726_v31 }
 0x271   : > { %v6758_v24 = vpop.f32.mrb[72].mxu1 }
 0x272   : > { %v3470_v25 = vpop.f32.mrb[8].mxu0  ;;  %v3022_v28 = vpop.f32.mrb[73].mxu1 }
 0x273   : > { %v6763_v34 = vadd.f32 %v3470_v25, %v2604_v60  ;;  %v3472_v35 = vpop.f32.mrb[9].mxu0  ;;  %v6765_v40 = vpop.f32.mrb[74].mxu1  ;;  %v5968_v60 = vld [vmem:[%s6109_s26 + $0x8d4] ss:$36 sps:$4 sm:$0xff]  }
 0x274   : > { %v3473_v45 = vpop.f32.mrb[10].mxu0  ;;  %v3025_v46 = vpop.f32.mrb[75].mxu1  ;;  %v5972_v35 = vld [vmem:[%s6109_s26 + $0x8d8] ss:$36 sps:$4 sm:$0xff]  }
 0x275   : > { %v6770_v2 = vadd.f32 %v3473_v45, %v2607_v33  ;;  %v3475_v51 = vpop.f32.mrb[11].mxu0 }
 0x276   : > { %5048 = vmatmul.mubr.bf16.gmra.mrb[180].mxu1 %v5962_v32 }
 0x277   : > { %3685 = vmatmul.mubr.bf16.gmra.mrb[116].mxu0 %v5961_v6  ;;  %5051 = vmatprep.mubr.bf16.mxu1 %v5965_v43  ;;  %v2623_v6 = vadd.f32 %v6722_v26, %v6508_v22 }
 0x278   : > { %3692 = vmatprep.mubr.bf16.mxu0 %v5963_v50  ;;  %v5971_v50 = vld [vmem:[%s6109_s26 + $0x8d0] ss:$36 sps:$4 sm:$0xff]   ;;  %s4447_s26 = sshll.u32 %s7271_s7, 2 }
 0x279   : > { %v6774_v52 = vpop.f32.mrb[76].mxu1  ;;  %s6947_s7 = scalar_lea.vmem %s7241_s3, %s4447_s26 }
 0x27a   : > { %v3478_v55 = vpop.f32.mrb[12].mxu0  ;;  %v3030_v56 = vpop.f32.mrb[77].mxu1 }
 0x27b   : > { %v6779_v4 = vadd.f32 %v3478_v55, %v2612_v5  ;;  %v3480_v9 = vpop.f32.mrb[13].mxu0  ;;  %v6781_v10 = vpop.f32.mrb[78].mxu1 }
 0x27c   : > { %v3481_v20 = vpop.f32.mrb[14].mxu0  ;;  %v3033_v21 = vpop.f32.mrb[79].mxu1  ;;  %v2631_v9 = vadd.f32 %v6722_v26, %v6516_v30  ;;  %v2639_v30 = vadd.f32 %v6722_v26, %v6531_v39  ;;  %v2647_v39 = vadd.f32 %v6722_v26, %v6545_v48  ;;  %v5125_v48 = vadd.f32 %v6722_v26, %v6658_v63 }
 0x27d   : > { %v6786_v11 = vadd.f32 %v3481_v20, %v2615_v62  ;;  %v3483_v25 = vpop.f32.mrb[15].mxu0  ;;  %v5129_v63 = vadd.f32 %v6722_v26, %v6666_v12  ;;  %v5133_v12 = vadd.f32 %v6722_v26, %v6674_v23  ;;  %v5137_v23 = vadd.f32 %v6722_v26, %v6682_v1 }
 0x27e   : > { %5052 = vmatmul.mubr.bf16.gmra.mrb[184].mxu1 %v5967_v58  ;;  %v5141_v1 = vadd.f32 %v6722_v26, %v6690_v42  ;;  %v5145_v42 = vadd.f32 %v6722_v26, %v6698_v53  ;;  %v5149_v53 = vadd.f32 %v6722_v26, %v6706_v3  ;;  %v5153_v3 = vadd.f32 %v6722_v26, %v6714_v17 }
 0x27f   : > { %3693 = vmatmul.mubr.bf16.gmra.mrb[120].mxu0 %v5966_v15  ;;  %5055 = vmatprep.mubr.bf16.mxu1 %v5970_v16  ;;  %v5157_v17 = vadd.f32 %v6722_v26, %v6733_v41 }
 0x280   : > { %3700 = vmatprep.mubr.bf16.mxu0 %v5968_v60 }
 0x281   : > { %v6790_v28 = vpop.f32.mrb[80].mxu1 }
 0x282   : > { %v3486_v32 = vpop.f32.mrb[16].mxu0  ;;  %v3038_v33 = vpop.f32.mrb[81].mxu1 }
 0x283   : > { %v6795_v43 = vadd.f32 %v3486_v32, %v2620_v14  ;;  %v3488_v45 = vpop.f32.mrb[17].mxu0  ;;  %v6797_v46 = vpop.f32.mrb[82].mxu1 }
 0x284   : > { %v3489_v51 = vpop.f32.mrb[18].mxu0  ;;  %v3041_v5 = vpop.f32.mrb[83].mxu1 }
 0x285   : > { %v6800_v55 = vadd.f32 %v3489_v51, %v2623_v6  ;;  %v3491_v56 = vpop.f32.mrb[19].mxu0 }
 0x286   : > { %5056 = vmatmul.mubr.bf16.gmra.mrb[188].mxu1 %v5972_v35 }
 0x287   : > { %3701 = vmatmul.mubr.bf16.gmra.mrb[124].mxu0 %v5971_v50 }
 0x289   : > { %v6804_v58 = vpop.f32.mrb[84].mxu1 }
 0x28a   : > { %v3494_v62 = vpop.f32.mrb[20].mxu0  ;;  %v3046_v22 = vpop.f32.mrb[85].mxu1 }
 0x28b   : > { %v6808_v15 = vadd.f32 %v3494_v62, %v2628_v19  ;;  %v3496_v16 = vpop.f32.mrb[21].mxu0  ;;  %v6810_v20 = vpop.f32.mrb[86].mxu1 }
 0x28c   : > { %v3497_v21 = vpop.f32.mrb[22].mxu0  ;;  %v3049_v60 = vpop.f32.mrb[87].mxu1 }
 0x28d   : > { %v6812_v25 = vadd.f32 %v3497_v21, %v2631_v9  ;;  %v3499_v14 = vpop.f32.mrb[23].mxu0 }
 0x291   : > { %v6816_v32 = vpop.f32.mrb[88].mxu1 }
 0x292   : > { %v3502_v33 = vpop.f32.mrb[24].mxu0  ;;  %v3054_v35 = vpop.f32.mrb[89].mxu1 }
 0x293   : > { %v6820_v6 = vadd.f32 %v3502_v33, %v2636_v27  ;;  %v3504_v45 = vpop.f32.mrb[25].mxu0  ;;  %v6822_v50 = vpop.f32.mrb[90].mxu1 }
 0x294   : > { %v3505_v51 = vpop.f32.mrb[26].mxu0  ;;  %v3057_v5 = vpop.f32.mrb[91].mxu1 }
 0x295   : > { %v6824_v56 = vadd.f32 %v3505_v51, %v2639_v30  ;;  %v3507_v19 = vpop.f32.mrb[27].mxu0 }
 0x299   : > { %v6828_v62 = vpop.f32.mrb[92].mxu1 }
 0x29a   : > { %v3510_v22 = vpop.f32.mrb[28].mxu0  ;;  %v3062_v9 = vpop.f32.mrb[93].mxu1 }
 0x29b   : > { %v6832_v16 = vadd.f32 %v3510_v22, %v2644_v36  ;;  %v3512_v21 = vpop.f32.mrb[29].mxu0  ;;  %v6834_v60 = vpop.f32.mrb[94].mxu1 }
 0x29c   : > { %v3513_v14 = vpop.f32.mrb[30].mxu0  ;;  %v3065_v27 = vpop.f32.mrb[95].mxu1 }
 0x29d   : > { %v6836_v33 = vadd.f32 %v3513_v14, %v2647_v39  ;;  %v3515_v35 = vpop.f32.mrb[31].mxu0 }
 0x2a1   : > { %v6840_v30 = vpop.f32.mrb[96].mxu1 }
 0x2a2   : > { %v3518_v45 = vpop.f32.mrb[32].mxu0  ;;  %v3070_v51 = vpop.f32.mrb[97].mxu1 }
 0x2a3   : > { %v6844_v5 = vadd.f32 %v5123_v44, %v3518_v45  ;;  %v3520_v19 = vpop.f32.mrb[33].mxu0  ;;  %v6846_v36 = vpop.f32.mrb[98].mxu1 }
 0x2a4   : > { %7242 = vst [vmem:[#allocation2_spill] sm:$0xff] %v6846_v36  ;;  %v3521_v22 = vpop.f32.mrb[34].mxu0  ;;  %v3073_v9 = vpop.f32.mrb[99].mxu1 }
 0x2a5   : > { %v6848_v39 = vadd.f32 %v5125_v48, %v3521_v22  ;;  %v3523_v21 = vpop.f32.mrb[35].mxu0 }
 0x2a9   : > { %v6852_v14 = vpop.f32.mrb[100].mxu1 }
 0x2aa   : > { %7243 = vst [vmem:[#allocation3_spill] sm:$0xff] %v6852_v14  ;;  %v3526_v27 = vpop.f32.mrb[36].mxu0  ;;  %v3078_v35 = vpop.f32.mrb[101].mxu1 }
 0x2ab   : > { %v6856_v44 = vadd.f32 %v5127_v59, %v3526_v27  ;;  %v3528_v45 = vpop.f32.mrb[37].mxu0  ;;  %v6858_v51 = vpop.f32.mrb[102].mxu1 }
 0x2ac   : > { %7244 = vst [vmem:[#allocation4_spill] sm:$0xff] %v6858_v51  ;;  %v3529_v19 = vpop.f32.mrb[38].mxu0  ;;  %v3081_v9 = vpop.f32.mrb[103].mxu1 }
 0x2ad   : > { %v6860_v48 = vadd.f32 %v5129_v63, %v3529_v19  ;;  %v3531_v22 = vpop.f32.mrb[39].mxu0 }
 0x2b1   : > { %v6864_v21 = vpop.f32.mrb[104].mxu1 }
 0x2b2   : > { %7245 = vst [vmem:[#allocation5_spill] sm:$0xff] %v6864_v21  ;;  %v3534_v14 = vpop.f32.mrb[40].mxu0  ;;  %v3086_v35 = vpop.f32.mrb[105].mxu1 }
 0x2b3   : > { %v6868_v59 = vadd.f32 %v5131_v8, %v3534_v14  ;;  %v3536_v27 = vpop.f32.mrb[41].mxu0  ;;  %v6870_v45 = vpop.f32.mrb[106].mxu1 }
 0x2b4   : > { %7246 = vst [vmem:[#allocation6_spill] sm:$0xff] %v6870_v45  ;;  %v3537_v51 = vpop.f32.mrb[42].mxu0  ;;  %v3089_v9 = vpop.f32.mrb[107].mxu1 }
 0x2b5   : > { %v6872_v63 = vadd.f32 %v5133_v12, %v3537_v51  ;;  %v3539_v19 = vpop.f32.mrb[43].mxu0 }
 0x2b9   : > { %v6876_v22 = vpop.f32.mrb[108].mxu1 }
 0x2ba   : > { %7247 = vst [vmem:[#allocation7_spill] sm:$0xff] %v6876_v22  ;;  %v3542_v21 = vpop.f32.mrb[44].mxu0  ;;  %v3094_v35 = vpop.f32.mrb[109].mxu1 }
 0x2bb   : > { %v6880_v14 = vadd.f32 %v5135_v18, %v3542_v21  ;;  %v3544_v8 = vpop.f32.mrb[45].mxu0  ;;  %v6882_v27 = vpop.f32.mrb[110].mxu1 }
 0x2bc   : > { %7248 = vst [vmem:[#allocation8_spill] sm:$0xff] %v6882_v27  ;;  %v3545_v45 = vpop.f32.mrb[46].mxu0  ;;  %v3097_v9 = vpop.f32.mrb[111].mxu1 }
 0x2bd   : > { %v6884_v51 = vadd.f32 %v5137_v23, %v3545_v45  ;;  %v3547_v12 = vpop.f32.mrb[47].mxu0 }
 0x2c1   : > { %v6888_v19 = vpop.f32.mrb[112].mxu1 }
 0x2c2   : > { %7249 = vst [vmem:[#allocation9_spill] sm:$0xff] %v6888_v19  ;;  %v3550_v22 = vpop.f32.mrb[48].mxu0  ;;  %v3102_v35 = vpop.f32.mrb[113].mxu1 }
 0x2c3   : > { %v6892_v21 = vadd.f32 %v5139_v29, %v3550_v22  ;;  %v3552_v18 = vpop.f32.mrb[49].mxu0  ;;  %v6894_v8 = vpop.f32.mrb[114].mxu1 }
 0x2c4   : > { %7250 = vst [vmem:[#allocation10_spill] sm:$0xff] %v6894_v8  ;;  %v3553_v27 = vpop.f32.mrb[50].mxu0  ;;  %v3105_v9 = vpop.f32.mrb[115].mxu1 }
 0x2c5   : > { %v6896_v45 = vadd.f32 %v5141_v1, %v3553_v27  ;;  %v3555_v23 = vpop.f32.mrb[51].mxu0 }
 0x2c9   : > { %v6900_v12 = vpop.f32.mrb[116].mxu1 }
 0x2ca   : > { %7251 = vst [vmem:[#allocation11_spill] sm:$0xff] %v6900_v12  ;;  %v3558_v19 = vpop.f32.mrb[52].mxu0  ;;  %v3110_v35 = vpop.f32.mrb[117].mxu1 }
 0x2cb   : > { %v6904_v22 = vadd.f32 %v5143_v38, %v3558_v19  ;;  %v3560_v29 = vpop.f32.mrb[53].mxu0  ;;  %v6906_v18 = vpop.f32.mrb[118].mxu1 }
 0x2cc   : > { %7252 = vst [vmem:[#allocation12_spill] sm:$0xff] %v6906_v18  ;;  %v3561_v8 = vpop.f32.mrb[54].mxu0  ;;  %v3113_v9 = vpop.f32.mrb[119].mxu1 }
 0x2cd   : > { %v6908_v27 = vadd.f32 %v5145_v42, %v3561_v8  ;;  %v3563_v1 = vpop.f32.mrb[55].mxu0 }
 0x2d1   : > { %v6912_v23 = vpop.f32.mrb[120].mxu1 }
 0x2d2   : > { %7253 = vst [vmem:[#allocation13_spill] sm:$0xff] %v6912_v23  ;;  %v3566_v12 = vpop.f32.mrb[56].mxu0  ;;  %v3118_v35 = vpop.f32.mrb[121].mxu1 }
 0x2d3   : > { %v6916_v19 = vadd.f32 %v5147_v47, %v3566_v12  ;;  %v3568_v38 = vpop.f32.mrb[57].mxu0  ;;  %v6918_v29 = vpop.f32.mrb[122].mxu1 }
 0x2d4   : > { %7254 = vst [vmem:[#allocation14_spill] sm:$0xff] %v6918_v29  ;;  %v3569_v18 = vpop.f32.mrb[58].mxu0  ;;  %v3121_v9 = vpop.f32.mrb[123].mxu1 }
 0x2d5   : > { %v6920_v8 = vadd.f32 %v5149_v53, %v3569_v18  ;;  %v3571_v42 = vpop.f32.mrb[59].mxu0 }
 0x2d9   : > { %v6924_v1 = vpop.f32.mrb[124].mxu1 }
 0x2da   : > { %7255 = vst [vmem:[#allocation15_spill] sm:$0xff] %v6924_v1  ;;  %v3574_v35 = vpop.f32.mrb[60].mxu0  ;;  %v3126_v23 = vpop.f32.mrb[125].mxu1 }
 0x2db   : > { %v6928_v12 = vadd.f32 %v5151_v61, %v3574_v35  ;;  %v3576_v47 = vpop.f32.mrb[61].mxu0  ;;  %v6930_v38 = vpop.f32.mrb[126].mxu1 }
 0x2dc   : > { %v3577_v9 = vpop.f32.mrb[62].mxu0  ;;  %v3129_v18 = vpop.f32.mrb[127].mxu1 }
 0x2dd   : > { %v6932_v53 = vadd.f32 %v5153_v3, %v3577_v9  ;;  %v3579_v42 = vpop.f32.mrb[63].mxu0 }
 0x2e1   : > { %v4997_v29 = vpop.f32.mrb[128].mxu1 }
 0x2e2   : > { %v3582_v1 = vpop.f32.mrb[64].mxu0  ;;  %v3752_v23 = vadd.f32 %v6747_v0, %v4997_v29  ;;  %v3743_v36 = vpop.f32.mrb[129].mxu1 }
 0x2e3   : > { %v6940_v61 = vadd.f32 %v5155_v13, %v3582_v1  ;;  %v3584_v35 = vpop.f32.mrb[65].mxu0  ;;  %v3744_v47 = vadd.f32 %v6731_v37, %v3743_v36  ;;  %v4998_v3 = vpop.f32.mrb[130].mxu1 }
 0x2e4   : > { %v4000_v9 = vmax.f32 %v3752_v23, 0.0  ;;  %v3585_v18 = vpop.f32.mrb[66].mxu0  ;;  %v3755_v42 = vadd.f32 %v6754_v57, %v4998_v3  ;;  %v3746_v31 = vpop.f32.mrb[131].mxu1  ;;  %v5159_v35 = vadd.f32 %v6722_v26, %v6742_v54 }
 0x2e5   : > { %v3998_v41 = vmax.f32 %v3744_v47, 0.0  ;;  %v6949_v0 = vadd.f32 %v5157_v17, %v3585_v18  ;;  %v3587_v29 = vpop.f32.mrb[67].mxu0  ;;  %v3747_v37 = vadd.f32 %v6738_v49, %v3746_v31 }
 0x2e6   : > { %v4877_v36 = vpack.c.bf16 %v4000_v9, %v4000_v9  ;;  %v4001_v1 = vmax.f32 %v3755_v42, 0.0  ;;  %v5161_v9 = vadd.f32 %v6722_v26, %v6749_v7 }
 0x2e7   : > { %v4875_v57 = vpack.c.bf16 %v3998_v41, %v3998_v41  ;;  %v3999_v13 = vmax.f32 %v3747_v37, 0.0 }
 0x2e8   : > { %4321 = vst.msk [vmem:[%s6947_s7 + $0x8] sm:$0xf] %vm4318_vm0, %v4877_v36  ;;  %v4878_v23 = vpack.c.bf16 %v4001_v1, %v4001_v1 }
 0x2e9   : > { %4319 = vst.msk [vmem:[%s6947_s7] sm:$0xf] %vm4318_vm0, %v4875_v57  ;;  %v4876_v3 = vpack.c.bf16 %v3999_v13, %v3999_v13  ;;  %v5001_v47 = vpop.f32.mrb[132].mxu1 }
 0x2ea   : > { %4322 = vst.msk [vmem:[%s6947_s7 + $0xc] sm:$0xf] %vm4318_vm0, %v4878_v23  ;;  %v3590_v17 = vpop.f32.mrb[68].mxu0  ;;  %v3768_v49 = vadd.f32 %v6779_v4, %v5001_v47  ;;  %v3759_v18 = vpop.f32.mrb[133].mxu1 }
 0x2eb   : > { %4320 = vst.msk [vmem:[%s6947_s7 + $0x4] sm:$0xf] %vm4318_vm0, %v4876_v3  ;;  %v6965_v42 = vadd.f32 %v5159_v35, %v3590_v17  ;;  %v3592_v31 = vpop.f32.mrb[69].mxu0  ;;  %v3760_v54 = vadd.f32 %v6763_v34, %v3759_v18  ;;  %v5002_v41 = vpop.f32.mrb[134].mxu1  ;;  %v5163_v17 = vadd.f32 %v6722_v26, %v6758_v24 }
 0x2ec   : > { %v4004_v29 = vmax.f32 %v3768_v49, 0.0  ;;  %v3593_v37 = vpop.f32.mrb[70].mxu0  ;;  %v3771_v36 = vadd.f32 %v6786_v11, %v5002_v41  ;;  %v3762_v4 = vpop.f32.mrb[135].mxu1  ;;  %v5165_v31 = vadd.f32 %v6722_v26, %v6765_v40 }
 0x2ed   : > { %v4002_v1 = vmax.f32 %v3760_v54, 0.0  ;;  %v6969_v57 = vadd.f32 %v5161_v9, %v3593_v37  ;;  %v3595_v7 = vpop.f32.mrb[71].mxu0  ;;  %v3763_v13 = vadd.f32 %v6770_v2, %v3762_v4 }
 0x2ee   : > { %v4881_v23 = vpack.c.bf16 %v4004_v29, %v4004_v29  ;;  %v4005_v35 = vmax.f32 %v3771_v36, 0.0 }
 0x2ef   : > { %v4879_v3 = vpack.c.bf16 %v4002_v1, %v4002_v1  ;;  %v4003_v47 = vmax.f32 %v3763_v13, 0.0 }
 0x2f0   : > { %4325 = vst.msk [vmem:[%s6947_s7 + $0x18] sm:$0xf] %vm4318_vm0, %v4881_v23  ;;  %v4882_v34 = vpack.c.bf16 %v4005_v35, %v4005_v35 }
 0x2f1   : > { %4323 = vst.msk [vmem:[%s6947_s7 + $0x10] sm:$0xf] %vm4318_vm0, %v4879_v3  ;;  %v4880_v11 = vpack.c.bf16 %v4003_v47, %v4003_v47  ;;  %v5005_v49 = vpop.f32.mrb[136].mxu1 }
 0x2f2   : > { %4326 = vst.msk [vmem:[%s6947_s7 + $0x1c] sm:$0xf] %vm4318_vm0, %v4882_v34  ;;  %v3598_v18 = vpop.f32.mrb[72].mxu0  ;;  %v3784_v2 = vadd.f32 %v6808_v15, %v5005_v49  ;;  %v3775_v9 = vpop.f32.mrb[137].mxu1  ;;  %v5167_v34 = vadd.f32 %v6722_v26, %v6774_v52 }
 0x2f3   : > { %4324 = vst.msk [vmem:[%s6947_s7 + $0x14] sm:$0xf] %vm4318_vm0, %v4880_v11  ;;  %v6985_v54 = vadd.f32 %v5163_v17, %v3598_v18  ;;  %v3600_v41 = vpop.f32.mrb[73].mxu0  ;;  %v3776_v24 = vadd.f32 %v6795_v43, %v3775_v9  ;;  %v5006_v29 = vpop.f32.mrb[138].mxu1  ;;  %v5169_v18 = vadd.f32 %v6722_v26, %v6781_v10 }
 0x2f4   : > { %v4008_v37 = vmax.f32 %v3784_v2, 0.0  ;;  %v3601_v36 = vpop.f32.mrb[74].mxu0  ;;  %v3787_v4 = vadd.f32 %v6812_v25, %v5006_v29  ;;  %v3778_v15 = vpop.f32.mrb[139].mxu1 }
 0x2f5   : > { %v4006_v1 = vmax.f32 %v3776_v24, 0.0  ;;  %v6989_v7 = vadd.f32 %v5165_v31, %v3601_v36  ;;  %v3603_v40 = vpop.f32.mrb[75].mxu0  ;;  %v3779_v13 = vadd.f32 %v6800_v55, %v3778_v15 }
 0x2f6   : > { %v4885_v23 = vpack.c.bf16 %v4008_v37, %v4008_v37  ;;  %v4009_v35 = vmax.f32 %v3787_v4, 0.0 }
 0x2f7   : > { %v4883_v3 = vpack.c.bf16 %v4006_v1, %v4006_v1  ;;  %v4007_v47 = vmax.f32 %v3779_v13, 0.0 }
 0x2f8   : > { %4329 = vst.msk [vmem:[%s6947_s7 + $0x28] sm:$0xf] %vm4318_vm0, %v4885_v23  ;;  %v4886_v43 = vpack.c.bf16 %v4009_v35, %v4009_v35  ;;  %v5171_v23 = vadd.f32 %v6722_v26, %v6790_v28 }
 0x2f9   : > { %4327 = vst.msk [vmem:[%s6947_s7 + $0x20] sm:$0xf] %vm4318_vm0, %v4883_v3  ;;  %v4884_v25 = vpack.c.bf16 %v4007_v47, %v4007_v47  ;;  %v5009_v17 = vpop.f32.mrb[140].mxu1 }
 0x2fa   : > { %4330 = vst.msk [vmem:[%s6947_s7 + $0x2c] sm:$0xf] %vm4318_vm0, %v4886_v43  ;;  %v3606_v11 = vpop.f32.mrb[76].mxu0  ;;  %v3800_v55 = vadd.f32 %v6832_v16, %v5009_v17  ;;  %v3791_v49 = vpop.f32.mrb[141].mxu1  ;;  %v5173_v43 = vadd.f32 %v6722_v26, %v6797_v46 }
 0x2fb   : > { %4328 = vst.msk [vmem:[%s6947_s7 + $0x24] sm:$0xf] %vm4318_vm0, %v4884_v25  ;;  %v7005_v2 = vadd.f32 %v5167_v34, %v3606_v11  ;;  %v3608_v9 = vpop.f32.mrb[77].mxu0  ;;  %v3792_v52 = vadd.f32 %v6820_v6, %v3791_v49  ;;  %v5010_v31 = vpop.f32.mrb[142].mxu1 }
 0x2fc   : > { %v4012_v41 = vmax.f32 %v3800_v55, 0.0  ;;  %v3609_v24 = vpop.f32.mrb[78].mxu0  ;;  %v3803_v29 = vadd.f32 %v6836_v33, %v5010_v31  ;;  %v3794_v16 = vpop.f32.mrb[143].mxu1 }
 0x2fd   : > { %v4010_v37 = vmax.f32 %v3792_v52, 0.0  ;;  %v7009_v36 = vadd.f32 %v5169_v18, %v3609_v24  ;;  %v3611_v10 = vpop.f32.mrb[79].mxu0  ;;  %v3795_v4 = vadd.f32 %v6824_v56, %v3794_v16  ;;  %v5175_v16 = vadd.f32 %v6722_v26, %v6804_v58 }
 0x2fe   : > { %v4889_v15 = vpack.c.bf16 %v4012_v41, %v4012_v41  ;;  %v4013_v1 = vmax.f32 %v3803_v29, 0.0 }
 0x2ff   : > { %v4887_v40 = vpack.c.bf16 %v4010_v37, %v4010_v37  ;;  %v4011_v13 = vmax.f32 %v3795_v4, 0.0 }
 0x300   : > { %4333 = vst.msk [vmem:[%s6947_s7 + $0x38] sm:$0xf] %vm4318_vm0, %v4889_v15  ;;  %v4890_v6 = vpack.c.bf16 %v4013_v1, %v4013_v1  ;;  %v5177_v15 = vadd.f32 %v6722_v26, %v6810_v20 }
 0x301   : > { %4331 = vst.msk [vmem:[%s6947_s7 + $0x30] sm:$0xf] %vm4318_vm0, %v4887_v40  ;;  %v4888_v33 = vpack.c.bf16 %v4011_v13, %v4011_v13  ;;  %v5013_v35 = vpop.f32.mrb[144].mxu1 }
 0x302   : > { %4334 = vst.msk [vmem:[%s6947_s7 + $0x3c] sm:$0xf] %vm4318_vm0, %v4890_v6  ;;  %v3614_v3 = vpop.f32.mrb[80].mxu0  ;;  %v3816_v56 = vadd.f32 %v6856_v44, %v5013_v35  ;;  %v3807_v47 = vpop.f32.mrb[145].mxu1 }
 0x303   : > { %4332 = vst.msk [vmem:[%s6947_s7 + $0x34] sm:$0xf] %vm4318_vm0, %v4888_v33  ;;  %v7025_v34 = vadd.f32 %v5171_v23, %v3614_v3  ;;  %v3616_v25 = vpop.f32.mrb[81].mxu0  ;;  %v3808_v28 = vadd.f32 %v6844_v5, %v3807_v47  ;;  %v5014_v17 = vpop.f32.mrb[146].mxu1 }
 0x304   : > { %v4016_v11 = vmax.f32 %v3816_v56, 0.0  ;;  %v3617_v55 = vpop.f32.mrb[82].mxu0  ;;  %v3819_v49 = vadd.f32 %v6860_v48, %v5014_v17  ;;  %v3810_v44 = vpop.f32.mrb[147].mxu1  ;;  %v5179_v17 = vadd.f32 %v6722_v26, %v6816_v32 }
 0x305   : > { %v4014_v18 = vmax.f32 %v3808_v28, 0.0  ;;  %v7029_v9 = vadd.f32 %v5173_v43, %v3617_v55  ;;  %v3619_v46 = vpop.f32.mrb[83].mxu0  ;;  %v3811_v52 = vadd.f32 %v6848_v39, %v3810_v44  ;;  %v5181_v44 = vadd.f32 %v6722_v26, %v6822_v50 }
 0x306   : > { %v4893_v31 = vpack.c.bf16 %v4016_v11, %v4016_v11  ;;  %v4017_v41 = vmax.f32 %v3819_v49, 0.0 }
 0x307   : > { %v4891_v24 = vpack.c.bf16 %v4014_v18, %v4014_v18  ;;  %v4015_v29 = vmax.f32 %v3811_v52, 0.0 }
 0x308   : > { %4337 = vst.msk [vmem:[%s6947_s7 + $0x48] sm:$0xf] %vm4318_vm0, %v4893_v31  ;;  %v4894_v5 = vpack.c.bf16 %v4017_v41, %v4017_v41 }
 0x309   : > { %4335 = vst.msk [vmem:[%s6947_s7 + $0x40] sm:$0xf] %vm4318_vm0, %v4891_v24  ;;  %v4892_v48 = vpack.c.bf16 %v4015_v29, %v4015_v29  ;;  %v5017_v37 = vpop.f32.mrb[148].mxu1 }
 0x30a   : > { %4338 = vst.msk [vmem:[%s6947_s7 + $0x4c] sm:$0xf] %vm4318_vm0, %v4894_v5  ;;  %v3622_v10 = vpop.f32.mrb[84].mxu0  ;;  %v3832_v39 = vadd.f32 %v6880_v14, %v5017_v37  ;;  %v3823_v4 = vpop.f32.mrb[149].mxu1 }
 0x30b   : > { %4336 = vst.msk [vmem:[%s6947_s7 + $0x44] sm:$0xf] %vm4318_vm0, %v4892_v48  ;;  %v7045_v1 = vadd.f32 %v5175_v16, %v3622_v10  ;;  %v3624_v40 = vpop.f32.mrb[85].mxu0  ;;  %v3824_v58 = vadd.f32 %v6868_v59, %v3823_v4  ;;  %v5018_v13 = vpop.f32.mrb[150].mxu1  ;;  %v5183_v4 = vadd.f32 %v6722_v26, %v6828_v62 }
 0x30c   : > { %v4020_v6 = vmax.f32 %v3832_v39, 0.0  ;;  %v3625_v23 = vpop.f32.mrb[86].mxu0  ;;  %v3835_v33 = vadd.f32 %v6884_v51, %v5018_v13  ;;  %v3826_v14 = vpop.f32.mrb[151].mxu1  ;;  %v5185_v13 = vadd.f32 %v6722_v26, %v6834_v60 }
 0x30d   : > { %v4018_v35 = vmax.f32 %v3824_v58, 0.0  ;;  %v7049_v3 = vadd.f32 %v5177_v15, %v3625_v23  ;;  %v3627_v20 = vpop.f32.mrb[87].mxu0  ;;  %v3827_v56 = vadd.f32 %v6872_v63, %v3826_v14 }
 0x30e   : > { %v4897_v47 = vpack.c.bf16 %v4020_v6, %v4020_v6  ;;  %v4021_v43 = vmax.f32 %v3835_v33, 0.0 }
 0x30f   : > { %v4895_v25 = vpack.c.bf16 %v4018_v35, %v4018_v35  ;;  %v4019_v28 = vmax.f32 %v3827_v56, 0.0 }
 0x310   : > { %4341 = vst.msk [vmem:[%s6947_s7 + $0x58] sm:$0xf] %vm4318_vm0, %v4897_v47  ;;  %v4898_v59 = vpack.c.bf16 %v4021_v43, %v4021_v43 }
 0x311   : > { %4339 = vst.msk [vmem:[%s6947_s7 + $0x50] sm:$0xf] %vm4318_vm0, %v4895_v25  ;;  %v4896_v51 = vpack.c.bf16 %v4019_v28, %v4019_v28  ;;  %v5021_v11 = vpop.f32.mrb[152].mxu1 }
 0x312   : > { %4342 = vst.msk [vmem:[%s6947_s7 + $0x5c] sm:$0xf] %vm4318_vm0, %v4898_v59  ;;  %v3630_v55 = vpop.f32.mrb[88].mxu0  ;;  %v3848_v63 = vadd.f32 %v6904_v22, %v5021_v11  ;;  %v3839_v49 = vpop.f32.mrb[153].mxu1 }
 0x313   : > { %4340 = vst.msk [vmem:[%s6947_s7 + $0x54] sm:$0xf] %vm4318_vm0, %v4896_v51  ;;  %v7065_v18 = vadd.f32 %v5179_v17, %v3630_v55  ;;  %v3632_v46 = vpop.f32.mrb[89].mxu0  ;;  %v3840_v32 = vadd.f32 %v6892_v21, %v3839_v49  ;;  %v5022_v52 = vpop.f32.mrb[154].mxu1  ;;  %v5187_v51 = vadd.f32 %v6722_v26, %v6840_v30  ;;  %v7256_v49 = vld [vmem:[#allocation2_spill] sm:$0xff] }
 0x314   : > { %v4024_v31 = vmax.f32 %v3848_v63, 0.0  ;;  %v3633_v41 = vpop.f32.mrb[90].mxu0  ;;  %v3851_v24 = vadd.f32 %v6908_v27, %v5022_v52  ;;  %v3842_v22 = vpop.f32.mrb[155].mxu1 }
 0x315   : > { %v4022_v29 = vmax.f32 %v3840_v32, 0.0  ;;  %v7069_v5 = vadd.f32 %v5181_v44, %v3633_v41  ;;  %v3635_v50 = vpop.f32.mrb[91].mxu0  ;;  %v3843_v16 = vadd.f32 %v6896_v45, %v3842_v22  ;;  %v5189_v44 = vadd.f32 %v6722_v26, %v7256_v49 }
 0x316   : > { %v4901_v48 = vpack.c.bf16 %v4024_v31, %v4024_v31  ;;  %v4025_v37 = vmax.f32 %v3851_v24, 0.0 }
 0x317   : > { %v4899_v10 = vpack.c.bf16 %v4022_v29, %v4022_v29  ;;  %v4023_v39 = vmax.f32 %v3843_v16, 0.0 }
 0x318   : > { %4345 = vst.msk [vmem:[%s6947_s7 + $0x68] sm:$0xf] %vm4318_vm0, %v4901_v48  ;;  %v4902_v21 = vpack.c.bf16 %v4025_v37, %v4025_v37 }
 0x319   : > { %4343 = vst.msk [vmem:[%s6947_s7 + $0x60] sm:$0xf] %vm4318_vm0, %v4899_v10  ;;  %v4900_v27 = vpack.c.bf16 %v4023_v39, %v4023_v39  ;;  %v5025_v15 = vpop.f32.mrb[156].mxu1 }
 0x31a   : > { %4346 = vst.msk [vmem:[%s6947_s7 + $0x6c] sm:$0xf] %vm4318_vm0, %v4902_v21  ;;  %v3638_v40 = vpop.f32.mrb[92].mxu0  ;;  %v3864_v45 = vadd.f32 %v6928_v12, %v5025_v15  ;;  %v3855_v58 = vpop.f32.mrb[157].mxu1  ;;  %v7257_v21 = vld [vmem:[#allocation3_spill] sm:$0xff] }
 0x31b   : > { %4344 = vst.msk [vmem:[%s6947_s7 + $0x64] sm:$0xf] %vm4318_vm0, %v4900_v27  ;;  %v7085_v6 = vadd.f32 %v5183_v4, %v3638_v40  ;;  %v3640_v23 = vpop.f32.mrb[93].mxu0  ;;  %v3856_v62 = vadd.f32 %v6916_v19, %v3855_v58  ;;  %v5026_v33 = vpop.f32.mrb[158].mxu1  ;;  %v5191_v4 = vadd.f32 %v6722_v26, %v7257_v21 }
 0x31c   : > { %v4028_v14 = vmax.f32 %v3864_v45, 0.0  ;;  %v3641_v35 = vpop.f32.mrb[94].mxu0  ;;  %v3867_v20 = vadd.f32 %v6932_v53, %v5026_v33  ;;  %v3858_v12 = vpop.f32.mrb[159].mxu1  ;;  %v7258_v45 = vld [vmem:[#allocation4_spill] sm:$0xff] }
 0x31d   : > { %v4026_v56 = vmax.f32 %v3856_v62, 0.0  ;;  %v7089_v47 = vadd.f32 %v5185_v13, %v3641_v35  ;;  %v3643_v60 = vpop.f32.mrb[95].mxu0  ;;  %v3859_v43 = vadd.f32 %v6920_v8, %v3858_v12  ;;  %v5193_v58 = vadd.f32 %v6722_v26, %v7258_v45 }
 0x31e   : > { %v4905_v25 = vpack.c.bf16 %v4028_v14, %v4028_v14  ;;  %v4029_v28 = vmax.f32 %v3867_v20, 0.0 }
 0x31f   : > { %v4903_v59 = vpack.c.bf16 %v4026_v56, %v4026_v56  ;;  %v4027_v17 = vmax.f32 %v3859_v43, 0.0 }
 0x320   : > { %4349 = vst.msk [vmem:[%s6947_s7 + $0x78] sm:$0xf] %vm4318_vm0, %v4905_v25  ;;  %v4906_v19 = vpack.c.bf16 %v4029_v28, %v4029_v28 }
 0x321   : > { %4347 = vst.msk [vmem:[%s6947_s7 + $0x70] sm:$0xf] %vm4318_vm0, %v4903_v59  ;;  %v4904_v53 = vpack.c.bf16 %v4027_v17, %v4027_v17  ;;  %v5029_v11 = vpop.f32.mrb[160].mxu1  ;;  %v7259_v17 = vld [vmem:[#allocation5_spill] sm:$0xff] }
 0x322   : > { %4350 = vst.msk [vmem:[%s6947_s7 + $0x7c] sm:$0xf] %vm4318_vm0, %v4906_v19  ;;  %v3646_v55 = vpop.f32.mrb[96].mxu0  ;;  %v3880_v8 = vadd.f32 %v6965_v42, %v5029_v11  ;;  %v3871_v63 = vpop.f32.mrb[161].mxu1 }
 0x323   : > { %4348 = vst.msk [vmem:[%s6947_s7 + $0x74] sm:$0xf] %vm4318_vm0, %v4904_v53  ;;  %v7105_v46 = vadd.f32 %v5187_v51, %v3646_v55  ;;  %v3648_v32 = vpop.f32.mrb[97].mxu0  ;;  %v3872_v30 = vadd.f32 %v6940_v61, %v3871_v63  ;;  %v5030_v52 = vpop.f32.mrb[162].mxu1 }
 0x324   : > { %v4032_v31 = vmax.f32 %v3880_v8, 0.0  ;;  %v3649_v41 = vpop.f32.mrb[98].mxu0  ;;  %v3883_v24 = vadd.f32 %v6969_v57, %v5030_v52  ;;  %v3874_v42 = vpop.f32.mrb[163].mxu1  ;;  %v7260_v8 = vld [vmem:[#allocation6_spill] sm:$0xff] }
 0x325   : > { %v4030_v22 = vmax.f32 %v3872_v30, 0.0  ;;  %v7109_v29 = vadd.f32 %v5189_v44, %v3649_v41  ;;  %v3651_v50 = vpop.f32.mrb[99].mxu0  ;;  %v3875_v16 = vadd.f32 %v6949_v0, %v3874_v42 }
 0x326   : > { %v4909_v48 = vpack.c.bf16 %v4032_v31, %v4032_v31  ;;  %v4033_v37 = vmax.f32 %v3883_v24, 0.0 }
 0x327   : > { %v4907_v10 = vpack.c.bf16 %v4030_v22, %v4030_v22  ;;  %v4031_v39 = vmax.f32 %v3875_v16, 0.0 }
 0x328   : > { %4353 = vst.msk [vmem:[%s6947_s7 + $0x88] sm:$0xf] %vm4318_vm0, %v4909_v48  ;;  %v4910_v61 = vpack.c.bf16 %v4033_v37, %v4033_v37 }
 0x329   : > { %4351 = vst.msk [vmem:[%s6947_s7 + $0x80] sm:$0xf] %vm4318_vm0, %v4907_v10  ;;  %v4908_v57 = vpack.c.bf16 %v4031_v39, %v4031_v39  ;;  %v5033_v27 = vpop.f32.mrb[164].mxu1  ;;  %v7261_v39 = vld [vmem:[#allocation7_spill] sm:$0xff] }
 0x32a   : > { %4354 = vst.msk [vmem:[%s6947_s7 + $0x8c] sm:$0xf] %vm4318_vm0, %v4910_v61  ;;  %v3654_v15 = vpop.f32.mrb[100].mxu0  ;;  %v3896_v0 = vadd.f32 %v7005_v2, %v5033_v27  ;;  %v3887_v40 = vpop.f32.mrb[165].mxu1  ;;  %v7262_v27 = vld [vmem:[#allocation8_spill] sm:$0xff] }
 0x32b   : > { %4352 = vst.msk [vmem:[%s6947_s7 + $0x84] sm:$0xf] %vm4318_vm0, %v4908_v57  ;;  %v7125_v13 = vadd.f32 %v5191_v4, %v3654_v15  ;;  %v3656_v23 = vpop.f32.mrb[101].mxu0  ;;  %v3888_v62 = vadd.f32 %v6985_v54, %v3887_v40  ;;  %v5034_v33 = vpop.f32.mrb[166].mxu1 }
 0x32c   : > { %v4036_v14 = vmax.f32 %v3896_v0, 0.0  ;;  %v3657_v35 = vpop.f32.mrb[102].mxu0  ;;  %v3899_v20 = vadd.f32 %v7009_v36, %v5034_v33  ;;  %v3890_v12 = vpop.f32.mrb[167].mxu1  ;;  %v7137_v36 = vld [vmem:[%s7240_s2] ss:$0 sm:$0xff] }
 0x32d   : > { %v4034_v2 = vmax.f32 %v3888_v62, 0.0  ;;  %v7129_v56 = vadd.f32 %v5193_v58, %v3657_v35  ;;  %v3659_v26 = vpop.f32.mrb[103].mxu0  ;;  %v3891_v60 = vadd.f32 %v6989_v7, %v3890_v12  ;;  %v5195_v19 = vadd.f32 %v7137_v36, %v7259_v17 }
 0x32e   : > { %v4913_v43 = vpack.c.bf16 %v4036_v14, %v4036_v14  ;;  %v4037_v25 = vmax.f32 %v3899_v20, 0.0  ;;  %v5197_v63 = vadd.f32 %v7137_v36, %v7260_v8  ;;  %v5199_v61 = vadd.f32 %v7137_v36, %v7261_v39 }
 0x32f   : > { %v4911_v28 = vpack.c.bf16 %v4034_v2, %v4034_v2  ;;  %v4035_v59 = vmax.f32 %v3891_v60, 0.0  ;;  %v5201_v15 = vadd.f32 %v7137_v36, %v7262_v27 }
 0x330   : > { %4357 = vst.msk [vmem:[%s6947_s7 + $0x98] sm:$0xf] %vm4318_vm0, %v4913_v43  ;;  %v4914_v54 = vpack.c.bf16 %v4037_v25, %v4037_v25  ;;  %v7263_v25 = vld [vmem:[#allocation9_spill] sm:$0xff] }
 0x331   : > { %4355 = vst.msk [vmem:[%s6947_s7 + $0x90] sm:$0xf] %vm4318_vm0, %v4911_v28  ;;  %v4912_v51 = vpack.c.bf16 %v4035_v59, %v4035_v59  ;;  %v5037_v7 = vpop.f32.mrb[168].mxu1  ;;  %v5203_v28 = vadd.f32 %v7137_v36, %v7263_v25 }
 0x332   : > { %4358 = vst.msk [vmem:[%s6947_s7 + $0x9c] sm:$0xf] %vm4318_vm0, %v4914_v54  ;;  %v3662_v53 = vpop.f32.mrb[104].mxu0  ;;  %v3912_v11 = vadd.f32 %v7045_v1, %v5037_v7  ;;  %v3903_v55 = vpop.f32.mrb[169].mxu1 }
 0x333   : > { %4356 = vst.msk [vmem:[%s6947_s7 + $0x94] sm:$0xf] %vm4318_vm0, %v4912_v51  ;;  %v7150_v49 = vadd.f32 %v5195_v19, %v3662_v53  ;;  %v3664_v44 = vpop.f32.mrb[105].mxu0  ;;  %v3904_v32 = vadd.f32 %v7025_v34, %v3903_v55  ;;  %v5038_v30 = vpop.f32.mrb[170].mxu1  ;;  %v7264_v19 = vld [vmem:[#allocation10_spill] sm:$0xff] }
 0x334   : > { %v4040_v52 = vmax.f32 %v3912_v11, 0.0  ;;  %v3665_v31 = vpop.f32.mrb[106].mxu0  ;;  %v3915_v41 = vadd.f32 %v7049_v3, %v5038_v30  ;;  %v3906_v1 = vpop.f32.mrb[171].mxu1  ;;  %v5205_v51 = vadd.f32 %v7137_v36, %v7264_v19 }
 0x335   : > { %v4038_v24 = vmax.f32 %v3904_v32, 0.0  ;;  %v7154_v42 = vadd.f32 %v5197_v63, %v3665_v31  ;;  %v3667_v22 = vpop.f32.mrb[107].mxu0  ;;  %v3907_v50 = vadd.f32 %v7029_v9, %v3906_v1 }
 0x336   : > { %v4917_v16 = vpack.c.bf16 %v4040_v52, %v4040_v52  ;;  %v4041_v48 = vmax.f32 %v3915_v41, 0.0 }
 0x337   : > { %v4915_v37 = vpack.c.bf16 %v4038_v24, %v4038_v24  ;;  %v4039_v10 = vmax.f32 %v3907_v50, 0.0  ;;  %v7265_v50 = vld [vmem:[#allocation11_spill] sm:$0xff] }
 0x338   : > { %4361 = vst.msk [vmem:[%s6947_s7 + $0xa8] sm:$0xf] %vm4318_vm0, %v4917_v16  ;;  %v4918_v34 = vpack.c.bf16 %v4041_v48, %v4041_v48  ;;  %v5207_v16 = vadd.f32 %v7137_v36, %v7265_v50 }
 0x339   : > { %4359 = vst.msk [vmem:[%s6947_s7 + $0xa0] sm:$0xf] %vm4318_vm0, %v4915_v37  ;;  %v4916_v3 = vpack.c.bf16 %v4039_v10, %v4039_v10  ;;  %v5041_v21 = vpop.f32.mrb[172].mxu1 }
 0x33a   : > { %4362 = vst.msk [vmem:[%s6947_s7 + $0xac] sm:$0xf] %vm4318_vm0, %v4918_v34  ;;  %v3670_v4 = vpop.f32.mrb[108].mxu0  ;;  %v3928_v9 = vadd.f32 %v7085_v6, %v5041_v21  ;;  %v3919_v57 = vpop.f32.mrb[173].mxu1  ;;  %v7266_v34 = vld [vmem:[#allocation12_spill] sm:$0xff] }
 0x33b   : > { %4360 = vst.msk [vmem:[%s6947_s7 + $0xa4] sm:$0xf] %vm4318_vm0, %v4916_v3  ;;  %v5200_v0 = vadd.f32 %v5199_v61, %v3670_v4  ;;  %v3672_v40 = vpop.f32.mrb[109].mxu0  ;;  %v3920_v45 = vadd.f32 %v7065_v18, %v3919_v57  ;;  %v5042_v58 = vpop.f32.mrb[174].mxu1  ;;  %v5209_v39 = vadd.f32 %v7137_v36, %v7266_v34 }
 0x33c   : > { %v4044_v23 = vmax.f32 %v3928_v9, 0.0  ;;  %v3673_v62 = vpop.f32.mrb[110].mxu0  ;;  %v3931_v33 = vadd.f32 %v7089_v47, %v5042_v58  ;;  %v3922_v14 = vpop.f32.mrb[175].mxu1 }
 0x33d   : > { %v4042_v6 = vmax.f32 %v3920_v45, 0.0  ;;  %v5202_v35 = vadd.f32 %v5201_v15, %v3673_v62  ;;  %v3675_v20 = vpop.f32.mrb[111].mxu0  ;;  %v3923_v12 = vadd.f32 %v7069_v5, %v3922_v14 }
 0x33e   : > { %v4921_v2 = vpack.c.bf16 %v4044_v23, %v4044_v23  ;;  %v4045_v26 = vmax.f32 %v3931_v33, 0.0 }
 0x33f   : > { %v4919_v60 = vpack.c.bf16 %v4042_v6, %v4042_v6  ;;  %v4043_v43 = vmax.f32 %v3923_v12, 0.0  ;;  %v7267_v6 = vld [vmem:[#allocation13_spill] sm:$0xff] }
 0x340   : > { %4365 = vst.msk [vmem:[%s6947_s7 + $0xb8] sm:$0xf] %vm4318_vm0, %v4921_v2  ;;  %v4922_v18 = vpack.c.bf16 %v4045_v26, %v4045_v26  ;;  %v5211_v20 = vadd.f32 %v7137_v36, %v7267_v6 }
 0x341   : > { %4363 = vst.msk [vmem:[%s6947_s7 + $0xb0] sm:$0xf] %vm4318_vm0, %v4919_v60  ;;  %v4920_v47 = vpack.c.bf16 %v4043_v43, %v4043_v43  ;;  %v5045_v59 = vpop.f32.mrb[176].mxu1  ;;  %v7268_v60 = vld [vmem:[#allocation14_spill] sm:$0xff] }
 0x342   : > { %4366 = vst.msk [vmem:[%s6947_s7 + $0xbc] sm:$0xf] %vm4318_vm0, %v4922_v18  ;;  %v3678_v54 = vpop.f32.mrb[112].mxu0  ;;  %v3944_v5 = vadd.f32 %v7125_v13, %v5045_v59  ;;  %v3935_v17 = vpop.f32.mrb[177].mxu1  ;;  %v5213_v43 = vadd.f32 %v7137_v36, %v7268_v60 }
 0x343   : > { %4364 = vst.msk [vmem:[%s6947_s7 + $0xb4] sm:$0xf] %vm4318_vm0, %v4920_v47  ;;  %v5204_v7 = vadd.f32 %v5203_v28, %v3678_v54  ;;  %v3680_v53 = vpop.f32.mrb[113].mxu0  ;;  %v3936_v11 = vadd.f32 %v7105_v46, %v3935_v17  ;;  %v5046_v55 = vpop.f32.mrb[178].mxu1 }
 0x344   : > { %v4048_v8 = vmax.f32 %v3944_v5, 0.0  ;;  %v3681_v63 = vpop.f32.mrb[114].mxu0  ;;  %v3947_v44 = vadd.f32 %v7129_v56, %v5046_v55  ;;  %v3938_v32 = vpop.f32.mrb[179].mxu1 }
 0x345   : > { %v4046_v13 = vmax.f32 %v3936_v11, 0.0  ;;  %v5206_v30 = vadd.f32 %v5205_v51, %v3681_v63  ;;  %v3683_v52 = vpop.f32.mrb[115].mxu0  ;;  %v3939_v31 = vadd.f32 %v7109_v29, %v3938_v32 }
 0x346   : > { %v4925_v41 = vpack.c.bf16 %v4048_v8, %v4048_v8  ;;  %v4049_v1 = vmax.f32 %v3947_v44, 0.0 }
 0x347   : > { %v4923_v24 = vpack.c.bf16 %v4046_v13, %v4046_v13  ;;  %v4047_v22 = vmax.f32 %v3939_v31, 0.0 }
 0x348   : > { %4369 = vst.msk [vmem:[%s6947_s7 + $0xc8] sm:$0xf] %vm4318_vm0, %v4925_v41  ;;  %v4926_v46 = vpack.c.bf16 %v4049_v1, %v4049_v1 }
 0x349   : > { %4367 = vst.msk [vmem:[%s6947_s7 + $0xc0] sm:$0xf] %vm4318_vm0, %v4923_v24  ;;  %v4924_v56 = vpack.c.bf16 %v4047_v22, %v4047_v22  ;;  %v5049_v48 = vpop.f32.mrb[180].mxu1 }
 0x34a   : > { %4370 = vst.msk [vmem:[%s6947_s7 + $0xcc] sm:$0xf] %vm4318_vm0, %v4926_v46  ;;  %v3686_v37 = vpop.f32.mrb[116].mxu0  ;;  %v3960_v10 = vadd.f32 %v5200_v0, %v5049_v48  ;;  %v3951_v29 = vpop.f32.mrb[181].mxu1 }
 0x34b   : > { %4368 = vst.msk [vmem:[%s6947_s7 + $0xc4] sm:$0xf] %vm4318_vm0, %v4924_v56  ;;  %v5208_v61 = vadd.f32 %v5207_v16, %v3686_v37  ;;  %v3688_v3 = vpop.f32.mrb[117].mxu0  ;;  %v3952_v21 = vadd.f32 %v7150_v49, %v3951_v29  ;;  %v5050_v4 = vpop.f32.mrb[182].mxu1 }
 0x34c   : > { %v4052_v9 = vmax.f32 %v3960_v10, 0.0  ;;  %v3689_v57 = vpop.f32.mrb[118].mxu0  ;;  %v3963_v27 = vadd.f32 %v5202_v35, %v5050_v4  ;;  %v3954_v15 = vpop.f32.mrb[183].mxu1 }
 0x34d   : > { %v4050_v40 = vmax.f32 %v3952_v21, 0.0  ;;  %v5210_v0 = vadd.f32 %v5209_v39, %v3689_v57  ;;  %v3691_v45 = vpop.f32.mrb[119].mxu0  ;;  %v3955_v58 = vadd.f32 %v7154_v42, %v3954_v15 }
 0x34e   : > { %v4929_v23 = vpack.c.bf16 %v4052_v9, %v4052_v9  ;;  %v4053_v62 = vmax.f32 %v3963_v27, 0.0 }
 0x34f   : > { %v4927_v33 = vpack.c.bf16 %v4050_v40, %v4050_v40  ;;  %v4051_v14 = vmax.f32 %v3955_v58, 0.0 }
 0x350   : > { %4373 = vst.msk [vmem:[%s6947_s7 + $0xd8] sm:$0xf] %vm4318_vm0, %v4929_v23  ;;  %v4930_v49 = vpack.c.bf16 %v4053_v62, %v4053_v62 }
 0x351   : > { %4371 = vst.msk [vmem:[%s6947_s7 + $0xd0] sm:$0xf] %vm4318_vm0, %v4927_v33  ;;  %v4928_v35 = vpack.c.bf16 %v4051_v14, %v4051_v14  ;;  %v5053_v12 = vpop.f32.mrb[184].mxu1 }
 0x352   : > { %4374 = vst.msk [vmem:[%s6947_s7 + $0xdc] sm:$0xf] %vm4318_vm0, %v4930_v49  ;;  %v3694_v2 = vpop.f32.mrb[120].mxu0  ;;  %v3976_v26 = vadd.f32 %v5208_v61, %v5053_v12  ;;  %v3967_v42 = vpop.f32.mrb[185].mxu1 }
 0x353   : > { %4372 = vst.msk [vmem:[%s6947_s7 + $0xd4] sm:$0xf] %vm4318_vm0, %v4928_v35  ;;  %v5212_v18 = vadd.f32 %v5211_v20, %v3694_v2  ;;  %v3696_v25 = vpop.f32.mrb[121].mxu0  ;;  %v3968_v28 = vadd.f32 %v5204_v7, %v3967_v42  ;;  %v5054_v47 = vpop.f32.mrb[186].mxu1  ;;  %v7269_v7 = vld [vmem:[#allocation15_spill] sm:$0xff] }
 0x354   : > { %v4056_v59 = vmax.f32 %v3976_v26, 0.0  ;;  %v3697_v54 = vpop.f32.mrb[122].mxu0  ;;  %v3979_v5 = vadd.f32 %v5210_v0, %v5054_v47  ;;  %v3970_v17 = vpop.f32.mrb[187].mxu1  ;;  %v5215_v13 = vadd.f32 %v7137_v36, %v7269_v7 }
 0x355   : > { %v4054_v19 = vmax.f32 %v3968_v28, 0.0  ;;  %v5214_v51 = vadd.f32 %v5213_v43, %v3697_v54  ;;  %v3699_v53 = vpop.f32.mrb[123].mxu0  ;;  %v3971_v11 = vadd.f32 %v5206_v30, %v3970_v17  ;;  %v5217_v30 = vadd.f32 %v7137_v36, %v6930_v38 }
 0x356   : > { %v4933_v55 = vpack.c.bf16 %v4056_v59, %v4056_v59  ;;  %v4057_v8 = vmax.f32 %v3979_v5, 0.0 }
 0x357   : > { %v4931_v63 = vpack.c.bf16 %v4054_v19, %v4054_v19  ;;  %v4055_v44 = vmax.f32 %v3971_v11, 0.0 }
 0x358   : > { %4377 = vst.msk [vmem:[%s6947_s7 + $0xe8] sm:$0xf] %vm4318_vm0, %v4933_v55  ;;  %v4934_v32 = vpack.c.bf16 %v4057_v8, %v4057_v8 }
 0x359   : > { %4375 = vst.msk [vmem:[%s6947_s7 + $0xe0] sm:$0xf] %vm4318_vm0, %v4931_v63  ;;  %v4932_v52 = vpack.c.bf16 %v4055_v44, %v4055_v44  ;;  %v5057_v31 = vpop.f32.mrb[188].mxu1 }
 0x35a   : > { %4378 = vst.msk [vmem:[%s6947_s7 + $0xec] sm:$0xf] %vm4318_vm0, %v4934_v32  ;;  %v3702_v41 = vpop.f32.mrb[124].mxu0  ;;  %v3983_v1 = vpop.f32.mrb[189].mxu1 }
 0x35b   : > { %4376 = vst.msk [vmem:[%s6947_s7 + $0xe4] sm:$0xf] %vm4318_vm0, %v4932_v52  ;;  %v5216_v24 = vadd.f32 %v5215_v13, %v3702_v41  ;;  %v3704_v22 = vpop.f32.mrb[125].mxu0  ;;  %v3984_v46 = vadd.f32 %v5212_v18, %v3983_v1  ;;  %v5058_v50 = vpop.f32.mrb[190].mxu1 }
 0x35c   : > { %v3705_v16 = vpop.f32.mrb[126].mxu0  ;;  %v3986_v56 = vpop.f32.mrb[191].mxu1 }
 0x35d   : > { %v3992_v48 = vadd.f32 %v5216_v24, %v5057_v31  ;;  %v4058_v37 = vmax.f32 %v3984_v46, 0.0  ;;  %v5218_v10 = vadd.f32 %v5217_v30, %v3705_v16  ;;  %v3707_v29 = vpop.f32.mrb[127].mxu0  ;;  %v3987_v34 = vadd.f32 %v5214_v51, %v3986_v56 }
 0x35f   : > { %v4060_v39 = vmax.f32 %v3992_v48, 0.0  ;;  %v4935_v61 = vpack.c.bf16 %v4058_v37, %v4058_v37  ;;  %v3995_v38 = vadd.f32 %v5218_v10, %v5058_v50  ;;  %v4059_v36 = vmax.f32 %v3987_v34, 0.0 }
 0x361   : > { %v4937_v3 = vpack.c.bf16 %v4060_v39, %v4060_v39  ;;  %4379 = vst.msk [vmem:[%s6947_s7 + $0xf0] sm:$0xf] %vm4318_vm0, %v4935_v61  ;;  %v4061_v21 = vmax.f32 %v3995_v38, 0.0  ;;  %v4936_v4 = vpack.c.bf16 %v4059_v36, %v4059_v36 }
 0x363   : > { %4381 = vst.msk [vmem:[%s6947_s7 + $0xf8] sm:$0xf] %vm4318_vm0, %v4937_v3  ;;  %v4938_v9 = vpack.c.bf16 %v4061_v21, %v4061_v21  ;;  %4380 = vst.msk [vmem:[%s6947_s7 + $0xf4] sm:$0xf] %vm4318_vm0, %v4936_v4 }
 0x365   : > { %4382 = vst.msk [vmem:[%s6947_s7 + $0xfc] sm:$0xf] %vm4318_vm0, %v4938_v9 }
 0x366 PF: > { %s13_s12 = sadd.s32 1, %s5980_s12  }
 0x367   : > { %p10_p4 = scmp.ge.s32.totalorder %s13_s12, 4  }
 0x369   :  { %12 = sbr.rel (!%p10_p4) target bundleno = 1 (0x1), region = 62 }

// kernel: squeezenet_forward.15
= control target key start
LH: loop header
LB: loop body
LE: loop exit
PB: predicated region body
PF: predicated region fallthrough
CT: control target
= control target key end

     0   :  { %vm110_vm0 = vcmask 523264   ;;  %s579_s1 = inlined_call_operand.vmem [shape: bf16[64,128], index: 1, kind: input, shape index: {}]   ;;  %s580_s0 = inlined_call_operand.vmem [shape: bf16[128,64], index: 0, kind: input, shape index: {}]   ;;  %s581_s2 = inlined_call_operand.vmem [shape: f32[1,128], index: 2, kind: input, shape index: {}]   ;;  %s582_s3 = inlined_call_operand.vmem [shape: bf16[128,128], index: 3, kind: output, shape index: {}]  }
   0x1   :  { %v476_v0 = vld [vmem:[%s579_s1] sm:$0xff]   ;;  %v477_v1 = vld [vmem:[%s579_s1 + $0x8] sm:$0xff]   ;;  %v478_v2 = vld [vmem:[%s579_s1 + $0x10] sm:$0xff]  }
   0x2   :  { %444 = vmatprep.subr.bf16.mxu0 %v476_v0  ;;  %468 = vmatprep.subr.bf16.mxu1 %v476_v0  ;;  %v480_v3 = vld [vmem:[%s580_s0] sm:$0xff]   ;;  %v479_v5 = vld [vmem:[%s579_s1 + $0x18] sm:$0xff]   ;;  %v482_v6 = vld [vmem:[%s580_s0 + $0x8] sm:$0xff]  }
   0x3   :  { %445 = vmatpush3.bf16.msra.mxu0 %v476_v0  ;;  %472 = vmatpush3.bf16.msra.mxu1 %v476_v0  ;;  %v481_v4 = vld [vmem:[%s580_s0 + $0x20] sm:$0xff]   ;;  %v483_v7 = vld [vmem:[%s580_s0 + $0x28] sm:$0xff]   ;;  %v484_v8 = vld [vmem:[%s580_s0 + $0x10] sm:$0xff]  }
   0x4   :  { %446 = vmatprep.subr.bf16.mxu0 %v477_v1  ;;  %469 = vmatprep.subr.bf16.mxu1 %v477_v1  ;;  %v485_v9 = vld [vmem:[%s580_s0 + $0x30] sm:$0xff]   ;;  %v486_v10 = vld [vmem:[%s580_s0 + $0x18] sm:$0xff]   ;;  %v332_v12 = vld [vmem:[%s581_s2] ss:$0 sm:$0xff] }
   0x5   :  { %452 = vmatprep.mubr.msk.bf16.mxu0 %vm110_vm0, %v480_v3  ;;  %460 = vmatprep.mubr.msk.bf16.mxu1 %vm110_vm0, %v481_v4  ;;  %v487_v11 = vld [vmem:[%s580_s0 + $0x38] sm:$0xff]  }
   0x7   :  { %447 = vmatpush3.bf16.msra.mxu0 %v477_v1  ;;  %473 = vmatpush3.bf16.msra.mxu1 %v477_v1 }
   0x8   :  { %448 = vmatprep.subr.bf16.mxu0 %v478_v2  ;;  %470 = vmatprep.subr.bf16.mxu1 %v478_v2 }
   0xb   :  { %449 = vmatpush3.bf16.msra.mxu0 %v478_v2  ;;  %474 = vmatpush3.bf16.msra.mxu1 %v478_v2 }
   0xc   :  { %450 = vmatprep.subr.bf16.mxu0 %v479_v5  ;;  %471 = vmatprep.subr.bf16.mxu1 %v479_v5 }
   0xf   :  { %451 = vmatpush3.bf16.msra.mxu0 %v479_v5  ;;  %475 = vmatpush3.bf16.msra.mxu1 %v479_v5 }
  0x12   :  { %453 = vmatmul.mubr.msk.bf16.vlgmr.msra.gmra.mrb[0].mxu0 %vm110_vm0, %v482_v6  ;;  %461 = vmatmul.mubr.msk.bf16.vlgmr.msra.gmra.mrb[0].mxu1 %vm110_vm0, %v483_v7 }
  0x13   :  { %456 = vmatprep.mubr.msk.bf16.mxu0 %vm110_vm0, %v484_v8  ;;  %464 = vmatprep.mubr.msk.bf16.mxu1 %vm110_vm0, %v485_v9 }
  0x1a   :  { %457 = vmatmul.mubr.msk.bf16.gmra.mrb[4].mxu0 %vm110_vm0, %v486_v10  ;;  %465 = vmatmul.mubr.msk.bf16.gmra.mrb[4].mxu1 %vm110_vm0, %v487_v11 }
  0xe5   :  { %v454_v13 = vpop.f32.mrb[0].mxu0  ;;  %v462_v14 = vpop.f32.mrb[0].mxu1 }
  0xe6   :  { %v178_v15 = vadd.f32 %v454_v13, %v332_v12  ;;  %v210_v16 = vadd.f32 %v462_v14, %v332_v12  ;;  %v169_v17 = vpop.f32.mrb[1].mxu0  ;;  %v201_v18 = vpop.f32.mrb[1].mxu1 }
  0xe7   :  { %v170_v19 = vadd.f32 %v332_v12, %v169_v17  ;;  %v202_v20 = vadd.f32 %v332_v12, %v201_v18  ;;  %v455_v21 = vpop.f32.mrb[2].mxu0  ;;  %v463_v22 = vpop.f32.mrb[2].mxu1 }
  0xe8   :  { %v181_v23 = vadd.f32 %v455_v21, %v332_v12  ;;  %v213_v24 = vadd.f32 %v463_v22, %v332_v12  ;;  %v172_v25 = vpop.f32.mrb[3].mxu0  ;;  %v204_v26 = vpop.f32.mrb[3].mxu1  ;;  %v234_v29 = vmax.f32 %v178_v15, 0.0  ;;  %v242_v30 = vmax.f32 %v210_v16, 0.0 }
  0xe9   :  { %v173_v27 = vadd.f32 %v332_v12, %v172_v25  ;;  %v205_v28 = vadd.f32 %v332_v12, %v204_v26  ;;  %v232_v33 = vmax.f32 %v170_v19, 0.0  ;;  %v240_v34 = vmax.f32 %v202_v20, 0.0 }
  0xea   :  { %v235_v31 = vmax.f32 %v181_v23, 0.0  ;;  %v243_v32 = vmax.f32 %v213_v24, 0.0 }
  0xeb   :  { %v233_v35 = vmax.f32 %v173_v27, 0.0  ;;  %v241_v36 = vmax.f32 %v205_v28, 0.0 }
  0xec   :  { %v393_v37 = vpack.c.bf16 %v235_v31, %v234_v29  ;;  %v413_v38 = vpack.c.bf16 %v243_v32, %v242_v30 }
  0xed   :  { %v388_v39 = vpack.c.bf16 %v233_v35, %v232_v33  ;;  %v408_v40 = vpack.c.bf16 %v241_v36, %v240_v34  ;;  %v458_v41 = vpop.f32.mrb[4].mxu0  ;;  %v466_v42 = vpop.f32.mrb[4].mxu1 }
  0xee   :  { %425 = vst [vmem:[%s582_s3 + $0x8] sm:$0xff] %v393_v37   ;;  %429 = vst [vmem:[%s582_s3 + $0x28] sm:$0xff] %v413_v38   ;;  %v194_v43 = vadd.f32 %v458_v41, %v332_v12  ;;  %v226_v44 = vadd.f32 %v466_v42, %v332_v12  ;;  %v185_v45 = vpop.f32.mrb[5].mxu0  ;;  %v217_v46 = vpop.f32.mrb[5].mxu1 }
  0xef   :  { %389 = vst [vmem:[%s582_s3] sm:$0xff] %v388_v39   ;;  %428 = vst [vmem:[%s582_s3 + $0x20] sm:$0xff] %v408_v40   ;;  %v186_v47 = vadd.f32 %v332_v12, %v185_v45  ;;  %v218_v48 = vadd.f32 %v332_v12, %v217_v46  ;;  %v459_v49 = vpop.f32.mrb[6].mxu0  ;;  %v467_v50 = vpop.f32.mrb[6].mxu1 }
  0xf0   :  { %v197_v51 = vadd.f32 %v459_v49, %v332_v12  ;;  %v229_v52 = vadd.f32 %v467_v50, %v332_v12  ;;  %v188_v53 = vpop.f32.mrb[7].mxu0  ;;  %v220_v54 = vpop.f32.mrb[7].mxu1  ;;  %v238_v57 = vmax.f32 %v194_v43, 0.0  ;;  %v246_v58 = vmax.f32 %v226_v44, 0.0 }
  0xf1   :  { %v189_v55 = vadd.f32 %v332_v12, %v188_v53  ;;  %v221_v56 = vadd.f32 %v332_v12, %v220_v54  ;;  %v236_v61 = vmax.f32 %v186_v47, 0.0  ;;  %v244_v62 = vmax.f32 %v218_v48, 0.0 }
  0xf2   :  { %v239_v59 = vmax.f32 %v197_v51, 0.0  ;;  %v247_v60 = vmax.f32 %v229_v52, 0.0 }
  0xf3   :  { %v237_v63 = vmax.f32 %v189_v55, 0.0  ;;  %v245_v0 = vmax.f32 %v221_v56, 0.0 }
  0xf4   :  { %v403_v1 = vpack.c.bf16 %v239_v59, %v238_v57  ;;  %v423_v2 = vpack.c.bf16 %v247_v60, %v246_v58 }
  0xf5   :  { %v398_v3 = vpack.c.bf16 %v237_v63, %v236_v61  ;;  %v418_v4 = vpack.c.bf16 %v245_v0, %v244_v62 }
  0xf6   :  { %427 = vst [vmem:[%s582_s3 + $0x18] sm:$0xff] %v403_v1   ;;  %431 = vst [vmem:[%s582_s3 + $0x38] sm:$0xff] %v423_v2  }
  0xf7   :  { %426 = vst [vmem:[%s582_s3 + $0x10] sm:$0xff] %v398_v3   ;;  %430 = vst [vmem:[%s582_s3 + $0x30] sm:$0xff] %v418_v4  }

// kernel: squeezenet_forward.16
= control target key start
LH: loop header
LB: loop body
LE: loop exit
PB: predicated region body
PF: predicated region fallthrough
CT: control target
= control target key end

     0   :  { %s1373_s1 = inlined_call_operand.vmem [shape: bf16[512,128], index: 1, kind: input, shape index: {}]   ;;  %s1374_s0 = inlined_call_operand.vmem [shape: bf16[128,512], index: 0, kind: input, shape index: {}]   ;;  %s1375_s2 = inlined_call_operand.vmem [shape: f32[1,128], index: 2, kind: input, shape index: {}]   ;;  %s1376_s3 = inlined_call_operand.vmem [shape: bf16[128,128], index: 3, kind: output, shape index: {}]  }
   0x1   :  { %v1036_v0 = vld [vmem:[%s1373_s1 + $0x40] sm:$0xff]   ;;  %v1040_v4 = vld [vmem:[%s1373_s1 + $0x48] sm:$0xff]   ;;  %v1044_v8 = vld [vmem:[%s1373_s1 + $0x50] sm:$0xff]  }
   0x2   :  { %v1037_v1 = vld [vmem:[%s1373_s1 + $0xc0] sm:$0xff]   ;;  %908 = vmatprep.subr.bf16.mxu0 %v1036_v0  ;;  %v1041_v5 = vld [vmem:[%s1373_s1 + $0xc8] sm:$0xff]   ;;  %v1045_v9 = vld [vmem:[%s1373_s1 + $0xd0] sm:$0xff]  }
   0x3   :  { %v1038_v2 = vld [vmem:[%s1373_s1] sm:$0xff]   ;;  %972 = vmatprep.subr.bf16.mxu1 %v1037_v1  ;;  %v1042_v6 = vld [vmem:[%s1373_s1 + $0x8] sm:$0xff]   ;;  %v1046_v10 = vld [vmem:[%s1373_s1 + $0x10] sm:$0xff]  }
   0x4   :  { %v1039_v3 = vld [vmem:[%s1373_s1 + $0x80] sm:$0xff]   ;;  %909 = vmatpush3.bf16.msra.mxu0 %v1038_v2  ;;  %v1043_v7 = vld [vmem:[%s1373_s1 + $0x88] sm:$0xff]   ;;  %v1047_v11 = vld [vmem:[%s1373_s1 + $0x90] sm:$0xff]  }
   0x5   :  { %973 = vmatpush3.bf16.msra.mxu1 %v1039_v3  ;;  %910 = vmatprep.subr.bf16.mxu0 %v1040_v4  ;;  %v1048_v12 = vld [vmem:[%s1373_s1 + $0x58] sm:$0xff]   ;;  %v1052_v16 = vld [vmem:[%s1373_s1 + $0x60] sm:$0xff]   ;;  %v1056_v20 = vld [vmem:[%s1373_s1 + $0x68] sm:$0xff]  }
   0x6   :  { %974 = vmatprep.subr.bf16.mxu1 %v1041_v5  ;;  %v1049_v13 = vld [vmem:[%s1373_s1 + $0xd8] sm:$0xff]   ;;  %v1053_v17 = vld [vmem:[%s1373_s1 + $0xe0] sm:$0xff]   ;;  %v1057_v21 = vld [vmem:[%s1373_s1 + $0xe8] sm:$0xff]  }
   0x7   :  { %v1050_v14 = vld [vmem:[%s1373_s1 + $0x18] sm:$0xff]   ;;  %v1054_v18 = vld [vmem:[%s1373_s1 + $0x20] sm:$0xff]   ;;  %v1058_v22 = vld [vmem:[%s1373_s1 + $0x28] sm:$0xff]  }
   0x8   :  { %911 = vmatpush3.bf16.msra.mxu0 %v1042_v6  ;;  %v1051_v15 = vld [vmem:[%s1373_s1 + $0x98] sm:$0xff]   ;;  %v1055_v19 = vld [vmem:[%s1373_s1 + $0xa0] sm:$0xff]   ;;  %v1059_v23 = vld [vmem:[%s1373_s1 + $0xa8] sm:$0xff]  }
   0x9   :  { %975 = vmatpush3.bf16.msra.mxu1 %v1043_v7  ;;  %912 = vmatprep.subr.bf16.mxu0 %v1044_v8  ;;  %v1060_v24 = vld [vmem:[%s1373_s1 + $0x70] sm:$0xff]   ;;  %v1064_v28 = vld [vmem:[%s1373_s1 + $0x78] sm:$0xff]   ;;  %v1331_v2 = vld [vmem:[%s1375_s2] ss:$0 sm:$0xff] }
   0xa   :  { %976 = vmatprep.subr.bf16.mxu1 %v1045_v9  ;;  %v1061_v25 = vld [vmem:[%s1373_s1 + $0xf0] sm:$0xff]   ;;  %v1065_v29 = vld [vmem:[%s1373_s1 + $0xf8] sm:$0xff]  }
   0xb   :  { %v1062_v26 = vld [vmem:[%s1373_s1 + $0x30] sm:$0xff]   ;;  %v1066_v30 = vld [vmem:[%s1373_s1 + $0x38] sm:$0xff]  }
   0xc   :  { %913 = vmatpush3.bf16.msra.mxu0 %v1046_v10  ;;  %v1063_v27 = vld [vmem:[%s1373_s1 + $0xb0] sm:$0xff]   ;;  %v1067_v31 = vld [vmem:[%s1373_s1 + $0xb8] sm:$0xff]  }
   0xd   :  { %977 = vmatpush3.bf16.msra.mxu1 %v1047_v11  ;;  %914 = vmatprep.subr.bf16.mxu0 %v1048_v12  ;;  %v1068_v32 = vld [vmem:[%s1374_s0] ss:$16 sps:$4 sm:$0xff]   ;;  %v1070_v33 = vld [vmem:[%s1374_s0 + $0x4] ss:$16 sps:$4 sm:$0xff]   ;;  %v1071_v34 = vld [vmem:[%s1374_s0 + $0x8] ss:$16 sps:$4 sm:$0xff]  }
   0xe   :  { %978 = vmatprep.subr.bf16.mxu1 %v1049_v13  ;;  %v1073_v35 = vld [vmem:[%s1374_s0 + $0xc] ss:$16 sps:$4 sm:$0xff]   ;;  %502 = vmatprep.mubr.bf16.mxu0 %v1070_v33  ;;  %v1074_v36 = vld [vmem:[%s1374_s0 + $0x24] ss:$16 sps:$4 sm:$0xff]   ;;  %v1078_v38 = vld [vmem:[%s1374_s0 + $0x20] ss:$16 sps:$4 sm:$0xff]  }
   0xf   :  { %599 = vmatprep.mubr.bf16.mxu1 %v1073_v35  ;;  %v1076_v37 = vld [vmem:[%s1374_s0 + $0x2c] ss:$16 sps:$4 sm:$0xff]   ;;  %v1079_v39 = vld [vmem:[%s1374_s0 + $0x28] ss:$16 sps:$4 sm:$0xff]   ;;  %v1080_v40 = vld [vmem:[%s1374_s0 + $0x44] ss:$16 sps:$4 sm:$0xff]  }
  0x10   :  { %915 = vmatpush3.bf16.msra.mxu0 %v1050_v14  ;;  %v1082_v41 = vld [vmem:[%s1374_s0 + $0x4c] ss:$16 sps:$4 sm:$0xff]   ;;  %v1084_v42 = vld [vmem:[%s1374_s0 + $0x40] ss:$16 sps:$4 sm:$0xff]   ;;  %v1085_v43 = vld [vmem:[%s1374_s0 + $0x48] ss:$16 sps:$4 sm:$0xff]  }
  0x11   :  { %979 = vmatpush3.bf16.msra.mxu1 %v1051_v15  ;;  %916 = vmatprep.subr.bf16.mxu0 %v1052_v16  ;;  %v1086_v44 = vld [vmem:[%s1374_s0 + $0x64] ss:$16 sps:$4 sm:$0xff]   ;;  %v1088_v45 = vld [vmem:[%s1374_s0 + $0x6c] ss:$16 sps:$4 sm:$0xff]   ;;  %v1090_v46 = vld [vmem:[%s1374_s0 + $0x60] ss:$16 sps:$4 sm:$0xff]  }
  0x12   :  { %980 = vmatprep.subr.bf16.mxu1 %v1053_v17  ;;  %v1091_v47 = vld [vmem:[%s1374_s0 + $0x68] ss:$16 sps:$4 sm:$0xff]   ;;  %v1092_v48 = vld [vmem:[%s1374_s0 + $0x84] ss:$16 sps:$4 sm:$0xff]   ;;  %v1094_v49 = vld [vmem:[%s1374_s0 + $0x8c] ss:$16 sps:$4 sm:$0xff]  }
  0x13   :  { %v1096_v50 = vld [vmem:[%s1374_s0 + $0x80] ss:$16 sps:$4 sm:$0xff]   ;;  %v1097_v51 = vld [vmem:[%s1374_s0 + $0x88] ss:$16 sps:$4 sm:$0xff]   ;;  %v1098_v52 = vld [vmem:[%s1374_s0 + $0xa4] ss:$16 sps:$4 sm:$0xff]  }
  0x14   :  { %917 = vmatpush3.bf16.msra.mxu0 %v1054_v18  ;;  %v1100_v53 = vld [vmem:[%s1374_s0 + $0xac] ss:$16 sps:$4 sm:$0xff]   ;;  %v1102_v54 = vld [vmem:[%s1374_s0 + $0xa0] ss:$16 sps:$4 sm:$0xff]   ;;  %v1103_v55 = vld [vmem:[%s1374_s0 + $0xa8] ss:$16 sps:$4 sm:$0xff]  }
  0x15   :  { %981 = vmatpush3.bf16.msra.mxu1 %v1055_v19  ;;  %918 = vmatprep.subr.bf16.mxu0 %v1056_v20  ;;  %v1104_v56 = vld [vmem:[%s1374_s0 + $0xc4] ss:$16 sps:$4 sm:$0xff]   ;;  %v1106_v57 = vld [vmem:[%s1374_s0 + $0xcc] ss:$16 sps:$4 sm:$0xff]   ;;  %v1108_v58 = vld [vmem:[%s1374_s0 + $0xc0] ss:$16 sps:$4 sm:$0xff]  }
  0x16   :  { %982 = vmatprep.subr.bf16.mxu1 %v1057_v21  ;;  %v1109_v59 = vld [vmem:[%s1374_s0 + $0xc8] ss:$16 sps:$4 sm:$0xff]   ;;  %v1110_v60 = vld [vmem:[%s1374_s0 + $0xe4] ss:$16 sps:$4 sm:$0xff]   ;;  %v1112_v61 = vld [vmem:[%s1374_s0 + $0xec] ss:$16 sps:$4 sm:$0xff]  }
  0x17   :  { %v1114_v62 = vld [vmem:[%s1374_s0 + $0xe0] ss:$16 sps:$4 sm:$0xff]   ;;  %v1115_v63 = vld [vmem:[%s1374_s0 + $0xe8] ss:$16 sps:$4 sm:$0xff]  }
  0x18   :  { %919 = vmatpush3.bf16.msra.mxu0 %v1058_v22 }
  0x19   :  { %983 = vmatpush3.bf16.msra.mxu1 %v1059_v23  ;;  %920 = vmatprep.subr.bf16.mxu0 %v1060_v24 }
  0x1a   :  { %984 = vmatprep.subr.bf16.mxu1 %v1061_v25 }
  0x1c   :  { %921 = vmatpush3.bf16.msra.mxu0 %v1062_v26 }
  0x1d   :  { %985 = vmatpush3.bf16.msra.mxu1 %v1063_v27  ;;  %922 = vmatprep.subr.bf16.mxu0 %v1064_v28 }
  0x1e   :  { %986 = vmatprep.subr.bf16.mxu1 %v1065_v29 }
  0x20   :  { %923 = vmatpush3.bf16.msra.mxu0 %v1066_v30 }
  0x21   :  { %987 = vmatpush3.bf16.msra.mxu1 %v1067_v31 }
  0x23   :  { %503 = vmatmul.mubr.bf16.vlgmr.msra.gmra.mrb[0].mxu0 %v1068_v32 }
  0x24   :  { %600 = vmatmul.mubr.bf16.vlgmr.msra.gmra.mrb[0].mxu1 %v1071_v34  ;;  %510 = vmatprep.mubr.bf16.mxu0 %v1074_v36 }
  0x25   :  { %607 = vmatprep.mubr.bf16.mxu1 %v1076_v37 }
  0x2b   :  { %511 = vmatmul.mubr.bf16.gmra.mrb[4].mxu0 %v1078_v38 }
  0x2c   :  { %608 = vmatmul.mubr.bf16.gmra.mrb[4].mxu1 %v1079_v39  ;;  %518 = vmatprep.mubr.bf16.mxu0 %v1080_v40 }
  0x2d   :  { %615 = vmatprep.mubr.bf16.mxu1 %v1082_v41 }
  0x33   :  { %519 = vmatmul.mubr.bf16.gmra.mrb[8].mxu0 %v1084_v42 }
  0x34   :  { %616 = vmatmul.mubr.bf16.gmra.mrb[8].mxu1 %v1085_v43  ;;  %526 = vmatprep.mubr.bf16.mxu0 %v1086_v44 }
  0x35   :  { %623 = vmatprep.mubr.bf16.mxu1 %v1088_v45 }
  0x3b   :  { %527 = vmatmul.mubr.bf16.gmra.mrb[12].mxu0 %v1090_v46 }
  0x3c   :  { %624 = vmatmul.mubr.bf16.gmra.mrb[12].mxu1 %v1091_v47  ;;  %534 = vmatprep.mubr.bf16.mxu0 %v1092_v48 }
  0x3d   :  { %631 = vmatprep.mubr.bf16.mxu1 %v1094_v49 }
  0x43   :  { %535 = vmatmul.mubr.bf16.gmra.mrb[16].mxu0 %v1096_v50 }
  0x44   :  { %632 = vmatmul.mubr.bf16.gmra.mrb[16].mxu1 %v1097_v51  ;;  %542 = vmatprep.mubr.bf16.mxu0 %v1098_v52 }
  0x45   :  { %639 = vmatprep.mubr.bf16.mxu1 %v1100_v53 }
  0x4b   :  { %543 = vmatmul.mubr.bf16.gmra.mrb[20].mxu0 %v1102_v54 }
  0x4c   :  { %640 = vmatmul.mubr.bf16.gmra.mrb[20].mxu1 %v1103_v55  ;;  %550 = vmatprep.mubr.bf16.mxu0 %v1104_v56 }
  0x4d   :  { %647 = vmatprep.mubr.bf16.mxu1 %v1106_v57 }
  0x53   :  { %551 = vmatmul.mubr.bf16.gmra.mrb[24].mxu0 %v1108_v58 }
  0x54   :  { %648 = vmatmul.mubr.bf16.gmra.mrb[24].mxu1 %v1109_v59  ;;  %558 = vmatprep.mubr.bf16.mxu0 %v1110_v60 }
  0x55   :  { %655 = vmatprep.mubr.bf16.mxu1 %v1112_v61 }
  0x5b   :  { %559 = vmatmul.mubr.bf16.gmra.mrb[28].mxu0 %v1114_v62 }
  0x5c   :  { %656 = vmatmul.mubr.bf16.gmra.mrb[28].mxu1 %v1115_v63 }
  0xf6   :  { %v924_v0 = vpop.f32.mrb[0].mxu0 }
  0xf7   :  { %v988_v1 = vpop.f32.mrb[0].mxu1  ;;  %v925_v3 = vpop.f32.mrb[1].mxu0 }
  0xf8   :  { %v926_v4 = vadd.f32 %v925_v3, %v924_v0  ;;  %v989_v5 = vpop.f32.mrb[1].mxu1  ;;  %v927_v6 = vpop.f32.mrb[2].mxu0 }
  0xf9   :  { %v990_v7 = vadd.f32 %v989_v5, %v988_v1  ;;  %v991_v8 = vpop.f32.mrb[2].mxu1  ;;  %v928_v9 = vpop.f32.mrb[3].mxu0 }
  0xfa   :  { %v505_v10 = vadd.f32 %v926_v4, %v1331_v2  ;;  %v929_v11 = vadd.f32 %v928_v9, %v927_v6  ;;  %v992_v12 = vpop.f32.mrb[3].mxu1 }
  0xfb   :  { %v993_v13 = vadd.f32 %v992_v12, %v991_v8 }
  0xfc   :  { %v602_v14 = vadd.f32 %v990_v7, %v505_v10  ;;  %v508_v15 = vadd.f32 %v929_v11, %v1331_v2 }
  0xfe   :  { %v605_v16 = vadd.f32 %v993_v13, %v508_v15  ;;  %v930_v17 = vpop.f32.mrb[4].mxu0  ;;  %v664_v20 = vmax.f32 %v602_v14, 0.0 }
  0xff   :  { %v994_v18 = vpop.f32.mrb[4].mxu1  ;;  %v931_v19 = vpop.f32.mrb[5].mxu0 }
 0x100   :  { %v665_v21 = vmax.f32 %v605_v16, 0.0  ;;  %v932_v22 = vadd.f32 %v931_v19, %v930_v17  ;;  %v995_v23 = vpop.f32.mrb[5].mxu1  ;;  %v933_v24 = vpop.f32.mrb[6].mxu0 }
 0x101   :  { %v996_v25 = vadd.f32 %v995_v23, %v994_v18  ;;  %v997_v26 = vpop.f32.mrb[6].mxu1  ;;  %v934_v27 = vpop.f32.mrb[7].mxu0 }
 0x102   :  { %v864_v28 = vpack.c.bf16 %v665_v21, %v664_v20  ;;  %v513_v29 = vadd.f32 %v932_v22, %v1331_v2  ;;  %v935_v30 = vadd.f32 %v934_v27, %v933_v24  ;;  %v998_v31 = vpop.f32.mrb[7].mxu1 }
 0x103   :  { %v999_v32 = vadd.f32 %v998_v31, %v997_v26 }
 0x104   :  { %865 = vst [vmem:[%s1376_s3] sm:$0xff] %v864_v28   ;;  %v610_v33 = vadd.f32 %v996_v25, %v513_v29  ;;  %v516_v34 = vadd.f32 %v935_v30, %v1331_v2 }
 0x106   :  { %v613_v35 = vadd.f32 %v999_v32, %v516_v34  ;;  %v936_v36 = vpop.f32.mrb[8].mxu0  ;;  %v666_v39 = vmax.f32 %v610_v33, 0.0 }
 0x107   :  { %v1000_v37 = vpop.f32.mrb[8].mxu1  ;;  %v937_v38 = vpop.f32.mrb[9].mxu0 }
 0x108   :  { %v667_v40 = vmax.f32 %v613_v35, 0.0  ;;  %v938_v41 = vadd.f32 %v937_v38, %v936_v36  ;;  %v1001_v42 = vpop.f32.mrb[9].mxu1  ;;  %v939_v43 = vpop.f32.mrb[10].mxu0 }
 0x109   :  { %v1002_v44 = vadd.f32 %v1001_v42, %v1000_v37  ;;  %v1003_v45 = vpop.f32.mrb[10].mxu1  ;;  %v940_v46 = vpop.f32.mrb[11].mxu0 }
 0x10a   :  { %v869_v47 = vpack.c.bf16 %v667_v40, %v666_v39  ;;  %v521_v48 = vadd.f32 %v938_v41, %v1331_v2  ;;  %v941_v49 = vadd.f32 %v940_v46, %v939_v43  ;;  %v1004_v50 = vpop.f32.mrb[11].mxu1 }
 0x10b   :  { %v1005_v51 = vadd.f32 %v1004_v50, %v1003_v45 }
 0x10c   :  { %901 = vst [vmem:[%s1376_s3 + $0x8] sm:$0xff] %v869_v47   ;;  %v618_v52 = vadd.f32 %v1002_v44, %v521_v48  ;;  %v524_v53 = vadd.f32 %v941_v49, %v1331_v2 }
 0x10e   :  { %v621_v54 = vadd.f32 %v1005_v51, %v524_v53  ;;  %v942_v55 = vpop.f32.mrb[12].mxu0  ;;  %v668_v58 = vmax.f32 %v618_v52, 0.0 }
 0x10f   :  { %v1006_v56 = vpop.f32.mrb[12].mxu1  ;;  %v943_v57 = vpop.f32.mrb[13].mxu0 }
 0x110   :  { %v669_v59 = vmax.f32 %v621_v54, 0.0  ;;  %v944_v60 = vadd.f32 %v943_v57, %v942_v55  ;;  %v1007_v61 = vpop.f32.mrb[13].mxu1  ;;  %v945_v62 = vpop.f32.mrb[14].mxu0 }
 0x111   :  { %v1008_v63 = vadd.f32 %v1007_v61, %v1006_v56  ;;  %v1009_v0 = vpop.f32.mrb[14].mxu1  ;;  %v946_v1 = vpop.f32.mrb[15].mxu0 }
 0x112   :  { %v874_v3 = vpack.c.bf16 %v669_v59, %v668_v58  ;;  %v529_v4 = vadd.f32 %v944_v60, %v1331_v2  ;;  %v947_v5 = vadd.f32 %v946_v1, %v945_v62  ;;  %v1010_v6 = vpop.f32.mrb[15].mxu1 }
 0x113   :  { %v1011_v7 = vadd.f32 %v1010_v6, %v1009_v0 }
 0x114   :  { %902 = vst [vmem:[%s1376_s3 + $0x10] sm:$0xff] %v874_v3   ;;  %v626_v8 = vadd.f32 %v1008_v63, %v529_v4  ;;  %v532_v9 = vadd.f32 %v947_v5, %v1331_v2 }
 0x116   :  { %v629_v10 = vadd.f32 %v1011_v7, %v532_v9  ;;  %v948_v11 = vpop.f32.mrb[16].mxu0  ;;  %v670_v14 = vmax.f32 %v626_v8, 0.0 }
 0x117   :  { %v1012_v12 = vpop.f32.mrb[16].mxu1  ;;  %v949_v13 = vpop.f32.mrb[17].mxu0 }
 0x118   :  { %v671_v15 = vmax.f32 %v629_v10, 0.0  ;;  %v950_v16 = vadd.f32 %v949_v13, %v948_v11  ;;  %v1013_v17 = vpop.f32.mrb[17].mxu1  ;;  %v951_v18 = vpop.f32.mrb[18].mxu0 }
 0x119   :  { %v1014_v19 = vadd.f32 %v1013_v17, %v1012_v12  ;;  %v1015_v20 = vpop.f32.mrb[18].mxu1  ;;  %v952_v21 = vpop.f32.mrb[19].mxu0 }
 0x11a   :  { %v879_v22 = vpack.c.bf16 %v671_v15, %v670_v14  ;;  %v537_v23 = vadd.f32 %v950_v16, %v1331_v2  ;;  %v953_v24 = vadd.f32 %v952_v21, %v951_v18  ;;  %v1016_v25 = vpop.f32.mrb[19].mxu1 }
 0x11b   :  { %v1017_v26 = vadd.f32 %v1016_v25, %v1015_v20 }
 0x11c   :  { %903 = vst [vmem:[%s1376_s3 + $0x18] sm:$0xff] %v879_v22   ;;  %v634_v27 = vadd.f32 %v1014_v19, %v537_v23  ;;  %v540_v28 = vadd.f32 %v953_v24, %v1331_v2 }
 0x11e   :  { %v637_v29 = vadd.f32 %v1017_v26, %v540_v28  ;;  %v954_v30 = vpop.f32.mrb[20].mxu0  ;;  %v672_v33 = vmax.f32 %v634_v27, 0.0 }
 0x11f   :  { %v1018_v31 = vpop.f32.mrb[20].mxu1  ;;  %v955_v32 = vpop.f32.mrb[21].mxu0 }
 0x120   :  { %v673_v34 = vmax.f32 %v637_v29, 0.0  ;;  %v956_v35 = vadd.f32 %v955_v32, %v954_v30  ;;  %v1019_v36 = vpop.f32.mrb[21].mxu1  ;;  %v957_v37 = vpop.f32.mrb[22].mxu0 }
 0x121   :  { %v1020_v38 = vadd.f32 %v1019_v36, %v1018_v31  ;;  %v1021_v39 = vpop.f32.mrb[22].mxu1  ;;  %v958_v40 = vpop.f32.mrb[23].mxu0 }
 0x122   :  { %v884_v41 = vpack.c.bf16 %v673_v34, %v672_v33  ;;  %v545_v42 = vadd.f32 %v956_v35, %v1331_v2  ;;  %v959_v43 = vadd.f32 %v958_v40, %v957_v37  ;;  %v1022_v44 = vpop.f32.mrb[23].mxu1 }
 0x123   :  { %v1023_v45 = vadd.f32 %v1022_v44, %v1021_v39 }
 0x124   :  { %904 = vst [vmem:[%s1376_s3 + $0x20] sm:$0xff] %v884_v41   ;;  %v642_v46 = vadd.f32 %v1020_v38, %v545_v42  ;;  %v548_v47 = vadd.f32 %v959_v43, %v1331_v2 }
 0x126   :  { %v645_v48 = vadd.f32 %v1023_v45, %v548_v47  ;;  %v960_v49 = vpop.f32.mrb[24].mxu0  ;;  %v674_v52 = vmax.f32 %v642_v46, 0.0 }
 0x127   :  { %v1024_v50 = vpop.f32.mrb[24].mxu1  ;;  %v961_v51 = vpop.f32.mrb[25].mxu0 }
 0x128   :  { %v675_v53 = vmax.f32 %v645_v48, 0.0  ;;  %v962_v54 = vadd.f32 %v961_v51, %v960_v49  ;;  %v1025_v55 = vpop.f32.mrb[25].mxu1  ;;  %v963_v56 = vpop.f32.mrb[26].mxu0 }
 0x129   :  { %v1026_v57 = vadd.f32 %v1025_v55, %v1024_v50  ;;  %v1027_v58 = vpop.f32.mrb[26].mxu1  ;;  %v964_v59 = vpop.f32.mrb[27].mxu0 }
 0x12a   :  { %v889_v60 = vpack.c.bf16 %v675_v53, %v674_v52  ;;  %v553_v61 = vadd.f32 %v962_v54, %v1331_v2  ;;  %v965_v62 = vadd.f32 %v964_v59, %v963_v56  ;;  %v1028_v63 = vpop.f32.mrb[27].mxu1 }
 0x12b   :  { %v1029_v0 = vadd.f32 %v1028_v63, %v1027_v58 }
 0x12c   :  { %905 = vst [vmem:[%s1376_s3 + $0x28] sm:$0xff] %v889_v60   ;;  %v650_v1 = vadd.f32 %v1026_v57, %v553_v61  ;;  %v556_v3 = vadd.f32 %v965_v62, %v1331_v2 }
 0x12e   :  { %v653_v4 = vadd.f32 %v1029_v0, %v556_v3  ;;  %v966_v5 = vpop.f32.mrb[28].mxu0  ;;  %v676_v8 = vmax.f32 %v650_v1, 0.0 }
 0x12f   :  { %v1030_v6 = vpop.f32.mrb[28].mxu1  ;;  %v967_v7 = vpop.f32.mrb[29].mxu0 }
 0x130   :  { %v677_v9 = vmax.f32 %v653_v4, 0.0  ;;  %v968_v10 = vadd.f32 %v967_v7, %v966_v5  ;;  %v1031_v11 = vpop.f32.mrb[29].mxu1  ;;  %v969_v12 = vpop.f32.mrb[30].mxu0 }
 0x131   :  { %v1032_v13 = vadd.f32 %v1031_v11, %v1030_v6  ;;  %v1033_v14 = vpop.f32.mrb[30].mxu1  ;;  %v970_v15 = vpop.f32.mrb[31].mxu0 }
 0x132   :  { %v894_v16 = vpack.c.bf16 %v677_v9, %v676_v8  ;;  %v561_v17 = vadd.f32 %v968_v10, %v1331_v2  ;;  %v971_v18 = vadd.f32 %v970_v15, %v969_v12  ;;  %v1034_v19 = vpop.f32.mrb[31].mxu1 }
 0x133   :  { %v1035_v20 = vadd.f32 %v1034_v19, %v1033_v14 }
 0x134   :  { %906 = vst [vmem:[%s1376_s3 + $0x30] sm:$0xff] %v894_v16   ;;  %v658_v21 = vadd.f32 %v1032_v13, %v561_v17  ;;  %v564_v22 = vadd.f32 %v971_v18, %v1331_v2 }
 0x136   :  { %v661_v23 = vadd.f32 %v1035_v20, %v564_v22  ;;  %v678_v24 = vmax.f32 %v658_v21, 0.0 }
 0x138   :  { %v679_v25 = vmax.f32 %v661_v23, 0.0 }
 0x13a   :  { %v899_v26 = vpack.c.bf16 %v679_v25, %v678_v24 }
 0x13c   :  { %907 = vst [vmem:[%s1376_s3 + $0x38] sm:$0xff] %v899_v26  }

// kernel: squeezenet_forward.17
= control target key start
LH: loop header
LB: loop body
LE: loop exit
PB: predicated region body
PF: predicated region fallthrough
CT: control target
= control target key end

     0   :  { %s618_s1 = inlined_call_operand.vmem [shape: bf16[128,128], index: 1, kind: input, shape index: {}]   ;;  %s619_s0 = inlined_call_operand.vmem [shape: bf16[128,128], index: 0, kind: input, shape index: {}]   ;;  %s620_s2 = inlined_call_operand.vmem [shape: f32[1,128], index: 2, kind: input, shape index: {}]   ;;  %s621_s3 = inlined_call_operand.vmem [shape: bf16[128,128], index: 3, kind: output, shape index: {}]  }
   0x1   :  { %v507_v0 = vld [vmem:[%s618_s1] sm:$0xff]   ;;  %v508_v1 = vld [vmem:[%s618_s1 + $0x8] sm:$0xff]   ;;  %v509_v2 = vld [vmem:[%s618_s1 + $0x10] sm:$0xff]  }
   0x2   :  { %459 = vmatprep.subr.bf16.mxu0 %v507_v0  ;;  %491 = vmatprep.subr.bf16.mxu1 %v507_v0  ;;  %v510_v3 = vld [vmem:[%s618_s1 + $0x18] sm:$0xff]   ;;  %v515_v4 = vld [vmem:[%s619_s0] sm:$0xff]   ;;  %v512_v7 = vld [vmem:[%s618_s1 + $0x28] sm:$0xff]  }
   0x3   :  { %460 = vmatpush3.bf16.msra.mxu0 %v507_v0  ;;  %499 = vmatpush3.bf16.msra.mxu1 %v507_v0  ;;  %v516_v5 = vld [vmem:[%s619_s0 + $0x20] sm:$0xff]   ;;  %v513_v8 = vld [vmem:[%s618_s1 + $0x30] sm:$0xff]   ;;  %v514_v9 = vld [vmem:[%s618_s1 + $0x38] sm:$0xff]  }
   0x4   :  { %461 = vmatprep.subr.bf16.mxu0 %v508_v1  ;;  %492 = vmatprep.subr.bf16.mxu1 %v508_v1  ;;  %v511_v6 = vld [vmem:[%s618_s1 + $0x20] sm:$0xff]   ;;  %v517_v10 = vld [vmem:[%s619_s0 + $0x8] sm:$0xff]   ;;  %v519_v12 = vld [vmem:[%s619_s0 + $0x10] sm:$0xff]  }
   0x5   :  { %475 = vmatprep.mubr.bf16.mxu0 %v515_v4  ;;  %483 = vmatprep.mubr.bf16.mxu1 %v516_v5  ;;  %v518_v11 = vld [vmem:[%s619_s0 + $0x28] sm:$0xff]   ;;  %v520_v13 = vld [vmem:[%s619_s0 + $0x30] sm:$0xff]   ;;  %v521_v14 = vld [vmem:[%s619_s0 + $0x18] sm:$0xff]  }
   0x6   :  { %v522_v15 = vld [vmem:[%s619_s0 + $0x38] sm:$0xff]   ;;  %v347_v16 = vld [vmem:[%s620_s2] ss:$0 sm:$0xff] }
   0x7   :  { %462 = vmatpush3.bf16.msra.mxu0 %v508_v1  ;;  %500 = vmatpush3.bf16.msra.mxu1 %v508_v1 }
   0x8   :  { %463 = vmatprep.subr.bf16.mxu0 %v509_v2  ;;  %493 = vmatprep.subr.bf16.mxu1 %v509_v2 }
   0xb   :  { %464 = vmatpush3.bf16.msra.mxu0 %v509_v2  ;;  %501 = vmatpush3.bf16.msra.mxu1 %v509_v2 }
   0xc   :  { %465 = vmatprep.subr.bf16.mxu0 %v510_v3  ;;  %494 = vmatprep.subr.bf16.mxu1 %v510_v3 }
   0xf   :  { %466 = vmatpush3.bf16.msra.mxu0 %v510_v3  ;;  %502 = vmatpush3.bf16.msra.mxu1 %v510_v3 }
  0x10   :  { %467 = vmatprep.subr.bf16.mxu0 %v511_v6  ;;  %495 = vmatprep.subr.bf16.mxu1 %v511_v6 }
  0x13   :  { %468 = vmatpush3.bf16.msra.mxu0 %v511_v6  ;;  %503 = vmatpush3.bf16.msra.mxu1 %v511_v6 }
  0x14   :  { %469 = vmatprep.subr.bf16.mxu0 %v512_v7  ;;  %496 = vmatprep.subr.bf16.mxu1 %v512_v7 }
  0x17   :  { %470 = vmatpush3.bf16.msra.mxu0 %v512_v7  ;;  %504 = vmatpush3.bf16.msra.mxu1 %v512_v7 }
  0x18   :  { %471 = vmatprep.subr.bf16.mxu0 %v513_v8  ;;  %497 = vmatprep.subr.bf16.mxu1 %v513_v8 }
  0x1b   :  { %472 = vmatpush3.bf16.msra.mxu0 %v513_v8  ;;  %505 = vmatpush3.bf16.msra.mxu1 %v513_v8 }
  0x1c   :  { %473 = vmatprep.subr.bf16.mxu0 %v514_v9  ;;  %498 = vmatprep.subr.bf16.mxu1 %v514_v9 }
  0x1f   :  { %474 = vmatpush3.bf16.msra.mxu0 %v514_v9  ;;  %506 = vmatpush3.bf16.msra.mxu1 %v514_v9 }
  0x22   :  { %476 = vmatmul.mubr.bf16.vlgmr.msra.gmra.mrb[0].mxu0 %v517_v10  ;;  %484 = vmatmul.mubr.bf16.vlgmr.msra.gmra.mrb[0].mxu1 %v518_v11 }
  0x23   :  { %479 = vmatprep.mubr.bf16.mxu0 %v519_v12  ;;  %487 = vmatprep.mubr.bf16.mxu1 %v520_v13 }
  0x2a   :  { %480 = vmatmul.mubr.bf16.gmra.mrb[4].mxu0 %v521_v14  ;;  %488 = vmatmul.mubr.bf16.gmra.mrb[4].mxu1 %v522_v15 }
  0xf5   :  { %v477_v17 = vpop.f32.mrb[0].mxu0  ;;  %v485_v18 = vpop.f32.mrb[0].mxu1 }
  0xf6   :  { %v193_v19 = vadd.f32 %v477_v17, %v347_v16  ;;  %v225_v20 = vadd.f32 %v485_v18, %v347_v16  ;;  %v184_v21 = vpop.f32.mrb[1].mxu0  ;;  %v216_v22 = vpop.f32.mrb[1].mxu1 }
  0xf7   :  { %v185_v23 = vadd.f32 %v347_v16, %v184_v21  ;;  %v217_v24 = vadd.f32 %v347_v16, %v216_v22  ;;  %v478_v25 = vpop.f32.mrb[2].mxu0  ;;  %v486_v26 = vpop.f32.mrb[2].mxu1 }
  0xf8   :  { %v196_v27 = vadd.f32 %v478_v25, %v347_v16  ;;  %v228_v28 = vadd.f32 %v486_v26, %v347_v16  ;;  %v187_v29 = vpop.f32.mrb[3].mxu0  ;;  %v219_v30 = vpop.f32.mrb[3].mxu1  ;;  %v249_v33 = vmax.f32 %v193_v19, 0.0  ;;  %v257_v34 = vmax.f32 %v225_v20, 0.0 }
  0xf9   :  { %v188_v31 = vadd.f32 %v347_v16, %v187_v29  ;;  %v220_v32 = vadd.f32 %v347_v16, %v219_v30  ;;  %v247_v37 = vmax.f32 %v185_v23, 0.0  ;;  %v255_v38 = vmax.f32 %v217_v24, 0.0 }
  0xfa   :  { %v250_v35 = vmax.f32 %v196_v27, 0.0  ;;  %v258_v36 = vmax.f32 %v228_v28, 0.0 }
  0xfb   :  { %v248_v39 = vmax.f32 %v188_v31, 0.0  ;;  %v256_v40 = vmax.f32 %v220_v32, 0.0 }
  0xfc   :  { %v404_v41 = vpack.c.bf16 %v250_v35, %v249_v33  ;;  %v424_v42 = vpack.c.bf16 %v258_v36, %v257_v34 }
  0xfd   :  { %v399_v43 = vpack.c.bf16 %v248_v39, %v247_v37  ;;  %v419_v44 = vpack.c.bf16 %v256_v40, %v255_v38  ;;  %v481_v45 = vpop.f32.mrb[4].mxu0  ;;  %v489_v46 = vpop.f32.mrb[4].mxu1 }
  0xfe   :  { %436 = vst [vmem:[%s621_s3 + $0x8] sm:$0xff] %v404_v41   ;;  %440 = vst [vmem:[%s621_s3 + $0x28] sm:$0xff] %v424_v42   ;;  %v209_v47 = vadd.f32 %v481_v45, %v347_v16  ;;  %v241_v48 = vadd.f32 %v489_v46, %v347_v16  ;;  %v200_v49 = vpop.f32.mrb[5].mxu0  ;;  %v232_v50 = vpop.f32.mrb[5].mxu1 }
  0xff   :  { %400 = vst [vmem:[%s621_s3] sm:$0xff] %v399_v43   ;;  %439 = vst [vmem:[%s621_s3 + $0x20] sm:$0xff] %v419_v44   ;;  %v201_v51 = vadd.f32 %v347_v16, %v200_v49  ;;  %v233_v52 = vadd.f32 %v347_v16, %v232_v50  ;;  %v482_v53 = vpop.f32.mrb[6].mxu0  ;;  %v490_v54 = vpop.f32.mrb[6].mxu1 }
 0x100   :  { %v212_v55 = vadd.f32 %v482_v53, %v347_v16  ;;  %v244_v56 = vadd.f32 %v490_v54, %v347_v16  ;;  %v203_v57 = vpop.f32.mrb[7].mxu0  ;;  %v235_v58 = vpop.f32.mrb[7].mxu1  ;;  %v253_v61 = vmax.f32 %v209_v47, 0.0  ;;  %v261_v62 = vmax.f32 %v241_v48, 0.0 }
 0x101   :  { %v204_v59 = vadd.f32 %v347_v16, %v203_v57  ;;  %v236_v60 = vadd.f32 %v347_v16, %v235_v58  ;;  %v251_v1 = vmax.f32 %v201_v51, 0.0  ;;  %v259_v2 = vmax.f32 %v233_v52, 0.0 }
 0x102   :  { %v254_v63 = vmax.f32 %v212_v55, 0.0  ;;  %v262_v0 = vmax.f32 %v244_v56, 0.0 }
 0x103   :  { %v252_v3 = vmax.f32 %v204_v59, 0.0  ;;  %v260_v4 = vmax.f32 %v236_v60, 0.0 }
 0x104   :  { %v414_v5 = vpack.c.bf16 %v254_v63, %v253_v61  ;;  %v434_v6 = vpack.c.bf16 %v262_v0, %v261_v62 }
 0x105   :  { %v409_v7 = vpack.c.bf16 %v252_v3, %v251_v1  ;;  %v429_v8 = vpack.c.bf16 %v260_v4, %v259_v2 }
 0x106   :  { %438 = vst [vmem:[%s621_s3 + $0x18] sm:$0xff] %v414_v5   ;;  %442 = vst [vmem:[%s621_s3 + $0x38] sm:$0xff] %v434_v6  }
 0x107   :  { %437 = vst [vmem:[%s621_s3 + $0x10] sm:$0xff] %v409_v7   ;;  %441 = vst [vmem:[%s621_s3 + $0x30] sm:$0xff] %v429_v8  }

// kernel: squeezenet_forward.19
= control target key start
LH: loop header
LB: loop body
LE: loop exit
PB: predicated region body
PF: predicated region fallthrough
CT: control target
= control target key end

     0   :  { %v210_v0 = vmov 0.0   ;;  %vm211_vm0 = vmmov 0   ;;  %s265_s1 = inlined_call_operand.vmem [shape: bf16[128,128], index: 1, kind: input, shape index: {}]   ;;  %s266_s0 = inlined_call_operand.vmem [shape: bf16[16,128], index: 0, kind: input, shape index: {}]   ;;  %s267_s2 = inlined_call_operand.vmem [shape: f32[1,128], index: 2, kind: input, shape index: {}]   ;;  %s268_s3 = inlined_call_operand.vmem [shape: bf16[16,128], index: 3, kind: output, shape index: {}]  }
   0x1   :  { %179 = vmatprep.subr.bf16.mxu0 %v210_v0  ;;  %v201_v1 = vld [vmem:[%s265_s1] sm:$0xff]   ;;  %195 = vmatprep.mubr.msk.bf16.mxu0 %vm211_vm0, %v210_v0  ;;  %v202_v2 = vld [vmem:[%s265_s1 + $0x8] sm:$0xff]   ;;  %v203_v3 = vld [vmem:[%s265_s1 + $0x10] sm:$0xff]  }
   0x2   :  { %180 = vmatpush3.bf16.msra.mxu0 %v201_v1  ;;  %v204_v4 = vld [vmem:[%s265_s1 + $0x18] sm:$0xff]   ;;  %v205_v5 = vld [vmem:[%s265_s1 + $0x20] sm:$0xff]   ;;  %v206_v6 = vld [vmem:[%s265_s1 + $0x28] sm:$0xff]  }
   0x3   :  { %181 = vmatprep.subr.bf16.mxu0 %v210_v0  ;;  %v207_v7 = vld [vmem:[%s265_s1 + $0x30] sm:$0xff]   ;;  %v208_v8 = vld [vmem:[%s265_s1 + $0x38] sm:$0xff]   ;;  %v209_v9 = vld [vmem:[%s266_s0] sm:$0xff]  }
   0x4   :  { %v151_v10 = vld [vmem:[%s267_s2] ss:$0 sm:$0xff] }
   0x6   :  { %182 = vmatpush3.bf16.msra.mxu0 %v202_v2 }
   0x7   :  { %183 = vmatprep.subr.bf16.mxu0 %v210_v0 }
   0xa   :  { %184 = vmatpush3.bf16.msra.mxu0 %v203_v3 }
   0xb   :  { %185 = vmatprep.subr.bf16.mxu0 %v210_v0 }
   0xe   :  { %186 = vmatpush3.bf16.msra.mxu0 %v204_v4 }
   0xf   :  { %187 = vmatprep.subr.bf16.mxu0 %v210_v0 }
  0x12   :  { %188 = vmatpush3.bf16.msra.mxu0 %v205_v5 }
  0x13   :  { %189 = vmatprep.subr.bf16.mxu0 %v210_v0 }
  0x16   :  { %190 = vmatpush3.bf16.msra.mxu0 %v206_v6 }
  0x17   :  { %191 = vmatprep.subr.bf16.mxu0 %v210_v0 }
  0x1a   :  { %192 = vmatpush3.bf16.msra.mxu0 %v207_v7 }
  0x1b   :  { %193 = vmatprep.subr.bf16.mxu0 %v210_v0 }
  0x1e   :  { %194 = vmatpush3.bf16.msra.mxu0 %v208_v8 }
  0x21   :  { %196 = vmatmul.mubr.bf16.vlgmr.msra.gmra.mrb[0].mxu0 %v209_v9 }
  0xf4   :  { %v128_v11 = vpop.f32.mrb[0].mxu0 }
  0xf5   :  { %v129_v12 = vadd.f32 %v151_v10, %v128_v11  ;;  %v197_v13 = vpop.f32.mrb[1].mxu0 }
  0xf6   :  { %v131_v14 = vpop.f32.mrb[2].mxu0 }
  0xf7   :  { %v132_v15 = vadd.f32 %v151_v10, %v131_v14  ;;  %v198_v16 = vpop.f32.mrb[3].mxu0  ;;  %v135_v17 = vmax.f32 %v129_v12, 0.0 }
  0xf9   :  { %v136_v18 = vmax.f32 %v132_v15, 0.0 }
  0xfb   :  { %v168_v19 = vpack.c.bf16 %v136_v18, %v135_v17 }
  0xfd   :  { %169 = vst [vmem:[%s268_s3] sm:$0xff] %v168_v19  }

// kernel: squeezenet_forward.21
= control target key start
LH: loop header
LB: loop body
LE: loop exit
PB: predicated region body
PF: predicated region fallthrough
CT: control target
= control target key end

     0   :  { %s368_s1 = inlined_call_operand.vmem [shape: bf16[256,128], index: 1, kind: input, shape index: {}]   ;;  %s369_s0 = inlined_call_operand.vmem [shape: bf16[16,256], index: 0, kind: input, shape index: {}]   ;;  %s370_s2 = inlined_call_operand.vmem [shape: f32[1,128], index: 2, kind: input, shape index: {}]   ;;  %s371_s3 = inlined_call_operand.vmem [shape: bf16[16,128], index: 3, kind: output, shape index: {}]  }
   0x1   :  { %v269_v0 = vld [vmem:[%s368_s1 + $0x40] sm:$0xff]   ;;  %v271_v2 = vld [vmem:[%s368_s1 + $0x48] sm:$0xff]   ;;  %v273_v4 = vld [vmem:[%s368_s1 + $0x50] sm:$0xff]  }
   0x2   :  { %v270_v1 = vld [vmem:[%s368_s1] sm:$0xff]   ;;  %247 = vmatprep.subr.bf16.mxu0 %v269_v0  ;;  %v272_v3 = vld [vmem:[%s368_s1 + $0x8] sm:$0xff]   ;;  %v274_v5 = vld [vmem:[%s368_s1 + $0x10] sm:$0xff]  }
   0x3   :  { %248 = vmatpush3.bf16.msra.mxu0 %v270_v1  ;;  %v275_v6 = vld [vmem:[%s368_s1 + $0x58] sm:$0xff]   ;;  %v277_v8 = vld [vmem:[%s368_s1 + $0x60] sm:$0xff]   ;;  %v279_v10 = vld [vmem:[%s368_s1 + $0x68] sm:$0xff]  }
   0x4   :  { %249 = vmatprep.subr.bf16.mxu0 %v271_v2  ;;  %v276_v7 = vld [vmem:[%s368_s1 + $0x18] sm:$0xff]   ;;  %v278_v9 = vld [vmem:[%s368_s1 + $0x20] sm:$0xff]   ;;  %v280_v12 = vld [vmem:[%s368_s1 + $0x28] sm:$0xff]  }
   0x5   :  { %v287_v11 = vld [vmem:[%s369_s0 + $0x4] ss:$8 sps:$4 sm:$0xff]   ;;  %v281_v13 = vld [vmem:[%s368_s1 + $0x70] sm:$0xff]   ;;  %v283_v15 = vld [vmem:[%s368_s1 + $0x78] sm:$0xff]  }
   0x6   :  { %194 = vmatprep.mubr.bf16.mxu0 %v287_v11  ;;  %v282_v14 = vld [vmem:[%s368_s1 + $0x30] sm:$0xff]   ;;  %v284_v16 = vld [vmem:[%s368_s1 + $0x38] sm:$0xff]   ;;  %v285_v17 = vld [vmem:[%s369_s0] ss:$8 sps:$4 sm:$0xff]  }
   0x7   :  { %250 = vmatpush3.bf16.msra.mxu0 %v272_v3  ;;  %v219_v19 = vld [vmem:[%s370_s2] ss:$0 sm:$0xff] }
   0x8   :  { %251 = vmatprep.subr.bf16.mxu0 %v273_v4 }
   0xb   :  { %252 = vmatpush3.bf16.msra.mxu0 %v274_v5 }
   0xc   :  { %253 = vmatprep.subr.bf16.mxu0 %v275_v6 }
   0xf   :  { %254 = vmatpush3.bf16.msra.mxu0 %v276_v7 }
  0x10   :  { %255 = vmatprep.subr.bf16.mxu0 %v277_v8 }
  0x13   :  { %256 = vmatpush3.bf16.msra.mxu0 %v278_v9 }
  0x14   :  { %257 = vmatprep.subr.bf16.mxu0 %v279_v10 }
  0x17   :  { %258 = vmatpush3.bf16.msra.mxu0 %v280_v12 }
  0x18   :  { %259 = vmatprep.subr.bf16.mxu0 %v281_v13 }
  0x1b   :  { %260 = vmatpush3.bf16.msra.mxu0 %v282_v14 }
  0x1c   :  { %261 = vmatprep.subr.bf16.mxu0 %v283_v15 }
  0x1f   :  { %262 = vmatpush3.bf16.msra.mxu0 %v284_v16 }
  0x22   :  { %195 = vmatmul.mubr.bf16.vlgmr.msra.gmra.mrb[0].mxu0 %v285_v17 }
  0xf5   :  { %v263_v18 = vpop.f32.mrb[0].mxu0 }
  0xf6   :  { %v264_v20 = vpop.f32.mrb[1].mxu0 }
  0xf7   :  { %v265_v21 = vadd.f32 %v264_v20, %v263_v18  ;;  %v266_v22 = vpop.f32.mrb[2].mxu0 }
  0xf8   :  { %v267_v23 = vpop.f32.mrb[3].mxu0 }
  0xf9   :  { %v197_v24 = vadd.f32 %v265_v21, %v219_v19  ;;  %v268_v25 = vadd.f32 %v267_v23, %v266_v22 }
  0xfb   :  { %v200_v26 = vadd.f32 %v268_v25, %v219_v19  ;;  %v203_v27 = vmax.f32 %v197_v24, 0.0 }
  0xfd   :  { %v204_v28 = vmax.f32 %v200_v26, 0.0 }
  0xff   :  { %v245_v29 = vpack.c.bf16 %v204_v28, %v203_v27 }
 0x101   :  { %246 = vst [vmem:[%s371_s3] sm:$0xff] %v245_v29  }

// kernel: squeezenet_forward.20
= control target key start
LH: loop header
LB: loop body
LE: loop exit
PB: predicated region body
PF: predicated region fallthrough
CT: control target
= control target key end

     0   :  { %s1642_s1 = inlined_call_operand.vmem [shape: bf16[896,256], index: 1, kind: input, shape index: {}]   ;;  %s1643_s0 = inlined_call_operand.vmem [shape: bf16[16,896], index: 0, kind: input, shape index: {}]   ;;  %s1644_s2 = inlined_call_operand.vmem [shape: f32[1,256], index: 2, kind: input, shape index: {}]   ;;  %s1645_s3 = inlined_call_operand.vmem [shape: bf16[16,256], index: 3, kind: output, shape index: {}]  }
   0x1   :  { %v1077_v0 = vld [vmem:[%s1642_s1 + $0x4] ss:$8 sps:$4 sm:$0xff]   ;;  %v1081_v2 = vld [vmem:[%s1642_s1] ss:$8 sps:$4 sm:$0xff]   ;;  %v1083_v4 = vld [vmem:[%s1642_s1 + $0x14] ss:$8 sps:$4 sm:$0xff]  }
   0x2   :  { %v1079_v1 = vld [vmem:[%s1642_s1 + $0x204] ss:$8 sps:$4 sm:$0xff]   ;;  %743 = vmatprep.subr.bf16.mxu1 %v1077_v0  ;;  %v1082_v3 = vld [vmem:[%s1642_s1 + $0x200] ss:$8 sps:$4 sm:$0xff]   ;;  %v1085_v5 = vld [vmem:[%s1642_s1 + $0x214] ss:$8 sps:$4 sm:$0xff]  }
   0x3   :  { %829 = vmatprep.subr.bf16.mxu0 %v1079_v1  ;;  %744 = vmatpush1.bf16.msra.mxu1 %v1081_v2  ;;  %v1087_v6 = vld [vmem:[%s1642_s1 + $0x10] ss:$8 sps:$4 sm:$0xff]   ;;  %v1089_v8 = vld [vmem:[%s1642_s1 + $0x24] ss:$8 sps:$4 sm:$0xff]   ;;  %v1093_v10 = vld [vmem:[%s1642_s1 + $0x20] ss:$8 sps:$4 sm:$0xff]  }
   0x4   :  { %830 = vmatpush1.bf16.msra.mxu0 %v1082_v3  ;;  %745 = vmatprep.subr.bf16.mxu1 %v1083_v4  ;;  %v1088_v7 = vld [vmem:[%s1642_s1 + $0x210] ss:$8 sps:$4 sm:$0xff]   ;;  %v1091_v9 = vld [vmem:[%s1642_s1 + $0x224] ss:$8 sps:$4 sm:$0xff]   ;;  %v1094_v11 = vld [vmem:[%s1642_s1 + $0x220] ss:$8 sps:$4 sm:$0xff]  }
   0x5   :  { %831 = vmatprep.subr.bf16.mxu0 %v1085_v5  ;;  %v1095_v12 = vld [vmem:[%s1642_s1 + $0x34] ss:$8 sps:$4 sm:$0xff]   ;;  %v1099_v14 = vld [vmem:[%s1642_s1 + $0x30] ss:$8 sps:$4 sm:$0xff]   ;;  %v1101_v16 = vld [vmem:[%s1642_s1 + $0x44] ss:$8 sps:$4 sm:$0xff]  }
   0x6   :  { %v1097_v13 = vld [vmem:[%s1642_s1 + $0x234] ss:$8 sps:$4 sm:$0xff]   ;;  %v1100_v15 = vld [vmem:[%s1642_s1 + $0x230] ss:$8 sps:$4 sm:$0xff]   ;;  %v1103_v17 = vld [vmem:[%s1642_s1 + $0x244] ss:$8 sps:$4 sm:$0xff]  }
   0x7   :  { %746 = vmatpush1.bf16.msra.mxu1 %v1087_v6  ;;  %v1105_v18 = vld [vmem:[%s1642_s1 + $0x40] ss:$8 sps:$4 sm:$0xff]   ;;  %v1107_v20 = vld [vmem:[%s1642_s1 + $0x54] ss:$8 sps:$4 sm:$0xff]   ;;  %v1111_v22 = vld [vmem:[%s1642_s1 + $0x50] ss:$8 sps:$4 sm:$0xff]  }
   0x8   :  { %832 = vmatpush1.bf16.msra.mxu0 %v1088_v7  ;;  %747 = vmatprep.subr.bf16.mxu1 %v1089_v8  ;;  %v1106_v19 = vld [vmem:[%s1642_s1 + $0x240] ss:$8 sps:$4 sm:$0xff]   ;;  %v1109_v21 = vld [vmem:[%s1642_s1 + $0x254] ss:$8 sps:$4 sm:$0xff]   ;;  %v1112_v23 = vld [vmem:[%s1642_s1 + $0x250] ss:$8 sps:$4 sm:$0xff]  }
   0x9   :  { %833 = vmatprep.subr.bf16.mxu0 %v1091_v9  ;;  %v1113_v24 = vld [vmem:[%s1642_s1 + $0x64] ss:$8 sps:$4 sm:$0xff]   ;;  %v1117_v26 = vld [vmem:[%s1642_s1 + $0x60] ss:$8 sps:$4 sm:$0xff]   ;;  %v1119_v28 = vld [vmem:[%s1642_s1 + $0x74] ss:$8 sps:$4 sm:$0xff]  }
   0xa   :  { %v1115_v25 = vld [vmem:[%s1642_s1 + $0x264] ss:$8 sps:$4 sm:$0xff]   ;;  %v1118_v27 = vld [vmem:[%s1642_s1 + $0x260] ss:$8 sps:$4 sm:$0xff]   ;;  %v1121_v29 = vld [vmem:[%s1642_s1 + $0x274] ss:$8 sps:$4 sm:$0xff]  }
   0xb   :  { %748 = vmatpush1.bf16.msra.mxu1 %v1093_v10  ;;  %v1123_v30 = vld [vmem:[%s1642_s1 + $0x70] ss:$8 sps:$4 sm:$0xff]   ;;  %v1125_v32 = vld [vmem:[%s1642_s1 + $0x84] ss:$8 sps:$4 sm:$0xff]   ;;  %v1129_v34 = vld [vmem:[%s1642_s1 + $0x80] ss:$8 sps:$4 sm:$0xff]  }
   0xc   :  { %834 = vmatpush1.bf16.msra.mxu0 %v1094_v11  ;;  %749 = vmatprep.subr.bf16.mxu1 %v1095_v12  ;;  %v1124_v31 = vld [vmem:[%s1642_s1 + $0x270] ss:$8 sps:$4 sm:$0xff]   ;;  %v1127_v33 = vld [vmem:[%s1642_s1 + $0x284] ss:$8 sps:$4 sm:$0xff]   ;;  %v1130_v35 = vld [vmem:[%s1642_s1 + $0x280] ss:$8 sps:$4 sm:$0xff]  }
   0xd   :  { %835 = vmatprep.subr.bf16.mxu0 %v1097_v13  ;;  %v1131_v36 = vld [vmem:[%s1642_s1 + $0x94] ss:$8 sps:$4 sm:$0xff]   ;;  %v1135_v38 = vld [vmem:[%s1642_s1 + $0x90] ss:$8 sps:$4 sm:$0xff]   ;;  %v1137_v40 = vld [vmem:[%s1642_s1 + $0xa4] ss:$8 sps:$4 sm:$0xff]  }
   0xe   :  { %v1133_v37 = vld [vmem:[%s1642_s1 + $0x294] ss:$8 sps:$4 sm:$0xff]   ;;  %v1136_v39 = vld [vmem:[%s1642_s1 + $0x290] ss:$8 sps:$4 sm:$0xff]   ;;  %v1139_v41 = vld [vmem:[%s1642_s1 + $0x2a4] ss:$8 sps:$4 sm:$0xff]  }
   0xf   :  { %750 = vmatpush1.bf16.msra.mxu1 %v1099_v14  ;;  %v1141_v42 = vld [vmem:[%s1642_s1 + $0xa0] ss:$8 sps:$4 sm:$0xff]   ;;  %v1143_v44 = vld [vmem:[%s1642_s1 + $0xb4] ss:$8 sps:$4 sm:$0xff]   ;;  %v1147_v46 = vld [vmem:[%s1642_s1 + $0xb0] ss:$8 sps:$4 sm:$0xff]  }
  0x10   :  { %836 = vmatpush1.bf16.msra.mxu0 %v1100_v15  ;;  %751 = vmatprep.subr.bf16.mxu1 %v1101_v16  ;;  %v1142_v43 = vld [vmem:[%s1642_s1 + $0x2a0] ss:$8 sps:$4 sm:$0xff]   ;;  %v1145_v45 = vld [vmem:[%s1642_s1 + $0x2b4] ss:$8 sps:$4 sm:$0xff]   ;;  %v1148_v47 = vld [vmem:[%s1642_s1 + $0x2b0] ss:$8 sps:$4 sm:$0xff]  }
  0x11   :  { %837 = vmatprep.subr.bf16.mxu0 %v1103_v17  ;;  %v1175_v48 = vld [vmem:[%s1643_s0 + $0x4] ss:$28 sps:$4 sm:$0xff]   ;;  %v1181_v51 = vld [vmem:[%s1643_s0 + $0x14] ss:$28 sps:$4 sm:$0xff]   ;;  %v1255_v14 = vmov 0  }
  0x12   :  { %v1149_v49 = vld [vmem:[%s1642_s1 + $0xc4] ss:$8 sps:$4 sm:$0xff]   ;;  %775 = vmatprep.mubr.bf16.mxu1 %v1175_v48  ;;  %v1153_v52 = vld [vmem:[%s1642_s1 + $0xc0] ss:$8 sps:$4 sm:$0xff]   ;;  %v1155_v54 = vld [vmem:[%s1642_s1 + $0xd4] ss:$8 sps:$4 sm:$0xff]   ;;  %861 = vmatprep.mubr.bf16.mxu0 %v1181_v51 }
  0x13   :  { %752 = vmatpush1.bf16.msra.mxu1 %v1105_v18  ;;  %v1151_v50 = vld [vmem:[%s1642_s1 + $0x2c4] ss:$8 sps:$4 sm:$0xff]   ;;  %v1154_v53 = vld [vmem:[%s1642_s1 + $0x2c0] ss:$8 sps:$4 sm:$0xff]   ;;  %v1157_v55 = vld [vmem:[%s1642_s1 + $0x2d4] ss:$8 sps:$4 sm:$0xff]  }
  0x14   :  { %838 = vmatpush1.bf16.msra.mxu0 %v1106_v19  ;;  %753 = vmatprep.subr.bf16.mxu1 %v1107_v20  ;;  %v1159_v56 = vld [vmem:[%s1642_s1 + $0xd0] ss:$8 sps:$4 sm:$0xff]   ;;  %v1161_v58 = vld [vmem:[%s1642_s1 + $0xe4] ss:$8 sps:$4 sm:$0xff]   ;;  %v1165_v60 = vld [vmem:[%s1642_s1 + $0xe0] ss:$8 sps:$4 sm:$0xff]  }
  0x15   :  { %839 = vmatprep.subr.bf16.mxu0 %v1109_v21  ;;  %v1160_v57 = vld [vmem:[%s1642_s1 + $0x2d0] ss:$8 sps:$4 sm:$0xff]   ;;  %v1163_v59 = vld [vmem:[%s1642_s1 + $0x2e4] ss:$8 sps:$4 sm:$0xff]   ;;  %v1166_v61 = vld [vmem:[%s1642_s1 + $0x2e0] ss:$8 sps:$4 sm:$0xff]  }
  0x16   :  { %v1167_v62 = vld [vmem:[%s1642_s1 + $0xf4] ss:$8 sps:$4 sm:$0xff]   ;;  %v1171_v0 = vld [vmem:[%s1642_s1 + $0xf0] ss:$8 sps:$4 sm:$0xff]   ;;  %v1178_v2 = vld [vmem:[%s1642_s1 + $0x104] ss:$8 sps:$4 sm:$0xff]  }
  0x17   :  { %754 = vmatpush1.bf16.msra.mxu1 %v1111_v22  ;;  %v1169_v63 = vld [vmem:[%s1642_s1 + $0x2f4] ss:$8 sps:$4 sm:$0xff]   ;;  %v1172_v1 = vld [vmem:[%s1642_s1 + $0x2f0] ss:$8 sps:$4 sm:$0xff]   ;;  %v1184_v3 = vld [vmem:[%s1642_s1 + $0x304] ss:$8 sps:$4 sm:$0xff]  }
  0x18   :  { %840 = vmatpush1.bf16.msra.mxu0 %v1112_v23  ;;  %755 = vmatprep.subr.bf16.mxu1 %v1113_v24  ;;  %v1173_v4 = vld [vmem:[%s1643_s0] ss:$28 sps:$4 sm:$0xff]   ;;  %v1179_v6 = vld [vmem:[%s1643_s0 + $0x10] ss:$28 sps:$4 sm:$0xff]  }
  0x19   :  { %841 = vmatprep.subr.bf16.mxu0 %v1115_v25  ;;  %v1176_v5 = vld [vmem:[%s1642_s1 + $0x100] ss:$8 sps:$4 sm:$0xff]   ;;  %v1187_v8 = vld [vmem:[%s1642_s1 + $0x114] ss:$8 sps:$4 sm:$0xff]   ;;  %v1185_v10 = vld [vmem:[%s1642_s1 + $0x110] ss:$8 sps:$4 sm:$0xff]  }
  0x1a   :  { %v1182_v7 = vld [vmem:[%s1642_s1 + $0x300] ss:$8 sps:$4 sm:$0xff]   ;;  %v1190_v9 = vld [vmem:[%s1642_s1 + $0x314] ss:$8 sps:$4 sm:$0xff]   ;;  %v1188_v11 = vld [vmem:[%s1642_s1 + $0x310] ss:$8 sps:$4 sm:$0xff]  }
  0x1b   :  { %756 = vmatpush1.bf16.msra.mxu1 %v1117_v26  ;;  %v1193_v12 = vld [vmem:[%s1642_s1 + $0x124] ss:$8 sps:$4 sm:$0xff]   ;;  %v1191_v15 = vld [vmem:[%s1642_s1 + $0x120] ss:$8 sps:$4 sm:$0xff]   ;;  %v1199_v17 = vld [vmem:[%s1642_s1 + $0x134] ss:$8 sps:$4 sm:$0xff]  }
  0x1c   :  { %842 = vmatpush1.bf16.msra.mxu0 %v1118_v27  ;;  %757 = vmatprep.subr.bf16.mxu1 %v1119_v28  ;;  %v1196_v13 = vld [vmem:[%s1642_s1 + $0x324] ss:$8 sps:$4 sm:$0xff]   ;;  %v1194_v16 = vld [vmem:[%s1642_s1 + $0x320] ss:$8 sps:$4 sm:$0xff]   ;;  %v1202_v18 = vld [vmem:[%s1642_s1 + $0x334] ss:$8 sps:$4 sm:$0xff]  }
  0x1d   :  { %843 = vmatprep.subr.bf16.mxu0 %v1121_v29  ;;  %v1197_v19 = vld [vmem:[%s1642_s1 + $0x130] ss:$8 sps:$4 sm:$0xff]   ;;  %v1205_v21 = vld [vmem:[%s1642_s1 + $0x144] ss:$8 sps:$4 sm:$0xff]   ;;  %v1203_v24 = vld [vmem:[%s1642_s1 + $0x140] ss:$8 sps:$4 sm:$0xff]  }
  0x1e   :  { %v1200_v20 = vld [vmem:[%s1642_s1 + $0x330] ss:$8 sps:$4 sm:$0xff]   ;;  %v1208_v22 = vld [vmem:[%s1642_s1 + $0x344] ss:$8 sps:$4 sm:$0xff]   ;;  %v1206_v25 = vld [vmem:[%s1642_s1 + $0x340] ss:$8 sps:$4 sm:$0xff]  }
  0x1f   :  { %758 = vmatpush1.bf16.msra.mxu1 %v1123_v30  ;;  %v1254_v23 = vld [vmem:[%s1643_s0 + $0xc] ss:$28 sps:$4 sm:$0xff]   ;;  %v1211_v26 = vld [vmem:[%s1642_s1 + $0x154] ss:$8 sps:$4 sm:$0xff]   ;;  %v1209_v28 = vld [vmem:[%s1642_s1 + $0x150] ss:$8 sps:$4 sm:$0xff]  }
  0x20   :  { %844 = vmatpush1.bf16.msra.mxu0 %v1124_v31  ;;  %759 = vmatprep.subr.bf16.mxu1 %v1125_v32  ;;  %v1214_v27 = vld [vmem:[%s1642_s1 + $0x354] ss:$8 sps:$4 sm:$0xff]   ;;  %v1212_v29 = vld [vmem:[%s1642_s1 + $0x350] ss:$8 sps:$4 sm:$0xff]   ;;  %v1217_v30 = vld [vmem:[%s1642_s1 + $0x164] ss:$8 sps:$4 sm:$0xff]  }
  0x21   :  { %845 = vmatprep.subr.bf16.mxu0 %v1127_v33  ;;  %v1220_v31 = vld [vmem:[%s1642_s1 + $0x364] ss:$8 sps:$4 sm:$0xff]   ;;  %v1215_v32 = vld [vmem:[%s1642_s1 + $0x160] ss:$8 sps:$4 sm:$0xff]  }
  0x22   :  { %v1218_v33 = vld [vmem:[%s1642_s1 + $0x360] ss:$8 sps:$4 sm:$0xff]   ;;  %v1248_v51 = vld [vmem:[%s1642_s1 + $0x1e4] ss:$8 sps:$4 sm:$0xff]  }
  0x23   :  { %760 = vmatpush1.bf16.msra.mxu1 %v1129_v34  ;;  %v1223_v34 = vld [vmem:[%s1642_s1 + $0x174] ss:$8 sps:$4 sm:$0xff]   ;;  %v1240_v48 = vld [vmem:[%s1642_s1 + $0x1c0] ss:$8 sps:$4 sm:$0xff]  }
  0x24   :  { %846 = vmatpush1.bf16.msra.mxu0 %v1130_v35  ;;  %761 = vmatprep.subr.bf16.mxu1 %v1131_v36  ;;  %v1226_v35 = vld [vmem:[%s1642_s1 + $0x374] ss:$8 sps:$4 sm:$0xff]   ;;  %v1221_v36 = vld [vmem:[%s1642_s1 + $0x170] ss:$8 sps:$4 sm:$0xff]  }
  0x25   :  { %847 = vmatprep.subr.bf16.mxu0 %v1133_v37  ;;  %v1224_v37 = vld [vmem:[%s1642_s1 + $0x370] ss:$8 sps:$4 sm:$0xff]  }
  0x27   :  { %762 = vmatpush1.bf16.msra.mxu1 %v1135_v38  ;;  %v1229_v38 = vld [vmem:[%s1642_s1 + $0x184] ss:$8 sps:$4 sm:$0xff]  }
  0x28   :  { %848 = vmatpush1.bf16.msra.mxu0 %v1136_v39  ;;  %763 = vmatprep.subr.bf16.mxu1 %v1137_v40  ;;  %v1230_v39 = vld [vmem:[%s1643_s0 + $0x18] ss:$28 sps:$4 sm:$0xff]   ;;  %v1227_v40 = vld [vmem:[%s1642_s1 + $0x180] ss:$8 sps:$4 sm:$0xff]  }
  0x29   :  { %849 = vmatprep.subr.bf16.mxu0 %v1139_v41  ;;  %v1233_v41 = vld [vmem:[%s1642_s1 + $0x194] ss:$8 sps:$4 sm:$0xff]  }
  0x2b   :  { %764 = vmatpush1.bf16.msra.mxu1 %v1141_v42  ;;  %v1231_v42 = vld [vmem:[%s1642_s1 + $0x190] ss:$8 sps:$4 sm:$0xff]  }
  0x2c   :  { %850 = vmatpush1.bf16.msra.mxu0 %v1142_v43  ;;  %765 = vmatprep.subr.bf16.mxu1 %v1143_v44  ;;  %v1236_v43 = vld [vmem:[%s1642_s1 + $0x1a4] ss:$8 sps:$4 sm:$0xff]   ;;  %v1234_v44 = vld [vmem:[%s1642_s1 + $0x1a0] ss:$8 sps:$4 sm:$0xff]  }
  0x2d   :  { %851 = vmatprep.subr.bf16.mxu0 %v1145_v45  ;;  %v1239_v45 = vld [vmem:[%s1642_s1 + $0x1b4] ss:$8 sps:$4 sm:$0xff]  }
  0x2f   :  { %766 = vmatpush1.bf16.msra.mxu1 %v1147_v46  ;;  %v1237_v46 = vld [vmem:[%s1642_s1 + $0x1b0] ss:$8 sps:$4 sm:$0xff]  }
  0x30   :  { %852 = vmatpush1.bf16.msra.mxu0 %v1148_v47  ;;  %767 = vmatprep.subr.bf16.mxu1 %v1149_v49  ;;  %v1242_v47 = vld [vmem:[%s1642_s1 + $0x1c4] ss:$8 sps:$4 sm:$0xff]   ;;  %v1245_v49 = vld [vmem:[%s1642_s1 + $0x1d4] ss:$8 sps:$4 sm:$0xff]  }
  0x31   :  { %853 = vmatprep.subr.bf16.mxu0 %v1151_v50  ;;  %v1243_v50 = vld [vmem:[%s1642_s1 + $0x1d0] ss:$8 sps:$4 sm:$0xff]  }
  0x33   :  { %768 = vmatpush1.bf16.msra.mxu1 %v1153_v52  ;;  %v1246_v52 = vld [vmem:[%s1642_s1 + $0x1e0] ss:$8 sps:$4 sm:$0xff]  }
  0x34   :  { %854 = vmatpush1.bf16.msra.mxu0 %v1154_v53  ;;  %769 = vmatprep.subr.bf16.mxu1 %v1155_v54  ;;  %v1251_v53 = vld [vmem:[%s1642_s1 + $0x1f4] ss:$8 sps:$4 sm:$0xff]   ;;  %v1249_v54 = vld [vmem:[%s1642_s1 + $0x1f0] ss:$8 sps:$4 sm:$0xff]  }
  0x35   :  { %855 = vmatprep.subr.bf16.mxu0 %v1157_v55  ;;  %v1252_v55 = vld [vmem:[%s1643_s0 + $0x8] ss:$28 sps:$4 sm:$0xff]  }
  0x37   :  { %770 = vmatpush1.bf16.msra.mxu1 %v1159_v56 }
  0x38   :  { %856 = vmatpush1.bf16.msra.mxu0 %v1160_v57  ;;  %771 = vmatprep.subr.bf16.mxu1 %v1161_v58 }
  0x39   :  { %857 = vmatprep.subr.bf16.mxu0 %v1163_v59 }
  0x3b   :  { %772 = vmatpush1.bf16.msra.mxu1 %v1165_v60  ;;  %v137_v60 = vlaneseq }
  0x3c   :  { %858 = vmatpush1.bf16.msra.mxu0 %v1166_v61  ;;  %773 = vmatprep.subr.bf16.mxu1 %v1167_v62 }
  0x3d   :  { %859 = vmatprep.subr.bf16.mxu0 %v1169_v63  ;;  %v138_v61 = vshrl.u32 %v137_v60, 7  ;;  %v135_v63 = vld [vmem:[%s1644_s2] sm:$0x3] }
  0x3f   :  { %774 = vmatpush1.bf16.msra.mxu1 %v1171_v0  ;;  %v139_v62 = vsub.s32 0, %v138_v61  ;;  %v143_v0 = vsub.s32 1, %v138_v61 }
  0x40   :  { %860 = vmatpush1.bf16.msra.mxu0 %v1172_v1  ;;  %786 = vmatprep.subr.bf16.mxu1 %v1178_v2 }
  0x41   :  { %872 = vmatprep.subr.bf16.mxu0 %v1184_v3  ;;  %v140_v1 = vrot.slane %v135_v63, %v139_v62  ;;  %v144_v2 = vrot.slane %v135_v63, %v143_v0 }
  0x42   :  { %776 = vmatmul.mubr.bf16.vlgmr.msra.gmra.mrb[0].mxu1 %v1173_v4 }
  0x43   :  { %862 = vmatmul.mubr.bf16.vlgmr.msra.gmra.mrb[0].mxu0 %v1179_v6  ;;  %787 = vmatpush1.bf16.msra.mxu1 %v1176_v5 }
  0x44   :  { %873 = vmatpush1.bf16.msra.mxu0 %v1182_v7  ;;  %788 = vmatprep.subr.bf16.mxu1 %v1187_v8 }
  0x45   :  { %874 = vmatprep.subr.bf16.mxu0 %v1190_v9  ;;  %904 = vmatprep.mubr.bf16.mxu0 %v1255_v14 }
  0x46   :  { %818 = vmatprep.mubr.bf16.mxu1 %v1254_v23 }
  0x47   :  { %789 = vmatpush1.bf16.msra.mxu1 %v1185_v10 }
  0x48   :  { %875 = vmatpush1.bf16.msra.mxu0 %v1188_v11  ;;  %790 = vmatprep.subr.bf16.mxu1 %v1193_v12 }
  0x49   :  { %876 = vmatprep.subr.bf16.mxu0 %v1196_v13 }
  0x4b   :  { %791 = vmatpush1.bf16.msra.mxu1 %v1191_v15 }
  0x4c   :  { %877 = vmatpush1.bf16.msra.mxu0 %v1194_v16  ;;  %792 = vmatprep.subr.bf16.mxu1 %v1199_v17 }
  0x4d   :  { %878 = vmatprep.subr.bf16.mxu0 %v1202_v18 }
  0x4f   :  { %793 = vmatpush1.bf16.msra.mxu1 %v1197_v19 }
  0x50   :  { %879 = vmatpush1.bf16.msra.mxu0 %v1200_v20  ;;  %794 = vmatprep.subr.bf16.mxu1 %v1205_v21 }
  0x51   :  { %880 = vmatprep.subr.bf16.mxu0 %v1208_v22 }
  0x53   :  { %795 = vmatpush1.bf16.msra.mxu1 %v1203_v24 }
  0x54   :  { %881 = vmatpush1.bf16.msra.mxu0 %v1206_v25  ;;  %796 = vmatprep.subr.bf16.mxu1 %v1211_v26 }
  0x55   :  { %882 = vmatprep.subr.bf16.mxu0 %v1214_v27 }
  0x57   :  { %797 = vmatpush1.bf16.msra.mxu1 %v1209_v28 }
  0x58   :  { %883 = vmatpush1.bf16.msra.mxu0 %v1212_v29  ;;  %798 = vmatprep.subr.bf16.mxu1 %v1217_v30 }
  0x59   :  { %884 = vmatprep.subr.bf16.mxu0 %v1220_v31 }
  0x5b   :  { %799 = vmatpush1.bf16.msra.mxu1 %v1215_v32 }
  0x5c   :  { %885 = vmatpush1.bf16.msra.mxu0 %v1218_v33  ;;  %800 = vmatprep.subr.bf16.mxu1 %v1223_v34 }
  0x5d   :  { %886 = vmatprep.subr.bf16.mxu0 %v1226_v35 }
  0x5f   :  { %801 = vmatpush1.bf16.msra.mxu1 %v1221_v36 }
  0x60   :  { %887 = vmatpush1.bf16.msra.mxu0 %v1224_v37  ;;  %802 = vmatprep.subr.bf16.mxu1 %v1229_v38 }
  0x63   :  { %905 = vmatmul.mubr.bf16.vlgmr.msra.gmra.mrb[0].mxu0 %v1230_v39  ;;  %803 = vmatpush1.bf16.msra.mxu1 %v1227_v40 }
  0x64   :  { %804 = vmatprep.subr.bf16.mxu1 %v1233_v41 }
  0x67   :  { %805 = vmatpush1.bf16.msra.mxu1 %v1231_v42 }
  0x68   :  { %806 = vmatprep.subr.bf16.mxu1 %v1236_v43 }
  0x6b   :  { %807 = vmatpush1.bf16.msra.mxu1 %v1234_v44 }
  0x6c   :  { %808 = vmatprep.subr.bf16.mxu1 %v1239_v45 }
  0x6f   :  { %809 = vmatpush1.bf16.msra.mxu1 %v1237_v46 }
  0x70   :  { %810 = vmatprep.subr.bf16.mxu1 %v1242_v47 }
  0x73   :  { %811 = vmatpush1.bf16.msra.mxu1 %v1240_v48 }
  0x74   :  { %812 = vmatprep.subr.bf16.mxu1 %v1245_v49 }
  0x77   :  { %813 = vmatpush1.bf16.msra.mxu1 %v1243_v50 }
  0x78   :  { %814 = vmatprep.subr.bf16.mxu1 %v1248_v51 }
  0x7b   :  { %815 = vmatpush1.bf16.msra.mxu1 %v1246_v52 }
  0x7c   :  { %816 = vmatprep.subr.bf16.mxu1 %v1251_v53 }
  0x7f   :  { %817 = vmatpush1.bf16.msra.mxu1 %v1249_v54 }
  0x82   :  { %819 = vmatmul.mubr.bf16.vlgmr.msra.gmra.mrb[0].mxu1 %v1252_v55 }
 0x136   :  { %v906_v56 = vpop.f32.mrb[0].mxu0 }
 0x137   :  { %v908_v57 = vpop.f32.mrb[1].mxu0 }
 0x138   :  { %v910_v58 = vpop.f32.mrb[2].mxu0 }
 0x139   :  { %v912_v59 = vpop.f32.mrb[3].mxu0 }
 0x155   :  { %v820_v3 = vpop.f32.mrb[0].mxu1 }
 0x156   :  { %v1060_v4 = vadd.f32 %v820_v3, %v140_v1  ;;  %v822_v5 = vpop.f32.mrb[1].mxu1 }
 0x157   :  { %v1062_v6 = vadd.f32 %v822_v5, %v144_v2  ;;  %v824_v7 = vpop.f32.mrb[2].mxu1 }
 0x158   :  { %v1061_v8 = vadd.f32 %v1060_v4, %v906_v56  ;;  %v1064_v9 = vadd.f32 %v824_v7, %v140_v1  ;;  %v826_v10 = vpop.f32.mrb[3].mxu1 }
 0x159   :  { %v1063_v11 = vadd.f32 %v1062_v6, %v908_v57  ;;  %v1066_v12 = vadd.f32 %v826_v10, %v144_v2 }
 0x15a   :  { %v915_v13 = vmax.f32 %v1061_v8, 0.0  ;;  %v1065_v14 = vadd.f32 %v1064_v9, %v910_v58 }
 0x15b   :  { %v916_v15 = vmax.f32 %v1063_v11, 0.0  ;;  %v1067_v16 = vadd.f32 %v1066_v12, %v912_v59 }
 0x15c   :  { %v917_v17 = vmax.f32 %v1065_v14, 0.0 }
 0x15d   :  { %v1058_v18 = vpack.c.bf16 %v916_v15, %v915_v13  ;;  %v918_v19 = vmax.f32 %v1067_v16, 0.0 }
 0x15f   :  { %931 = vst [vmem:[%s1645_s3] sm:$0xff] %v1058_v18  ;;  %v1059_v20 = vpack.c.bf16 %v918_v19, %v917_v17 }
 0x161   :  { %932 = vst [vmem:[%s1645_s3 + $0x8] sm:$0xff] %v1059_v20 }

// kernel: squeezenet_forward.23
= control target key start
LH: loop header
LB: loop body
LE: loop exit
PB: predicated region body
PF: predicated region fallthrough
CT: control target
= control target key end

     0   :  { %v493_v25 = vmov 0   ;;  %v494_v26 = vmov 0.0   ;;  %vm283_vm0 = vcmask 392192   ;;  %vm495_vm1 = vmmov 0   ;;  %s616_s1 = inlined_call_operand.vmem [shape: bf16[256,48], index: 1, kind: input, shape index: {}]   ;;  %s617_s0 = inlined_call_operand.vmem [shape: bf16[8,256], index: 0, kind: input, shape index: {}]   ;;  %s618_s3 = inlined_call_operand.vmem [shape: bf16[48,384], index: 3, kind: input, shape index: {}]   ;;  %s619_s2 = inlined_call_operand.vmem [shape: f32[1,48], index: 2, kind: input, shape index: {}]   ;;  %s620_s4 = inlined_call_operand.vmem [shape: f32[1,384], index: 4, kind: input, shape index: {}]   ;;  %s621_s5 = inlined_call_operand.vmem [shape: bf16[8,384], index: 5, kind: output, shape index: {}]  }
   0x1   :  { %v463_v0 = vld [vmem:[%s616_s1 + $0x40] sm:$0xff]   ;;  %v465_v2 = vld [vmem:[%s616_s1 + $0x48] sm:$0xff]   ;;  %v467_v4 = vld [vmem:[%s616_s1 + $0x50] sm:$0xff]   ;;  %319 = vmatprep.mubr.bf16.mxu1 %v493_v25  ;;  %v220_v39 = vlaneseq }
   0x2   :  { %v464_v1 = vld [vmem:[%s616_s1] sm:$0xff]   ;;  %424 = vmatprep.subr.bf16.mxu0 %v463_v0  ;;  %v466_v3 = vld [vmem:[%s616_s1 + $0x8] sm:$0xff]   ;;  %v468_v5 = vld [vmem:[%s616_s1 + $0x10] sm:$0xff]  }
   0x3   :  { %425 = vmatpush3.bf16.msra.mxu0 %v464_v1  ;;  %v469_v6 = vld [vmem:[%s616_s1 + $0x58] sm:$0xff]   ;;  %v471_v8 = vld [vmem:[%s616_s1 + $0x60] sm:$0xff]   ;;  %v473_v10 = vld [vmem:[%s616_s1 + $0x68] sm:$0xff]   ;;  %v221_v40 = vshrl.u32 %v220_v39, 7 }
   0x4   :  { %426 = vmatprep.subr.bf16.mxu0 %v465_v2  ;;  %v470_v7 = vld [vmem:[%s616_s1 + $0x18] sm:$0xff]   ;;  %v472_v9 = vld [vmem:[%s616_s1 + $0x20] sm:$0xff]   ;;  %v474_v12 = vld [vmem:[%s616_s1 + $0x28] sm:$0xff]  }
   0x5   :  { %v21_v11 = vld [vmem:[%s617_s0] sm:$0xff]  ;;  %v475_v16 = vld [vmem:[%s616_s1 + $0x70] sm:$0xff]   ;;  %v477_v18 = vld [vmem:[%s616_s1 + $0x78] sm:$0xff]   ;;  %v222_v41 = vsub.s32 0, %v221_v40  ;;  %v226_v43 = vsub.s32 1, %v221_v40  ;;  %v230_v54 = vsub.s32 2, %v221_v40 }
   0x6   :  { %v392_v13 = vcombine.high %v21_v11, %v21_v11  ;;  %v481_v14 = vld [vmem:[%s618_s3 + $0x4] ss:$12 sps:$4 sm:$0xff]   ;;  %v483_v15 = vld [vmem:[%s618_s3] ss:$12 sps:$4 sm:$0xff]   ;;  %v478_v19 = vld [vmem:[%s616_s1 + $0x38] sm:$0xff]   ;;  %v391_v20 = vcombine.low %v21_v11, %v21_v11 }
   0x7   :  { %427 = vmatpush3.bf16.msra.mxu0 %v466_v3  ;;  %287 = vmatprep.subr.bf16.mxu1 %v481_v14  ;;  %v476_v17 = vld [vmem:[%s616_s1 + $0x30] sm:$0xff]   ;;  %v484_v21 = vld [vmem:[%s618_s3 + $0x1c] ss:$12 sps:$4 sm:$0xff]   ;;  %v486_v22 = vld [vmem:[%s618_s3 + $0x18] ss:$12 sps:$4 sm:$0xff]  }
   0x8   :  { %428 = vmatprep.subr.bf16.mxu0 %v467_v4  ;;  %196 = vmatprep.mubr.bf16.mxu0 %v392_v13  ;;  %v487_v23 = vld [vmem:[%s618_s3 + $0x34] ss:$12 sps:$4 sm:$0xff]   ;;  %v489_v24 = vld [vmem:[%s618_s3 + $0x30] ss:$12 sps:$4 sm:$0xff]   ;;  %v492_v38 = vld [vmem:[%s618_s3 + $0x38] ss:$12 sps:$4 sm:$0xff]  }
   0x9   :  { %288 = vmatpush1.bf16.msra.mxu1 %v483_v15  ;;  %v390_v28 = vld [vmem:[%s619_s2] ss:$0 sm:$0xff]  ;;  %v490_v35 = vld [vmem:[%s618_s3 + $0x8] ss:$12 sps:$4 sm:$0xff]  }
   0xa   :  { %289 = vmatprep.subr.bf16.mxu1 %v484_v21  ;;  %v491_v37 = vld [vmem:[%s618_s3 + $0x20] ss:$12 sps:$4 sm:$0xff]  }
   0xb   :  { %429 = vmatpush3.bf16.msra.mxu0 %v468_v5  ;;  %v218_v42 = vld [vmem:[%s620_s4] sm:$0x7] }
   0xc   :  { %430 = vmatprep.subr.bf16.mxu0 %v469_v6  ;;  %v223_v44 = vrot.slane %v218_v42, %v222_v41  ;;  %v227_v45 = vrot.slane %v218_v42, %v226_v43  ;;  %v231_v56 = vrot.slane %v218_v42, %v230_v54 }
   0xd   :  { %290 = vmatpush1.bf16.msra.mxu1 %v486_v22 }
   0xe   :  { %291 = vmatprep.subr.bf16.mxu1 %v487_v23 }
   0xf   :  { %431 = vmatpush3.bf16.msra.mxu0 %v470_v7 }
  0x10   :  { %432 = vmatprep.subr.bf16.mxu0 %v471_v8 }
  0x11   :  { %292 = vmatpush1.bf16.msra.mxu1 %v489_v24 }
  0x12   :  { %450 = vmatprep.subr.bf16.mxu1 %v494_v26 }
  0x13   :  { %433 = vmatpush3.bf16.msra.mxu0 %v472_v9 }
  0x14   :  { %434 = vmatprep.subr.bf16.mxu0 %v473_v10 }
  0x17   :  { %435 = vmatpush3.bf16.msra.mxu0 %v474_v12 }
  0x18   :  { %436 = vmatprep.subr.bf16.mxu0 %v475_v16 }
  0x1b   :  { %437 = vmatpush3.bf16.msra.mxu0 %v476_v17 }
  0x1c   :  { %438 = vmatprep.subr.bf16.mxu0 %v477_v18 }
  0x1f   :  { %439 = vmatpush3.bf16.msra.mxu0 %v478_v19 }
  0x22   :  { %197 = vmatmul.mubr.bf16.vlgmr.msra.gmra.mrb[0].mxu0 %v391_v20 }
  0xf5   :  { %v440_v27 = vpop.f32.mrb[0].mxu0 }
  0xf6   :  { %v441_v29 = vpop.f32.mrb[1].mxu0 }
  0xf7   :  { %v442_v30 = vadd.f32 %v441_v29, %v440_v27  ;;  %v443_v31 = vpop.f32.mrb[2].mxu0 }
  0xf8   :  { %v444_v32 = vpop.f32.mrb[3].mxu0 }
  0xf9   :  { %v199_v33 = vadd.f32 %v442_v30, %v390_v28 }
  0xfb   :  { %v204_v34 = vmax.f32 %v199_v33, 0.0 }
  0xfd   :  { %v205_v36 = vpack.c.bf16 %v204_v34, %v204_v34 }
  0xff   :  { %418 = vmatmul.mubr.msk.bf16.vlgmr.msra.gmra.mrb[0].mxu1 %vm283_vm0, %v205_v36 }
 0x100   :  { %451 = vmatpush3.bf16.msra.mxu1 %v490_v35  ;;  %456 = vmatprep.mubr.msk.bf16.mxu1 %vm495_vm1, %v494_v26 }
 0x101   :  { %452 = vmatprep.subr.bf16.mxu1 %v494_v26 }
 0x104   :  { %453 = vmatpush3.bf16.msra.mxu1 %v491_v37 }
 0x105   :  { %454 = vmatprep.subr.bf16.mxu1 %v494_v26 }
 0x108   :  { %455 = vmatpush3.bf16.msra.mxu1 %v492_v38 }
 0x10b   :  { %457 = vmatmul.mubr.msk.bf16.vlgmr.msra.gmra.mrb[4].mxu1 %vm283_vm0, %v205_v36 }
 0x1d2   :  { %v321_v46 = vpop.f32.mrb[0].mxu1 }
 0x1d3   :  { %v322_v47 = vadd.f32 %v321_v46, %v223_v44  ;;  %v323_v48 = vpop.f32.mrb[1].mxu1 }
 0x1d4   :  { %v324_v49 = vadd.f32 %v323_v48, %v227_v45  ;;  %v325_v50 = vpop.f32.mrb[2].mxu1 }
 0x1d5   :  { %v368_v51 = vmax.f32 %v322_v47, 0.0  ;;  %v326_v52 = vpop.f32.mrb[3].mxu1 }
 0x1d6   :  { %v369_v53 = vmax.f32 %v324_v49, 0.0 }
 0x1d8   :  { %v422_v55 = vpack.c.bf16 %v369_v53, %v368_v51 }
 0x1da   :  { %384 = vst [vmem:[%s621_s5] sm:$0xff] %v422_v55 }
 0x1de   :  { %v362_v57 = vpop.f32.mrb[4].mxu1 }
 0x1df   :  { %v363_v58 = vadd.f32 %v362_v57, %v231_v56  ;;  %v458_v59 = vpop.f32.mrb[5].mxu1 }
 0x1e0   :  { %v365_v60 = vpop.f32.mrb[6].mxu1 }
 0x1e1   :  { %v370_v61 = vmax.f32 %v363_v58, 0.0  ;;  %v459_v62 = vpop.f32.mrb[7].mxu1 }
 0x1e3   :  { %v423_v63 = vpack.c.bf16 %v370_v61, %v370_v61 }
 0x1e5   :  { %385 = vst [vmem:[%s621_s5 + $0x8] sm:$0xf] %v423_v63 }

// kernel: squeezenet_forward.24
= control target key start
LH: loop header
LB: loop body
LE: loop exit
PB: predicated region body
PF: predicated region fallthrough
CT: control target
= control target key end

     0   :  { %v649_v1 = vmov 0.0   ;;  %vm650_vm0 = vmmov 0   ;;  %v651_v38 = vmov 0   ;;  %vm392_vm1 = vcmask 392192   ;;  %s814_s1 = inlined_call_operand.vmem [shape: bf16[384,48], index: 1, kind: input, shape index: {}]   ;;  %s815_s0 = inlined_call_operand.vmem [shape: bf16[8,384], index: 0, kind: input, shape index: {}]   ;;  %s816_s3 = inlined_call_operand.vmem [shape: bf16[48,384], index: 3, kind: input, shape index: {}]   ;;  %s817_s2 = inlined_call_operand.vmem [shape: f32[1,48], index: 2, kind: input, shape index: {}]   ;;  %s818_s4 = inlined_call_operand.vmem [shape: f32[1,384], index: 4, kind: input, shape index: {}]   ;;  %s819_s5 = inlined_call_operand.vmem [shape: bf16[8,384], index: 5, kind: output, shape index: {}]  }
   0x1   :  { %v610_v0 = vld [vmem:[%s814_s1 + $0x40] sm:$0xff]   ;;  %577 = vmatprep.subr.bf16.mxu1 %v649_v1  ;;  %593 = vmatprep.mubr.msk.bf16.mxu1 %vm650_vm0, %v649_v1  ;;  %v613_v4 = vld [vmem:[%s814_s1 + $0x48] sm:$0xff]   ;;  %v616_v7 = vld [vmem:[%s814_s1 + $0x50] sm:$0xff]   ;;  %v329_v53 = vlaneseq }
   0x2   :  { %v611_v2 = vld [vmem:[%s814_s1] sm:$0xff]   ;;  %542 = vmatprep.subr.bf16.mxu0 %v610_v0  ;;  %v614_v5 = vld [vmem:[%s814_s1 + $0x8] sm:$0xff]   ;;  %v617_v8 = vld [vmem:[%s814_s1 + $0x10] sm:$0xff]  }
   0x3   :  { %v612_v3 = vld [vmem:[%s814_s1 + $0x80] sm:$0xff]   ;;  %543 = vmatpush3.bf16.msra.mxu0 %v611_v2  ;;  %v615_v6 = vld [vmem:[%s814_s1 + $0x88] sm:$0xff]   ;;  %v618_v9 = vld [vmem:[%s814_s1 + $0x90] sm:$0xff]   ;;  %v330_v54 = vshrl.u32 %v329_v53, 7 }
   0x4   :  { %578 = vmatpush3.bf16.msra.mxu1 %v612_v3  ;;  %544 = vmatprep.subr.bf16.mxu0 %v613_v4  ;;  %v619_v10 = vld [vmem:[%s814_s1 + $0x58] sm:$0xff]   ;;  %v622_v13 = vld [vmem:[%s814_s1 + $0x60] sm:$0xff]   ;;  %v625_v16 = vld [vmem:[%s814_s1 + $0x68] sm:$0xff]  }
   0x5   :  { %579 = vmatprep.subr.bf16.mxu1 %v649_v1  ;;  %v620_v11 = vld [vmem:[%s814_s1 + $0x18] sm:$0xff]   ;;  %v623_v14 = vld [vmem:[%s814_s1 + $0x20] sm:$0xff]   ;;  %v626_v17 = vld [vmem:[%s814_s1 + $0x28] sm:$0xff]   ;;  %v331_v55 = vsub.s32 0, %v330_v54  ;;  %v339_v56 = vsub.s32 2, %v330_v54  ;;  %v335_v58 = vsub.s32 1, %v330_v54 }
   0x6   :  { %v621_v12 = vld [vmem:[%s814_s1 + $0x98] sm:$0xff]   ;;  %v624_v15 = vld [vmem:[%s814_s1 + $0xa0] sm:$0xff]   ;;  %v627_v18 = vld [vmem:[%s814_s1 + $0xa8] sm:$0xff]  }
   0x7   :  { %545 = vmatpush3.bf16.msra.mxu0 %v614_v5  ;;  %v628_v19 = vld [vmem:[%s814_s1 + $0x70] sm:$0xff]   ;;  %v21_v22 = vld [vmem:[%s815_s0] sm:$0xff]  ;;  %v631_v23 = vld [vmem:[%s814_s1 + $0x78] sm:$0xff]  }
   0x8   :  { %580 = vmatpush3.bf16.msra.mxu1 %v615_v6  ;;  %546 = vmatprep.subr.bf16.mxu0 %v616_v7  ;;  %v629_v20 = vld [vmem:[%s814_s1 + $0x30] sm:$0xff]   ;;  %v501_v24 = vcombine.high %v21_v22, %v21_v22  ;;  %v632_v25 = vld [vmem:[%s814_s1 + $0x38] sm:$0xff]   ;;  %v500_v27 = vcombine.low %v21_v22, %v21_v22  ;;  %v635_v28 = vld [vmem:[%s815_s0 + $0x8] ss:$0 sps:$4 sm:$0xff]  }
   0x9   :  { %581 = vmatprep.subr.bf16.mxu1 %v649_v1  ;;  %v630_v21 = vld [vmem:[%s814_s1 + $0xb0] sm:$0xff]   ;;  %v636_v26 = vld [vmem:[%s814_s1 + $0xb8] sm:$0xff]   ;;  %v637_v30 = vld [vmem:[%s816_s3] ss:$12 sps:$4 sm:$0xff]  }
   0xa   :  { %265 = vmatprep.mubr.bf16.mxu0 %v501_v24  ;;  %v639_v29 = vld [vmem:[%s816_s3 + $0x4] ss:$12 sps:$4 sm:$0xff]   ;;  %v640_v31 = vld [vmem:[%s816_s3 + $0x8] ss:$12 sps:$4 sm:$0xff]   ;;  %v644_v34 = vld [vmem:[%s816_s3 + $0x20] ss:$12 sps:$4 sm:$0xff]  }
   0xb   :  { %547 = vmatpush3.bf16.msra.mxu0 %v617_v8  ;;  %v643_v32 = vld [vmem:[%s816_s3 + $0x1c] ss:$12 sps:$4 sm:$0xff]   ;;  %v641_v33 = vld [vmem:[%s816_s3 + $0x18] ss:$12 sps:$4 sm:$0xff]   ;;  %v647_v35 = vld [vmem:[%s816_s3 + $0x34] ss:$12 sps:$4 sm:$0xff]  }
   0xc   :  { %582 = vmatpush3.bf16.msra.mxu1 %v618_v9  ;;  %548 = vmatprep.subr.bf16.mxu0 %v619_v10  ;;  %v645_v36 = vld [vmem:[%s816_s3 + $0x30] ss:$12 sps:$4 sm:$0xff]   ;;  %v648_v37 = vld [vmem:[%s816_s3 + $0x38] ss:$12 sps:$4 sm:$0xff]   ;;  %v499_v41 = vld [vmem:[%s817_s2] ss:$0 sm:$0xff] }
   0xd   :  { %583 = vmatprep.subr.bf16.mxu1 %v649_v1  ;;  %v327_v57 = vld [vmem:[%s818_s4] sm:$0x7] }
   0xe   :  { %v332_v59 = vrot.slane %v327_v57, %v331_v55  ;;  %v340_v60 = vrot.slane %v327_v57, %v339_v56  ;;  %v336_v61 = vrot.slane %v327_v57, %v335_v58 }
   0xf   :  { %549 = vmatpush3.bf16.msra.mxu0 %v620_v11 }
  0x10   :  { %584 = vmatpush3.bf16.msra.mxu1 %v621_v12  ;;  %550 = vmatprep.subr.bf16.mxu0 %v622_v13 }
  0x11   :  { %585 = vmatprep.subr.bf16.mxu1 %v649_v1 }
  0x13   :  { %551 = vmatpush3.bf16.msra.mxu0 %v623_v14 }
  0x14   :  { %586 = vmatpush3.bf16.msra.mxu1 %v624_v15  ;;  %552 = vmatprep.subr.bf16.mxu0 %v625_v16 }
  0x15   :  { %587 = vmatprep.subr.bf16.mxu1 %v649_v1 }
  0x17   :  { %553 = vmatpush3.bf16.msra.mxu0 %v626_v17 }
  0x18   :  { %588 = vmatpush3.bf16.msra.mxu1 %v627_v18  ;;  %554 = vmatprep.subr.bf16.mxu0 %v628_v19 }
  0x19   :  { %589 = vmatprep.subr.bf16.mxu1 %v649_v1 }
  0x1b   :  { %555 = vmatpush3.bf16.msra.mxu0 %v629_v20 }
  0x1c   :  { %590 = vmatpush3.bf16.msra.mxu1 %v630_v21  ;;  %556 = vmatprep.subr.bf16.mxu0 %v631_v23 }
  0x1d   :  { %591 = vmatprep.subr.bf16.mxu1 %v649_v1 }
  0x1f   :  { %557 = vmatpush3.bf16.msra.mxu0 %v632_v25 }
  0x20   :  { %592 = vmatpush3.bf16.msra.mxu1 %v636_v26  ;;  %396 = vmatprep.subr.bf16.mxu0 %v639_v29 }
  0x21   :  { %597 = vmatprep.subr.bf16.mxu1 %v649_v1 }
  0x22   :  { %266 = vmatmul.mubr.bf16.vlgmr.msra.gmra.mrb[0].mxu0 %v500_v27 }
  0x23   :  { %594 = vmatmul.mubr.bf16.vlgmr.msra.gmra.mrb[0].mxu1 %v635_v28  ;;  %397 = vmatpush1.bf16.msra.mxu0 %v637_v30 }
  0x24   :  { %603 = vmatprep.mubr.msk.bf16.mxu1 %vm650_vm0, %v649_v1  ;;  %598 = vmatpush3.bf16.msra.mxu1 %v640_v31 }
  0x25   :  { %599 = vmatprep.subr.bf16.mxu1 %v649_v1  ;;  %398 = vmatprep.subr.bf16.mxu0 %v643_v32 }
  0x26   :  { %428 = vmatprep.mubr.bf16.mxu0 %v651_v38 }
  0x27   :  { %399 = vmatpush1.bf16.msra.mxu0 %v641_v33 }
  0x28   :  { %600 = vmatpush3.bf16.msra.mxu1 %v644_v34  ;;  %400 = vmatprep.subr.bf16.mxu0 %v647_v35 }
  0x29   :  { %601 = vmatprep.subr.bf16.mxu1 %v649_v1 }
  0x2b   :  { %401 = vmatpush1.bf16.msra.mxu0 %v645_v36 }
  0x2c   :  { %602 = vmatpush3.bf16.msra.mxu1 %v648_v37 }
  0xf5   :  { %v558_v39 = vpop.f32.mrb[0].mxu0 }
  0xf6   :  { %v559_v40 = vpop.f32.mrb[1].mxu0  ;;  %v307_v42 = vpop.f32.mrb[0].mxu1 }
  0xf7   :  { %v560_v43 = vadd.f32 %v559_v40, %v558_v39  ;;  %v561_v44 = vpop.f32.mrb[2].mxu0  ;;  %v595_v45 = vpop.f32.mrb[1].mxu1 }
  0xf8   :  { %v562_v46 = vpop.f32.mrb[3].mxu0  ;;  %v310_v47 = vpop.f32.mrb[2].mxu1 }
  0xf9   :  { %v268_v48 = vadd.f32 %v560_v43, %v499_v41  ;;  %v596_v49 = vpop.f32.mrb[3].mxu1 }
  0xfb   :  { %v308_v50 = vadd.f32 %v307_v42, %v268_v48 }
  0xfd   :  { %v313_v51 = vmax.f32 %v308_v50, 0.0 }
  0xff   :  { %v314_v52 = vpack.c.bf16 %v313_v51, %v313_v51 }
 0x101   :  { %536 = vmatmul.mubr.msk.bf16.vlgmr.msra.gmra.mrb[4].mxu0 %vm392_vm1, %v314_v52  ;;  %604 = vmatmul.mubr.msk.bf16.vlgmr.msra.gmra.mrb[4].mxu1 %vm392_vm1, %v314_v52 }
 0x1d4   :  { %v430_v62 = vpop.f32.mrb[4].mxu0  ;;  %v471_v63 = vpop.f32.mrb[4].mxu1 }
 0x1d5   :  { %v431_v0 = vadd.f32 %v430_v62, %v332_v59  ;;  %v472_v1 = vadd.f32 %v471_v63, %v340_v60  ;;  %v432_v2 = vpop.f32.mrb[5].mxu0  ;;  %v605_v3 = vpop.f32.mrb[5].mxu1 }
 0x1d6   :  { %v433_v4 = vadd.f32 %v432_v2, %v336_v61  ;;  %v434_v5 = vpop.f32.mrb[6].mxu0  ;;  %v474_v6 = vpop.f32.mrb[6].mxu1 }
 0x1d7   :  { %v477_v7 = vmax.f32 %v431_v0, 0.0  ;;  %v479_v8 = vmax.f32 %v472_v1, 0.0  ;;  %v435_v9 = vpop.f32.mrb[7].mxu0  ;;  %v606_v10 = vpop.f32.mrb[7].mxu1 }
 0x1d8   :  { %v478_v11 = vmax.f32 %v433_v4, 0.0 }
 0x1d9   :  { %v541_v12 = vpack.c.bf16 %v479_v8, %v479_v8 }
 0x1da   :  { %v540_v13 = vpack.c.bf16 %v478_v11, %v477_v7 }
 0x1db   :  { %494 = vst [vmem:[%s819_s5 + $0x8] sm:$0xf] %v541_v12 }
 0x1dc   :  { %493 = vst [vmem:[%s819_s5] sm:$0xff] %v540_v13 }

// kernel: squeezenet_forward.25
= control target key start
LH: loop header
LB: loop body
LE: loop exit
PB: predicated region body
PF: predicated region fallthrough
CT: control target
= control target key end

     0   :  { %v700_v1 = vmov 0.0   ;;  %vm701_vm0 = vmmov 0   ;;  %v702_v45 = vmov 0   ;;  %vm433_vm1 = vcmask 523264   ;;  %s871_s1 = inlined_call_operand.vmem [shape: bf16[384,64], index: 1, kind: input, shape index: {}]   ;;  %s872_s0 = inlined_call_operand.vmem [shape: bf16[8,384], index: 0, kind: input, shape index: {}]   ;;  %s873_s3 = inlined_call_operand.vmem [shape: bf16[64,512], index: 3, kind: input, shape index: {}]   ;;  %s874_s2 = inlined_call_operand.vmem [shape: f32[1,64], index: 2, kind: input, shape index: {}]   ;;  %s875_s4 = inlined_call_operand.vmem [shape: f32[1,512], index: 4, kind: input, shape index: {}]   ;;  %s876_s5 = inlined_call_operand.vmem [shape: bf16[8,512], index: 5, kind: output, shape index: {}]  }
   0x1   :  { %v649_v0 = vld [vmem:[%s871_s1 + $0x40] sm:$0xff]   ;;  %626 = vmatprep.subr.bf16.mxu1 %v700_v1  ;;  %642 = vmatprep.mubr.msk.bf16.mxu1 %vm701_vm0, %v700_v1  ;;  %v652_v4 = vld [vmem:[%s871_s1 + $0x48] sm:$0xff]   ;;  %v655_v7 = vld [vmem:[%s871_s1 + $0x50] sm:$0xff]   ;;  %v333_v60 = vlaneseq }
   0x2   :  { %v650_v2 = vld [vmem:[%s871_s1] sm:$0xff]   ;;  %595 = vmatprep.subr.bf16.mxu0 %v649_v0  ;;  %v653_v5 = vld [vmem:[%s871_s1 + $0x8] sm:$0xff]   ;;  %v656_v8 = vld [vmem:[%s871_s1 + $0x10] sm:$0xff]  }
   0x3   :  { %v651_v3 = vld [vmem:[%s871_s1 + $0x80] sm:$0xff]   ;;  %596 = vmatpush3.bf16.msra.mxu0 %v650_v2  ;;  %v654_v6 = vld [vmem:[%s871_s1 + $0x88] sm:$0xff]   ;;  %v657_v9 = vld [vmem:[%s871_s1 + $0x90] sm:$0xff]   ;;  %v334_v61 = vshrl.u32 %v333_v60, 7 }
   0x4   :  { %627 = vmatpush3.bf16.msra.mxu1 %v651_v3  ;;  %597 = vmatprep.subr.bf16.mxu0 %v652_v4  ;;  %v658_v10 = vld [vmem:[%s871_s1 + $0x58] sm:$0xff]   ;;  %v661_v13 = vld [vmem:[%s871_s1 + $0x60] sm:$0xff]   ;;  %v664_v16 = vld [vmem:[%s871_s1 + $0x68] sm:$0xff]  }
   0x5   :  { %628 = vmatprep.subr.bf16.mxu1 %v700_v1  ;;  %v659_v11 = vld [vmem:[%s871_s1 + $0x18] sm:$0xff]   ;;  %v662_v14 = vld [vmem:[%s871_s1 + $0x20] sm:$0xff]   ;;  %v665_v17 = vld [vmem:[%s871_s1 + $0x28] sm:$0xff]   ;;  %v335_v62 = vsub.s32 0, %v334_v61  ;;  %v343_v63 = vsub.s32 2, %v334_v61  ;;  %v347_v2 = vsub.s32 3, %v334_v61 }
   0x6   :  { %v660_v12 = vld [vmem:[%s871_s1 + $0x98] sm:$0xff]   ;;  %v663_v15 = vld [vmem:[%s871_s1 + $0xa0] sm:$0xff]   ;;  %v666_v18 = vld [vmem:[%s871_s1 + $0xa8] sm:$0xff]  }
   0x7   :  { %598 = vmatpush3.bf16.msra.mxu0 %v653_v5  ;;  %v667_v19 = vld [vmem:[%s871_s1 + $0x70] sm:$0xff]   ;;  %v21_v22 = vld [vmem:[%s872_s0] sm:$0xff]  ;;  %v670_v23 = vld [vmem:[%s871_s1 + $0x78] sm:$0xff]  }
   0x8   :  { %629 = vmatpush3.bf16.msra.mxu1 %v654_v6  ;;  %599 = vmatprep.subr.bf16.mxu0 %v655_v7  ;;  %v668_v20 = vld [vmem:[%s871_s1 + $0x30] sm:$0xff]   ;;  %v547_v24 = vcombine.high %v21_v22, %v21_v22  ;;  %v671_v25 = vld [vmem:[%s871_s1 + $0x38] sm:$0xff]   ;;  %v674_v29 = vld [vmem:[%s872_s0 + $0x8] ss:$0 sps:$4 sm:$0xff]   ;;  %v546_v30 = vcombine.low %v21_v22, %v21_v22 }
   0x9   :  { %630 = vmatprep.subr.bf16.mxu1 %v700_v1  ;;  %v669_v21 = vld [vmem:[%s871_s1 + $0xb0] sm:$0xff]   ;;  %v675_v26 = vld [vmem:[%s871_s1 + $0xb8] sm:$0xff]   ;;  %v545_v48 = vld [vmem:[%s874_s2] ss:$0 sm:$0xff] }
   0xa   :  { %265 = vmatprep.mubr.bf16.mxu0 %v547_v24  ;;  %v678_v27 = vld [vmem:[%s873_s3 + $0x4] ss:$16 sps:$4 sm:$0xff]   ;;  %v681_v28 = vld [vmem:[%s873_s3 + $0xc] ss:$16 sps:$4 sm:$0xff]   ;;  %v676_v31 = vld [vmem:[%s873_s3] ss:$16 sps:$4 sm:$0xff]  }
   0xb   :  { %600 = vmatpush3.bf16.msra.mxu0 %v656_v8  ;;  %v679_v32 = vld [vmem:[%s873_s3 + $0x8] ss:$16 sps:$4 sm:$0xff]   ;;  %v684_v33 = vld [vmem:[%s873_s3 + $0x24] ss:$16 sps:$4 sm:$0xff]   ;;  %v687_v34 = vld [vmem:[%s873_s3 + $0x2c] ss:$16 sps:$4 sm:$0xff]  }
   0xc   :  { %631 = vmatpush3.bf16.msra.mxu1 %v657_v9  ;;  %601 = vmatprep.subr.bf16.mxu0 %v658_v10  ;;  %v682_v35 = vld [vmem:[%s873_s3 + $0x20] ss:$16 sps:$4 sm:$0xff]   ;;  %v685_v36 = vld [vmem:[%s873_s3 + $0x28] ss:$16 sps:$4 sm:$0xff]   ;;  %v690_v37 = vld [vmem:[%s873_s3 + $0x44] ss:$16 sps:$4 sm:$0xff]  }
   0xd   :  { %632 = vmatprep.subr.bf16.mxu1 %v700_v1  ;;  %v693_v38 = vld [vmem:[%s873_s3 + $0x4c] ss:$16 sps:$4 sm:$0xff]   ;;  %v688_v39 = vld [vmem:[%s873_s3 + $0x40] ss:$16 sps:$4 sm:$0xff]   ;;  %v691_v40 = vld [vmem:[%s873_s3 + $0x48] ss:$16 sps:$4 sm:$0xff]  }
   0xe   :  { %v696_v41 = vld [vmem:[%s873_s3 + $0x64] ss:$16 sps:$4 sm:$0xff]   ;;  %v699_v42 = vld [vmem:[%s873_s3 + $0x6c] ss:$16 sps:$4 sm:$0xff]   ;;  %v694_v43 = vld [vmem:[%s873_s3 + $0x60] ss:$16 sps:$4 sm:$0xff]  }
   0xf   :  { %602 = vmatpush3.bf16.msra.mxu0 %v659_v11  ;;  %v697_v44 = vld [vmem:[%s873_s3 + $0x68] ss:$16 sps:$4 sm:$0xff]   ;;  %v331_v0 = vld [vmem:[%s875_s4] sm:$0xf] }
  0x10   :  { %633 = vmatpush3.bf16.msra.mxu1 %v660_v12  ;;  %603 = vmatprep.subr.bf16.mxu0 %v661_v13  ;;  %v336_v3 = vrot.slane %v331_v0, %v335_v62  ;;  %v344_v4 = vrot.slane %v331_v0, %v343_v63  ;;  %v348_v6 = vrot.slane %v331_v0, %v347_v2 }
  0x11   :  { %634 = vmatprep.subr.bf16.mxu1 %v700_v1 }
  0x13   :  { %604 = vmatpush3.bf16.msra.mxu0 %v662_v14 }
  0x14   :  { %635 = vmatpush3.bf16.msra.mxu1 %v663_v15  ;;  %605 = vmatprep.subr.bf16.mxu0 %v664_v16 }
  0x15   :  { %636 = vmatprep.subr.bf16.mxu1 %v700_v1 }
  0x17   :  { %606 = vmatpush3.bf16.msra.mxu0 %v665_v17 }
  0x18   :  { %637 = vmatpush3.bf16.msra.mxu1 %v666_v18  ;;  %607 = vmatprep.subr.bf16.mxu0 %v667_v19 }
  0x19   :  { %638 = vmatprep.subr.bf16.mxu1 %v700_v1 }
  0x1b   :  { %608 = vmatpush3.bf16.msra.mxu0 %v668_v20 }
  0x1c   :  { %639 = vmatpush3.bf16.msra.mxu1 %v669_v21  ;;  %609 = vmatprep.subr.bf16.mxu0 %v670_v23 }
  0x1d   :  { %640 = vmatprep.subr.bf16.mxu1 %v700_v1  ;;  %v339_v1 = vsub.s32 1, %v334_v61 }
  0x1f   :  { %610 = vmatpush3.bf16.msra.mxu0 %v671_v25  ;;  %v340_v5 = vrot.slane %v331_v0, %v339_v1 }
  0x20   :  { %641 = vmatpush3.bf16.msra.mxu1 %v675_v26  ;;  %437 = vmatprep.subr.bf16.mxu0 %v678_v27 }
  0x21   :  { %478 = vmatprep.subr.bf16.mxu1 %v681_v28 }
  0x22   :  { %266 = vmatmul.mubr.bf16.vlgmr.msra.gmra.mrb[0].mxu0 %v546_v30 }
  0x23   :  { %643 = vmatmul.mubr.bf16.vlgmr.msra.gmra.mrb[0].mxu1 %v674_v29  ;;  %438 = vmatpush1.bf16.msra.mxu0 %v676_v31 }
  0x24   :  { %479 = vmatpush1.bf16.msra.mxu1 %v679_v32  ;;  %439 = vmatprep.subr.bf16.mxu0 %v684_v33 }
  0x25   :  { %480 = vmatprep.subr.bf16.mxu1 %v687_v34  ;;  %469 = vmatprep.mubr.bf16.mxu0 %v702_v45 }
  0x26   :  { %510 = vmatprep.mubr.bf16.mxu1 %v702_v45 }
  0x27   :  { %440 = vmatpush1.bf16.msra.mxu0 %v682_v35 }
  0x28   :  { %481 = vmatpush1.bf16.msra.mxu1 %v685_v36  ;;  %441 = vmatprep.subr.bf16.mxu0 %v690_v37 }
  0x29   :  { %482 = vmatprep.subr.bf16.mxu1 %v693_v38 }
  0x2b   :  { %442 = vmatpush1.bf16.msra.mxu0 %v688_v39 }
  0x2c   :  { %483 = vmatpush1.bf16.msra.mxu1 %v691_v40  ;;  %443 = vmatprep.subr.bf16.mxu0 %v696_v41 }
  0x2d   :  { %484 = vmatprep.subr.bf16.mxu1 %v699_v42 }
  0x2f   :  { %444 = vmatpush1.bf16.msra.mxu0 %v694_v43 }
  0x30   :  { %485 = vmatpush1.bf16.msra.mxu1 %v697_v44 }
  0xf5   :  { %v611_v46 = vpop.f32.mrb[0].mxu0 }
  0xf6   :  { %v612_v47 = vpop.f32.mrb[1].mxu0  ;;  %v307_v49 = vpop.f32.mrb[0].mxu1 }
  0xf7   :  { %v613_v50 = vadd.f32 %v612_v47, %v611_v46  ;;  %v614_v51 = vpop.f32.mrb[2].mxu0  ;;  %v644_v52 = vpop.f32.mrb[1].mxu1 }
  0xf8   :  { %v615_v53 = vpop.f32.mrb[3].mxu0  ;;  %v310_v54 = vpop.f32.mrb[2].mxu1 }
  0xf9   :  { %v268_v55 = vadd.f32 %v613_v50, %v545_v48  ;;  %v645_v56 = vpop.f32.mrb[3].mxu1 }
  0xfb   :  { %v308_v57 = vadd.f32 %v307_v49, %v268_v55 }
  0xfd   :  { %v313_v58 = vmax.f32 %v308_v57, 0.0 }
  0xff   :  { %v314_v59 = vpack.c.bf16 %v313_v58, %v313_v58 }
 0x101   :  { %589 = vmatmul.mubr.msk.bf16.vlgmr.msra.gmra.mrb[4].mxu0 %vm433_vm1, %v314_v59  ;;  %590 = vmatmul.mubr.msk.bf16.vlgmr.msra.gmra.mrb[4].mxu1 %vm433_vm1, %v314_v59 }
 0x1d4   :  { %v471_v7 = vpop.f32.mrb[4].mxu0  ;;  %v512_v8 = vpop.f32.mrb[4].mxu1 }
 0x1d5   :  { %v472_v9 = vadd.f32 %v471_v7, %v336_v3  ;;  %v513_v10 = vadd.f32 %v512_v8, %v344_v4  ;;  %v473_v11 = vpop.f32.mrb[5].mxu0  ;;  %v514_v12 = vpop.f32.mrb[5].mxu1 }
 0x1d6   :  { %v474_v13 = vadd.f32 %v473_v11, %v340_v5  ;;  %v515_v14 = vadd.f32 %v514_v12, %v348_v6  ;;  %v475_v15 = vpop.f32.mrb[6].mxu0  ;;  %v516_v16 = vpop.f32.mrb[6].mxu1 }
 0x1d7   :  { %v519_v17 = vmax.f32 %v472_v9, 0.0  ;;  %v521_v18 = vmax.f32 %v513_v10, 0.0  ;;  %v476_v19 = vpop.f32.mrb[7].mxu0  ;;  %v517_v20 = vpop.f32.mrb[7].mxu1 }
 0x1d8   :  { %v520_v21 = vmax.f32 %v474_v13, 0.0  ;;  %v522_v22 = vmax.f32 %v515_v14, 0.0 }
 0x1da   :  { %v593_v23 = vpack.c.bf16 %v520_v21, %v519_v17  ;;  %v594_v24 = vpack.c.bf16 %v522_v22, %v521_v18 }
 0x1dc   :  { %539 = vst [vmem:[%s876_s5] sm:$0xff] %v593_v23  ;;  %540 = vst [vmem:[%s876_s5 + $0x8] sm:$0xff] %v594_v24 }

// kernel: squeezenet_forward.27
= control target key start
LH: loop header
LB: loop body
LE: loop exit
PB: predicated region body
PF: predicated region fallthrough
CT: control target
= control target key end

     0   :  { %v663_v39 = vmov 0.0   ;;  %vm664_vm0 = vmmov 0   ;;  %s830_s1 = inlined_call_operand.vmem [shape: bf16[512,128], index: 1, kind: input, shape index: {}]   ;;  %s831_s0 = inlined_call_operand.vmem [shape: bf16[8,512], index: 0, kind: input, shape index: {}]   ;;  %s832_s3 = inlined_call_operand.vmem [shape: bf16[128,128], index: 3, kind: input, shape index: {}]   ;;  %s833_s2 = inlined_call_operand.vmem [shape: f32[1,128], index: 2, kind: input, shape index: {}]   ;;  %s834_s4 = inlined_call_operand.vmem [shape: f32[1,128], index: 4, kind: input, shape index: {}]   ;;  %s835_s5 = inlined_call_operand.vmem [shape: f32[8,128], index: 5, kind: output, shape index: {}]  }
   0x1   :  { %v619_v0 = vld [vmem:[%s830_s1 + $0x40] sm:$0xff]   ;;  %v623_v4 = vld [vmem:[%s830_s1 + $0x48] sm:$0xff]   ;;  %v627_v8 = vld [vmem:[%s830_s1 + $0x50] sm:$0xff]  }
   0x2   :  { %v620_v1 = vld [vmem:[%s830_s1 + $0xc0] sm:$0xff]   ;;  %544 = vmatprep.subr.bf16.mxu0 %v619_v0  ;;  %v624_v5 = vld [vmem:[%s830_s1 + $0xc8] sm:$0xff]   ;;  %v628_v9 = vld [vmem:[%s830_s1 + $0xd0] sm:$0xff]  }
   0x3   :  { %v621_v2 = vld [vmem:[%s830_s1] sm:$0xff]   ;;  %566 = vmatprep.subr.bf16.mxu1 %v620_v1  ;;  %v625_v6 = vld [vmem:[%s830_s1 + $0x8] sm:$0xff]   ;;  %v629_v10 = vld [vmem:[%s830_s1 + $0x10] sm:$0xff]  }
   0x4   :  { %v622_v3 = vld [vmem:[%s830_s1 + $0x80] sm:$0xff]   ;;  %545 = vmatpush3.bf16.msra.mxu0 %v621_v2  ;;  %v626_v7 = vld [vmem:[%s830_s1 + $0x88] sm:$0xff]   ;;  %v630_v11 = vld [vmem:[%s830_s1 + $0x90] sm:$0xff]  }
   0x5   :  { %567 = vmatpush3.bf16.msra.mxu1 %v622_v3  ;;  %546 = vmatprep.subr.bf16.mxu0 %v623_v4  ;;  %v631_v12 = vld [vmem:[%s830_s1 + $0x58] sm:$0xff]   ;;  %v635_v16 = vld [vmem:[%s830_s1 + $0x60] sm:$0xff]   ;;  %v639_v20 = vld [vmem:[%s830_s1 + $0x68] sm:$0xff]  }
   0x6   :  { %568 = vmatprep.subr.bf16.mxu1 %v624_v5  ;;  %v632_v13 = vld [vmem:[%s830_s1 + $0xd8] sm:$0xff]   ;;  %v636_v17 = vld [vmem:[%s830_s1 + $0xe0] sm:$0xff]   ;;  %v640_v21 = vld [vmem:[%s830_s1 + $0xe8] sm:$0xff]  }
   0x7   :  { %v633_v14 = vld [vmem:[%s830_s1 + $0x18] sm:$0xff]   ;;  %v637_v18 = vld [vmem:[%s830_s1 + $0x20] sm:$0xff]   ;;  %v641_v22 = vld [vmem:[%s830_s1 + $0x28] sm:$0xff]  }
   0x8   :  { %547 = vmatpush3.bf16.msra.mxu0 %v625_v6  ;;  %v634_v15 = vld [vmem:[%s830_s1 + $0x98] sm:$0xff]   ;;  %v638_v19 = vld [vmem:[%s830_s1 + $0xa0] sm:$0xff]   ;;  %v642_v23 = vld [vmem:[%s830_s1 + $0xa8] sm:$0xff]  }
   0x9   :  { %569 = vmatpush3.bf16.msra.mxu1 %v626_v7  ;;  %548 = vmatprep.subr.bf16.mxu0 %v627_v8  ;;  %v643_v24 = vld [vmem:[%s830_s1 + $0x70] sm:$0xff]   ;;  %v647_v28 = vld [vmem:[%s830_s1 + $0x78] sm:$0xff]   ;;  %v21_v32 = vld [vmem:[%s831_s0] sm:$0xff] }
   0xa   :  { %570 = vmatprep.subr.bf16.mxu1 %v628_v9  ;;  %v644_v25 = vld [vmem:[%s830_s1 + $0xf0] sm:$0xff]   ;;  %v648_v29 = vld [vmem:[%s830_s1 + $0xf8] sm:$0xff]   ;;  %v22_v33 = vld [vmem:[%s831_s0 + $0x8] sm:$0xff]  ;;  %v499_v34 = vcombine.low %v21_v32, %v21_v32  ;;  %v500_v35 = vcombine.high %v21_v32, %v21_v32 }
   0xb   :  { %v645_v26 = vld [vmem:[%s830_s1 + $0x30] sm:$0xff]   ;;  %v649_v30 = vld [vmem:[%s830_s1 + $0x38] sm:$0xff]   ;;  %v501_v36 = vcombine.low %v22_v33, %v22_v33  ;;  %v502_v37 = vcombine.high %v22_v33, %v22_v33  ;;  %v655_v38 = vld [vmem:[%s832_s3] sm:$0xff]  }
   0xc   :  { %549 = vmatpush3.bf16.msra.mxu0 %v629_v10  ;;  %v646_v27 = vld [vmem:[%s830_s1 + $0xb0] sm:$0xff]   ;;  %v650_v31 = vld [vmem:[%s830_s1 + $0xb8] sm:$0xff]   ;;  %332 = vmatprep.mubr.bf16.mxu0 %v500_v35  ;;  %v656_v40 = vld [vmem:[%s832_s3 + $0x8] sm:$0xff]  }
   0xd   :  { %571 = vmatpush3.bf16.msra.mxu1 %v630_v11  ;;  %550 = vmatprep.subr.bf16.mxu0 %v631_v12  ;;  %v657_v41 = vld [vmem:[%s832_s3 + $0x10] sm:$0xff]   ;;  %v658_v42 = vld [vmem:[%s832_s3 + $0x18] sm:$0xff]   ;;  %v659_v43 = vld [vmem:[%s832_s3 + $0x20] sm:$0xff]  }
   0xe   :  { %572 = vmatprep.subr.bf16.mxu1 %v632_v13  ;;  %372 = vmatprep.mubr.bf16.mxu1 %v502_v37  ;;  %v660_v44 = vld [vmem:[%s832_s3 + $0x28] sm:$0xff]   ;;  %v661_v45 = vld [vmem:[%s832_s3 + $0x30] sm:$0xff]   ;;  %v662_v46 = vld [vmem:[%s832_s3 + $0x38] sm:$0xff]  }
   0xf   :  { %v498_v49 = vld [vmem:[%s833_s2] ss:$0 sm:$0xff] }
  0x10   :  { %551 = vmatpush3.bf16.msra.mxu0 %v633_v14  ;;  %v535_v62 = vld [vmem:[%s834_s4] ss:$0 sm:$0xff] }
  0x11   :  { %573 = vmatpush3.bf16.msra.mxu1 %v634_v15  ;;  %552 = vmatprep.subr.bf16.mxu0 %v635_v16 }
  0x12   :  { %574 = vmatprep.subr.bf16.mxu1 %v636_v17 }
  0x14   :  { %553 = vmatpush3.bf16.msra.mxu0 %v637_v18 }
  0x15   :  { %575 = vmatpush3.bf16.msra.mxu1 %v638_v19  ;;  %554 = vmatprep.subr.bf16.mxu0 %v639_v20 }
  0x16   :  { %576 = vmatprep.subr.bf16.mxu1 %v640_v21 }
  0x18   :  { %555 = vmatpush3.bf16.msra.mxu0 %v641_v22 }
  0x19   :  { %577 = vmatpush3.bf16.msra.mxu1 %v642_v23  ;;  %556 = vmatprep.subr.bf16.mxu0 %v643_v24 }
  0x1a   :  { %578 = vmatprep.subr.bf16.mxu1 %v644_v25 }
  0x1c   :  { %557 = vmatpush3.bf16.msra.mxu0 %v645_v26 }
  0x1d   :  { %579 = vmatpush3.bf16.msra.mxu1 %v646_v27  ;;  %558 = vmatprep.subr.bf16.mxu0 %v647_v28 }
  0x1e   :  { %580 = vmatprep.subr.bf16.mxu1 %v648_v29 }
  0x20   :  { %559 = vmatpush3.bf16.msra.mxu0 %v649_v30 }
  0x21   :  { %581 = vmatpush3.bf16.msra.mxu1 %v650_v31  ;;  %597 = vmatprep.subr.bf16.mxu0 %v663_v39 }
  0x23   :  { %333 = vmatmul.mubr.bf16.vlgmr.msra.gmra.mrb[0].mxu0 %v499_v34 }
  0x24   :  { %373 = vmatmul.mubr.bf16.vlgmr.msra.gmra.mrb[0].mxu1 %v501_v36  ;;  %598 = vmatpush3.bf16.msra.mxu0 %v655_v38 }
  0x25   :  { %599 = vmatprep.subr.bf16.mxu0 %v663_v39  ;;  %613 = vmatprep.mubr.msk.bf16.mxu0 %vm664_vm0, %v663_v39 }
  0x28   :  { %600 = vmatpush3.bf16.msra.mxu0 %v656_v40 }
  0x29   :  { %601 = vmatprep.subr.bf16.mxu0 %v663_v39 }
  0x2c   :  { %602 = vmatpush3.bf16.msra.mxu0 %v657_v41 }
  0x2d   :  { %603 = vmatprep.subr.bf16.mxu0 %v663_v39 }
  0x30   :  { %604 = vmatpush3.bf16.msra.mxu0 %v658_v42 }
  0x31   :  { %605 = vmatprep.subr.bf16.mxu0 %v663_v39 }
  0x34   :  { %606 = vmatpush3.bf16.msra.mxu0 %v659_v43 }
  0x35   :  { %607 = vmatprep.subr.bf16.mxu0 %v663_v39 }
  0x38   :  { %608 = vmatpush3.bf16.msra.mxu0 %v660_v44 }
  0x39   :  { %609 = vmatprep.subr.bf16.mxu0 %v663_v39 }
  0x3c   :  { %610 = vmatpush3.bf16.msra.mxu0 %v661_v45 }
  0x3d   :  { %611 = vmatprep.subr.bf16.mxu0 %v663_v39 }
  0x40   :  { %612 = vmatpush3.bf16.msra.mxu0 %v662_v46 }
  0xf6   :  { %v560_v47 = vpop.f32.mrb[0].mxu0 }
  0xf7   :  { %v582_v48 = vpop.f32.mrb[0].mxu1  ;;  %v561_v50 = vpop.f32.mrb[1].mxu0 }
  0xf8   :  { %v583_v51 = vpop.f32.mrb[1].mxu1  ;;  %v562_v52 = vadd.f32 %v561_v50, %v560_v47  ;;  %v563_v54 = vpop.f32.mrb[2].mxu0 }
  0xf9   :  { %v584_v53 = vadd.f32 %v583_v51, %v582_v48  ;;  %v585_v55 = vpop.f32.mrb[2].mxu1  ;;  %v564_v56 = vpop.f32.mrb[3].mxu0 }
  0xfa   :  { %v586_v57 = vpop.f32.mrb[3].mxu1  ;;  %v335_v58 = vadd.f32 %v562_v52, %v498_v49 }
  0xfc   :  { %v375_v59 = vadd.f32 %v584_v53, %v335_v58 }
  0xfe   :  { %v380_v60 = vmax.f32 %v375_v59, 0.0 }
 0x100   :  { %v381_v61 = vpack.c.bf16 %v380_v60, %v380_v60 }
 0x102   :  { %614 = vmatmul.mubr.bf16.vlgmr.msra.gmra.mrb[4].mxu0 %v381_v61 }
 0x1d5   :  { %v487_v63 = vpop.f32.mrb[4].mxu0 }
 0x1d6   :  { %v488_v0 = vadd.f32 %v535_v62, %v487_v63  ;;  %v615_v1 = vpop.f32.mrb[5].mxu0 }
 0x1d7   :  { %v490_v2 = vpop.f32.mrb[6].mxu0 }
 0x1d8   :  { %493 = vst [vmem:[%s835_s5] sm:$0xff] %v488_v0  ;;  %v616_v3 = vpop.f32.mrb[7].mxu0 }

// kernel: squeezenet_forward.26
= control target key start
LH: loop header
LB: loop body
LE: loop exit
PB: predicated region body
PF: predicated region fallthrough
CT: control target
= control target key end

     0   :  { %v776_v54 = vmov 0   ;;  %vm500_vm0 = vcmask 523264   ;;  %s969_s1 = inlined_call_operand.vmem [shape: bf16[512,64], index: 1, kind: input, shape index: {}]   ;;  %s970_s0 = inlined_call_operand.vmem [shape: bf16[8,512], index: 0, kind: input, shape index: {}]   ;;  %s971_s3 = inlined_call_operand.vmem [shape: bf16[64,512], index: 3, kind: input, shape index: {}]   ;;  %s972_s2 = inlined_call_operand.vmem [shape: f32[1,64], index: 2, kind: input, shape index: {}]   ;;  %s973_s4 = inlined_call_operand.vmem [shape: f32[1,512], index: 4, kind: input, shape index: {}]   ;;  %s974_s5 = inlined_call_operand.vmem [shape: bf16[8,512], index: 5, kind: output, shape index: {}]  }
   0x1   :  { %v716_v0 = vld [vmem:[%s969_s1 + $0x40] sm:$0xff]   ;;  %v720_v4 = vld [vmem:[%s969_s1 + $0x48] sm:$0xff]   ;;  %v724_v8 = vld [vmem:[%s969_s1 + $0x50] sm:$0xff]  }
   0x2   :  { %v717_v1 = vld [vmem:[%s969_s1 + $0xc0] sm:$0xff]   ;;  %671 = vmatprep.subr.bf16.mxu0 %v716_v0  ;;  %v721_v5 = vld [vmem:[%s969_s1 + $0xc8] sm:$0xff]   ;;  %v725_v9 = vld [vmem:[%s969_s1 + $0xd0] sm:$0xff]  }
   0x3   :  { %v718_v2 = vld [vmem:[%s969_s1] sm:$0xff]   ;;  %693 = vmatprep.subr.bf16.mxu1 %v717_v1  ;;  %v722_v6 = vld [vmem:[%s969_s1 + $0x8] sm:$0xff]   ;;  %v726_v10 = vld [vmem:[%s969_s1 + $0x10] sm:$0xff]  }
   0x4   :  { %v719_v3 = vld [vmem:[%s969_s1 + $0x80] sm:$0xff]   ;;  %672 = vmatpush3.bf16.msra.mxu0 %v718_v2  ;;  %v723_v7 = vld [vmem:[%s969_s1 + $0x88] sm:$0xff]   ;;  %v727_v11 = vld [vmem:[%s969_s1 + $0x90] sm:$0xff]  }
   0x5   :  { %694 = vmatpush3.bf16.msra.mxu1 %v719_v3  ;;  %673 = vmatprep.subr.bf16.mxu0 %v720_v4  ;;  %v728_v12 = vld [vmem:[%s969_s1 + $0x58] sm:$0xff]   ;;  %v732_v16 = vld [vmem:[%s969_s1 + $0x60] sm:$0xff]   ;;  %v736_v20 = vld [vmem:[%s969_s1 + $0x68] sm:$0xff]  }
   0x6   :  { %695 = vmatprep.subr.bf16.mxu1 %v721_v5  ;;  %v729_v13 = vld [vmem:[%s969_s1 + $0xd8] sm:$0xff]   ;;  %v733_v17 = vld [vmem:[%s969_s1 + $0xe0] sm:$0xff]   ;;  %v737_v21 = vld [vmem:[%s969_s1 + $0xe8] sm:$0xff]  }
   0x7   :  { %v730_v14 = vld [vmem:[%s969_s1 + $0x18] sm:$0xff]   ;;  %v734_v18 = vld [vmem:[%s969_s1 + $0x20] sm:$0xff]   ;;  %v738_v22 = vld [vmem:[%s969_s1 + $0x28] sm:$0xff]  }
   0x8   :  { %674 = vmatpush3.bf16.msra.mxu0 %v722_v6  ;;  %v731_v15 = vld [vmem:[%s969_s1 + $0x98] sm:$0xff]   ;;  %v735_v19 = vld [vmem:[%s969_s1 + $0xa0] sm:$0xff]   ;;  %v739_v23 = vld [vmem:[%s969_s1 + $0xa8] sm:$0xff]   ;;  %v400_v6 = vlaneseq }
   0x9   :  { %696 = vmatpush3.bf16.msra.mxu1 %v723_v7  ;;  %675 = vmatprep.subr.bf16.mxu0 %v724_v8  ;;  %v740_v24 = vld [vmem:[%s969_s1 + $0x70] sm:$0xff]   ;;  %v744_v28 = vld [vmem:[%s969_s1 + $0x78] sm:$0xff]   ;;  %v21_v32 = vld [vmem:[%s970_s0] sm:$0xff] }
   0xa   :  { %697 = vmatprep.subr.bf16.mxu1 %v725_v9  ;;  %v741_v25 = vld [vmem:[%s969_s1 + $0xf0] sm:$0xff]   ;;  %v745_v29 = vld [vmem:[%s969_s1 + $0xf8] sm:$0xff]   ;;  %v22_v33 = vld [vmem:[%s970_s0 + $0x8] sm:$0xff]  ;;  %v613_v34 = vcombine.low %v21_v32, %v21_v32  ;;  %v614_v35 = vcombine.high %v21_v32, %v21_v32  ;;  %v401_v7 = vshrl.u32 %v400_v6, 7 }
   0xb   :  { %v742_v26 = vld [vmem:[%s969_s1 + $0x30] sm:$0xff]   ;;  %v746_v30 = vld [vmem:[%s969_s1 + $0x38] sm:$0xff]   ;;  %v615_v36 = vcombine.low %v22_v33, %v22_v33  ;;  %v616_v37 = vcombine.high %v22_v33, %v22_v33  ;;  %v612_v57 = vld [vmem:[%s972_s2] ss:$0 sm:$0xff] }
   0xc   :  { %676 = vmatpush3.bf16.msra.mxu0 %v726_v10  ;;  %v743_v27 = vld [vmem:[%s969_s1 + $0xb0] sm:$0xff]   ;;  %v747_v31 = vld [vmem:[%s969_s1 + $0xb8] sm:$0xff]   ;;  %332 = vmatprep.mubr.bf16.mxu0 %v614_v35  ;;  %v402_v8 = vsub.s32 0, %v401_v7  ;;  %v410_v9 = vsub.s32 2, %v401_v7  ;;  %v398_v10 = vld [vmem:[%s973_s4] sm:$0xf] }
   0xd   :  { %698 = vmatpush3.bf16.msra.mxu1 %v727_v11  ;;  %677 = vmatprep.subr.bf16.mxu0 %v728_v12  ;;  %v752_v38 = vld [vmem:[%s971_s3] ss:$16 sps:$4 sm:$0xff]   ;;  %v754_v39 = vld [vmem:[%s971_s3 + $0x4] ss:$16 sps:$4 sm:$0xff]   ;;  %v755_v40 = vld [vmem:[%s971_s3 + $0x8] ss:$16 sps:$4 sm:$0xff]  }
   0xe   :  { %699 = vmatprep.subr.bf16.mxu1 %v729_v13  ;;  %372 = vmatprep.mubr.bf16.mxu1 %v616_v37  ;;  %v757_v41 = vld [vmem:[%s971_s3 + $0xc] ss:$16 sps:$4 sm:$0xff]   ;;  %v760_v42 = vld [vmem:[%s971_s3 + $0x24] ss:$16 sps:$4 sm:$0xff]   ;;  %v758_v44 = vld [vmem:[%s971_s3 + $0x20] ss:$16 sps:$4 sm:$0xff]   ;;  %v403_v13 = vrot.slane %v398_v10, %v402_v8 }
   0xf   :  { %v763_v43 = vld [vmem:[%s971_s3 + $0x2c] ss:$16 sps:$4 sm:$0xff]   ;;  %v761_v45 = vld [vmem:[%s971_s3 + $0x28] ss:$16 sps:$4 sm:$0xff]   ;;  %v766_v46 = vld [vmem:[%s971_s3 + $0x44] ss:$16 sps:$4 sm:$0xff]  }
  0x10   :  { %678 = vmatpush3.bf16.msra.mxu0 %v730_v14  ;;  %v769_v47 = vld [vmem:[%s971_s3 + $0x4c] ss:$16 sps:$4 sm:$0xff]   ;;  %v764_v48 = vld [vmem:[%s971_s3 + $0x40] ss:$16 sps:$4 sm:$0xff]   ;;  %v767_v49 = vld [vmem:[%s971_s3 + $0x48] ss:$16 sps:$4 sm:$0xff]   ;;  %v411_v14 = vrot.slane %v398_v10, %v410_v9 }
  0x11   :  { %700 = vmatpush3.bf16.msra.mxu1 %v731_v15  ;;  %679 = vmatprep.subr.bf16.mxu0 %v732_v16  ;;  %v772_v50 = vld [vmem:[%s971_s3 + $0x64] ss:$16 sps:$4 sm:$0xff]   ;;  %v775_v51 = vld [vmem:[%s971_s3 + $0x6c] ss:$16 sps:$4 sm:$0xff]   ;;  %v770_v52 = vld [vmem:[%s971_s3 + $0x60] ss:$16 sps:$4 sm:$0xff]  }
  0x12   :  { %701 = vmatprep.subr.bf16.mxu1 %v733_v17  ;;  %v773_v53 = vld [vmem:[%s971_s3 + $0x68] ss:$16 sps:$4 sm:$0xff]   ;;  %v406_v11 = vsub.s32 1, %v401_v7  ;;  %v414_v12 = vsub.s32 3, %v401_v7 }
  0x14   :  { %680 = vmatpush3.bf16.msra.mxu0 %v734_v18  ;;  %v407_v15 = vrot.slane %v398_v10, %v406_v11  ;;  %v415_v16 = vrot.slane %v398_v10, %v414_v12 }
  0x15   :  { %702 = vmatpush3.bf16.msra.mxu1 %v735_v19  ;;  %681 = vmatprep.subr.bf16.mxu0 %v736_v20 }
  0x16   :  { %703 = vmatprep.subr.bf16.mxu1 %v737_v21 }
  0x18   :  { %682 = vmatpush3.bf16.msra.mxu0 %v738_v22 }
  0x19   :  { %704 = vmatpush3.bf16.msra.mxu1 %v739_v23  ;;  %683 = vmatprep.subr.bf16.mxu0 %v740_v24 }
  0x1a   :  { %705 = vmatprep.subr.bf16.mxu1 %v741_v25 }
  0x1c   :  { %684 = vmatpush3.bf16.msra.mxu0 %v742_v26 }
  0x1d   :  { %706 = vmatpush3.bf16.msra.mxu1 %v743_v27  ;;  %685 = vmatprep.subr.bf16.mxu0 %v744_v28 }
  0x1e   :  { %707 = vmatprep.subr.bf16.mxu1 %v745_v29 }
  0x20   :  { %686 = vmatpush3.bf16.msra.mxu0 %v746_v30 }
  0x21   :  { %708 = vmatpush3.bf16.msra.mxu1 %v747_v31  ;;  %504 = vmatprep.subr.bf16.mxu0 %v754_v39 }
  0x22   :  { %545 = vmatprep.subr.bf16.mxu1 %v757_v41 }
  0x23   :  { %333 = vmatmul.mubr.bf16.vlgmr.msra.gmra.mrb[0].mxu0 %v613_v34 }
  0x24   :  { %373 = vmatmul.mubr.bf16.vlgmr.msra.gmra.mrb[0].mxu1 %v615_v36  ;;  %505 = vmatpush1.bf16.msra.mxu0 %v752_v38 }
  0x25   :  { %546 = vmatpush1.bf16.msra.mxu1 %v755_v40  ;;  %506 = vmatprep.subr.bf16.mxu0 %v760_v42 }
  0x26   :  { %547 = vmatprep.subr.bf16.mxu1 %v763_v43  ;;  %536 = vmatprep.mubr.bf16.mxu0 %v776_v54 }
  0x27   :  { %577 = vmatprep.mubr.bf16.mxu1 %v776_v54 }
  0x28   :  { %507 = vmatpush1.bf16.msra.mxu0 %v758_v44 }
  0x29   :  { %548 = vmatpush1.bf16.msra.mxu1 %v761_v45  ;;  %508 = vmatprep.subr.bf16.mxu0 %v766_v46 }
  0x2a   :  { %549 = vmatprep.subr.bf16.mxu1 %v769_v47 }
  0x2c   :  { %509 = vmatpush1.bf16.msra.mxu0 %v764_v48 }
  0x2d   :  { %550 = vmatpush1.bf16.msra.mxu1 %v767_v49  ;;  %510 = vmatprep.subr.bf16.mxu0 %v772_v50 }
  0x2e   :  { %551 = vmatprep.subr.bf16.mxu1 %v775_v51 }
  0x30   :  { %511 = vmatpush1.bf16.msra.mxu0 %v770_v52 }
  0x31   :  { %552 = vmatpush1.bf16.msra.mxu1 %v773_v53 }
  0xf6   :  { %v687_v55 = vpop.f32.mrb[0].mxu0 }
  0xf7   :  { %v709_v56 = vpop.f32.mrb[0].mxu1  ;;  %v688_v58 = vpop.f32.mrb[1].mxu0 }
  0xf8   :  { %v710_v59 = vpop.f32.mrb[1].mxu1  ;;  %v689_v60 = vadd.f32 %v688_v58, %v687_v55  ;;  %v690_v62 = vpop.f32.mrb[2].mxu0 }
  0xf9   :  { %v711_v61 = vadd.f32 %v710_v59, %v709_v56  ;;  %v712_v63 = vpop.f32.mrb[2].mxu1  ;;  %v691_v0 = vpop.f32.mrb[3].mxu0 }
  0xfa   :  { %v713_v1 = vpop.f32.mrb[3].mxu1  ;;  %v335_v2 = vadd.f32 %v689_v60, %v612_v57 }
  0xfc   :  { %v375_v3 = vadd.f32 %v711_v61, %v335_v2 }
  0xfe   :  { %v380_v4 = vmax.f32 %v375_v3, 0.0 }
 0x100   :  { %v381_v5 = vpack.c.bf16 %v380_v4, %v380_v4 }
 0x102   :  { %665 = vmatmul.mubr.msk.bf16.vlgmr.msra.gmra.mrb[4].mxu0 %vm500_vm0, %v381_v5  ;;  %666 = vmatmul.mubr.msk.bf16.vlgmr.msra.gmra.mrb[4].mxu1 %vm500_vm0, %v381_v5 }
 0x1d5   :  { %v538_v17 = vpop.f32.mrb[4].mxu0  ;;  %v579_v18 = vpop.f32.mrb[4].mxu1 }
 0x1d6   :  { %v539_v19 = vadd.f32 %v538_v17, %v403_v13  ;;  %v580_v20 = vadd.f32 %v579_v18, %v411_v14  ;;  %v540_v21 = vpop.f32.mrb[5].mxu0  ;;  %v581_v22 = vpop.f32.mrb[5].mxu1 }
 0x1d7   :  { %v541_v23 = vadd.f32 %v540_v21, %v407_v15  ;;  %v582_v24 = vadd.f32 %v581_v22, %v415_v16  ;;  %v542_v25 = vpop.f32.mrb[6].mxu0  ;;  %v583_v26 = vpop.f32.mrb[6].mxu1 }
 0x1d8   :  { %v586_v27 = vmax.f32 %v539_v19, 0.0  ;;  %v588_v28 = vmax.f32 %v580_v20, 0.0  ;;  %v543_v29 = vpop.f32.mrb[7].mxu0  ;;  %v584_v30 = vpop.f32.mrb[7].mxu1 }
 0x1d9   :  { %v587_v31 = vmax.f32 %v541_v23, 0.0  ;;  %v589_v32 = vmax.f32 %v582_v24, 0.0 }
 0x1db   :  { %v669_v33 = vpack.c.bf16 %v587_v31, %v586_v27  ;;  %v670_v34 = vpack.c.bf16 %v589_v32, %v588_v28 }
 0x1dd   :  { %606 = vst [vmem:[%s974_s5] sm:$0xff] %v669_v33  ;;  %607 = vst [vmem:[%s974_s5 + $0x8] sm:$0xff] %v670_v34 }

</bundles_post_ra>
